<compile_context>
chip_gen: v6e
topology: v6e:2x2x1
jax: 0.10.0
libtpu: 0.0.40
codegen_flags: <defaults>
</compile_context>

<pallas_src>
import functools

import jax
import jax.numpy as jnp
from jax import lax
from jax.experimental import pallas as pl
from jax.experimental.pallas import tpu as pltpu


def _round_up(x, m):
    return ((x + m - 1) // m) * m


_VMEM_SPACE = (pltpu.MemorySpace.VMEM if hasattr(pltpu, "MemorySpace")
               else pltpu.VMEM)


# --------------------------------------------------------------------------
# Per-generation capabilities / budgets
# --------------------------------------------------------------------------
@functools.lru_cache(maxsize=None)
def _tpu_caps():
    kind = ""
    try:
        kind = jax.devices()[0].device_kind.lower()
    except Exception:
        pass
    is_v5e = any(s in kind for s in ("v5 lite", "v5lite", "v5e"))
    is_v6e = any(s in kind for s in ("v6 lite", "v6lite", "v6e"))
    is_v7 = ("v7" in kind) or ("7x" in kind)
    single_tc = is_v5e or is_v6e            # v5e/v6e: 1 TensorCore, 128 MiB VMEM
    if single_tc:
        vmem_budget = 100 << 20             # raise well above 16/32 MiB default
        row_cap = 2048                      # big single-step tiles are fine
    else:                                   # v7x (or unknown): assume 64 MiB, 2 TC
        vmem_budget = 48 << 20
        row_cap = 1024
    return dict(
        multi_tc=not single_tc,             # keep >=2 parallel grid steps
        bf16_epilogue=bool(is_v6e or is_v7),  # v5e VPU has no bf16 -> f32 epilogue
        vmem_budget=int(vmem_budget),
        row_tile_cap=row_cap,
        sa_rows_cap=row_cap,
    )


def _chain_vmem_est(rows, cin, layer_dims, out_w, out_bytes):
    """Rough VMEM bytes for one fused-MLP grid step: double-buffered input/output
    tiles + single-copy resident weights + live f32 chain intermediates."""
    est = 2 * rows * cin * 2                               # bf16 input tile x2
    est += 2 * rows * out_w * out_bytes                    # output tile x2
    est += sum(ci * co * 2 + co * 4 for ci, co in layer_dims)   # weights + biases
    max_co = max(co for _, co in layer_dims)
    est += 2 * rows * max_co * 4                           # f32 intermediates
    return int(est * 1.25) + (2 << 20)                     # headroom


def _pick_row_tile(r, cin, layer_dims, out_w, out_bytes, caps):
    if r <= 8:
        return r
    tr = min(caps["row_tile_cap"], _round_up(r, 8))
    if caps["multi_tc"]:                                   # >=2 steps for 2 TCs
        tr = min(tr, max(8, _round_up((r + 1) // 2, 8)))
    while tr > 8 and _chain_vmem_est(tr, cin, layer_dims, out_w,
                                     out_bytes) > caps["vmem_budget"]:
        tr = max(8, _round_up(tr // 2, 8))
    return tr


def _pick_sa_tiles(g, k, cin, layer_dims, out_w, caps):
    """(group_tile, k_tile) for the fused SA kernel. k_tile always divides K (K
    is a multiple of 8), group axis uses a cdiv grid with masked partial blocks."""
    budget = caps["vmem_budget"]
    if g <= 8:
        tg = g                                             # tiny g: full dim block
    else:
        tg = min(_round_up(g, 8),
                 max(8, (caps["sa_rows_cap"] // max(k, 1)) // 8 * 8))
        if caps["multi_tc"]:
            tg = min(tg, max(8, _round_up((g + 1) // 2, 8)))
        tg = max(tg, 8)
    kt = k
    while tg > 8 and _chain_vmem_est(tg * kt, cin, layer_dims, out_w, 2) > budget:
        tg = max(8, _round_up(tg // 2, 8))
    while kt > 8 and kt % 16 == 0 and \
            _chain_vmem_est(tg * kt, cin, layer_dims, out_w, 2) > budget:
        kt //= 2                                           # chunk K, max-accumulate
    return tg, kt


# --------------------------------------------------------------------------
# Pallas kernels (hot path)
# --------------------------------------------------------------------------
def _mlp_chain(x, wb_refs, num_layers, relu_last, bf16_epi):
    """In-kernel chain of (matmul + bias [+ ReLU]). bf16 MXU inputs, f32 acc.
    Epilogue (bias+ReLU) in bf16 on v6e/v7x, f32 on v5e. Final no-ReLU layer
    (prediction heads) keeps an f32 bias add."""
    y = None
    for l in range(num_layers):
        w = wb_refs[2 * l][...]                      # (Cin, Cout) bf16, VMEM-resident
        b = wb_refs[2 * l + 1][...]                  # (1, Cout)   f32, VMEM-resident
        acc = jnp.dot(x, w, preferred_element_type=jnp.float32)
        last = (l == num_layers - 1)
        if last and not relu_last:
            y = acc + b                              # logits: f32 bias add
        elif bf16_epi:
            y = jnp.maximum(acc.astype(jnp.bfloat16) + b.astype(jnp.bfloat16), 0.0)
        else:
            y = jnp.maximum(acc + b, 0.0)
        x = y.astype(jnp.bfloat16)
    return y


def _mlp_rows_kernel(x_ref, *refs, num_layers, relu_last, bf16_epi):
    o_ref = refs[-1]
    y = _mlp_chain(x_ref[...], refs[:-1], num_layers, relu_last, bf16_epi)
    o_ref[...] = y.astype(o_ref.dtype)


def _sa_mlp_max_kernel(x_ref, *refs, num_layers, tg, kt, bf16_epi):
    """SharedMLP chain + max over the K neighbours, with the K axis optionally
    chunked across grid axis 1 (max accumulated into the resident output block)."""
    o_ref = refs[-1]
    x = x_ref[...].reshape(tg * kt, x_ref.shape[-1])
    y = _mlp_chain(x, refs[:-1], num_layers, True, bf16_epi)
    y = jnp.max(y.reshape(tg, kt, y.shape[-1]), axis=1).astype(o_ref.dtype)

    @pl.when(pl.program_id(1) == 0)
    def _():
        o_ref[...] = y

    @pl.when(pl.program_id(1) != 0)
    def _():
        o_ref[...] = jnp.maximum(o_ref[...], y)


def _wb_inputs(layers):
    """bf16 weights + f32 (1, Cout) biases, passed whole-array in VMEM: one
    resident copy for the entire kernel (no double-buffering, no per-step DMA)."""
    vspec = pl.BlockSpec(memory_space=_VMEM_SPACE)
    args, specs = [], []
    for w, b in layers:
        args.append(w.astype(jnp.bfloat16))
        args.append(b.astype(jnp.float32).reshape(1, -1))
        specs.extend([vspec, vspec])
    return args, specs


def _pad_layers_out(layers, target):
    """Zero-pad the last layer's output channels to `target` (lane-dense stores)."""
    w, b = layers[-1]
    pad = target - w.shape[1]
    if pad <= 0:
        return list(layers)
    w = jnp.concatenate([w, jnp.zeros((w.shape[0], pad), w.dtype)], axis=1)
    b = jnp.concatenate([b, jnp.zeros((pad,), b.dtype)], axis=0)
    return list(layers[:-1]) + [(w, b)]


def fused_mlp_rows(x2d, layers, relu_last=True, out_dtype=jnp.bfloat16,
                   pad_out_to=0):
    """Whole SharedMLP chain in ONE pallas_call; weights stay resident in VMEM and
    intermediate activations never touch HBM.  x2d: (R, Cin) -> (R, Cout[_padded])."""
    R, Cin = x2d.shape
    if pad_out_to:
        layers = _pad_layers_out(layers, pad_out_to)
    layer_dims = [(w.shape[0], w.shape[1]) for w, _ in layers]
    Cout = layer_dims[-1][1]
    caps = _tpu_caps()
    out_bytes = jnp.dtype(out_dtype).itemsize
    tr = _pick_row_tile(R, Cin, layer_dims, Cout, out_bytes, caps)
    wb, wb_specs = _wb_inputs(layers)
    return pl.pallas_call(
        functools.partial(_mlp_rows_kernel, num_layers=len(layers),
                          relu_last=relu_last, bf16_epi=caps["bf16_epilogue"]),
        out_shape=jax.ShapeDtypeStruct((R, Cout), out_dtype),
        grid=(pl.cdiv(R, tr),),
        in_specs=[pl.BlockSpec((tr, Cin), lambda i: (i, 0))] + wb_specs,
        out_specs=pl.BlockSpec((tr, Cout), lambda i: (i, 0)),
        compiler_params=pltpu.CompilerParams(
            dimension_semantics=("parallel",),
            vmem_limit_bytes=caps["vmem_budget"]),
    )(x2d.astype(jnp.bfloat16), *wb)


def fused_sa_mlp_maxpool(grouped, layers):
    """SA-module hot path in ONE kernel: SharedMLP chain + max over the K
    neighbours.  grouped: (G, K, Cin) with K % 8 == 0 -> (G, Cout) bf16.
    Grid: (group chunks, K chunks); K chunks max-accumulate into the output block,
    so VMEM stays bounded even for the global-SA path at large batch."""
    G, K, Cin = grouped.shape
    layer_dims = [(w.shape[0], w.shape[1]) for w, _ in layers]
    Cout = layer_dims[-1][1]
    caps = _tpu_caps()
    tg, kt = _pick_sa_tiles(G, K, Cin, layer_dims, Cout, caps)
    wb, wb_specs = _wb_inputs(layers)
    return pl.pallas_call(
        functools.partial(_sa_mlp_max_kernel, num_layers=len(layers),
                          tg=tg, kt=kt, bf16_epi=caps["bf16_epilogue"]),
        out_shape=jax.ShapeDtypeStruct((G, Cout), jnp.bfloat16),
        grid=(pl.cdiv(G, tg), K // kt),
        in_specs=[pl.BlockSpec((tg, kt, Cin), lambda i, j: (i, j, 0))] + wb_specs,
        out_specs=pl.BlockSpec((tg, Cout), lambda i, j: (i, 0)),
        compiler_params=pltpu.CompilerParams(
            dimension_semantics=("parallel", "arbitrary"),
            vmem_limit_bytes=caps["vmem_budget"]),
    )(grouped.astype(jnp.bfloat16), *wb)


# --------------------------------------------------------------------------
# Point-cloud glue ops (data-dependent gathers; plain JAX)
# --------------------------------------------------------------------------
def farthest_point_sample(xyz, num_centroids):
    """xyz: (B, N, 3) -> indices (B, M). Deterministic: first centroid = index 0.
    TODO(synk): serial M-step argmax loop; profile / kernelize at production N."""
    idxs = jnp.zeros((xyz.shape[0], num_centroids), jnp.int32)
    d0 = jnp.sum((xyz - xyz[:, :1, :]) ** 2, axis=-1)          # (B, N)

    def body(i, carry):
        dist, idxs = carry
        far = jnp.argmax(dist, axis=-1).astype(jnp.int32)      # (B,)
        idxs = idxs.at[:, i].set(far)
        new_pt = jnp.take_along_axis(xyz, far[:, None, None], axis=1)
        d2 = jnp.sum((xyz - new_pt) ** 2, axis=-1)
        return jnp.minimum(dist, d2), idxs

    _, idxs = lax.fori_loop(1, num_centroids, body, (d0, idxs))
    return idxs


def gather_points(x, idx):
    """x: (B, N, C), idx: (B, M) -> (B, M, C)."""
    return jnp.take_along_axis(x, idx[..., None], axis=1)


def group_points(x, idx):
    """x: (B, N, C), idx: (B, M, K) -> (B, M, K, C)."""
    B, M, K = idx.shape
    flat = idx.reshape(B, M * K)
    out = jnp.take_along_axis(x, flat[..., None], axis=1)
    return out.reshape(B, M, K, x.shape[-1])


def ball_query(xyz, new_xyz, radius, num_neighbours):
    """xyz: (B, N, 3), new_xyz: (B, M, 3) -> (B, M, K) neighbour indices.
    Slots past the in-radius count repeat the first in-radius index (standard
    PointNet++ semantics). top_k replaces the previous full sort."""
    N = xyz.shape[1]
    d2 = jnp.sum((new_xyz[:, :, None, :] - xyz[:, None, :, :]) ** 2, axis=-1)
    in_ball = d2 < (radius * radius)
    score = jnp.where(in_ball, jnp.arange(N, dtype=jnp.int32)[None, None, :], N)
    neg_topk, _ = lax.top_k(-score, num_neighbours)            # K smallest scores
    sorted_idx = -neg_topk                                     # ascending
    first = sorted_idx[..., :1]
    first = jnp.where(first >= N, 0, first)
    return jnp.where(sorted_idx >= N, first, sorted_idx)


def knn(dense_xyz, sparse_xyz, k):
    """k nearest sparse points for every dense point. Returns (idx, squared_dist)."""
    d2 = jnp.sum((dense_xyz[:, :, None, :] - sparse_xyz[:, None, :, :]) ** 2, axis=-1)
    neg_d, idx = lax.top_k(-d2, k)
    return idx, -neg_d


def to_rot_matrix(x6):
    """6D rotation representation -> rotation matrix (Gram-Schmidt).
    x6: (B, N, 6) -> (B, N, 9) with channels [b1(3), b2(3), b3(3)]."""
    eps = 1e-8
    a1, a2 = x6[..., 0:3], x6[..., 3:6]
    b1 = a1 / jnp.maximum(jnp.linalg.norm(a1, axis=-1, keepdims=True), eps)
    a2p = a2 - jnp.sum(b1 * a2, axis=-1, keepdims=True) * b1
    b2 = a2p / jnp.maximum(jnp.linalg.norm(a2p, axis=-1, keepdims=True), eps)
    b3 = jnp.cross(b1, b2)
    return jnp.concatenate([b1, b2, b3], axis=-1)


# --------------------------------------------------------------------------
# PointNet++ modules
# --------------------------------------------------------------------------
def sa_module_forward(layers, xyz, feature, num_centroids, radius, num_neighbours):
    """PointNet Set Abstraction (single-scale grouping, use_xyz=True)."""
    B, N, _ = xyz.shape
    if num_centroids == 0:          # global set abstraction: group all points
        new_xyz = jnp.zeros((B, 1, 3), jnp.float32)
        M, K = 1, N
        parts = [xyz[:, None, :, :].astype(jnp.bfloat16)]
        if feature is not None:
            parts.append(feature[:, None, :, :].astype(jnp.bfloat16))
        kpad = _round_up(K, 8) - K
        if kpad:                    # duplicate point 0: max over K is unchanged
            parts = [jnp.concatenate([p, jnp.repeat(p[:, :, :1, :], kpad, axis=2)],
                                     axis=2) for p in parts]
            K += kpad
    else:
        M, K = num_centroids, num_neighbours
        cidx = farthest_point_sample(xyz, num_centroids)
        new_xyz = gather_points(xyz, cidx)                            # (B, M, 3)
        nbr = ball_query(xyz, new_xyz, radius, num_neighbours)        # (B, M, K)
        kpad = _round_up(K, 8) - K
        if kpad:                    # duplicate neighbour 0: max over K unchanged
            nbr = jnp.concatenate([nbr, jnp.repeat(nbr[..., :1], kpad, axis=-1)],
                                  axis=-1)
            K += kpad
        group_xyz = group_points(xyz, nbr) - new_xyz[:, :, None, :]   # centered
        parts = [group_xyz.astype(jnp.bfloat16)]
        if feature is not None:
            parts.append(group_points(feature, nbr))

    # pad the channel axis up to the (8-aligned) first-layer fan-in in one concat
    cin = sum(p.shape[-1] for p in parts)
    cin_p = layers[0][0].shape[0]
    if cin_p > cin:
        parts.append(jnp.zeros((B, M, K, cin_p - cin), jnp.bfloat16))
    grouped = jnp.concatenate(parts, axis=-1)                         # (B,M,K,cin_p)

    # TODO(synk): move the neighbour gather into the SA kernel (scalar-prefetched
    # nbr indices + in-kernel DMA) so grouped never materializes in HBM.
    new_feature = fused_sa_mlp_maxpool(grouped.reshape(B * M, K, cin_p), layers)
    return new_xyz, new_feature.reshape(B, M, -1)


def fp_module_forward(layers, dense_xyz, sparse_xyz, dense_feature, sparse_feature,
                      num_neighbors, pad_out_to=0):
    """PointNet Feature Propagation."""
    B, Nd, _ = dense_xyz.shape
    if num_neighbors == 0:           # propagate a global feature
        expanded = jnp.broadcast_to(sparse_feature, (B, Nd, sparse_feature.shape[-1]))
        new_feature = jnp.concatenate([expanded, dense_feature], axis=-1)
    else:                            # inverse-distance-weighted k-NN interpolation
        idx, dist2 = knn(dense_xyz, sparse_xyz, num_neighbors)
        dist2 = jnp.maximum(dist2, 1e-10)
        inv = 1.0 / dist2
        weight = inv / jnp.sum(inv, axis=-1, keepdims=True)           # (B, Nd, k)
        nbr_feat = group_points(sparse_feature, idx)                  # (B, Nd, k, C)
        interpolated = jnp.sum(nbr_feat.astype(jnp.float32) * weight[..., None],
                               axis=2).astype(jnp.bfloat16)
        if dense_feature is not None:
            new_feature = jnp.concatenate([interpolated, dense_feature], axis=-1)
        else:
            new_feature = interpolated
    cin = new_feature.shape[-1]
    x = fused_mlp_rows(new_feature.reshape(B * Nd, cin), layers,
                       pad_out_to=pad_out_to)
    return x.reshape(B, Nd, -1)


def _block_diag(ms):
    rows = sum(m.shape[0] for m in ms)
    cols = sum(m.shape[1] for m in ms)
    out = jnp.zeros((rows, cols), ms[0].dtype)
    r = c = 0
    for m in ms:
        out = out.at[r:r + m.shape[0], c:c + m.shape[1]].set(m)
        r += m.shape[0]
        c += m.shape[1]
    return out


def _fuse_head_layers(params, pad_in_to):
    """Fuse mlp_seg/mlp_R/mlp_t + their logit convs into one MLP chain: layer 0
    weights concatenated along Cout (zero rows appended for the lane-padded
    feat2d fan-in), deeper layers block-diagonal, so feat2d is read from HBM
    once and all three heads share one wide matmul."""
    heads = [list(params["mlp_seg"]) + [params["seg_logit"]],
             list(params["mlp_R"]) + [params["R_logit"]],
             list(params["mlp_t"]) + [params["t_logit"]]]
    fused = []
    for l in range(len(heads[0])):
        ws = [h[l][0] for h in heads]
        bs = [h[l][1] for h in heads]
        w = jnp.concatenate(ws, axis=1) if l == 0 else _block_diag(ws)
        b = jnp.concatenate(bs, axis=0)
        if l == 0 and pad_in_to > w.shape[0]:
            w = jnp.concatenate(
                [w, jnp.zeros((pad_in_to - w.shape[0], w.shape[1]), w.dtype)], axis=0)
        fused.append((w, b))
    return fused


def pointnet2_forward(params, points, config):
    """points: (B, 3, N) float32 (PyTorch data_batch['scene_points'])."""
    B, _, N = points.shape
    xyz = jnp.transpose(points, (0, 2, 1)).astype(jnp.float32)        # (B, N, 3)
    feature = None
    inter_xyz, inter_feature = [xyz], [feature]

    for i in range(len(config["num_centroids"])):
        xyz, feature = sa_module_forward(
            params["sa"][i], xyz, feature,
            config["num_centroids"][i], config["radius"][i],
            config["num_neighbours"][i])
        inter_xyz.append(xyz)
        inter_feature.append(feature)

    sparse_xyz, sparse_feature = xyz, feature
    n_fp = len(config["num_fp_neighbours"])
    for i in range(n_fp):
        dense_xyz = inter_xyz[-2 - i]
        dense_feature = inter_feature[-2 - i]
        pad_out = 0
        if i == n_fp - 1:           # feat2d producer: make it lane-dense (128)
            pad_out = _round_up(params["fp"][i][-1][0].shape[1], 128)
        sparse_feature = fp_module_forward(
            params["fp"][i], dense_xyz, sparse_xyz, dense_feature, sparse_feature,
            config["num_fp_neighbours"][i], pad_out_to=pad_out)
        sparse_xyz = dense_xyz

    feat2d = sparse_feature.reshape(B * N, -1)                         # (B*N, 128)

    # Fused heads: ONE kernel over feat2d; output lanes = [seg | R(6) | t(3) | 0-pad]
    # padded to 128 so the biggest row-count store is lane-dense.
    # TODO(synk): dropout in mlp_seg is eval-mode identity here (no RNG dropout).
    head_layers = _fuse_head_layers(params, pad_in_to=feat2d.shape[1])
    sc = params["seg_logit"][0].shape[1]
    head_out = fused_mlp_rows(feat2d, head_layers, relu_last=False,
                              out_dtype=jnp.float32,
                              pad_out_to=_round_up(sc + 9, 128))
    logits = head_out[:, :sc].reshape(B, N, sc)
    r6 = head_out[:, sc:sc + 6].reshape(B, N, 6)
    t3 = head_out[:, sc + 6:sc + 9].reshape(B, N, 3)

    R = to_rot_matrix(r6)                                              # (B, N, 9)
    t_out = points + jnp.transpose(t3, (0, 2, 1))                      # (B, 3, N)

    return {
        "scene_score_logits": jnp.transpose(logits, (0, 2, 1)),        # (B, classes, N)
        "frame_R": jnp.transpose(R, (0, 2, 1)),                        # (B, 9, N)
        "frame_t": t_out,                                              # (B, 3, N)
    }


# --------------------------------------------------------------------------
# Deterministic parameter initialization (BN folded: eval mode, default init)
# --------------------------------------------------------------------------
_BN_SCALE = 1.0 / (1.0 + 1e-5) ** 0.5   # gamma=1, beta=0, mean=0, var=1


def _init_mlp(key, cin, channels, pad_first_in_to=8):
    layers = []
    for li, cout in enumerate(channels):
        key, wk = jax.random.split(key)
        w = jax.random.normal(wk, (cin, cout), jnp.float32) * (float(cin) ** -0.5) * _BN_SCALE
        if li == 0:                  # zero-pad fan-in rows for sublane alignment
            cin_p = _round_up(cin, pad_first_in_to)
            if cin_p != cin:
                w = jnp.concatenate([w, jnp.zeros((cin_p - cin, cout), jnp.float32)], 0)
        b = jnp.zeros((cout,), jnp.float32)   # conv bias=False when followed by BN
        layers.append((w, b))
        cin = cout
    return key, layers


def _init_linear(key, cin, cout, zero=False):
    key, wk, bk = jax.random.split(key, 3)
    if zero:
        return key, (jnp.zeros((cin, cout), jnp.float32), jnp.zeros((cout,), jnp.float32))
    bound = float(cin) ** -0.5
    w = jax.random.uniform(wk, (cin, cout), jnp.float32, -bound, bound)
    b = jax.random.uniform(bk, (cout,), jnp.float32, -bound, bound)
    return key, (w, b)


def make_params(key, score_classes, sa_channels, fp_channels, seg_channels):
    params = {"sa": [], "fp": []}
    feature_channels = 0
    for ch in sa_channels:                       # use_xyz=True -> +3 input channels
        key, layers = _init_mlp(key, feature_channels + 3, ch)
        params["sa"].append(layers)
        feature_channels = ch[-1]

    inter_channels = [0] + [c[-1] for c in sa_channels]
    feature_channels = inter_channels[-1]
    for ind, ch in enumerate(fp_channels):
        key, layers = _init_mlp(key, feature_channels + inter_channels[-2 - ind], ch)
        params["fp"].append(layers)
        feature_channels = ch[-1]

    key, params["mlp_seg"] = _init_mlp(key, feature_channels, seg_channels)
    key, params["seg_logit"] = _init_linear(key, seg_channels[-1], score_classes)
    key, params["mlp_R"] = _init_mlp(key, feature_channels, seg_channels)
    key, params["R_logit"] = _init_linear(key, seg_channels[-1], 6)
    key, params["mlp_t"] = _init_mlp(key, feature_channels, seg_channels)
    # PointNet2.init_weights(): zero the t_logit conv
    key, params["t_logit"] = _init_linear(key, seg_channels[-1], 3, zero=True)
    return params


# --------------------------------------------------------------------------
if __name__ == "__main__":
    # Same channel structure as the PyTorch defaults; point / centroid /
    # neighbour counts scaled down so the example runs quickly.
    SCORE_CLASSES = 3
    NUM_CENTROIDS = (64, 32, 16, 0)
    RADIUS = (0.2, 0.3, 0.4, -1.0)
    NUM_NEIGHBOURS = (8, 8, 8, -1)
    SA_CHANNELS = ((32, 32, 64), (64, 64, 128), (128, 128, 256), (256, 512, 1024))
    FP_CHANNELS = ((256, 256), (256, 128), (128, 128), (64, 64, 64))
    NUM_FP_NEIGHBOURS = (0, 3, 3, 3)
    SEG_CHANNELS = (128,)

    config = dict(num_centroids=NUM_CENTROIDS, radius=RADIUS,
                  num_neighbours=NUM_NEIGHBOURS, num_fp_neighbours=NUM_FP_NEIGHBOURS)

    key = jax.random.PRNGKey(0)
    key, pkey, xkey = jax.random.split(key, 3)
    params = make_params(pkey, SCORE_CLASSES, SA_CHANNELS, FP_CHANNELS, SEG_CHANNELS)

    B, N = 2, 128
    scene_points = jax.random.uniform(xkey, (B, 3, N), jnp.float32,
                                      minval=-0.5, maxval=0.5)

    fwd = jax.jit(lambda p, x: pointnet2_forward(p, x, config))
    preds = fwd(params, scene_points)
    preds = jax.block_until_ready(preds)

    assert preds["scene_score_logits"].shape == (B, SCORE_CLASSES, N)
    assert preds["frame_R"].shape == (B, 9, N)
    assert preds["frame_t"].shape == (B, 3, N)
    assert all(bool(jnp.all(jnp.isfinite(v))) for v in preds.values())
    print("KERNEL_OK")
</pallas_src>

<mosaic_0001>
module attributes {stable_mosaic.version = 11 : i64} {
  func.func @_sa_mlp_max_kernel(%arg0: i32, %arg1: i32, %arg2: memref<64x8x8xbf16, #tpu.memory_space<vmem>>, %arg3: memref<8x32xbf16, #tpu.memory_space<vmem>>, %arg4: memref<1x32xf32, #tpu.memory_space<vmem>>, %arg5: memref<32x32xbf16, #tpu.memory_space<vmem>>, %arg6: memref<1x32xf32, #tpu.memory_space<vmem>>, %arg7: memref<32x64xbf16, #tpu.memory_space<vmem>>, %arg8: memref<1x64xf32, #tpu.memory_space<vmem>>, %arg9: memref<64x64xbf16, #tpu.memory_space<vmem>>) attributes {dimension_semantics = [#tpu.dimension_semantics<parallel>, #tpu.dimension_semantics<arbitrary>], iteration_bounds = array<i64: 2, 1>, scalar_prefetch = 0 : i64, scratch_operands = 0 : i64, tpu.core_type = #tpu.core_type<tc>, window_params = [{transform_indices = @transform_0, window_bounds = array<i64: 64, 8, 8>}, {pipeline_mode = #tpu.pipeline_mode<synchronous>, transform_indices = @transform_1, window_bounds = array<i64: 8, 32>}, {pipeline_mode = #tpu.pipeline_mode<synchronous>, transform_indices = @transform_2, window_bounds = array<i64: 1, 32>}, {pipeline_mode = #tpu.pipeline_mode<synchronous>, transform_indices = @transform_3, window_bounds = array<i64: 32, 32>}, {pipeline_mode = #tpu.pipeline_mode<synchronous>, transform_indices = @transform_4, window_bounds = array<i64: 1, 32>}, {pipeline_mode = #tpu.pipeline_mode<synchronous>, transform_indices = @transform_5, window_bounds = array<i64: 32, 64>}, {pipeline_mode = #tpu.pipeline_mode<synchronous>, transform_indices = @transform_6, window_bounds = array<i64: 1, 64>}, {transform_indices = @transform_7, window_bounds = array<i64: 64, 64>}]} {
    %c0 = arith.constant 0 : index
    %c0_0 = arith.constant 0 : index
    %c0_1 = arith.constant 0 : index
    %0 = vector.load %arg2[%c0, %c0_0, %c0_1] : memref<64x8x8xbf16, #tpu.memory_space<vmem>>, vector<64x8x8xbf16>
    %1 = vector.shape_cast %0 : vector<64x8x8xbf16> to vector<512x8xbf16>
    %c0_2 = arith.constant 0 : index
    %c0_3 = arith.constant 0 : index
    %2 = vector.load %arg3[%c0_2, %c0_3] : memref<8x32xbf16, #tpu.memory_space<vmem>>, vector<8x32xbf16>
    %c0_4 = arith.constant 0 : index
    %c0_5 = arith.constant 0 : index
    %3 = vector.load %arg4[%c0_4, %c0_5] : memref<1x32xf32, #tpu.memory_space<vmem>>, vector<1x32xf32>
    %cst = arith.constant dense<0.000000e+00> : vector<512x32xf32>
    %4 = tpu.matmul %1, %2, %cst {dimension_numbers = #tpu.dot_dimension_numbers<[1], [0], [0], [1], [0, 0, 1, 1], [], []>} : vector<512x8xbf16>, vector<8x32xbf16>, vector<512x32xf32> -> vector<512x32xf32>
    %5 = vector.broadcast %3 : vector<1x32xf32> to vector<512x32xf32>
    %6 = arith.addf %4, %5 : vector<512x32xf32>
    %cst_6 = arith.constant 0.000000e+00 : f32
    %7 = vector.broadcast %cst_6 : f32 to vector<512x32xf32>
    %8 = arith.maximumf %6, %7 : vector<512x32xf32>
    %9 = arith.truncf %8 : vector<512x32xf32> to vector<512x32xbf16>
    %c0_7 = arith.constant 0 : index
    %c0_8 = arith.constant 0 : index
    %10 = vector.load %arg5[%c0_7, %c0_8] : memref<32x32xbf16, #tpu.memory_space<vmem>>, vector<32x32xbf16>
    %c0_9 = arith.constant 0 : index
    %c0_10 = arith.constant 0 : index
    %11 = vector.load %arg6[%c0_9, %c0_10] : memref<1x32xf32, #tpu.memory_space<vmem>>, vector<1x32xf32>
    %cst_11 = arith.constant dense<0.000000e+00> : vector<512x32xf32>
    %12 = tpu.matmul %9, %10, %cst_11 {dimension_numbers = #tpu.dot_dimension_numbers<[1], [0], [0], [1], [0, 0, 1, 1], [], []>} : vector<512x32xbf16>, vector<32x32xbf16>, vector<512x32xf32> -> vector<512x32xf32>
    %13 = vector.broadcast %11 : vector<1x32xf32> to vector<512x32xf32>
    %14 = arith.addf %12, %13 : vector<512x32xf32>
    %cst_12 = arith.constant 0.000000e+00 : f32
    %15 = vector.broadcast %cst_12 : f32 to vector<512x32xf32>
    %16 = arith.maximumf %14, %15 : vector<512x32xf32>
    %17 = arith.truncf %16 : vector<512x32xf32> to vector<512x32xbf16>
    %c0_13 = arith.constant 0 : index
    %c0_14 = arith.constant 0 : index
    %18 = vector.load %arg7[%c0_13, %c0_14] : memref<32x64xbf16, #tpu.memory_space<vmem>>, vector<32x64xbf16>
    %c0_15 = arith.constant 0 : index
    %c0_16 = arith.constant 0 : index
    %19 = vector.load %arg8[%c0_15, %c0_16] : memref<1x64xf32, #tpu.memory_space<vmem>>, vector<1x64xf32>
    %cst_17 = arith.constant dense<0.000000e+00> : vector<512x64xf32>
    %20 = tpu.matmul %17, %18, %cst_17 {dimension_numbers = #tpu.dot_dimension_numbers<[1], [0], [0], [1], [0, 0, 1, 1], [], []>} : vector<512x32xbf16>, vector<32x64xbf16>, vector<512x64xf32> -> vector<512x64xf32>
    %21 = vector.broadcast %19 : vector<1x64xf32> to vector<512x64xf32>
    %22 = arith.addf %20, %21 : vector<512x64xf32>
    %cst_18 = arith.constant 0.000000e+00 : f32
    %23 = vector.broadcast %cst_18 : f32 to vector<512x64xf32>
    %24 = arith.maximumf %22, %23 : vector<512x64xf32>
    %25 = vector.shape_cast %24 : vector<512x64xf32> to vector<64x8x64xf32>
    %cst_19 = arith.constant dense<0xFF800000> : vector<64x64xf32>
    %26 = vector.multi_reduction <maximumf>, %25, %cst_19 [1] : vector<64x8x64xf32> to vector<64x64xf32>
    %27 = arith.truncf %26 : vector<64x64xf32> to vector<64x64xbf16>
    %c0_i32 = arith.constant 0 : i32
    %28 = arith.cmpi eq, %arg1, %c0_i32 : i32
    %29 = arith.extui %28 : i1 to i32
    %c0_i32_20 = arith.constant 0 : i32
    %30 = arith.cmpi ne, %29, %c0_i32_20 : i32
    scf.if %30 {
      %c0_23 = arith.constant 0 : index
      %c0_24 = arith.constant 0 : index
      %34 = vector.load %arg9[%c0_23, %c0_24] : memref<64x64xbf16, #tpu.memory_space<vmem>>, vector<64x64xbf16>
      tpu.vector_store %arg9[%c0_23, %c0_24], %27 {strides = array<i32>} : memref<64x64xbf16, #tpu.memory_space<vmem>>, vector<64x64xbf16>,
    } else {
    }
    %c0_i32_21 = arith.constant 0 : i32
    %31 = arith.cmpi ne, %arg1, %c0_i32_21 : i32
    %32 = arith.extui %31 : i1 to i32
    %c0_i32_22 = arith.constant 0 : i32
    %33 = arith.cmpi ne, %32, %c0_i32_22 : i32
    scf.if %33 {
      %c0_23 = arith.constant 0 : index
      %c0_24 = arith.constant 0 : index
      %34 = vector.load %arg9[%c0_23, %c0_24] : memref<64x64xbf16, #tpu.memory_space<vmem>>, vector<64x64xbf16>
      %35 = arith.maximumf %34, %27 : vector<64x64xbf16>
      %c0_25 = arith.constant 0 : index
      %c0_26 = arith.constant 0 : index
      %36 = vector.load %arg9[%c0_25, %c0_26] : memref<64x64xbf16, #tpu.memory_space<vmem>>, vector<64x64xbf16>
      tpu.vector_store %arg9[%c0_25, %c0_26], %35 {strides = array<i32>} : memref<64x64xbf16, #tpu.memory_space<vmem>>, vector<64x64xbf16>,
    } else {
    }
    return
  }
  func.func @transform_0(%arg0: i32, %arg1: i32) -> (i32, i32, i32) {
    %c0_i32 = arith.constant 0 : i32
    %c0_i32_0 = arith.constant 0 : i32
    return %arg0, %arg1, %c0_i32 : i32, i32, i32
  }
  func.func @transform_1(%arg0: i32, %arg1: i32) -> (i32, i32) {
    %c0_i32 = arith.constant 0 : i32
    %c0_i32_0 = arith.constant 0 : i32
    %c0_i32_1 = arith.constant 0 : i32
    return %c0_i32, %c0_i32_0 : i32, i32
  }
  func.func @transform_2(%arg0: i32, %arg1: i32) -> (i32, i32) {
    %c0_i32 = arith.constant 0 : i32
    %c0_i32_0 = arith.constant 0 : i32
    %c0_i32_1 = arith.constant 0 : i32
    return %c0_i32, %c0_i32_0 : i32, i32
  }
  func.func @transform_3(%arg0: i32, %arg1: i32) -> (i32, i32) {
    %c0_i32 = arith.constant 0 : i32
    %c0_i32_0 = arith.constant 0 : i32
    %c0_i32_1 = arith.constant 0 : i32
    return %c0_i32, %c0_i32_0 : i32, i32
  }
  func.func @transform_4(%arg0: i32, %arg1: i32) -> (i32, i32) {
    %c0_i32 = arith.constant 0 : i32
    %c0_i32_0 = arith.constant 0 : i32
    %c0_i32_1 = arith.constant 0 : i32
    return %c0_i32, %c0_i32_0 : i32, i32
  }
  func.func @transform_5(%arg0: i32, %arg1: i32) -> (i32, i32) {
    %c0_i32 = arith.constant 0 : i32
    %c0_i32_0 = arith.constant 0 : i32
    %c0_i32_1 = arith.constant 0 : i32
    return %c0_i32, %c0_i32_0 : i32, i32
  }
  func.func @transform_6(%arg0: i32, %arg1: i32) -> (i32, i32) {
    %c0_i32 = arith.constant 0 : i32
    %c0_i32_0 = arith.constant 0 : i32
    %c0_i32_1 = arith.constant 0 : i32
    return %c0_i32, %c0_i32_0 : i32, i32
  }
  func.func @transform_7(%arg0: i32, %arg1: i32) -> (i32, i32) {
    %c0_i32 = arith.constant 0 : i32
    %c0_i32_0 = arith.constant 0 : i32
    return %arg0, %c0_i32 : i32, i32
  }
}

module attributes {stable_mosaic.version = 11 : i64} {
  func.func @_sa_mlp_max_kernel(%arg0: i32, %arg1: i32, %arg2: memref<32x8x72xbf16, #tpu.memory_space<vmem>>, %arg3: memref<72x64xbf16, #tpu.memory_space<vmem>>, %arg4: memref<1x64xf32, #tpu.memory_space<vmem>>, %arg5: memref<64x64xbf16, #tpu.memory_space<vmem>>, %arg6: memref<1x64xf32, #tpu.memory_space<vmem>>, %arg7: memref<64x128xbf16, #tpu.memory_space<vmem>>, %arg8: memref<1x128xf32, #tpu.memory_space<vmem>>, %arg9: memref<32x128xbf16, #tpu.memory_space<vmem>>) attributes {dimension_semantics = [#tpu.dimension_semantics<parallel>, #tpu.dimension_semantics<arbitrary>], iteration_bounds = array<i64: 2, 1>, scalar_prefetch = 0 : i64, scratch_operands = 0 : i64, tpu.core_type = #tpu.core_type<tc>, window_params = [{transform_indices = @transform_0, window_bounds = array<i64: 32, 8, 72>}, {pipeline_mode = #tpu.pipeline_mode<synchronous>, transform_indices = @transform_1, window_bounds = array<i64: 72, 64>}, {pipeline_mode = #tpu.pipeline_mode<synchronous>, transform_indices = @transform_2, window_bounds = array<i64: 1, 64>}, {pipeline_mode = #tpu.pipeline_mode<synchronous>, transform_indices = @transform_3, window_bounds = array<i64: 64, 64>}, {pipeline_mode = #tpu.pipeline_mode<synchronous>, transform_indices = @transform_4, window_bounds = array<i64: 1, 64>}, {pipeline_mode = #tpu.pipeline_mode<synchronous>, transform_indices = @transform_5, window_bounds = array<i64: 64, 128>}, {pipeline_mode = #tpu.pipeline_mode<synchronous>, transform_indices = @transform_6, window_bounds = array<i64: 1, 128>}, {transform_indices = @transform_7, window_bounds = array<i64: 32, 128>}]} {
    %c0 = arith.constant 0 : index
    %c0_0 = arith.constant 0 : index
    %c0_1 = arith.constant 0 : index
    %0 = vector.load %arg2[%c0, %c0_0, %c0_1] : memref<32x8x72xbf16, #tpu.memory_space<vmem>>, vector<32x8x72xbf16>
    %1 = vector.shape_cast %0 : vector<32x8x72xbf16> to vector<256x72xbf16>
    %c0_2 = arith.constant 0 : index
    %c0_3 = arith.constant 0 : index
    %2 = vector.load %arg3[%c0_2, %c0_3] : memref<72x64xbf16, #tpu.memory_space<vmem>>, vector<72x64xbf16>
    %c0_4 = arith.constant 0 : index
    %c0_5 = arith.constant 0 : index
    %3 = vector.load %arg4[%c0_4, %c0_5] : memref<1x64xf32, #tpu.memory_space<vmem>>, vector<1x64xf32>
    %cst = arith.constant dense<0.000000e+00> : vector<256x64xf32>
    %4 = tpu.matmul %1, %2, %cst {dimension_numbers = #tpu.dot_dimension_numbers<[1], [0], [0], [1], [0, 0, 1, 1], [], []>} : vector<256x72xbf16>, vector<72x64xbf16>, vector<256x64xf32> -> vector<256x64xf32>
    %5 = vector.broadcast %3 : vector<1x64xf32> to vector<256x64xf32>
    %6 = arith.addf %4, %5 : vector<256x64xf32>
    %cst_6 = arith.constant 0.000000e+00 : f32
    %7 = vector.broadcast %cst_6 : f32 to vector<256x64xf32>
    %8 = arith.maximumf %6, %7 : vector<256x64xf32>
    %9 = arith.truncf %8 : vector<256x64xf32> to vector<256x64xbf16>
    %c0_7 = arith.constant 0 : index
    %c0_8 = arith.constant 0 : index
    %10 = vector.load %arg5[%c0_7, %c0_8] : memref<64x64xbf16, #tpu.memory_space<vmem>>, vector<64x64xbf16>
    %c0_9 = arith.constant 0 : index
    %c0_10 = arith.constant 0 : index
    %11 = vector.load %arg6[%c0_9, %c0_10] : memref<1x64xf32, #tpu.memory_space<vmem>>, vector<1x64xf32>
    %cst_11 = arith.constant dense<0.000000e+00> : vector<256x64xf32>
    %12 = tpu.matmul %9, %10, %cst_11 {dimension_numbers = #tpu.dot_dimension_numbers<[1], [0], [0], [1], [0, 0, 1, 1], [], []>} : vector<256x64xbf16>, vector<64x64xbf16>, vector<256x64xf32> -> vector<256x64xf32>
    %13 = vector.broadcast %11 : vector<1x64xf32> to vector<256x64xf32>
    %14 = arith.addf %12, %13 : vector<256x64xf32>
    %cst_12 = arith.constant 0.000000e+00 : f32
    %15 = vector.broadcast %cst_12 : f32 to vector<256x64xf32>
    %16 = arith.maximumf %14, %15 : vector<256x64xf32>
    %17 = arith.truncf %16 : vector<256x64xf32> to vector<256x64xbf16>
    %c0_13 = arith.constant 0 : index
    %c0_14 = arith.constant 0 : index
    %18 = vector.load %arg7[%c0_13, %c0_14] : memref<64x128xbf16, #tpu.memory_space<vmem>>, vector<64x128xbf16>
    %c0_15 = arith.constant 0 : index
    %c0_16 = arith.constant 0 : index
    %19 = vector.load %arg8[%c0_15, %c0_16] : memref<1x128xf32, #tpu.memory_space<vmem>>, vector<1x128xf32>
    %cst_17 = arith.constant dense<0.000000e+00> : vector<256x128xf32>
    %20 = tpu.matmul %17, %18, %cst_17 {dimension_numbers = #tpu.dot_dimension_numbers<[1], [0], [0], [1], [0, 0, 1, 1], [], []>} : vector<256x64xbf16>, vector<64x128xbf16>, vector<256x128xf32> -> vector<256x128xf32>
    %21 = vector.broadcast %19 : vector<1x128xf32> to vector<256x128xf32>
    %22 = arith.addf %20, %21 : vector<256x128xf32>
    %cst_18 = arith.constant 0.000000e+00 : f32
    %23 = vector.broadcast %cst_18 : f32 to vector<256x128xf32>
    %24 = arith.maximumf %22, %23 : vector<256x128xf32>
    %25 = vector.shape_cast %24 : vector<256x128xf32> to vector<32x8x128xf32>
    %cst_19 = arith.constant dense<0xFF800000> : vector<32x128xf32>
    %26 = vector.multi_reduction <maximumf>, %25, %cst_19 [1] : vector<32x8x128xf32> to vector<32x128xf32>
    %27 = arith.truncf %26 : vector<32x128xf32> to vector<32x128xbf16>
    %c0_i32 = arith.constant 0 : i32
    %28 = arith.cmpi eq, %arg1, %c0_i32 : i32
    %29 = arith.extui %28 : i1 to i32
    %c0_i32_20 = arith.constant 0 : i32
    %30 = arith.cmpi ne, %29, %c0_i32_20 : i32
    scf.if %30 {
      %c0_23 = arith.constant 0 : index
      %c0_24 = arith.constant 0 : index
      %34 = vector.load %arg9[%c0_23, %c0_24] : memref<32x128xbf16, #tpu.memory_space<vmem>>, vector<32x128xbf16>
      tpu.vector_store %arg9[%c0_23, %c0_24], %27 {strides = array<i32>} : memref<32x128xbf16, #tpu.memory_space<vmem>>, vector<32x128xbf16>,
    } else {
    }
    %c0_i32_21 = arith.constant 0 : i32
    %31 = arith.cmpi ne, %arg1, %c0_i32_21 : i32
    %32 = arith.extui %31 : i1 to i32
    %c0_i32_22 = arith.constant 0 : i32
    %33 = arith.cmpi ne, %32, %c0_i32_22 : i32
    scf.if %33 {
      %c0_23 = arith.constant 0 : index
      %c0_24 = arith.constant 0 : index
      %34 = vector.load %arg9[%c0_23, %c0_24] : memref<32x128xbf16, #tpu.memory_space<vmem>>, vector<32x128xbf16>
      %35 = arith.maximumf %34, %27 : vector<32x128xbf16>
      %c0_25 = arith.constant 0 : index
      %c0_26 = arith.constant 0 : index
      %36 = vector.load %arg9[%c0_25, %c0_26] : memref<32x128xbf16, #tpu.memory_space<vmem>>, vector<32x128xbf16>
      tpu.vector_store %arg9[%c0_25, %c0_26], %35 {strides = array<i32>} : memref<32x128xbf16, #tpu.memory_space<vmem>>, vector<32x128xbf16>,
    } else {
    }
    return
  }
  func.func @transform_0(%arg0: i32, %arg1: i32) -> (i32, i32, i32) {
    %c0_i32 = arith.constant 0 : i32
    %c0_i32_0 = arith.constant 0 : i32
    return %arg0, %arg1, %c0_i32 : i32, i32, i32
  }
  func.func @transform_1(%arg0: i32, %arg1: i32) -> (i32, i32) {
    %c0_i32 = arith.constant 0 : i32
    %c0_i32_0 = arith.constant 0 : i32
    %c0_i32_1 = arith.constant 0 : i32
    return %c0_i32, %c0_i32_0 : i32, i32
  }
  func.func @transform_2(%arg0: i32, %arg1: i32) -> (i32, i32) {
    %c0_i32 = arith.constant 0 : i32
    %c0_i32_0 = arith.constant 0 : i32
    %c0_i32_1 = arith.constant 0 : i32
    return %c0_i32, %c0_i32_0 : i32, i32
  }
  func.func @transform_3(%arg0: i32, %arg1: i32) -> (i32, i32) {
    %c0_i32 = arith.constant 0 : i32
    %c0_i32_0 = arith.constant 0 : i32
    %c0_i32_1 = arith.constant 0 : i32
    return %c0_i32, %c0_i32_0 : i32, i32
  }
  func.func @transform_4(%arg0: i32, %arg1: i32) -> (i32, i32) {
    %c0_i32 = arith.constant 0 : i32
    %c0_i32_0 = arith.constant 0 : i32
    %c0_i32_1 = arith.constant 0 : i32
    return %c0_i32, %c0_i32_0 : i32, i32
  }
  func.func @transform_5(%arg0: i32, %arg1: i32) -> (i32, i32) {
    %c0_i32 = arith.constant 0 : i32
    %c0_i32_0 = arith.constant 0 : i32
    %c0_i32_1 = arith.constant 0 : i32
    return %c0_i32, %c0_i32_0 : i32, i32
  }
  func.func @transform_6(%arg0: i32, %arg1: i32) -> (i32, i32) {
    %c0_i32 = arith.constant 0 : i32
    %c0_i32_0 = arith.constant 0 : i32
    %c0_i32_1 = arith.constant 0 : i32
    return %c0_i32, %c0_i32_0 : i32, i32
  }
  func.func @transform_7(%arg0: i32, %arg1: i32) -> (i32, i32) {
    %c0_i32 = arith.constant 0 : i32
    %c0_i32_0 = arith.constant 0 : i32
    return %arg0, %c0_i32 : i32, i32
  }
}

module attributes {stable_mosaic.version = 11 : i64} {
  func.func @_sa_mlp_max_kernel(%arg0: i32, %arg1: i32, %arg2: memref<16x8x136xbf16, #tpu.memory_space<vmem>>, %arg3: memref<136x128xbf16, #tpu.memory_space<vmem>>, %arg4: memref<1x128xf32, #tpu.memory_space<vmem>>, %arg5: memref<128x128xbf16, #tpu.memory_space<vmem>>, %arg6: memref<1x128xf32, #tpu.memory_space<vmem>>, %arg7: memref<128x256xbf16, #tpu.memory_space<vmem>>, %arg8: memref<1x256xf32, #tpu.memory_space<vmem>>, %arg9: memref<16x256xbf16, #tpu.memory_space<vmem>>) attributes {dimension_semantics = [#tpu.dimension_semantics<parallel>, #tpu.dimension_semantics<arbitrary>], iteration_bounds = array<i64: 2, 1>, scalar_prefetch = 0 : i64, scratch_operands = 0 : i64, tpu.core_type = #tpu.core_type<tc>, window_params = [{transform_indices = @transform_0, window_bounds = array<i64: 16, 8, 136>}, {pipeline_mode = #tpu.pipeline_mode<synchronous>, transform_indices = @transform_1, window_bounds = array<i64: 136, 128>}, {pipeline_mode = #tpu.pipeline_mode<synchronous>, transform_indices = @transform_2, window_bounds = array<i64: 1, 128>}, {pipeline_mode = #tpu.pipeline_mode<synchronous>, transform_indices = @transform_3, window_bounds = array<i64: 128, 128>}, {pipeline_mode = #tpu.pipeline_mode<synchronous>, transform_indices = @transform_4, window_bounds = array<i64: 1, 128>}, {pipeline_mode = #tpu.pipeline_mode<synchronous>, transform_indices = @transform_5, window_bounds = array<i64: 128, 256>}, {pipeline_mode = #tpu.pipeline_mode<synchronous>, transform_indices = @transform_6, window_bounds = array<i64: 1, 256>}, {transform_indices = @transform_7, window_bounds = array<i64: 16, 256>}]} {
    %c0 = arith.constant 0 : index
    %c0_0 = arith.constant 0 : index
    %c0_1 = arith.constant 0 : index
    %0 = vector.load %arg2[%c0, %c0_0, %c0_1] : memref<16x8x136xbf16, #tpu.memory_space<vmem>>, vector<16x8x136xbf16>
    %1 = vector.shape_cast %0 : vector<16x8x136xbf16> to vector<128x136xbf16>
    %c0_2 = arith.constant 0 : index
    %c0_3 = arith.constant 0 : index
    %2 = vector.load %arg3[%c0_2, %c0_3] : memref<136x128xbf16, #tpu.memory_space<vmem>>, vector<136x128xbf16>
    %c0_4 = arith.constant 0 : index
    %c0_5 = arith.constant 0 : index
    %3 = vector.load %arg4[%c0_4, %c0_5] : memref<1x128xf32, #tpu.memory_space<vmem>>, vector<1x128xf32>
    %cst = arith.constant dense<0.000000e+00> : vector<128x128xf32>
    %4 = tpu.matmul %1, %2, %cst {dimension_numbers = #tpu.dot_dimension_numbers<[1], [0], [0], [1], [0, 0, 1, 1], [], []>} : vector<128x136xbf16>, vector<136x128xbf16>, vector<128x128xf32> -> vector<128x128xf32>
    %5 = vector.broadcast %3 : vector<1x128xf32> to vector<128x128xf32>
    %6 = arith.addf %4, %5 : vector<128x128xf32>
    %cst_6 = arith.constant 0.000000e+00 : f32
    %7 = vector.broadcast %cst_6 : f32 to vector<128x128xf32>
    %8 = arith.maximumf %6, %7 : vector<128x128xf32>
    %9 = arith.truncf %8 : vector<128x128xf32> to vector<128x128xbf16>
    %c0_7 = arith.constant 0 : index
    %c0_8 = arith.constant 0 : index
    %10 = vector.load %arg5[%c0_7, %c0_8] : memref<128x128xbf16, #tpu.memory_space<vmem>>, vector<128x128xbf16>
    %c0_9 = arith.constant 0 : index
    %c0_10 = arith.constant 0 : index
    %11 = vector.load %arg6[%c0_9, %c0_10] : memref<1x128xf32, #tpu.memory_space<vmem>>, vector<1x128xf32>
    %cst_11 = arith.constant dense<0.000000e+00> : vector<128x128xf32>
    %12 = tpu.matmul %9, %10, %cst_11 {dimension_numbers = #tpu.dot_dimension_numbers<[1], [0], [0], [1], [0, 0, 1, 1], [], []>} : vector<128x128xbf16>, vector<128x128xbf16>, vector<128x128xf32> -> vector<128x128xf32>
    %13 = vector.broadcast %11 : vector<1x128xf32> to vector<128x128xf32>
    %14 = arith.addf %12, %13 : vector<128x128xf32>
    %cst_12 = arith.constant 0.000000e+00 : f32
    %15 = vector.broadcast %cst_12 : f32 to vector<128x128xf32>
    %16 = arith.maximumf %14, %15 : vector<128x128xf32>
    %17 = arith.truncf %16 : vector<128x128xf32> to vector<128x128xbf16>
    %c0_13 = arith.constant 0 : index
    %c0_14 = arith.constant 0 : index
    %18 = vector.load %arg7[%c0_13, %c0_14] : memref<128x256xbf16, #tpu.memory_space<vmem>>, vector<128x256xbf16>
    %c0_15 = arith.constant 0 : index
    %c0_16 = arith.constant 0 : index
    %19 = vector.load %arg8[%c0_15, %c0_16] : memref<1x256xf32, #tpu.memory_space<vmem>>, vector<1x256xf32>
    %cst_17 = arith.constant dense<0.000000e+00> : vector<128x256xf32>
    %20 = tpu.matmul %17, %18, %cst_17 {dimension_numbers = #tpu.dot_dimension_numbers<[1], [0], [0], [1], [0, 0, 1, 1], [], []>} : vector<128x128xbf16>, vector<128x256xbf16>, vector<128x256xf32> -> vector<128x256xf32>
    %21 = vector.broadcast %19 : vector<1x256xf32> to vector<128x256xf32>
    %22 = arith.addf %20, %21 : vector<128x256xf32>
    %cst_18 = arith.constant 0.000000e+00 : f32
    %23 = vector.broadcast %cst_18 : f32 to vector<128x256xf32>
    %24 = arith.maximumf %22, %23 : vector<128x256xf32>
    %25 = vector.shape_cast %24 : vector<128x256xf32> to vector<16x8x256xf32>
    %cst_19 = arith.constant dense<0xFF800000> : vector<16x256xf32>
    %26 = vector.multi_reduction <maximumf>, %25, %cst_19 [1] : vector<16x8x256xf32> to vector<16x256xf32>
    %27 = arith.truncf %26 : vector<16x256xf32> to vector<16x256xbf16>
    %c0_i32 = arith.constant 0 : i32
    %28 = arith.cmpi eq, %arg1, %c0_i32 : i32
    %29 = arith.extui %28 : i1 to i32
    %c0_i32_20 = arith.constant 0 : i32
    %30 = arith.cmpi ne, %29, %c0_i32_20 : i32
    scf.if %30 {
      %c0_23 = arith.constant 0 : index
      %c0_24 = arith.constant 0 : index
      %34 = vector.load %arg9[%c0_23, %c0_24] : memref<16x256xbf16, #tpu.memory_space<vmem>>, vector<16x256xbf16>
      tpu.vector_store %arg9[%c0_23, %c0_24], %27 {strides = array<i32>} : memref<16x256xbf16, #tpu.memory_space<vmem>>, vector<16x256xbf16>,
    } else {
    }
    %c0_i32_21 = arith.constant 0 : i32
    %31 = arith.cmpi ne, %arg1, %c0_i32_21 : i32
    %32 = arith.extui %31 : i1 to i32
    %c0_i32_22 = arith.constant 0 : i32
    %33 = arith.cmpi ne, %32, %c0_i32_22 : i32
    scf.if %33 {
      %c0_23 = arith.constant 0 : index
      %c0_24 = arith.constant 0 : index
      %34 = vector.load %arg9[%c0_23, %c0_24] : memref<16x256xbf16, #tpu.memory_space<vmem>>, vector<16x256xbf16>
      %35 = arith.maximumf %34, %27 : vector<16x256xbf16>
      %c0_25 = arith.constant 0 : index
      %c0_26 = arith.constant 0 : index
      %36 = vector.load %arg9[%c0_25, %c0_26] : memref<16x256xbf16, #tpu.memory_space<vmem>>, vector<16x256xbf16>
      tpu.vector_store %arg9[%c0_25, %c0_26], %35 {strides = array<i32>} : memref<16x256xbf16, #tpu.memory_space<vmem>>, vector<16x256xbf16>,
    } else {
    }
    return
  }
  func.func @transform_0(%arg0: i32, %arg1: i32) -> (i32, i32, i32) {
    %c0_i32 = arith.constant 0 : i32
    %c0_i32_0 = arith.constant 0 : i32
    return %arg0, %arg1, %c0_i32 : i32, i32, i32
  }
  func.func @transform_1(%arg0: i32, %arg1: i32) -> (i32, i32) {
    %c0_i32 = arith.constant 0 : i32
    %c0_i32_0 = arith.constant 0 : i32
    %c0_i32_1 = arith.constant 0 : i32
    return %c0_i32, %c0_i32_0 : i32, i32
  }
  func.func @transform_2(%arg0: i32, %arg1: i32) -> (i32, i32) {
    %c0_i32 = arith.constant 0 : i32
    %c0_i32_0 = arith.constant 0 : i32
    %c0_i32_1 = arith.constant 0 : i32
    return %c0_i32, %c0_i32_0 : i32, i32
  }
  func.func @transform_3(%arg0: i32, %arg1: i32) -> (i32, i32) {
    %c0_i32 = arith.constant 0 : i32
    %c0_i32_0 = arith.constant 0 : i32
    %c0_i32_1 = arith.constant 0 : i32
    return %c0_i32, %c0_i32_0 : i32, i32
  }
  func.func @transform_4(%arg0: i32, %arg1: i32) -> (i32, i32) {
    %c0_i32 = arith.constant 0 : i32
    %c0_i32_0 = arith.constant 0 : i32
    %c0_i32_1 = arith.constant 0 : i32
    return %c0_i32, %c0_i32_0 : i32, i32
  }
  func.func @transform_5(%arg0: i32, %arg1: i32) -> (i32, i32) {
    %c0_i32 = arith.constant 0 : i32
    %c0_i32_0 = arith.constant 0 : i32
    %c0_i32_1 = arith.constant 0 : i32
    return %c0_i32, %c0_i32_0 : i32, i32
  }
  func.func @transform_6(%arg0: i32, %arg1: i32) -> (i32, i32) {
    %c0_i32 = arith.constant 0 : i32
    %c0_i32_0 = arith.constant 0 : i32
    %c0_i32_1 = arith.constant 0 : i32
    return %c0_i32, %c0_i32_0 : i32, i32
  }
  func.func @transform_7(%arg0: i32, %arg1: i32) -> (i32, i32) {
    %c0_i32 = arith.constant 0 : i32
    %c0_i32_0 = arith.constant 0 : i32
    return %arg0, %c0_i32 : i32, i32
  }
}

module attributes {stable_mosaic.version = 11 : i64} {
  func.func @_sa_mlp_max_kernel(%arg0: i32, %arg1: i32, %arg2: memref<2x16x264xbf16, #tpu.memory_space<vmem>>, %arg3: memref<264x256xbf16, #tpu.memory_space<vmem>>, %arg4: memref<1x256xf32, #tpu.memory_space<vmem>>, %arg5: memref<256x512xbf16, #tpu.memory_space<vmem>>, %arg6: memref<1x512xf32, #tpu.memory_space<vmem>>, %arg7: memref<512x1024xbf16, #tpu.memory_space<vmem>>, %arg8: memref<1x1024xf32, #tpu.memory_space<vmem>>, %arg9: memref<2x1024xbf16, #tpu.memory_space<vmem>>) attributes {dimension_semantics = [#tpu.dimension_semantics<parallel>, #tpu.dimension_semantics<arbitrary>], iteration_bounds = array<i64: 1, 1>, scalar_prefetch = 0 : i64, scratch_operands = 0 : i64, tpu.core_type = #tpu.core_type<tc>, window_params = [{transform_indices = @transform_0, window_bounds = array<i64: 2, 16, 264>}, {pipeline_mode = #tpu.pipeline_mode<synchronous>, transform_indices = @transform_1, window_bounds = array<i64: 264, 256>}, {pipeline_mode = #tpu.pipeline_mode<synchronous>, transform_indices = @transform_2, window_bounds = array<i64: 1, 256>}, {pipeline_mode = #tpu.pipeline_mode<synchronous>, transform_indices = @transform_3, window_bounds = array<i64: 256, 512>}, {pipeline_mode = #tpu.pipeline_mode<synchronous>, transform_indices = @transform_4, window_bounds = array<i64: 1, 512>}, {pipeline_mode = #tpu.pipeline_mode<synchronous>, transform_indices = @transform_5, window_bounds = array<i64: 512, 1024>}, {pipeline_mode = #tpu.pipeline_mode<synchronous>, transform_indices = @transform_6, window_bounds = array<i64: 1, 1024>}, {transform_indices = @transform_7, window_bounds = array<i64: 2, 1024>}]} {
    %c0 = arith.constant 0 : index
    %c0_0 = arith.constant 0 : index
    %c0_1 = arith.constant 0 : index
    %0 = vector.load %arg2[%c0, %c0_0, %c0_1] : memref<2x16x264xbf16, #tpu.memory_space<vmem>>, vector<2x16x264xbf16>
    %1 = vector.shape_cast %0 : vector<2x16x264xbf16> to vector<32x264xbf16>
    %c0_2 = arith.constant 0 : index
    %c0_3 = arith.constant 0 : index
    %2 = vector.load %arg3[%c0_2, %c0_3] : memref<264x256xbf16, #tpu.memory_space<vmem>>, vector<264x256xbf16>
    %c0_4 = arith.constant 0 : index
    %c0_5 = arith.constant 0 : index
    %3 = vector.load %arg4[%c0_4, %c0_5] : memref<1x256xf32, #tpu.memory_space<vmem>>, vector<1x256xf32>
    %cst = arith.constant dense<0.000000e+00> : vector<32x256xf32>
    %4 = tpu.matmul %1, %2, %cst {dimension_numbers = #tpu.dot_dimension_numbers<[1], [0], [0], [1], [0, 0, 1, 1], [], []>} : vector<32x264xbf16>, vector<264x256xbf16>, vector<32x256xf32> -> vector<32x256xf32>
    %5 = vector.broadcast %3 : vector<1x256xf32> to vector<32x256xf32>
    %6 = arith.addf %4, %5 : vector<32x256xf32>
    %cst_6 = arith.constant 0.000000e+00 : f32
    %7 = vector.broadcast %cst_6 : f32 to vector<32x256xf32>
    %8 = arith.maximumf %6, %7 : vector<32x256xf32>
    %9 = arith.truncf %8 : vector<32x256xf32> to vector<32x256xbf16>
    %c0_7 = arith.constant 0 : index
    %c0_8 = arith.constant 0 : index
    %10 = vector.load %arg5[%c0_7, %c0_8] : memref<256x512xbf16, #tpu.memory_space<vmem>>, vector<256x512xbf16>
    %c0_9 = arith.constant 0 : index
    %c0_10 = arith.constant 0 : index
    %11 = vector.load %arg6[%c0_9, %c0_10] : memref<1x512xf32, #tpu.memory_space<vmem>>, vector<1x512xf32>
    %cst_11 = arith.constant dense<0.000000e+00> : vector<32x512xf32>
    %12 = tpu.matmul %9, %10, %cst_11 {dimension_numbers = #tpu.dot_dimension_numbers<[1], [0], [0], [1], [0, 0, 1, 1], [], []>} : vector<32x256xbf16>, vector<256x512xbf16>, vector<32x512xf32> -> vector<32x512xf32>
    %13 = vector.broadcast %11 : vector<1x512xf32> to vector<32x512xf32>
    %14 = arith.addf %12, %13 : vector<32x512xf32>
    %cst_12 = arith.constant 0.000000e+00 : f32
    %15 = vector.broadcast %cst_12 : f32 to vector<32x512xf32>
    %16 = arith.maximumf %14, %15 : vector<32x512xf32>
    %17 = arith.truncf %16 : vector<32x512xf32> to vector<32x512xbf16>
    %c0_13 = arith.constant 0 : index
    %c0_14 = arith.constant 0 : index
    %18 = vector.load %arg7[%c0_13, %c0_14] : memref<512x1024xbf16, #tpu.memory_space<vmem>>, vector<512x1024xbf16>
    %c0_15 = arith.constant 0 : index
    %c0_16 = arith.constant 0 : index
    %19 = vector.load %arg8[%c0_15, %c0_16] : memref<1x1024xf32, #tpu.memory_space<vmem>>, vector<1x1024xf32>
    %cst_17 = arith.constant dense<0.000000e+00> : vector<32x1024xf32>
    %20 = tpu.matmul %17, %18, %cst_17 {dimension_numbers = #tpu.dot_dimension_numbers<[1], [0], [0], [1], [0, 0, 1, 1], [], []>} : vector<32x512xbf16>, vector<512x1024xbf16>, vector<32x1024xf32> -> vector<32x1024xf32>
    %21 = vector.broadcast %19 : vector<1x1024xf32> to vector<32x1024xf32>
    %22 = arith.addf %20, %21 : vector<32x1024xf32>
    %cst_18 = arith.constant 0.000000e+00 : f32
    %23 = vector.broadcast %cst_18 : f32 to vector<32x1024xf32>
    %24 = arith.maximumf %22, %23 : vector<32x1024xf32>
    %25 = vector.shape_cast %24 : vector<32x1024xf32> to vector<2x16x1024xf32>
    %cst_19 = arith.constant dense<0xFF800000> : vector<2x1024xf32>
    %26 = vector.multi_reduction <maximumf>, %25, %cst_19 [1] : vector<2x16x1024xf32> to vector<2x1024xf32>
    %27 = arith.truncf %26 : vector<2x1024xf32> to vector<2x1024xbf16>
    %c0_i32 = arith.constant 0 : i32
    %28 = arith.cmpi eq, %arg1, %c0_i32 : i32
    %29 = arith.extui %28 : i1 to i32
    %c0_i32_20 = arith.constant 0 : i32
    %30 = arith.cmpi ne, %29, %c0_i32_20 : i32
    scf.if %30 {
      %c0_23 = arith.constant 0 : index
      %c0_24 = arith.constant 0 : index
      %34 = vector.load %arg9[%c0_23, %c0_24] : memref<2x1024xbf16, #tpu.memory_space<vmem>>, vector<2x1024xbf16>
      tpu.vector_store %arg9[%c0_23, %c0_24], %27 {strides = array<i32>} : memref<2x1024xbf16, #tpu.memory_space<vmem>>, vector<2x1024xbf16>,
    } else {
    }
    %c0_i32_21 = arith.constant 0 : i32
    %31 = arith.cmpi ne, %arg1, %c0_i32_21 : i32
    %32 = arith.extui %31 : i1 to i32
    %c0_i32_22 = arith.constant 0 : i32
    %33 = arith.cmpi ne, %32, %c0_i32_22 : i32
    scf.if %33 {
      %c0_23 = arith.constant 0 : index
      %c0_24 = arith.constant 0 : index
      %34 = vector.load %arg9[%c0_23, %c0_24] : memref<2x1024xbf16, #tpu.memory_space<vmem>>, vector<2x1024xbf16>
      %35 = arith.maximumf %34, %27 : vector<2x1024xbf16>
      %c0_25 = arith.constant 0 : index
      %c0_26 = arith.constant 0 : index
      %36 = vector.load %arg9[%c0_25, %c0_26] : memref<2x1024xbf16, #tpu.memory_space<vmem>>, vector<2x1024xbf16>
      tpu.vector_store %arg9[%c0_25, %c0_26], %35 {strides = array<i32>} : memref<2x1024xbf16, #tpu.memory_space<vmem>>, vector<2x1024xbf16>,
    } else {
    }
    return
  }
  func.func @transform_0(%arg0: i32, %arg1: i32) -> (i32, i32, i32) {
    %c0_i32 = arith.constant 0 : i32
    %c0_i32_0 = arith.constant 0 : i32
    return %arg0, %arg1, %c0_i32 : i32, i32, i32
  }
  func.func @transform_1(%arg0: i32, %arg1: i32) -> (i32, i32) {
    %c0_i32 = arith.constant 0 : i32
    %c0_i32_0 = arith.constant 0 : i32
    %c0_i32_1 = arith.constant 0 : i32
    return %c0_i32, %c0_i32_0 : i32, i32
  }
  func.func @transform_2(%arg0: i32, %arg1: i32) -> (i32, i32) {
    %c0_i32 = arith.constant 0 : i32
    %c0_i32_0 = arith.constant 0 : i32
    %c0_i32_1 = arith.constant 0 : i32
    return %c0_i32, %c0_i32_0 : i32, i32
  }
  func.func @transform_3(%arg0: i32, %arg1: i32) -> (i32, i32) {
    %c0_i32 = arith.constant 0 : i32
    %c0_i32_0 = arith.constant 0 : i32
    %c0_i32_1 = arith.constant 0 : i32
    return %c0_i32, %c0_i32_0 : i32, i32
  }
  func.func @transform_4(%arg0: i32, %arg1: i32) -> (i32, i32) {
    %c0_i32 = arith.constant 0 : i32
    %c0_i32_0 = arith.constant 0 : i32
    %c0_i32_1 = arith.constant 0 : i32
    return %c0_i32, %c0_i32_0 : i32, i32
  }
  func.func @transform_5(%arg0: i32, %arg1: i32) -> (i32, i32) {
    %c0_i32 = arith.constant 0 : i32
    %c0_i32_0 = arith.constant 0 : i32
    %c0_i32_1 = arith.constant 0 : i32
    return %c0_i32, %c0_i32_0 : i32, i32
  }
  func.func @transform_6(%arg0: i32, %arg1: i32) -> (i32, i32) {
    %c0_i32 = arith.constant 0 : i32
    %c0_i32_0 = arith.constant 0 : i32
    %c0_i32_1 = arith.constant 0 : i32
    return %c0_i32, %c0_i32_0 : i32, i32
  }
  func.func @transform_7(%arg0: i32, %arg1: i32) -> (i32, i32) {
    %c0_i32 = arith.constant 0 : i32
    %c0_i32_0 = arith.constant 0 : i32
    return %arg0, %c0_i32 : i32, i32
  }
}

module attributes {stable_mosaic.version = 11 : i64} {
  func.func @_mlp_rows_kernel(%arg0: i32, %arg1: memref<16x1280xbf16, #tpu.memory_space<vmem>>, %arg2: memref<1280x256xbf16, #tpu.memory_space<vmem>>, %arg3: memref<1x256xf32, #tpu.memory_space<vmem>>, %arg4: memref<256x256xbf16, #tpu.memory_space<vmem>>, %arg5: memref<1x256xf32, #tpu.memory_space<vmem>>, %arg6: memref<16x256xbf16, #tpu.memory_space<vmem>>) attributes {dimension_semantics = [#tpu.dimension_semantics<parallel>], iteration_bounds = array<i64: 2>, scalar_prefetch = 0 : i64, scratch_operands = 0 : i64, tpu.core_type = #tpu.core_type<tc>, window_params = [{transform_indices = @transform_0, window_bounds = array<i64: 16, 1280>}, {pipeline_mode = #tpu.pipeline_mode<synchronous>, transform_indices = @transform_1, window_bounds = array<i64: 1280, 256>}, {pipeline_mode = #tpu.pipeline_mode<synchronous>, transform_indices = @transform_2, window_bounds = array<i64: 1, 256>}, {pipeline_mode = #tpu.pipeline_mode<synchronous>, transform_indices = @transform_3, window_bounds = array<i64: 256, 256>}, {pipeline_mode = #tpu.pipeline_mode<synchronous>, transform_indices = @transform_4, window_bounds = array<i64: 1, 256>}, {transform_indices = @transform_5, window_bounds = array<i64: 16, 256>}]} {
    %c0 = arith.constant 0 : index
    %c0_0 = arith.constant 0 : index
    %0 = vector.load %arg1[%c0, %c0_0] : memref<16x1280xbf16, #tpu.memory_space<vmem>>, vector<16x1280xbf16>
    %c0_1 = arith.constant 0 : index
    %c0_2 = arith.constant 0 : index
    %1 = vector.load %arg2[%c0_1, %c0_2] : memref<1280x256xbf16, #tpu.memory_space<vmem>>, vector<1280x256xbf16>
    %c0_3 = arith.constant 0 : index
    %c0_4 = arith.constant 0 : index
    %2 = vector.load %arg3[%c0_3, %c0_4] : memref<1x256xf32, #tpu.memory_space<vmem>>, vector<1x256xf32>
    %cst = arith.constant dense<0.000000e+00> : vector<16x256xf32>
    %3 = tpu.matmul %0, %1, %cst {dimension_numbers = #tpu.dot_dimension_numbers<[1], [0], [0], [1], [0, 0, 1, 1], [], []>} : vector<16x1280xbf16>, vector<1280x256xbf16>, vector<16x256xf32> -> vector<16x256xf32>
    %4 = vector.broadcast %2 : vector<1x256xf32> to vector<16x256xf32>
    %5 = arith.addf %3, %4 : vector<16x256xf32>
    %cst_5 = arith.constant 0.000000e+00 : f32
    %6 = vector.broadcast %cst_5 : f32 to vector<16x256xf32>
    %7 = arith.maximumf %5, %6 : vector<16x256xf32>
    %8 = arith.truncf %7 : vector<16x256xf32> to vector<16x256xbf16>
    %c0_6 = arith.constant 0 : index
    %c0_7 = arith.constant 0 : index
    %9 = vector.load %arg4[%c0_6, %c0_7] : memref<256x256xbf16, #tpu.memory_space<vmem>>, vector<256x256xbf16>
    %c0_8 = arith.constant 0 : index
    %c0_9 = arith.constant 0 : index
    %10 = vector.load %arg5[%c0_8, %c0_9] : memref<1x256xf32, #tpu.memory_space<vmem>>, vector<1x256xf32>
    %cst_10 = arith.constant dense<0.000000e+00> : vector<16x256xf32>
    %11 = tpu.matmul %8, %9, %cst_10 {dimension_numbers = #tpu.dot_dimension_numbers<[1], [0], [0], [1], [0, 0, 1, 1], [], []>} : vector<16x256xbf16>, vector<256x256xbf16>, vector<16x256xf32> -> vector<16x256xf32>
    %12 = vector.broadcast %10 : vector<1x256xf32> to vector<16x256xf32>
    %13 = arith.addf %11, %12 : vector<16x256xf32>
    %cst_11 = arith.constant 0.000000e+00 : f32
    %14 = vector.broadcast %cst_11 : f32 to vector<16x256xf32>
    %15 = arith.maximumf %13, %14 : vector<16x256xf32>
    %16 = arith.truncf %15 : vector<16x256xf32> to vector<16x256xbf16>
    %c0_12 = arith.constant 0 : index
    %c0_13 = arith.constant 0 : index
    %17 = vector.load %arg6[%c0_12, %c0_13] : memref<16x256xbf16, #tpu.memory_space<vmem>>, vector<16x256xbf16>
    tpu.vector_store %arg6[%c0_12, %c0_13], %16 {strides = array<i32>} : memref<16x256xbf16, #tpu.memory_space<vmem>>, vector<16x256xbf16>,
    return
  }
  func.func @transform_0(%arg0: i32) -> (i32, i32) {
    %c0_i32 = arith.constant 0 : i32
    %c0_i32_0 = arith.constant 0 : i32
    return %arg0, %c0_i32 : i32, i32
  }
  func.func @transform_1(%arg0: i32) -> (i32, i32) {
    %c0_i32 = arith.constant 0 : i32
    %c0_i32_0 = arith.constant 0 : i32
    %c0_i32_1 = arith.constant 0 : i32
    return %c0_i32, %c0_i32_0 : i32, i32
  }
  func.func @transform_2(%arg0: i32) -> (i32, i32) {
    %c0_i32 = arith.constant 0 : i32
    %c0_i32_0 = arith.constant 0 : i32
    %c0_i32_1 = arith.constant 0 : i32
    return %c0_i32, %c0_i32_0 : i32, i32
  }
  func.func @transform_3(%arg0: i32) -> (i32, i32) {
    %c0_i32 = arith.constant 0 : i32
    %c0_i32_0 = arith.constant 0 : i32
    %c0_i32_1 = arith.constant 0 : i32
    return %c0_i32, %c0_i32_0 : i32, i32
  }
  func.func @transform_4(%arg0: i32) -> (i32, i32) {
    %c0_i32 = arith.constant 0 : i32
    %c0_i32_0 = arith.constant 0 : i32
    %c0_i32_1 = arith.constant 0 : i32
    return %c0_i32, %c0_i32_0 : i32, i32
  }
  func.func @transform_5(%arg0: i32) -> (i32, i32) {
    %c0_i32 = arith.constant 0 : i32
    %c0_i32_0 = arith.constant 0 : i32
    return %arg0, %c0_i32 : i32, i32
  }
}

module attributes {stable_mosaic.version = 11 : i64} {
  func.func @_mlp_rows_kernel(%arg0: i32, %arg1: memref<32x384xbf16, #tpu.memory_space<vmem>>, %arg2: memref<384x256xbf16, #tpu.memory_space<vmem>>, %arg3: memref<1x256xf32, #tpu.memory_space<vmem>>, %arg4: memref<256x128xbf16, #tpu.memory_space<vmem>>, %arg5: memref<1x128xf32, #tpu.memory_space<vmem>>, %arg6: memref<32x128xbf16, #tpu.memory_space<vmem>>) attributes {dimension_semantics = [#tpu.dimension_semantics<parallel>], iteration_bounds = array<i64: 2>, scalar_prefetch = 0 : i64, scratch_operands = 0 : i64, tpu.core_type = #tpu.core_type<tc>, window_params = [{transform_indices = @transform_0, window_bounds = array<i64: 32, 384>}, {pipeline_mode = #tpu.pipeline_mode<synchronous>, transform_indices = @transform_1, window_bounds = array<i64: 384, 256>}, {pipeline_mode = #tpu.pipeline_mode<synchronous>, transform_indices = @transform_2, window_bounds = array<i64: 1, 256>}, {pipeline_mode = #tpu.pipeline_mode<synchronous>, transform_indices = @transform_3, window_bounds = array<i64: 256, 128>}, {pipeline_mode = #tpu.pipeline_mode<synchronous>, transform_indices = @transform_4, window_bounds = array<i64: 1, 128>}, {transform_indices = @transform_5, window_bounds = array<i64: 32, 128>}]} {
    %c0 = arith.constant 0 : index
    %c0_0 = arith.constant 0 : index
    %0 = vector.load %arg1[%c0, %c0_0] : memref<32x384xbf16, #tpu.memory_space<vmem>>, vector<32x384xbf16>
    %c0_1 = arith.constant 0 : index
    %c0_2 = arith.constant 0 : index
    %1 = vector.load %arg2[%c0_1, %c0_2] : memref<384x256xbf16, #tpu.memory_space<vmem>>, vector<384x256xbf16>
    %c0_3 = arith.constant 0 : index
    %c0_4 = arith.constant 0 : index
    %2 = vector.load %arg3[%c0_3, %c0_4] : memref<1x256xf32, #tpu.memory_space<vmem>>, vector<1x256xf32>
    %cst = arith.constant dense<0.000000e+00> : vector<32x256xf32>
    %3 = tpu.matmul %0, %1, %cst {dimension_numbers = #tpu.dot_dimension_numbers<[1], [0], [0], [1], [0, 0, 1, 1], [], []>} : vector<32x384xbf16>, vector<384x256xbf16>, vector<32x256xf32> -> vector<32x256xf32>
    %4 = vector.broadcast %2 : vector<1x256xf32> to vector<32x256xf32>
    %5 = arith.addf %3, %4 : vector<32x256xf32>
    %cst_5 = arith.constant 0.000000e+00 : f32
    %6 = vector.broadcast %cst_5 : f32 to vector<32x256xf32>
    %7 = arith.maximumf %5, %6 : vector<32x256xf32>
    %8 = arith.truncf %7 : vector<32x256xf32> to vector<32x256xbf16>
    %c0_6 = arith.constant 0 : index
    %c0_7 = arith.constant 0 : index
    %9 = vector.load %arg4[%c0_6, %c0_7] : memref<256x128xbf16, #tpu.memory_space<vmem>>, vector<256x128xbf16>
    %c0_8 = arith.constant 0 : index
    %c0_9 = arith.constant 0 : index
    %10 = vector.load %arg5[%c0_8, %c0_9] : memref<1x128xf32, #tpu.memory_space<vmem>>, vector<1x128xf32>
    %cst_10 = arith.constant dense<0.000000e+00> : vector<32x128xf32>
    %11 = tpu.matmul %8, %9, %cst_10 {dimension_numbers = #tpu.dot_dimension_numbers<[1], [0], [0], [1], [0, 0, 1, 1], [], []>} : vector<32x256xbf16>, vector<256x128xbf16>, vector<32x128xf32> -> vector<32x128xf32>
    %12 = vector.broadcast %10 : vector<1x128xf32> to vector<32x128xf32>
    %13 = arith.addf %11, %12 : vector<32x128xf32>
    %cst_11 = arith.constant 0.000000e+00 : f32
    %14 = vector.broadcast %cst_11 : f32 to vector<32x128xf32>
    %15 = arith.maximumf %13, %14 : vector<32x128xf32>
    %16 = arith.truncf %15 : vector<32x128xf32> to vector<32x128xbf16>
    %c0_12 = arith.constant 0 : index
    %c0_13 = arith.constant 0 : index
    %17 = vector.load %arg6[%c0_12, %c0_13] : memref<32x128xbf16, #tpu.memory_space<vmem>>, vector<32x128xbf16>
    tpu.vector_store %arg6[%c0_12, %c0_13], %16 {strides = array<i32>} : memref<32x128xbf16, #tpu.memory_space<vmem>>, vector<32x128xbf16>,
    return
  }
  func.func @transform_0(%arg0: i32) -> (i32, i32) {
    %c0_i32 = arith.constant 0 : i32
    %c0_i32_0 = arith.constant 0 : i32
    return %arg0, %c0_i32 : i32, i32
  }
  func.func @transform_1(%arg0: i32) -> (i32, i32) {
    %c0_i32 = arith.constant 0 : i32
    %c0_i32_0 = arith.constant 0 : i32
    %c0_i32_1 = arith.constant 0 : i32
    return %c0_i32, %c0_i32_0 : i32, i32
  }
  func.func @transform_2(%arg0: i32) -> (i32, i32) {
    %c0_i32 = arith.constant 0 : i32
    %c0_i32_0 = arith.constant 0 : i32
    %c0_i32_1 = arith.constant 0 : i32
    return %c0_i32, %c0_i32_0 : i32, i32
  }
  func.func @transform_3(%arg0: i32) -> (i32, i32) {
    %c0_i32 = arith.constant 0 : i32
    %c0_i32_0 = arith.constant 0 : i32
    %c0_i32_1 = arith.constant 0 : i32
    return %c0_i32, %c0_i32_0 : i32, i32
  }
  func.func @transform_4(%arg0: i32) -> (i32, i32) {
    %c0_i32 = arith.constant 0 : i32
    %c0_i32_0 = arith.constant 0 : i32
    %c0_i32_1 = arith.constant 0 : i32
    return %c0_i32, %c0_i32_0 : i32, i32
  }
  func.func @transform_5(%arg0: i32) -> (i32, i32) {
    %c0_i32 = arith.constant 0 : i32
    %c0_i32_0 = arith.constant 0 : i32
    return %arg0, %c0_i32 : i32, i32
  }
}

module attributes {stable_mosaic.version = 11 : i64} {
  func.func @_mlp_rows_kernel(%arg0: i32, %arg1: memref<64x192xbf16, #tpu.memory_space<vmem>>, %arg2: memref<192x128xbf16, #tpu.memory_space<vmem>>, %arg3: memref<1x128xf32, #tpu.memory_space<vmem>>, %arg4: memref<128x128xbf16, #tpu.memory_space<vmem>>, %arg5: memref<1x128xf32, #tpu.memory_space<vmem>>, %arg6: memref<64x128xbf16, #tpu.memory_space<vmem>>) attributes {dimension_semantics = [#tpu.dimension_semantics<parallel>], iteration_bounds = array<i64: 2>, scalar_prefetch = 0 : i64, scratch_operands = 0 : i64, tpu.core_type = #tpu.core_type<tc>, window_params = [{transform_indices = @transform_0, window_bounds = array<i64: 64, 192>}, {pipeline_mode = #tpu.pipeline_mode<synchronous>, transform_indices = @transform_1, window_bounds = array<i64: 192, 128>}, {pipeline_mode = #tpu.pipeline_mode<synchronous>, transform_indices = @transform_2, window_bounds = array<i64: 1, 128>}, {pipeline_mode = #tpu.pipeline_mode<synchronous>, transform_indices = @transform_3, window_bounds = array<i64: 128, 128>}, {pipeline_mode = #tpu.pipeline_mode<synchronous>, transform_indices = @transform_4, window_bounds = array<i64: 1, 128>}, {transform_indices = @transform_5, window_bounds = array<i64: 64, 128>}]} {
    %c0 = arith.constant 0 : index
    %c0_0 = arith.constant 0 : index
    %0 = vector.load %arg1[%c0, %c0_0] : memref<64x192xbf16, #tpu.memory_space<vmem>>, vector<64x192xbf16>
    %c0_1 = arith.constant 0 : index
    %c0_2 = arith.constant 0 : index
    %1 = vector.load %arg2[%c0_1, %c0_2] : memref<192x128xbf16, #tpu.memory_space<vmem>>, vector<192x128xbf16>
    %c0_3 = arith.constant 0 : index
    %c0_4 = arith.constant 0 : index
    %2 = vector.load %arg3[%c0_3, %c0_4] : memref<1x128xf32, #tpu.memory_space<vmem>>, vector<1x128xf32>
    %cst = arith.constant dense<0.000000e+00> : vector<64x128xf32>
    %3 = tpu.matmul %0, %1, %cst {dimension_numbers = #tpu.dot_dimension_numbers<[1], [0], [0], [1], [0, 0, 1, 1], [], []>} : vector<64x192xbf16>, vector<192x128xbf16>, vector<64x128xf32> -> vector<64x128xf32>
    %4 = vector.broadcast %2 : vector<1x128xf32> to vector<64x128xf32>
    %5 = arith.addf %3, %4 : vector<64x128xf32>
    %cst_5 = arith.constant 0.000000e+00 : f32
    %6 = vector.broadcast %cst_5 : f32 to vector<64x128xf32>
    %7 = arith.maximumf %5, %6 : vector<64x128xf32>
    %8 = arith.truncf %7 : vector<64x128xf32> to vector<64x128xbf16>
    %c0_6 = arith.constant 0 : index
    %c0_7 = arith.constant 0 : index
    %9 = vector.load %arg4[%c0_6, %c0_7] : memref<128x128xbf16, #tpu.memory_space<vmem>>, vector<128x128xbf16>
    %c0_8 = arith.constant 0 : index
    %c0_9 = arith.constant 0 : index
    %10 = vector.load %arg5[%c0_8, %c0_9] : memref<1x128xf32, #tpu.memory_space<vmem>>, vector<1x128xf32>
    %cst_10 = arith.constant dense<0.000000e+00> : vector<64x128xf32>
    %11 = tpu.matmul %8, %9, %cst_10 {dimension_numbers = #tpu.dot_dimension_numbers<[1], [0], [0], [1], [0, 0, 1, 1], [], []>} : vector<64x128xbf16>, vector<128x128xbf16>, vector<64x128xf32> -> vector<64x128xf32>
    %12 = vector.broadcast %10 : vector<1x128xf32> to vector<64x128xf32>
    %13 = arith.addf %11, %12 : vector<64x128xf32>
    %cst_11 = arith.constant 0.000000e+00 : f32
    %14 = vector.broadcast %cst_11 : f32 to vector<64x128xf32>
    %15 = arith.maximumf %13, %14 : vector<64x128xf32>
    %16 = arith.truncf %15 : vector<64x128xf32> to vector<64x128xbf16>
    %c0_12 = arith.constant 0 : index
    %c0_13 = arith.constant 0 : index
    %17 = vector.load %arg6[%c0_12, %c0_13] : memref<64x128xbf16, #tpu.memory_space<vmem>>, vector<64x128xbf16>
    tpu.vector_store %arg6[%c0_12, %c0_13], %16 {strides = array<i32>} : memref<64x128xbf16, #tpu.memory_space<vmem>>, vector<64x128xbf16>,
    return
  }
  func.func @transform_0(%arg0: i32) -> (i32, i32) {
    %c0_i32 = arith.constant 0 : i32
    %c0_i32_0 = arith.constant 0 : i32
    return %arg0, %c0_i32 : i32, i32
  }
  func.func @transform_1(%arg0: i32) -> (i32, i32) {
    %c0_i32 = arith.constant 0 : i32
    %c0_i32_0 = arith.constant 0 : i32
    %c0_i32_1 = arith.constant 0 : i32
    return %c0_i32, %c0_i32_0 : i32, i32
  }
  func.func @transform_2(%arg0: i32) -> (i32, i32) {
    %c0_i32 = arith.constant 0 : i32
    %c0_i32_0 = arith.constant 0 : i32
    %c0_i32_1 = arith.constant 0 : i32
    return %c0_i32, %c0_i32_0 : i32, i32
  }
  func.func @transform_3(%arg0: i32) -> (i32, i32) {
    %c0_i32 = arith.constant 0 : i32
    %c0_i32_0 = arith.constant 0 : i32
    %c0_i32_1 = arith.constant 0 : i32
    return %c0_i32, %c0_i32_0 : i32, i32
  }
  func.func @transform_4(%arg0: i32) -> (i32, i32) {
    %c0_i32 = arith.constant 0 : i32
    %c0_i32_0 = arith.constant 0 : i32
    %c0_i32_1 = arith.constant 0 : i32
    return %c0_i32, %c0_i32_0 : i32, i32
  }
  func.func @transform_5(%arg0: i32) -> (i32, i32) {
    %c0_i32 = arith.constant 0 : i32
    %c0_i32_0 = arith.constant 0 : i32
    return %arg0, %c0_i32 : i32, i32
  }
}

module attributes {stable_mosaic.version = 11 : i64} {
  func.func @_mlp_rows_kernel(%arg0: i32, %arg1: memref<128x128xbf16, #tpu.memory_space<vmem>>, %arg2: memref<128x64xbf16, #tpu.memory_space<vmem>>, %arg3: memref<1x64xf32, #tpu.memory_space<vmem>>, %arg4: memref<64x64xbf16, #tpu.memory_space<vmem>>, %arg5: memref<1x64xf32, #tpu.memory_space<vmem>>, %arg6: memref<64x128xbf16, #tpu.memory_space<vmem>>, %arg7: memref<1x128xf32, #tpu.memory_space<vmem>>, %arg8: memref<128x128xbf16, #tpu.memory_space<vmem>>) attributes {dimension_semantics = [#tpu.dimension_semantics<parallel>], iteration_bounds = array<i64: 2>, scalar_prefetch = 0 : i64, scratch_operands = 0 : i64, tpu.core_type = #tpu.core_type<tc>, window_params = [{transform_indices = @transform_0, window_bounds = array<i64: 128, 128>}, {pipeline_mode = #tpu.pipeline_mode<synchronous>, transform_indices = @transform_1, window_bounds = array<i64: 128, 64>}, {pipeline_mode = #tpu.pipeline_mode<synchronous>, transform_indices = @transform_2, window_bounds = array<i64: 1, 64>}, {pipeline_mode = #tpu.pipeline_mode<synchronous>, transform_indices = @transform_3, window_bounds = array<i64: 64, 64>}, {pipeline_mode = #tpu.pipeline_mode<synchronous>, transform_indices = @transform_4, window_bounds = array<i64: 1, 64>}, {pipeline_mode = #tpu.pipeline_mode<synchronous>, transform_indices = @transform_5, window_bounds = array<i64: 64, 128>}, {pipeline_mode = #tpu.pipeline_mode<synchronous>, transform_indices = @transform_6, window_bounds = array<i64: 1, 128>}, {transform_indices = @transform_7, window_bounds = array<i64: 128, 128>}]} {
    %c0 = arith.constant 0 : index
    %c0_0 = arith.constant 0 : index
    %0 = vector.load %arg1[%c0, %c0_0] : memref<128x128xbf16, #tpu.memory_space<vmem>>, vector<128x128xbf16>
    %c0_1 = arith.constant 0 : index
    %c0_2 = arith.constant 0 : index
    %1 = vector.load %arg2[%c0_1, %c0_2] : memref<128x64xbf16, #tpu.memory_space<vmem>>, vector<128x64xbf16>
    %c0_3 = arith.constant 0 : index
    %c0_4 = arith.constant 0 : index
    %2 = vector.load %arg3[%c0_3, %c0_4] : memref<1x64xf32, #tpu.memory_space<vmem>>, vector<1x64xf32>
    %cst = arith.constant dense<0.000000e+00> : vector<128x64xf32>
    %3 = tpu.matmul %0, %1, %cst {dimension_numbers = #tpu.dot_dimension_numbers<[1], [0], [0], [1], [0, 0, 1, 1], [], []>} : vector<128x128xbf16>, vector<128x64xbf16>, vector<128x64xf32> -> vector<128x64xf32>
    %4 = vector.broadcast %2 : vector<1x64xf32> to vector<128x64xf32>
    %5 = arith.addf %3, %4 : vector<128x64xf32>
    %cst_5 = arith.constant 0.000000e+00 : f32
    %6 = vector.broadcast %cst_5 : f32 to vector<128x64xf32>
    %7 = arith.maximumf %5, %6 : vector<128x64xf32>
    %8 = arith.truncf %7 : vector<128x64xf32> to vector<128x64xbf16>
    %c0_6 = arith.constant 0 : index
    %c0_7 = arith.constant 0 : index
    %9 = vector.load %arg4[%c0_6, %c0_7] : memref<64x64xbf16, #tpu.memory_space<vmem>>, vector<64x64xbf16>
    %c0_8 = arith.constant 0 : index
    %c0_9 = arith.constant 0 : index
    %10 = vector.load %arg5[%c0_8, %c0_9] : memref<1x64xf32, #tpu.memory_space<vmem>>, vector<1x64xf32>
    %cst_10 = arith.constant dense<0.000000e+00> : vector<128x64xf32>
    %11 = tpu.matmul %8, %9, %cst_10 {dimension_numbers = #tpu.dot_dimension_numbers<[1], [0], [0], [1], [0, 0, 1, 1], [], []>} : vector<128x64xbf16>, vector<64x64xbf16>, vector<128x64xf32> -> vector<128x64xf32>
    %12 = vector.broadcast %10 : vector<1x64xf32> to vector<128x64xf32>
    %13 = arith.addf %11, %12 : vector<128x64xf32>
    %cst_11 = arith.constant 0.000000e+00 : f32
    %14 = vector.broadcast %cst_11 : f32 to vector<128x64xf32>
    %15 = arith.maximumf %13, %14 : vector<128x64xf32>
    %16 = arith.truncf %15 : vector<128x64xf32> to vector<128x64xbf16>
    %c0_12 = arith.constant 0 : index
    %c0_13 = arith.constant 0 : index
    %17 = vector.load %arg6[%c0_12, %c0_13] : memref<64x128xbf16, #tpu.memory_space<vmem>>, vector<64x128xbf16>
    %c0_14 = arith.constant 0 : index
    %c0_15 = arith.constant 0 : index
    %18 = vector.load %arg7[%c0_14, %c0_15] : memref<1x128xf32, #tpu.memory_space<vmem>>, vector<1x128xf32>
    %cst_16 = arith.constant dense<0.000000e+00> : vector<128x128xf32>
    %19 = tpu.matmul %16, %17, %cst_16 {dimension_numbers = #tpu.dot_dimension_numbers<[1], [0], [0], [1], [0, 0, 1, 1], [], []>} : vector<128x64xbf16>, vector<64x128xbf16>, vector<128x128xf32> -> vector<128x128xf32>
    %20 = vector.broadcast %18 : vector<1x128xf32> to vector<128x128xf32>
    %21 = arith.addf %19, %20 : vector<128x128xf32>
    %cst_17 = arith.constant 0.000000e+00 : f32
    %22 = vector.broadcast %cst_17 : f32 to vector<128x128xf32>
    %23 = arith.maximumf %21, %22 : vector<128x128xf32>
    %24 = arith.truncf %23 : vector<128x128xf32> to vector<128x128xbf16>
    %c0_18 = arith.constant 0 : index
    %c0_19 = arith.constant 0 : index
    %25 = vector.load %arg8[%c0_18, %c0_19] : memref<128x128xbf16, #tpu.memory_space<vmem>>, vector<128x128xbf16>
    tpu.vector_store %arg8[%c0_18, %c0_19], %24 {strides = array<i32>} : memref<128x128xbf16, #tpu.memory_space<vmem>>, vector<128x128xbf16>,
    return
  }
  func.func @transform_0(%arg0: i32) -> (i32, i32) {
    %c0_i32 = arith.constant 0 : i32
    %c0_i32_0 = arith.constant 0 : i32
    return %arg0, %c0_i32 : i32, i32
  }
  func.func @transform_1(%arg0: i32) -> (i32, i32) {
    %c0_i32 = arith.constant 0 : i32
    %c0_i32_0 = arith.constant 0 : i32
    %c0_i32_1 = arith.constant 0 : i32
    return %c0_i32, %c0_i32_0 : i32, i32
  }
  func.func @transform_2(%arg0: i32) -> (i32, i32) {
    %c0_i32 = arith.constant 0 : i32
    %c0_i32_0 = arith.constant 0 : i32
    %c0_i32_1 = arith.constant 0 : i32
    return %c0_i32, %c0_i32_0 : i32, i32
  }
  func.func @transform_3(%arg0: i32) -> (i32, i32) {
    %c0_i32 = arith.constant 0 : i32
    %c0_i32_0 = arith.constant 0 : i32
    %c0_i32_1 = arith.constant 0 : i32
    return %c0_i32, %c0_i32_0 : i32, i32
  }
  func.func @transform_4(%arg0: i32) -> (i32, i32) {
    %c0_i32 = arith.constant 0 : i32
    %c0_i32_0 = arith.constant 0 : i32
    %c0_i32_1 = arith.constant 0 : i32
    return %c0_i32, %c0_i32_0 : i32, i32
  }
  func.func @transform_5(%arg0: i32) -> (i32, i32) {
    %c0_i32 = arith.constant 0 : i32
    %c0_i32_0 = arith.constant 0 : i32
    %c0_i32_1 = arith.constant 0 : i32
    return %c0_i32, %c0_i32_0 : i32, i32
  }
  func.func @transform_6(%arg0: i32) -> (i32, i32) {
    %c0_i32 = arith.constant 0 : i32
    %c0_i32_0 = arith.constant 0 : i32
    %c0_i32_1 = arith.constant 0 : i32
    return %c0_i32, %c0_i32_0 : i32, i32
  }
  func.func @transform_7(%arg0: i32) -> (i32, i32) {
    %c0_i32 = arith.constant 0 : i32
    %c0_i32_0 = arith.constant 0 : i32
    return %arg0, %c0_i32 : i32, i32
  }
}

module attributes {stable_mosaic.version = 11 : i64} {
  func.func @_mlp_rows_kernel(%arg0: i32, %arg1: memref<128x128xbf16, #tpu.memory_space<vmem>>, %arg2: memref<128x384xbf16, #tpu.memory_space<vmem>>, %arg3: memref<1x384xf32, #tpu.memory_space<vmem>>, %arg4: memref<384x128xbf16, #tpu.memory_space<vmem>>, %arg5: memref<1x128xf32, #tpu.memory_space<vmem>>, %arg6: memref<128x128xf32, #tpu.memory_space<vmem>>) attributes {dimension_semantics = [#tpu.dimension_semantics<parallel>], iteration_bounds = array<i64: 2>, scalar_prefetch = 0 : i64, scratch_operands = 0 : i64, tpu.core_type = #tpu.core_type<tc>, window_params = [{transform_indices = @transform_0, window_bounds = array<i64: 128, 128>}, {pipeline_mode = #tpu.pipeline_mode<synchronous>, transform_indices = @transform_1, window_bounds = array<i64: 128, 384>}, {pipeline_mode = #tpu.pipeline_mode<synchronous>, transform_indices = @transform_2, window_bounds = array<i64: 1, 384>}, {pipeline_mode = #tpu.pipeline_mode<synchronous>, transform_indices = @transform_3, window_bounds = array<i64: 384, 128>}, {pipeline_mode = #tpu.pipeline_mode<synchronous>, transform_indices = @transform_4, window_bounds = array<i64: 1, 128>}, {transform_indices = @transform_5, window_bounds = array<i64: 128, 128>}]} {
    %c0 = arith.constant 0 : index
    %c0_0 = arith.constant 0 : index
    %0 = vector.load %arg1[%c0, %c0_0] : memref<128x128xbf16, #tpu.memory_space<vmem>>, vector<128x128xbf16>
    %c0_1 = arith.constant 0 : index
    %c0_2 = arith.constant 0 : index
    %1 = vector.load %arg2[%c0_1, %c0_2] : memref<128x384xbf16, #tpu.memory_space<vmem>>, vector<128x384xbf16>
    %c0_3 = arith.constant 0 : index
    %c0_4 = arith.constant 0 : index
    %2 = vector.load %arg3[%c0_3, %c0_4] : memref<1x384xf32, #tpu.memory_space<vmem>>, vector<1x384xf32>
    %cst = arith.constant dense<0.000000e+00> : vector<128x384xf32>
    %3 = tpu.matmul %0, %1, %cst {dimension_numbers = #tpu.dot_dimension_numbers<[1], [0], [0], [1], [0, 0, 1, 1], [], []>} : vector<128x128xbf16>, vector<128x384xbf16>, vector<128x384xf32> -> vector<128x384xf32>
    %4 = vector.broadcast %2 : vector<1x384xf32> to vector<128x384xf32>
    %5 = arith.addf %3, %4 : vector<128x384xf32>
    %cst_5 = arith.constant 0.000000e+00 : f32
    %6 = vector.broadcast %cst_5 : f32 to vector<128x384xf32>
    %7 = arith.maximumf %5, %6 : vector<128x384xf32>
    %8 = arith.truncf %7 : vector<128x384xf32> to vector<128x384xbf16>
    %c0_6 = arith.constant 0 : index
    %c0_7 = arith.constant 0 : index
    %9 = vector.load %arg4[%c0_6, %c0_7] : memref<384x128xbf16, #tpu.memory_space<vmem>>, vector<384x128xbf16>
    %c0_8 = arith.constant 0 : index
    %c0_9 = arith.constant 0 : index
    %10 = vector.load %arg5[%c0_8, %c0_9] : memref<1x128xf32, #tpu.memory_space<vmem>>, vector<1x128xf32>
    %cst_10 = arith.constant dense<0.000000e+00> : vector<128x128xf32>
    %11 = tpu.matmul %8, %9, %cst_10 {dimension_numbers = #tpu.dot_dimension_numbers<[1], [0], [0], [1], [0, 0, 1, 1], [], []>} : vector<128x384xbf16>, vector<384x128xbf16>, vector<128x128xf32> -> vector<128x128xf32>
    %12 = vector.broadcast %10 : vector<1x128xf32> to vector<128x128xf32>
    %13 = arith.addf %11, %12 : vector<128x128xf32>
    %c0_11 = arith.constant 0 : index
    %c0_12 = arith.constant 0 : index
    %14 = vector.load %arg6[%c0_11, %c0_12] : memref<128x128xf32, #tpu.memory_space<vmem>>, vector<128x128xf32>
    tpu.vector_store %arg6[%c0_11, %c0_12], %13 {strides = array<i32>} : memref<128x128xf32, #tpu.memory_space<vmem>>, vector<128x128xf32>,
    return
  }
  func.func @transform_0(%arg0: i32) -> (i32, i32) {
    %c0_i32 = arith.constant 0 : i32
    %c0_i32_0 = arith.constant 0 : i32
    return %arg0, %c0_i32 : i32, i32
  }
  func.func @transform_1(%arg0: i32) -> (i32, i32) {
    %c0_i32 = arith.constant 0 : i32
    %c0_i32_0 = arith.constant 0 : i32
    %c0_i32_1 = arith.constant 0 : i32
    return %c0_i32, %c0_i32_0 : i32, i32
  }
  func.func @transform_2(%arg0: i32) -> (i32, i32) {
    %c0_i32 = arith.constant 0 : i32
    %c0_i32_0 = arith.constant 0 : i32
    %c0_i32_1 = arith.constant 0 : i32
    return %c0_i32, %c0_i32_0 : i32, i32
  }
  func.func @transform_3(%arg0: i32) -> (i32, i32) {
    %c0_i32 = arith.constant 0 : i32
    %c0_i32_0 = arith.constant 0 : i32
    %c0_i32_1 = arith.constant 0 : i32
    return %c0_i32, %c0_i32_0 : i32, i32
  }
  func.func @transform_4(%arg0: i32) -> (i32, i32) {
    %c0_i32 = arith.constant 0 : i32
    %c0_i32_0 = arith.constant 0 : i32
    %c0_i32_1 = arith.constant 0 : i32
    return %c0_i32, %c0_i32_0 : i32, i32
  }
  func.func @transform_5(%arg0: i32) -> (i32, i32) {
    %c0_i32 = arith.constant 0 : i32
    %c0_i32_0 = arith.constant 0 : i32
    return %arg0, %c0_i32 : i32, i32
  }
}

</mosaic_0001>

<bundles_post_ra>
// kernel: _lambda_.9
= control target key start
LH: loop header
LB: loop body
LE: loop exit
PB: predicated region body
PF: predicated region fallthrough
CT: control target
= control target key end

     0   :  { %s4128_s24 = smov 0   ;;  %s4130_s25 = smov 0   ;;  %s4832_s0 = inlined_call_operand.vmem [shape: bf16[128,8,8], index: 0, kind: input, shape index: {}]   ;;  %s4833_s1 = inlined_call_operand.vmem [shape: bf16[8,32], index: 1, kind: input, shape index: {}]   ;;  %s4834_s2 = inlined_call_operand.vmem [shape: f32[1,32], index: 2, kind: input, shape index: {}]   ;;  %s4835_s3 = inlined_call_operand.vmem [shape: bf16[32,32], index: 3, kind: input, shape index: {}]   ;;  %s4836_s4 = inlined_call_operand.vmem [shape: f32[1,32], index: 4, kind: input, shape index: {}]   ;;  %s4837_s5 = inlined_call_operand.vmem [shape: bf16[32,64], index: 5, kind: input, shape index: {}]   ;;  %s4838_s6 = inlined_call_operand.vmem [shape: f32[1,64], index: 6, kind: input, shape index: {}]   ;;  %s4839_s7 = inlined_call_operand.vmem [shape: bf16[128,64], index: 7, kind: output, shape index: {}]  }
   0x1   :  { %s4132_s26 = smov 0  }
   0x2 LB: > { %s29_s27 = sadd.s32 1, %s4082_s25  ;;  %p3298_p0 = scmp.ge.s32.totalorder %s4086_s26, 1  ;;  %s4086_s26 = sphi %s4132_s26, %s17_s26   ;;  %s4082_s25 = sphi %s4130_s25, %s4842_s25   ;;  %s4078_s24 = sphi %s4128_s24, %s4841_s24  }
   0x3   : > { %p31_p1 = scmp.ge.s32.totalorder %s29_s27, 2  ;;  %p255_p2 = scmp.lt.s32.totalorder %s4086_s26, 3 }
   0x5   : > { %s4844_s27 = smov (%p31_p1, %s29_s27), 0  ;;  %p256_p3 = pnand %p3298_p0, %p255_p2 }
   0x6   : > { %s3299_s30 = sshll.u32 (!%p256_p3), %s4078_s24, 6 }
   0x7   : > { %259 = sbr.rel (%p256_p3) target bundleno = 833 (0x341), region = 48  ;;  %p291_p4 = scmp.lt.s32.totalorder (!%p256_p3), %s3299_s30, 127 }
   0xc   : > { %v370_v0 = vld [vmem:[%s4833_s1] sm:$0xf]  ;;  %vm635_vm0 = vcmask 1043456   ;;  %v4059_v1 = vld [vmem:[%s4835_s3 + $0x8] sm:$0xff]   ;;  %s4846_s30 = smov (!%p291_p4, %s3299_s30), 127  ;;  %vm538_vm1 = vcmask 64512  }
   0xd   : > { %4001 = vmatprep.subr.msk.bf16.mxu0 %vm635_vm0, %v370_v0  ;;  %v637_v2 = vsel %vm635_vm0, %v370_v0, 0  ;;  %4002 = vmatprep.subr.msk.bf16.mxu1 %vm635_vm0, %v370_v0  ;;  %s3300_s10 = sshll.u32 %s4846_s30, 2  ;;  %v4060_v11 = vld [vmem:[%s4835_s3] sm:$0xff]   ;;  %v4061_v44 = vld [vmem:[%s4837_s5 + $0x8] sm:$0xff]   ;;  %vm1047_vm2 = vcmask 261120   ;;  %vm2001_vm3 = vcmask 523264  }
   0xe   : > { %3798 = vmatpush3.bf16.msra.mxu0 %v637_v2  ;;  %4000 = vmatpush3.bf16.msra.mxu1 %v637_v2  ;;  %s4158_s13 = scalar_lea.vmem %s4832_s0, %s3300_s10  ;;  %v4230_v38 = vld [vmem:[%s4834_s2] ss:$0 sm:$0xff]  ;;  %vm2774_vm4 = vcmask 1041409   ;;  %vm2776_vm5 = vcmask 1042434   ;;  %vm2778_vm6 = vcmask 1043459   ;;  %vm2780_vm7 = vcmask 1044484  }
   0xf   : > { %3863 = vmatprep.subr.bf16.mxu1 %v4059_v1  ;;  %v4027_v3 = vld [vmem:[%s4158_s13] sm:$0xff]   ;;  %v4028_v4 = vld [vmem:[%s4158_s13 + $0x8] sm:$0xff]   ;;  %v4029_v5 = vld [vmem:[%s4158_s13 + $0x10] sm:$0xff]   ;;  %3931 = vmatprep.subr.bf16.mxu0 %v4061_v44  ;;  %s3301_s30 = sshll.u32 %s4078_s24, 3  ;;  %vm2782_vm8 = vcmask 1045509   ;;  %vm2784_vm9 = vcmask 1046534  }
  0x10   : > { %3799 = vmatprep.mubr.msk.bf16.mxu0 %vm538_vm1, %v4027_v3  ;;  %v4030_v6 = vld [vmem:[%s4158_s13 + $0x18] sm:$0xff]   ;;  %v4031_v7 = vld [vmem:[%s4158_s13 + $0x20] sm:$0xff]   ;;  %v4032_v8 = vld [vmem:[%s4158_s13 + $0x28] sm:$0xff]   ;;  %p4526_p5 = scmp.lt.s32.totalorder %s3301_s30, 15  ;;  %vm2786_vm10 = vcmask 1047559   ;;  %vm2853_vm11 = vcmask 519168  }
  0x11   : > { %3800 = vmatmul.mubr.msk.bf16.vlgmr.msra.gmra.mxu0 %vm538_vm1, %v4028_v4  ;;  %v4033_v9 = vld [vmem:[%s4158_s13 + $0x30] sm:$0xff]   ;;  %v4043_v10 = vld [vmem:[%s4158_s13 + $0x80] sm:$0xff]   ;;  %v4044_v12 = vld [vmem:[%s4158_s13 + $0x88] sm:$0xff]  }
  0x12   : > { %3803 = vmatprep.mubr.msk.bf16.mxu0 %vm538_vm1, %v4029_v5  ;;  %3831 = vmatprep.mubr.msk.bf16.mxu1 %vm538_vm1, %v4043_v10  ;;  %v4045_v13 = vld [vmem:[%s4158_s13 + $0x90] sm:$0xff]   ;;  %v4034_v14 = vld [vmem:[%s4158_s13 + $0x38] sm:$0xff]   ;;  %v4035_v15 = vld [vmem:[%s4158_s13 + $0x40] sm:$0xff]   ;;  %s4848_s30 = smov (!%p4526_p5, %s3301_s30), 15 }
  0x13   : > { %3832 = vmatmul.mubr.msk.bf16.vlgmr.msra.gmra.mxu1 %vm538_vm1, %v4044_v12  ;;  %v4046_v16 = vld [vmem:[%s4158_s13 + $0x98] sm:$0xff]   ;;  %v4047_v17 = vld [vmem:[%s4158_s13 + $0xa0] sm:$0xff]   ;;  %v4036_v18 = vld [vmem:[%s4158_s13 + $0x48] sm:$0xff]   ;;  %3932 = vmatpush3.bf16.msra.mxu0 %v4061_v44  ;;  %s3302_s24 = sshll.u32 %s4848_s30, 2 }
  0x14   : > { %3835 = vmatprep.mubr.msk.bf16.mxu1 %vm538_vm1, %v4045_v13  ;;  %3864 = vmatpush3.bf16.msra.mxu1 %v4059_v1  ;;  %v4048_v19 = vld [vmem:[%s4158_s13 + $0xa8] sm:$0xff]   ;;  %v4037_v20 = vld [vmem:[%s4158_s13 + $0x50] sm:$0xff]   ;;  %v4038_v22 = vld [vmem:[%s4158_s13 + $0x58] sm:$0xff]   ;;  %s4556_s11 = scalar_lea.vmem %s4839_s7, %s3302_s24 }
  0x15   : > { %3865 = vmatprep.subr.bf16.mxu1 %v4060_v11  ;;  %v4049_v21 = vld [vmem:[%s4158_s13 + $0xb0] sm:$0xff]   ;;  %v4050_v23 = vld [vmem:[%s4158_s13 + $0xb8] sm:$0xff]   ;;  %v4039_v24 = vld [vmem:[%s4158_s13 + $0x60] sm:$0xff]  }
  0x16   : > { %v4051_v25 = vld [vmem:[%s4158_s13 + $0xc0] sm:$0xff]   ;;  %v4040_v26 = vld [vmem:[%s4158_s13 + $0x68] sm:$0xff]   ;;  %v4041_v28 = vld [vmem:[%s4158_s13 + $0x70] sm:$0xff]  }
  0x17   : > { %v4052_v27 = vld [vmem:[%s4158_s13 + $0xc8] sm:$0xff]   ;;  %v4053_v29 = vld [vmem:[%s4158_s13 + $0xd0] sm:$0xff]   ;;  %v4042_v30 = vld [vmem:[%s4158_s13 + $0x78] sm:$0xff]  }
  0x18   : > { %3866 = vmatpush3.bf16.msra.mxu1 %v4060_v11  ;;  %v4054_v31 = vld [vmem:[%s4158_s13 + $0xd8] sm:$0xff]   ;;  %v4055_v32 = vld [vmem:[%s4158_s13 + $0xe0] sm:$0xff]   ;;  %v4056_v33 = vld [vmem:[%s4158_s13 + $0xe8] sm:$0xff]  }
  0x19   : > { %3804 = vmatmul.mubr.msk.bf16.gmra.mxu0 %vm538_vm1, %v4030_v6  ;;  %v4057_v34 = vld [vmem:[%s4158_s13 + $0xf0] sm:$0xff]   ;;  %v4058_v35 = vld [vmem:[%s4158_s13 + $0xf8] sm:$0xff]   ;;  %v4062_v45 = vld [vmem:[%s4837_s5] sm:$0xff]  }
  0x1a   : > { %3807 = vmatprep.mubr.msk.bf16.mxu0 %vm538_vm1, %v4031_v7  ;;  %3933 = vmatprep.subr.bf16.mxu0 %v4062_v45 }
  0x1b   : > { %3836 = vmatmul.mubr.msk.bf16.gmra.mxu1 %vm538_vm1, %v4046_v16  ;;  %3934 = vmatpush3.bf16.msra.mxu0 %v4062_v45 }
  0x1c   : > { %3839 = vmatprep.mubr.msk.bf16.mxu1 %vm538_vm1, %v4047_v17 }
  0x21   : > { %3808 = vmatmul.mubr.msk.bf16.gmra.mxu0 %vm538_vm1, %v4032_v8 }
  0x22   : > { %3811 = vmatprep.mubr.msk.bf16.mxu0 %vm538_vm1, %v4033_v9 }
  0x23   : > { %3840 = vmatmul.mubr.msk.bf16.gmra.mxu1 %vm538_vm1, %v4048_v19 }
  0x24   : > { %3843 = vmatprep.mubr.msk.bf16.mxu1 %vm538_vm1, %v4049_v21 }
  0x29   : > { %3812 = vmatmul.mubr.msk.bf16.gmra.mxu0 %vm538_vm1, %v4034_v14 }
  0x2a   : > { %3815 = vmatprep.mubr.msk.bf16.mxu0 %vm538_vm1, %v4035_v15 }
  0x2b   : > { %3844 = vmatmul.mubr.msk.bf16.gmra.mxu1 %vm538_vm1, %v4050_v23 }
  0x2c   : > { %3847 = vmatprep.mubr.msk.bf16.mxu1 %vm538_vm1, %v4051_v25 }
  0x31   : > { %3816 = vmatmul.mubr.msk.bf16.gmra.mxu0 %vm538_vm1, %v4036_v18 }
  0x32   : > { %3819 = vmatprep.mubr.msk.bf16.mxu0 %vm538_vm1, %v4037_v20 }
  0x33   : > { %3848 = vmatmul.mubr.msk.bf16.gmra.mxu1 %vm538_vm1, %v4052_v27 }
  0x34   : > { %3851 = vmatprep.mubr.msk.bf16.mxu1 %vm538_vm1, %v4053_v29 }
  0x39   : > { %3820 = vmatmul.mubr.msk.bf16.gmra.mxu0 %vm538_vm1, %v4038_v22 }
  0x3a   : > { %3823 = vmatprep.mubr.msk.bf16.mxu0 %vm538_vm1, %v4039_v24 }
  0x3b   : > { %3852 = vmatmul.mubr.msk.bf16.gmra.mxu1 %vm538_vm1, %v4054_v31 }
  0x3c   : > { %3855 = vmatprep.mubr.msk.bf16.mxu1 %vm538_vm1, %v4055_v32 }
  0x41   : > { %3824 = vmatmul.mubr.msk.bf16.gmra.mxu0 %vm538_vm1, %v4040_v26 }
  0x42   : > { %3827 = vmatprep.mubr.msk.bf16.mxu0 %vm538_vm1, %v4041_v28 }
  0x43   : > { %3856 = vmatmul.mubr.msk.bf16.gmra.mxu1 %vm538_vm1, %v4056_v33 }
  0x44   : > { %3859 = vmatprep.mubr.msk.bf16.mxu1 %vm538_vm1, %v4057_v34 }
  0x49   : > { %3828 = vmatmul.mubr.msk.bf16.gmra.mxu0 %vm538_vm1, %v4042_v30 }
  0x4b   : > { %3860 = vmatmul.mubr.msk.bf16.gmra.mxu1 %vm538_vm1, %v4058_v35 }
  0xd1   : > { %v3801_v36 = vpop.f32.mrf.mxu0 }
  0xd2   : > { %v682_v42 = vadd.f32 %v3801_v36, %v4230_v38 }
  0xd3   : > { %v673_v37 = vpop.f32.mrf.mxu0  ;;  %v4248_v63 = vpop.f32.mrf.mxu1 }
  0xd4   : > { %v674_v40 = vadd.f32 %v4230_v38, %v673_v37  ;;  %v930_v51 = vmax.f32 %v682_v42, 0.0 }
  0xd5   : > { %v3802_v39 = vpop.f32.mrf.mxu0  ;;  %v4250_v4 = vpop.f32.mrf.mxu1 }
  0xd6   : > { %v685_v41 = vadd.f32 %v3802_v39, %v4230_v38  ;;  %v928_v49 = vmax.f32 %v674_v40, 0.0 }
  0xd7   : > { %v676_v43 = vpop.f32.mrf.mxu0  ;;  %v4252_v8 = vpop.f32.mrf.mxu1 }
  0xd8   : > { %v677_v46 = vadd.f32 %v4230_v38, %v676_v43  ;;  %v931_v47 = vmax.f32 %v685_v41, 0.0 }
  0xd9   : > { %v3805_v48 = vpop.f32.mrf.mxu0  ;;  %v4259_v13 = vpop.f32.mrf.mxu1 }
  0xda   : > { %v929_v50 = vmax.f32 %v677_v46, 0.0  ;;  %v993_v54 = vpack.c.bf16 %v931_v47, %v930_v51  ;;  %v698_v58 = vadd.f32 %v3805_v48, %v4230_v38 }
  0xdb   : > { %v689_v52 = vpop.f32.mrf.mxu0  ;;  %v4262_v17 = vpop.f32.mrf.mxu1 }
  0xdc   : > { %v992_v53 = vpack.c.bf16 %v929_v50, %v928_v49  ;;  %v690_v56 = vadd.f32 %v4230_v38, %v689_v52  ;;  %v934_v2 = vmax.f32 %v698_v58, 0.0 }
  0xdd   : > { %v3806_v55 = vpop.f32.mrf.mxu0  ;;  %v4264_v22 = vpop.f32.mrf.mxu1 }
  0xde   : > { %v701_v57 = vadd.f32 %v3806_v55, %v4230_v38  ;;  %3867 = vmatprep.mubr.msk.bf16.mxu1 %vm1047_vm2, %v992_v53  ;;  %v932_v0 = vmax.f32 %v690_v56, 0.0 }
  0xdf   : > { %v692_v59 = vpop.f32.mrf.mxu0  ;;  %3868 = vmatmul.mubr.msk.bf16.vlgmr.msra.gmra.mxu1 %vm1047_vm2, %v993_v54  ;;  %v4266_v26 = vpop.f32.mrf.mxu1 }
  0xe0   : > { %v693_v60 = vadd.f32 %v4230_v38, %v692_v59  ;;  %v935_v61 = vmax.f32 %v701_v57, 0.0 }
  0xe1   : > { %v3809_v62 = vpop.f32.mrf.mxu0  ;;  %v4273_v31 = vpop.f32.mrf.mxu1 }
  0xe2   : > { %v933_v1 = vmax.f32 %v693_v60, 0.0  ;;  %v995_v6 = vpack.c.bf16 %v935_v61, %v934_v2  ;;  %v714_v11 = vadd.f32 %v3809_v62, %v4230_v38 }
  0xe3   : > { %v705_v3 = vpop.f32.mrf.mxu0  ;;  %v4276_v35 = vpop.f32.mrf.mxu1 }
  0xe4   : > { %v994_v5 = vpack.c.bf16 %v933_v1, %v932_v0  ;;  %v706_v9 = vadd.f32 %v4230_v38, %v705_v3  ;;  %v938_v20 = vmax.f32 %v714_v11, 0.0 }
  0xe5   : > { %v3810_v7 = vpop.f32.mrf.mxu0  ;;  %v4278_v41 = vpop.f32.mrf.mxu1 }
  0xe6   : > { %v717_v10 = vadd.f32 %v3810_v7, %v4230_v38  ;;  %3871 = vmatprep.mubr.msk.bf16.mxu1 %vm1047_vm2, %v994_v5  ;;  %v936_v18 = vmax.f32 %v706_v9, 0.0 }
  0xe7   : > { %v708_v12 = vpop.f32.mrf.mxu0  ;;  %3872 = vmatmul.mubr.msk.bf16.gmra.mxu1 %vm1047_vm2, %v995_v6  ;;  %v4280_v45 = vpop.f32.mrf.mxu1 }
  0xe8   : > { %v709_v14 = vadd.f32 %v4230_v38, %v708_v12  ;;  %v939_v15 = vmax.f32 %v717_v10, 0.0 }
  0xe9   : > { %v3813_v16 = vpop.f32.mrf.mxu0  ;;  %v4287_v50 = vpop.f32.mrf.mxu1 }
  0xea   : > { %v937_v19 = vmax.f32 %v709_v14, 0.0  ;;  %v997_v24 = vpack.c.bf16 %v939_v15, %v938_v20  ;;  %v730_v29 = vadd.f32 %v3813_v16, %v4230_v38 }
  0xeb   : > { %v721_v21 = vpop.f32.mrf.mxu0  ;;  %v4290_v54 = vpop.f32.mrf.mxu1 }
  0xec   : > { %v996_v23 = vpack.c.bf16 %v937_v19, %v936_v18  ;;  %v722_v27 = vadd.f32 %v4230_v38, %v721_v21  ;;  %v942_v39 = vmax.f32 %v730_v29, 0.0 }
  0xed   : > { %v3814_v25 = vpop.f32.mrf.mxu0  ;;  %v4292_v59 = vpop.f32.mrf.mxu1 }
  0xee   : > { %v733_v28 = vadd.f32 %v3814_v25, %v4230_v38  ;;  %3875 = vmatprep.mubr.msk.bf16.mxu1 %vm1047_vm2, %v996_v23  ;;  %v940_v36 = vmax.f32 %v722_v27, 0.0 }
  0xef   : > { %v724_v30 = vpop.f32.mrf.mxu0  ;;  %3876 = vmatmul.mubr.msk.bf16.gmra.mxu1 %vm1047_vm2, %v997_v24  ;;  %v4294_v0 = vpop.f32.mrf.mxu1 }
  0xf0   : > { %v725_v32 = vadd.f32 %v4230_v38, %v724_v30  ;;  %v943_v33 = vmax.f32 %v733_v28, 0.0 }
  0xf1   : > { %v3817_v34 = vpop.f32.mrf.mxu0  ;;  %v4302_v10 = vpop.f32.mrf.mxu1 }
  0xf2   : > { %v941_v37 = vmax.f32 %v725_v32, 0.0  ;;  %v999_v43 = vpack.c.bf16 %v943_v33, %v942_v39  ;;  %v746_v48 = vadd.f32 %v3817_v34, %v4230_v38  ;;  %v802_v39 = vadd.f32 %v4230_v38, %v4250_v4 }
  0xf3   : > { %v737_v40 = vpop.f32.mrf.mxu0  ;;  %v4304_v20 = vpop.f32.mrf.mxu1 }
  0xf4   : > { %v998_v42 = vpack.c.bf16 %v941_v37, %v940_v36  ;;  %v738_v46 = vadd.f32 %v4230_v38, %v737_v40  ;;  %v946_v57 = vmax.f32 %v746_v48, 0.0  ;;  %v805_v40 = vadd.f32 %v4230_v38, %v4259_v13 }
  0xf5   : > { %v3818_v44 = vpop.f32.mrf.mxu0  ;;  %v4312_v30 = vpop.f32.mrf.mxu1 }
  0xf6   : > { %v749_v47 = vadd.f32 %v3818_v44, %v4230_v38  ;;  %3879 = vmatprep.mubr.msk.bf16.mxu1 %vm1047_vm2, %v998_v42  ;;  %v944_v55 = vmax.f32 %v738_v46, 0.0 }
  0xf7   : > { %v740_v49 = vpop.f32.mrf.mxu0  ;;  %3880 = vmatmul.mubr.msk.bf16.gmra.mxu1 %vm1047_vm2, %v999_v43  ;;  %v4318_v44 = vpop.f32.mrf.mxu1 }
  0xf8   : > { %v741_v51 = vadd.f32 %v4230_v38, %v740_v49  ;;  %v947_v52 = vmax.f32 %v749_v47, 0.0 }
  0xf9   : > { %v3821_v53 = vpop.f32.mrf.mxu0 }
  0xfa   : > { %v945_v56 = vmax.f32 %v741_v51, 0.0  ;;  %v1001_v61 = vpack.c.bf16 %v947_v52, %v946_v57  ;;  %v762_v3 = vadd.f32 %v3821_v53, %v4230_v38  ;;  %v960_v51 = vmax.f32 %v802_v39, 0.0  ;;  %v868_v53 = vpop.f32.mrf.mxu1 }
  0xfb   : > { %v753_v58 = vpop.f32.mrf.mxu0  ;;  %v961_v52 = vmax.f32 %v805_v40, 0.0  ;;  %v861_v39 = vadd.f32 %v4294_v0, %v4230_v38  ;;  %v877_v0 = vadd.f32 %v4318_v44, %v4230_v38 }
  0xfc   : > { %v1000_v60 = vpack.c.bf16 %v945_v56, %v944_v55  ;;  %v754_v1 = vadd.f32 %v4230_v38, %v753_v58  ;;  %v950_v14 = vmax.f32 %v762_v3, 0.0  ;;  %v813_v3 = vadd.f32 %v4252_v8, %v4230_v38 }
  0xfd   : > { %v3822_v62 = vpop.f32.mrf.mxu0  ;;  %v837_v8 = vadd.f32 %v4230_v38, %v4287_v50  ;;  %v850_v50 = vadd.f32 %v4230_v38, %v4292_v59 }
  0xfe   : > { %v765_v2 = vadd.f32 %v3822_v62, %v4230_v38  ;;  %3883 = vmatprep.mubr.msk.bf16.mxu1 %vm1047_vm2, %v1000_v60  ;;  %v948_v11 = vmax.f32 %v754_v1, 0.0  ;;  %v1008_v60 = vpack.c.bf16 %v961_v52, %v960_v51  ;;  %v821_v62 = vadd.f32 %v4230_v38, %v4273_v31 }
  0xff   : > { %v756_v5 = vpop.f32.mrf.mxu0  ;;  %3884 = vmatmul.mubr.msk.bf16.gmra.mxu1 %vm1047_vm2, %v1001_v61  ;;  %v818_v61 = vadd.f32 %v4230_v38, %v4264_v22  ;;  %v810_v1 = vadd.f32 %v4248_v63, %v4230_v38  ;;  %v834_v63 = vadd.f32 %v4230_v38, %v4278_v41 }
 0x100   : > { %v757_v6 = vadd.f32 %v4230_v38, %v756_v5  ;;  %v951_v7 = vmax.f32 %v765_v2, 0.0  ;;  %v4334_v5 = vpop.f32.mrf.mxu1  ;;  %v965_v22 = vmax.f32 %v821_v62, 0.0 }
 0x101   : > { %v3825_v9 = vpop.f32.mrf.mxu0 }
 0x102   : > { %v949_v12 = vmax.f32 %v757_v6, 0.0  ;;  %v1003_v18 = vpack.c.bf16 %v951_v7, %v950_v14  ;;  %v778_v24 = vadd.f32 %v3825_v9, %v4230_v38  ;;  %v964_v6 = vmax.f32 %v818_v61, 0.0  ;;  %v881_v31 = vpop.f32.mrf.mxu1 }
 0x103   : > { %v769_v15 = vpop.f32.mrf.mxu0  ;;  %v962_v7 = vmax.f32 %v810_v1, 0.0  ;;  %v963_v9 = vmax.f32 %v813_v3, 0.0  ;;  %v826_v14 = vadd.f32 %v4262_v17, %v4230_v38  ;;  %v853_v17 = vadd.f32 %v4230_v38, %v4302_v10 }
 0x104   : > { %v1002_v16 = vpack.c.bf16 %v949_v12, %v948_v11  ;;  %v770_v21 = vadd.f32 %v4230_v38, %v769_v15  ;;  %v954_v34 = vmax.f32 %v778_v24, 0.0  ;;  %v1010_v11 = vpack.c.bf16 %v965_v22, %v964_v6 }
 0x105   : > { %v3826_v19 = vpop.f32.mrf.mxu0  ;;  %v1009_v12 = vpack.c.bf16 %v963_v9, %v962_v7  ;;  %v829_v15 = vadd.f32 %v4266_v26, %v4230_v38  ;;  %v842_v26 = vadd.f32 %v4276_v35, %v4230_v38  ;;  %v866_v10 = vadd.f32 %v4230_v38, %v4312_v30 }
 0x106   : > { %v781_v23 = vadd.f32 %v3826_v19, %v4230_v38  ;;  %3887 = vmatprep.mubr.msk.bf16.mxu1 %vm1047_vm2, %v1002_v16  ;;  %v952_v32 = vmax.f32 %v770_v21, 0.0  ;;  %v3854_v16 = vpop.f32.mrf.mxu1  ;;  %v969_v19 = vmax.f32 %v837_v8, 0.0  ;;  %v966_v21 = vmax.f32 %v826_v14, 0.0 }
 0x107   : > { %v772_v25 = vpop.f32.mrf.mxu0  ;;  %3888 = vmatmul.mubr.msk.bf16.gmra.mxu1 %vm1047_vm2, %v1003_v18  ;;  %v968_v18 = vmax.f32 %v834_v63, 0.0  ;;  %v893_v44 = vadd.f32 %v3854_v16, %v4230_v38 }
 0x108   : > { %v773_v27 = vadd.f32 %v4230_v38, %v772_v25  ;;  %v955_v28 = vmax.f32 %v781_v23, 0.0  ;;  %v967_v23 = vmax.f32 %v829_v15, 0.0  ;;  %v884_v41 = vpop.f32.mrf.mxu1 }
 0x109   : > { %v3829_v29 = vpop.f32.mrf.mxu0  ;;  %v1012_v24 = vpack.c.bf16 %v969_v19, %v968_v18  ;;  %v885_v51 = vadd.f32 %v4230_v38, %v884_v41  ;;  %v983_v22 = vmax.f32 %v893_v44, 0.0 }
 0x10a   : > { %v953_v33 = vmax.f32 %v773_v27, 0.0  ;;  %v1005_v42 = vpack.c.bf16 %v955_v28, %v954_v34  ;;  %v794_v48 = vadd.f32 %v3829_v29, %v4230_v38  ;;  %v1011_v25 = vpack.c.bf16 %v967_v23, %v966_v21  ;;  %v3857_v28 = vpop.f32.mrf.mxu1 }
 0x10b   : > { %v785_v36 = vpop.f32.mrf.mxu0  ;;  %v845_v27 = vadd.f32 %v4280_v45, %v4230_v38  ;;  %v972_v29 = vmax.f32 %v850_v50, 0.0  ;;  %v858_v45 = vadd.f32 %v4290_v54, %v4230_v38  ;;  %v874_v54 = vadd.f32 %v4304_v20, %v4230_v38 }
 0x10c   : > { %v1004_v37 = vpack.c.bf16 %v953_v33, %v952_v32  ;;  %v786_v46 = vadd.f32 %v4230_v38, %v785_v36  ;;  %v958_v57 = vmax.f32 %v794_v48, 0.0  ;;  %v973_v32 = vmax.f32 %v853_v17, 0.0  ;;  %v897_v59 = vpop.f32.mrf.mxu1 }
 0x10d   : > { %v3830_v43 = vpop.f32.mrf.mxu0  ;;  %v970_v33 = vmax.f32 %v842_v26, 0.0  ;;  %v971_v34 = vmax.f32 %v845_v27, 0.0  ;;  %v890_v20 = vadd.f32 %v4334_v5, %v4230_v38  ;;  %v906_v5 = vadd.f32 %v3857_v28, %v4230_v38  ;;  %v4397_v26 = vld [vmem:[%s4836_s4] ss:$0 sm:$0xff] }
 0x10e   : > { %v797_v47 = vadd.f32 %v3830_v43, %v4230_v38  ;;  %3891 = vmatprep.mubr.msk.bf16.mxu1 %vm1047_vm2, %v1004_v37  ;;  %v956_v55 = vmax.f32 %v786_v46, 0.0  ;;  %v1014_v36 = vpack.c.bf16 %v973_v32, %v972_v29  ;;  %v869_v37 = vadd.f32 %v4230_v38, %v868_v53  ;;  %v3858_v40 = vpop.f32.mrf.mxu1 }
 0x10f   : > { %v788_v49 = vpop.f32.mrf.mxu0  ;;  %3892 = vmatmul.mubr.msk.bf16.gmra.mxu1 %vm1047_vm2, %v1005_v42  ;;  %v1013_v35 = vpack.c.bf16 %v971_v34, %v970_v33  ;;  %v976_v42 = vmax.f32 %v866_v10, 0.0  ;;  %v974_v46 = vmax.f32 %v858_v45, 0.0  ;;  %v981_v53 = vmax.f32 %v885_v51, 0.0 }
 0x110   : > { %v789_v4 = vadd.f32 %v4230_v38, %v788_v49  ;;  %v959_v13 = vmax.f32 %v797_v47, 0.0  ;;  %v977_v43 = vmax.f32 %v869_v37, 0.0  ;;  %v975_v47 = vmax.f32 %v861_v39, 0.0  ;;  %v900_v48 = vpop.f32.mrf.mxu1 }
 0x111   : > { %v882_v49 = vadd.f32 %v4230_v38, %v881_v31  ;;  %v901_v61 = vadd.f32 %v4230_v38, %v900_v48  ;;  %v982_v6 = vmax.f32 %v890_v20, 0.0  ;;  %v909_v8 = vadd.f32 %v3858_v40, %v4230_v38 }
 0x112   : > { %v957_v56 = vmax.f32 %v789_v4, 0.0  ;;  %v1007_v2 = vpack.c.bf16 %v959_v13, %v958_v57  ;;  %v1016_v30 = vpack.c.bf16 %v977_v43, %v976_v42  ;;  %v1015_v4 = vpack.c.bf16 %v975_v47, %v974_v46  ;;  %v3861_v52 = vpop.f32.mrf.mxu1 }
 0x113   : > { %v980_v13 = vmax.f32 %v882_v49, 0.0  ;;  %v985_v3 = vmax.f32 %v901_v61, 0.0  ;;  %v1019_v63 = vpack.c.bf16 %v983_v22, %v982_v6  ;;  %v986_v15 = vmax.f32 %v906_v5, 0.0 }
 0x114   : > { %v1006_v58 = vpack.c.bf16 %v957_v56, %v956_v55  ;;  %v978_v55 = vmax.f32 %v874_v54, 0.0  ;;  %v979_v56 = vmax.f32 %v877_v0, 0.0  ;;  %v913_v57 = vpop.f32.mrf.mxu1  ;;  %v987_v16 = vmax.f32 %v909_v8, 0.0 }
 0x115   : > { %v914_v31 = vadd.f32 %v4230_v38, %v913_v57  ;;  %v922_v21 = vadd.f32 %v3861_v52, %v4230_v38 }
 0x116   : > { %3895 = vmatprep.mubr.msk.bf16.mxu1 %vm1047_vm2, %v1006_v58  ;;  %v1018_v58 = vpack.c.bf16 %v981_v53, %v980_v13  ;;  %v1017_v62 = vpack.c.bf16 %v979_v56, %v978_v55  ;;  %v3862_v1 = vpop.f32.mrf.mxu1  ;;  %v1021_v19 = vpack.c.bf16 %v987_v16, %v986_v15 }
 0x117   : > { %3896 = vmatmul.mubr.msk.bf16.gmra.mxu1 %vm1047_vm2, %v1007_v2  ;;  %v925_v23 = vadd.f32 %v3862_v1, %v4230_v38  ;;  %v990_v41 = vmax.f32 %v922_v21, 0.0 }
 0x118   : > { %3899 = vmatprep.mubr.msk.bf16.mxu1 %vm1047_vm2, %v1008_v60  ;;  %v898_v60 = vadd.f32 %v4230_v38, %v897_v59  ;;  %v916_v7 = vpop.f32.mrf.mxu1 }
 0x11a   : > { %v984_v2 = vmax.f32 %v898_v60, 0.0 }
 0x11c   : > { %v1020_v9 = vpack.c.bf16 %v985_v3, %v984_v2 }
 0x11f   : > { %3900 = vmatmul.mubr.msk.bf16.gmra.mxu1 %vm1047_vm2, %v1009_v12  ;;  %v988_v12 = vmax.f32 %v914_v31, 0.0 }
 0x120   : > { %3903 = vmatprep.mubr.msk.bf16.mxu1 %vm1047_vm2, %v1010_v11  ;;  %v917_v11 = vadd.f32 %v4230_v38, %v916_v7 }
 0x122   : > { %v989_v14 = vmax.f32 %v917_v11, 0.0 }
 0x124   : > { %v1022_v18 = vpack.c.bf16 %v989_v14, %v988_v12 }
 0x127   : > { %3904 = vmatmul.mubr.msk.bf16.gmra.mxu1 %vm1047_vm2, %v1011_v25 }
 0x128   : > { %3907 = vmatprep.mubr.msk.bf16.mxu1 %vm1047_vm2, %v1012_v24  ;;  %v991_v24 = vmax.f32 %v925_v23, 0.0 }
 0x12a   : > { %v1023_v50 = vpack.c.bf16 %v991_v24, %v990_v41 }
 0x12f   : > { %3908 = vmatmul.mubr.msk.bf16.gmra.mxu1 %vm1047_vm2, %v1013_v35 }
 0x130   : > { %3911 = vmatprep.mubr.msk.bf16.mxu1 %vm1047_vm2, %v1014_v36 }
 0x137   : > { %3912 = vmatmul.mubr.msk.bf16.gmra.mxu1 %vm1047_vm2, %v1015_v4 }
 0x138   : > { %3915 = vmatprep.mubr.msk.bf16.mxu1 %vm1047_vm2, %v1016_v30 }
 0x13f   : > { %3916 = vmatmul.mubr.msk.bf16.gmra.mxu1 %vm1047_vm2, %v1017_v62 }
 0x140   : > { %3919 = vmatprep.mubr.msk.bf16.mxu1 %vm1047_vm2, %v1018_v58 }
 0x147   : > { %3920 = vmatmul.mubr.msk.bf16.gmra.mxu1 %vm1047_vm2, %v1019_v63 }
 0x148   : > { %3923 = vmatprep.mubr.msk.bf16.mxu1 %vm1047_vm2, %v1020_v9 }
 0x14f   : > { %3924 = vmatmul.mubr.msk.bf16.gmra.mxu1 %vm1047_vm2, %v1021_v19 }
 0x150   : > { %3927 = vmatprep.mubr.msk.bf16.mxu1 %vm1047_vm2, %v1022_v18 }
 0x157   : > { %3928 = vmatmul.mubr.msk.bf16.gmra.mxu1 %vm1047_vm2, %v1023_v50 }
 0x19f   : > { %v3869_v17 = vpop.f32.mrf.mxu1 }
 0x1a0   : > { %v1187_v29 = vadd.f32 %v3869_v17, %v4397_v26 }
 0x1a1   : > { %v1178_v25 = vpop.f32.mrf.mxu1 }
 0x1a2   : > { %v1179_v28 = vadd.f32 %v4397_v26, %v1178_v25  ;;  %v1435_v37 = vmax.f32 %v1187_v29, 0.0 }
 0x1a3   : > { %v3870_v27 = vpop.f32.mrf.mxu1 }
 0x1a4   : > { %v1190_v38 = vadd.f32 %v3870_v27, %v4397_v26  ;;  %v1433_v36 = vmax.f32 %v1179_v28, 0.0 }
 0x1a5   : > { %v1181_v32 = vpop.f32.mrf.mxu1 }
 0x1a6   : > { %v1182_v33 = vadd.f32 %v4397_v26, %v1181_v32  ;;  %v1436_v34 = vmax.f32 %v1190_v38, 0.0 }
 0x1a7   : > { %v3873_v59 = vpop.f32.mrf.mxu1 }
 0x1a8   : > { %v1434_v10 = vmax.f32 %v1182_v33, 0.0  ;;  %v1498_v39 = vpack.c.bf16 %v1436_v34, %v1435_v37  ;;  %v1203_v46 = vadd.f32 %v3873_v59, %v4397_v26 }
 0x1a9   : > { %v1194_v35 = vpop.f32.mrf.mxu1 }
 0x1aa   : > { %v1497_v45 = vpack.c.bf16 %v1434_v10, %v1433_v36  ;;  %v1195_v42 = vadd.f32 %v4397_v26, %v1194_v35  ;;  %v1439_v54 = vmax.f32 %v1203_v46, 0.0 }
 0x1ab   : > { %v3874_v40 = vpop.f32.mrf.mxu1 }
 0x1ac   : > { %v1206_v43 = vadd.f32 %v3874_v40, %v4397_v26  ;;  %3935 = vmatprep.mubr.msk.bf16.mxu0 %vm1047_vm2, %v1497_v45  ;;  %v1437_v51 = vmax.f32 %v1195_v42, 0.0 }
 0x1ad   : > { %v1197_v47 = vpop.f32.mrf.mxu1  ;;  %3936 = vmatmul.mubr.msk.bf16.vlgmr.msra.gmra.mxu0 %vm1047_vm2, %v1498_v39 }
 0x1ae   : > { %v1198_v48 = vadd.f32 %v4397_v26, %v1197_v47  ;;  %v1440_v30 = vmax.f32 %v1206_v43, 0.0 }
 0x1af   : > { %v3877_v49 = vpop.f32.mrf.mxu1 }
 0x1b0   : > { %v1438_v4 = vmax.f32 %v1198_v48, 0.0  ;;  %v1500_v13 = vpack.c.bf16 %v1440_v30, %v1439_v54  ;;  %v1219_v57 = vadd.f32 %v3877_v49, %v4397_v26 }
 0x1b1   : > { %v1210_v0 = vpop.f32.mrf.mxu1 }
 0x1b2   : > { %v1499_v52 = vpack.c.bf16 %v1438_v4, %v1437_v51  ;;  %v1211_v55 = vadd.f32 %v4397_v26, %v1210_v0  ;;  %v1443_v1 = vmax.f32 %v1219_v57, 0.0 }
 0x1b3   : > { %v3878_v53 = vpop.f32.mrf.mxu1 }
 0x1b4   : > { %v1222_v56 = vadd.f32 %v3878_v53, %v4397_v26  ;;  %3939 = vmatprep.mubr.msk.bf16.mxu0 %vm1047_vm2, %v1499_v52  ;;  %v1441_v20 = vmax.f32 %v1211_v55, 0.0 }
 0x1b5   : > { %v1213_v58 = vpop.f32.mrf.mxu1  ;;  %3940 = vmatmul.mubr.msk.bf16.gmra.mxu0 %vm1047_vm2, %v1500_v13 }
 0x1b6   : > { %v1214_v60 = vadd.f32 %v4397_v26, %v1213_v58  ;;  %v1444_v61 = vmax.f32 %v1222_v56, 0.0 }
 0x1b7   : > { %v3881_v62 = vpop.f32.mrf.mxu1 }
 0x1b8   : > { %v1442_v44 = vmax.f32 %v1214_v60, 0.0  ;;  %v1502_v6 = vpack.c.bf16 %v1444_v61, %v1443_v1  ;;  %v1235_v31 = vadd.f32 %v3881_v62, %v4397_v26 }
 0x1b9   : > { %v1226_v2 = vpop.f32.mrf.mxu1 }
 0x1ba   : > { %v1501_v3 = vpack.c.bf16 %v1442_v44, %v1441_v20  ;;  %v1227_v7 = vadd.f32 %v4397_v26, %v1226_v2  ;;  %v1447_v15 = vmax.f32 %v1235_v31, 0.0 }
 0x1bb   : > { %v3882_v22 = vpop.f32.mrf.mxu1 }
 0x1bc   : > { %v1238_v9 = vadd.f32 %v3882_v22, %v4397_v26  ;;  %3943 = vmatprep.mubr.msk.bf16.mxu0 %vm1047_vm2, %v1501_v3  ;;  %v1445_v12 = vmax.f32 %v1227_v7, 0.0 }
 0x1bd   : > { %v1229_v11 = vpop.f32.mrf.mxu1  ;;  %3944 = vmatmul.mubr.msk.bf16.gmra.mxu0 %vm1047_vm2, %v1502_v6 }
 0x1be   : > { %v1230_v63 = vadd.f32 %v4397_v26, %v1229_v11  ;;  %v1448_v5 = vmax.f32 %v1238_v9, 0.0 }
 0x1bf   : > { %v3885_v8 = vpop.f32.mrf.mxu1 }
 0x1c0   : > { %v1446_v14 = vmax.f32 %v1230_v63, 0.0  ;;  %v1504_v19 = vpack.c.bf16 %v1448_v5, %v1447_v15  ;;  %v1251_v24 = vadd.f32 %v3885_v8, %v4397_v26 }
 0x1c1   : > { %v1242_v16 = vpop.f32.mrf.mxu1 }
 0x1c2   : > { %v1503_v18 = vpack.c.bf16 %v1446_v14, %v1445_v12  ;;  %v1243_v23 = vadd.f32 %v4397_v26, %v1242_v16  ;;  %v1451_v29 = vmax.f32 %v1251_v24, 0.0 }
 0x1c3   : > { %v3886_v21 = vpop.f32.mrf.mxu1 }
 0x1c4   : > { %v1254_v41 = vadd.f32 %v3886_v21, %v4397_v26  ;;  %3947 = vmatprep.mubr.msk.bf16.mxu0 %vm1047_vm2, %v1503_v18  ;;  %v1449_v28 = vmax.f32 %v1243_v23, 0.0 }
 0x1c5   : > { %v1245_v50 = vpop.f32.mrf.mxu1  ;;  %3948 = vmatmul.mubr.msk.bf16.gmra.mxu0 %vm1047_vm2, %v1504_v19 }
 0x1c6   : > { %v1246_v17 = vadd.f32 %v4397_v26, %v1245_v50  ;;  %v1452_v25 = vmax.f32 %v1254_v41, 0.0 }
 0x1c7   : > { %v3889_v27 = vpop.f32.mrf.mxu1 }
 0x1c8   : > { %v1450_v38 = vmax.f32 %v1246_v17, 0.0  ;;  %v1506_v34 = vpack.c.bf16 %v1452_v25, %v1451_v29  ;;  %v1267_v37 = vadd.f32 %v3889_v27, %v4397_v26 }
 0x1c9   : > { %v1258_v32 = vpop.f32.mrf.mxu1 }
 0x1ca   : > { %v1505_v33 = vpack.c.bf16 %v1450_v38, %v1449_v28  ;;  %v1259_v36 = vadd.f32 %v4397_v26, %v1258_v32  ;;  %v1455_v46 = vmax.f32 %v1267_v37, 0.0 }
 0x1cb   : > { %v3890_v59 = vpop.f32.mrf.mxu1 }
 0x1cc   : > { %v1270_v10 = vadd.f32 %v3890_v59, %v4397_v26  ;;  %3951 = vmatprep.mubr.msk.bf16.mxu0 %vm1047_vm2, %v1505_v33  ;;  %v1453_v42 = vmax.f32 %v1259_v36, 0.0 }
 0x1cd   : > { %v1261_v35 = vpop.f32.mrf.mxu1  ;;  %3952 = vmatmul.mubr.msk.bf16.gmra.mxu0 %vm1047_vm2, %v1506_v34 }
 0x1ce   : > { %v1262_v45 = vadd.f32 %v4397_v26, %v1261_v35  ;;  %v1456_v39 = vmax.f32 %v1270_v10, 0.0 }
 0x1cf   : > { %v3893_v40 = vpop.f32.mrf.mxu1 }
 0x1d0   : > { %v1454_v43 = vmax.f32 %v1262_v45, 0.0  ;;  %v1508_v30 = vpack.c.bf16 %v1456_v39, %v1455_v46  ;;  %v1283_v54 = vadd.f32 %v3893_v40, %v4397_v26 }
 0x1d1   : > { %v1274_v47 = vpop.f32.mrf.mxu1 }
 0x1d2   : > { %v1507_v48 = vpack.c.bf16 %v1454_v43, %v1453_v42  ;;  %v1275_v51 = vadd.f32 %v4397_v26, %v1274_v47  ;;  %v1459_v57 = vmax.f32 %v1283_v54, 0.0 }
 0x1d3   : > { %v3894_v49 = vpop.f32.mrf.mxu1 }
 0x1d4   : > { %v1286_v4 = vadd.f32 %v3894_v49, %v4397_v26  ;;  %3955 = vmatprep.mubr.msk.bf16.mxu0 %vm1047_vm2, %v1507_v48  ;;  %v1457_v55 = vmax.f32 %v1275_v51, 0.0 }
 0x1d5   : > { %v1277_v0 = vpop.f32.mrf.mxu1  ;;  %3956 = vmatmul.mubr.msk.bf16.gmra.mxu0 %vm1047_vm2, %v1508_v30 }
 0x1d6   : > { %v1278_v52 = vadd.f32 %v4397_v26, %v1277_v0  ;;  %v1460_v13 = vmax.f32 %v1286_v4, 0.0 }
 0x1d7   : > { %v3897_v53 = vpop.f32.mrf.mxu1 }
 0x1d8   : > { %v1458_v56 = vmax.f32 %v1278_v52, 0.0  ;;  %v1510_v61 = vpack.c.bf16 %v1460_v13, %v1459_v57  ;;  %v1299_v1 = vadd.f32 %v3897_v53, %v4397_v26 }
 0x1d9   : > { %v1290_v58 = vpop.f32.mrf.mxu1 }
 0x1da   : > { %v1509_v60 = vpack.c.bf16 %v1458_v56, %v1457_v55  ;;  %v1291_v20 = vadd.f32 %v4397_v26, %v1290_v58  ;;  %v1463_v31 = vmax.f32 %v1299_v1, 0.0 }
 0x1db   : > { %v3898_v62 = vpop.f32.mrf.mxu1 }
 0x1dc   : > { %v1302_v44 = vadd.f32 %v3898_v62, %v4397_v26  ;;  %3959 = vmatprep.mubr.msk.bf16.mxu0 %vm1047_vm2, %v1509_v60  ;;  %v1461_v7 = vmax.f32 %v1291_v20, 0.0 }
 0x1dd   : > { %v1293_v2 = vpop.f32.mrf.mxu1  ;;  %3960 = vmatmul.mubr.msk.bf16.gmra.mxu0 %vm1047_vm2, %v1510_v61 }
 0x1de   : > { %v1294_v3 = vadd.f32 %v4397_v26, %v1293_v2  ;;  %v1464_v6 = vmax.f32 %v1302_v44, 0.0 }
 0x1df   : > { %v3901_v22 = vpop.f32.mrf.mxu1 }
 0x1e0   : > { %v1462_v9 = vmax.f32 %v1294_v3, 0.0  ;;  %v1512_v5 = vpack.c.bf16 %v1464_v6, %v1463_v31  ;;  %v1315_v15 = vadd.f32 %v3901_v22, %v4397_v26 }
 0x1e1   : > { %v1306_v11 = vpop.f32.mrf.mxu1 }
 0x1e2   : > { %v1511_v63 = vpack.c.bf16 %v1462_v9, %v1461_v7  ;;  %v1307_v12 = vadd.f32 %v4397_v26, %v1306_v11  ;;  %v1467_v24 = vmax.f32 %v1315_v15, 0.0 }
 0x1e3   : > { %v3902_v8 = vpop.f32.mrf.mxu1 }
 0x1e4   : > { %v1318_v14 = vadd.f32 %v3902_v8, %v4397_v26  ;;  %3963 = vmatprep.mubr.msk.bf16.mxu0 %vm1047_vm2, %v1511_v63  ;;  %v1465_v23 = vmax.f32 %v1307_v12, 0.0 }
 0x1e5   : > { %v1309_v16 = vpop.f32.mrf.mxu1  ;;  %3964 = vmatmul.mubr.msk.bf16.gmra.mxu0 %vm1047_vm2, %v1512_v5 }
 0x1e6   : > { %v1310_v18 = vadd.f32 %v4397_v26, %v1309_v16  ;;  %v1468_v19 = vmax.f32 %v1318_v14, 0.0 }
 0x1e7   : > { %v3905_v21 = vpop.f32.mrf.mxu1 }
 0x1e8   : > { %v1466_v41 = vmax.f32 %v1310_v18, 0.0  ;;  %v1514_v25 = vpack.c.bf16 %v1468_v19, %v1467_v24  ;;  %v1331_v29 = vadd.f32 %v3905_v21, %v4397_v26 }
 0x1e9   : > { %v1322_v50 = vpop.f32.mrf.mxu1 }
 0x1ea   : > { %v1513_v17 = vpack.c.bf16 %v1466_v41, %v1465_v23  ;;  %v1323_v28 = vadd.f32 %v4397_v26, %v1322_v50  ;;  %v1471_v37 = vmax.f32 %v1331_v29, 0.0 }
 0x1eb   : > { %v3906_v27 = vpop.f32.mrf.mxu1 }
 0x1ec   : > { %v1334_v38 = vadd.f32 %v3906_v27, %v4397_v26  ;;  %3967 = vmatprep.mubr.msk.bf16.mxu0 %vm1047_vm2, %v1513_v17  ;;  %v1469_v36 = vmax.f32 %v1323_v28, 0.0 }
 0x1ed   : > { %v1325_v32 = vpop.f32.mrf.mxu1  ;;  %3968 = vmatmul.mubr.msk.bf16.gmra.mxu0 %vm1047_vm2, %v1514_v25 }
 0x1ee   : > { %v1326_v33 = vadd.f32 %v4397_v26, %v1325_v32  ;;  %v1472_v34 = vmax.f32 %v1334_v38, 0.0 }
 0x1ef   : > { %v3909_v59 = vpop.f32.mrf.mxu1 }
 0x1f0   : > { %v1470_v10 = vmax.f32 %v1326_v33, 0.0  ;;  %v1516_v39 = vpack.c.bf16 %v1472_v34, %v1471_v37  ;;  %v1347_v46 = vadd.f32 %v3909_v59, %v4397_v26 }
 0x1f1   : > { %v1338_v35 = vpop.f32.mrf.mxu1 }
 0x1f2   : > { %v1515_v45 = vpack.c.bf16 %v1470_v10, %v1469_v36  ;;  %v1339_v42 = vadd.f32 %v4397_v26, %v1338_v35  ;;  %v1475_v54 = vmax.f32 %v1347_v46, 0.0 }
 0x1f3   : > { %v3910_v40 = vpop.f32.mrf.mxu1 }
 0x1f4   : > { %v1350_v43 = vadd.f32 %v3910_v40, %v4397_v26  ;;  %3971 = vmatprep.mubr.msk.bf16.mxu0 %vm1047_vm2, %v1515_v45  ;;  %v1473_v51 = vmax.f32 %v1339_v42, 0.0 }
 0x1f5   : > { %v1341_v47 = vpop.f32.mrf.mxu1  ;;  %3972 = vmatmul.mubr.msk.bf16.gmra.mxu0 %vm1047_vm2, %v1516_v39 }
 0x1f6   : > { %v1342_v48 = vadd.f32 %v4397_v26, %v1341_v47  ;;  %v1476_v30 = vmax.f32 %v1350_v43, 0.0 }
 0x1f7   : > { %v3913_v49 = vpop.f32.mrf.mxu1 }
 0x1f8   : > { %v1474_v4 = vmax.f32 %v1342_v48, 0.0  ;;  %v1518_v13 = vpack.c.bf16 %v1476_v30, %v1475_v54  ;;  %v1363_v57 = vadd.f32 %v3913_v49, %v4397_v26 }
 0x1f9   : > { %v1354_v0 = vpop.f32.mrf.mxu1 }
 0x1fa   : > { %v1517_v52 = vpack.c.bf16 %v1474_v4, %v1473_v51  ;;  %v1355_v55 = vadd.f32 %v4397_v26, %v1354_v0  ;;  %v1479_v1 = vmax.f32 %v1363_v57, 0.0 }
 0x1fb   : > { %v3914_v53 = vpop.f32.mrf.mxu1 }
 0x1fc   : > { %v1366_v56 = vadd.f32 %v3914_v53, %v4397_v26  ;;  %3975 = vmatprep.mubr.msk.bf16.mxu0 %vm1047_vm2, %v1517_v52  ;;  %v1477_v20 = vmax.f32 %v1355_v55, 0.0 }
 0x1fd   : > { %v1357_v58 = vpop.f32.mrf.mxu1  ;;  %3976 = vmatmul.mubr.msk.bf16.gmra.mxu0 %vm1047_vm2, %v1518_v13 }
 0x1fe   : > { %v1358_v60 = vadd.f32 %v4397_v26, %v1357_v58  ;;  %v1480_v61 = vmax.f32 %v1366_v56, 0.0 }
 0x1ff   : > { %v3917_v62 = vpop.f32.mrf.mxu1 }
 0x200   : > { %v1478_v44 = vmax.f32 %v1358_v60, 0.0  ;;  %v1520_v6 = vpack.c.bf16 %v1480_v61, %v1479_v1  ;;  %v1379_v31 = vadd.f32 %v3917_v62, %v4397_v26  ;;  %v4498_v60 = vld [vmem:[%s4838_s6] ss:$0 sm:$0xff] }
 0x201   : > { %v1370_v2 = vpop.f32.mrf.mxu1 }
 0x202   : > { %v1519_v3 = vpack.c.bf16 %v1478_v44, %v1477_v20  ;;  %v1371_v7 = vadd.f32 %v4397_v26, %v1370_v2  ;;  %v1483_v15 = vmax.f32 %v1379_v31, 0.0 }
 0x203   : > { %v3918_v22 = vpop.f32.mrf.mxu1 }
 0x204   : > { %v1382_v9 = vadd.f32 %v3918_v22, %v4397_v26  ;;  %3979 = vmatprep.mubr.msk.bf16.mxu0 %vm1047_vm2, %v1519_v3  ;;  %v1481_v12 = vmax.f32 %v1371_v7, 0.0 }
 0x205   : > { %v1373_v11 = vpop.f32.mrf.mxu1  ;;  %3980 = vmatmul.mubr.msk.bf16.gmra.mxu0 %vm1047_vm2, %v1520_v6 }
 0x206   : > { %v1374_v63 = vadd.f32 %v4397_v26, %v1373_v11  ;;  %v1484_v5 = vmax.f32 %v1382_v9, 0.0 }
 0x207   : > { %v3921_v8 = vpop.f32.mrf.mxu1 }
 0x208   : > { %v1482_v14 = vmax.f32 %v1374_v63, 0.0  ;;  %v1522_v19 = vpack.c.bf16 %v1484_v5, %v1483_v15  ;;  %v1395_v24 = vadd.f32 %v3921_v8, %v4397_v26 }
 0x209   : > { %v1386_v16 = vpop.f32.mrf.mxu1 }
 0x20a   : > { %v1521_v18 = vpack.c.bf16 %v1482_v14, %v1481_v12  ;;  %v1387_v23 = vadd.f32 %v4397_v26, %v1386_v16  ;;  %v1487_v29 = vmax.f32 %v1395_v24, 0.0 }
 0x20b   : > { %v3922_v21 = vpop.f32.mrf.mxu1 }
 0x20c   : > { %v1398_v41 = vadd.f32 %v3922_v21, %v4397_v26  ;;  %3983 = vmatprep.mubr.msk.bf16.mxu0 %vm1047_vm2, %v1521_v18  ;;  %v1485_v28 = vmax.f32 %v1387_v23, 0.0 }
 0x20d   : > { %v1389_v50 = vpop.f32.mrf.mxu1  ;;  %3984 = vmatmul.mubr.msk.bf16.gmra.mxu0 %vm1047_vm2, %v1522_v19 }
 0x20e   : > { %v1390_v17 = vadd.f32 %v4397_v26, %v1389_v50  ;;  %v1488_v25 = vmax.f32 %v1398_v41, 0.0 }
 0x20f   : > { %v3925_v27 = vpop.f32.mrf.mxu1 }
 0x210   : > { %v1486_v38 = vmax.f32 %v1390_v17, 0.0  ;;  %v1524_v34 = vpack.c.bf16 %v1488_v25, %v1487_v29  ;;  %v1411_v37 = vadd.f32 %v3925_v27, %v4397_v26 }
 0x211   : > { %v1402_v32 = vpop.f32.mrf.mxu1 }
 0x212   : > { %v1523_v33 = vpack.c.bf16 %v1486_v38, %v1485_v28  ;;  %v1403_v36 = vadd.f32 %v4397_v26, %v1402_v32  ;;  %v1491_v46 = vmax.f32 %v1411_v37, 0.0 }
 0x213   : > { %v3926_v59 = vpop.f32.mrf.mxu1 }
 0x214   : > { %v1414_v10 = vadd.f32 %v3926_v59, %v4397_v26  ;;  %3987 = vmatprep.mubr.msk.bf16.mxu0 %vm1047_vm2, %v1523_v33  ;;  %v1489_v42 = vmax.f32 %v1403_v36, 0.0 }
 0x215   : > { %v1405_v35 = vpop.f32.mrf.mxu1  ;;  %3988 = vmatmul.mubr.msk.bf16.gmra.mxu0 %vm1047_vm2, %v1524_v34 }
 0x216   : > { %v1406_v45 = vadd.f32 %v4397_v26, %v1405_v35  ;;  %v1492_v39 = vmax.f32 %v1414_v10, 0.0 }
 0x217   : > { %v3929_v40 = vpop.f32.mrf.mxu1 }
 0x218   : > { %v1490_v43 = vmax.f32 %v1406_v45, 0.0  ;;  %v1526_v30 = vpack.c.bf16 %v1492_v39, %v1491_v46  ;;  %v1427_v54 = vadd.f32 %v3929_v40, %v4397_v26 }
 0x219   : > { %v1418_v47 = vpop.f32.mrf.mxu1 }
 0x21a   : > { %v1525_v48 = vpack.c.bf16 %v1490_v43, %v1489_v42  ;;  %v1419_v51 = vadd.f32 %v4397_v26, %v1418_v47  ;;  %v1495_v56 = vmax.f32 %v1427_v54, 0.0 }
 0x21b   : > { %v3930_v49 = vpop.f32.mrf.mxu1 }
 0x21c   : > { %v1430_v4 = vadd.f32 %v3930_v49, %v4397_v26  ;;  %3991 = vmatprep.mubr.msk.bf16.mxu0 %vm1047_vm2, %v1525_v48  ;;  %v1493_v53 = vmax.f32 %v1419_v51, 0.0 }
 0x21d   : > { %v1421_v0 = vpop.f32.mrf.mxu1  ;;  %3992 = vmatmul.mubr.msk.bf16.gmra.mxu0 %vm1047_vm2, %v1526_v30 }
 0x21e   : > { %v1422_v52 = vadd.f32 %v4397_v26, %v1421_v0  ;;  %v1496_v13 = vmax.f32 %v1430_v4, 0.0 }
 0x220   : > { %v1494_v55 = vmax.f32 %v1422_v52, 0.0  ;;  %v1528_v58 = vpack.c.bf16 %v1496_v13, %v1495_v56 }
 0x222   : > { %v1527_v57 = vpack.c.bf16 %v1494_v55, %v1493_v53 }
 0x224   : > { %3995 = vmatprep.mubr.msk.bf16.mxu0 %vm1047_vm2, %v1527_v57 }
 0x225   : > { %3996 = vmatmul.mubr.msk.bf16.gmra.mxu0 %vm1047_vm2, %v1528_v58 }
 0x26d   : > { %v3937_v61 = vpop.f32.mrf.mxu0 }
 0x26e   : > { %v1691_v62 = vadd.f32 %v3937_v61, %v4498_v60 }
 0x26f   : > { %v1682_v26 = vpop.f32.mrf.mxu0 }
 0x270   : > { %v1939_v20 = vmax.f32 %v1691_v62, 0.0  ;;  %v1683_v44 = vadd.f32 %v4498_v60, %v1682_v26 }
 0x271   : > { %v3938_v1 = vpop.f32.mrf.mxu0 }
 0x272   : > { %v2016_v2 = vsel %vm2001_vm3, %v1939_v20, -inf  ;;  %v1937_v3 = vmax.f32 %v1683_v44, 0.0  ;;  %v1694_v6 = vadd.f32 %v3938_v1, %v4498_v60 }
 0x273   : > { %v2017_v22 = vrot.slane %v2016_v2, 4  ;;  %v1685_v7 = vpop.f32.mrf.mxu0 }
 0x274   : > { %v2002_v9 = vsel %vm2001_vm3, %v1937_v3, -inf  ;;  %v1940_v31 = vmax.f32 %v1694_v6, 0.0  ;;  %v1686_v11 = vadd.f32 %v4498_v60, %v1685_v7 }
 0x275   : > { %v2018_v63 = vmax.f32 %v2016_v2, %v2017_v22  ;;  %v2003_v5 = vrot.slane %v2002_v9, 4  ;;  %v3941_v8 = vpop.f32.mrf.mxu0 }
 0x276   : > { %v2023_v12 = vsel %vm2001_vm3, %v1940_v31, -inf  ;;  %v1938_v14 = vmax.f32 %v1686_v11, 0.0  ;;  %v1707_v15 = vadd.f32 %v3941_v8, %v4498_v60 }
 0x277   : > { %v2019_v16 = vrot.slane %v2018_v63, 2  ;;  %v2004_v18 = vmax.f32 %v2002_v9, %v2003_v5  ;;  %v2024_v19 = vrot.slane %v2023_v12, 4  ;;  %v1698_v21 = vpop.f32.mrf.mxu0 }
 0x278   : > { %v2009_v23 = vsel %vm2001_vm3, %v1938_v14, -inf  ;;  %v1943_v41 = vmax.f32 %v1707_v15, 0.0  ;;  %v1699_v24 = vadd.f32 %v4498_v60, %v1698_v21 }
 0x279   : > { %v2020_v50 = vmax.f32 %v2018_v63, %v2019_v16  ;;  %v2005_v17 = vrot.slane %v2004_v18, 2  ;;  %v2025_v25 = vmax.f32 %v2023_v12, %v2024_v19  ;;  %v2010_v27 = vrot.slane %v2009_v23, 4  ;;  %v3942_v28 = vpop.f32.mrf.mxu0 }
 0x27a   : > { %v2044_v38 = vsel %vm2001_vm3, %v1943_v41, -inf  ;;  %v1941_v29 = vmax.f32 %v1699_v24, 0.0  ;;  %v1710_v32 = vadd.f32 %v3942_v28, %v4498_v60 }
 0x27b   : > { %v2021_v33 = vrot.slane %v2020_v50, 1  ;;  %v2006_v34 = vmax.f32 %v2004_v18, %v2005_v17  ;;  %v2026_v59 = vrot.slane %v2025_v25, 2  ;;  %v2011_v36 = vmax.f32 %v2009_v23, %v2010_v27  ;;  %v1701_v10 = vpop.f32.mrf.mxu0 }
 0x27c   : > { %v2045_v37 = vrot.slane %v2044_v38, 4  ;;  %v2030_v35 = vsel %vm2001_vm3, %v1941_v29, -inf  ;;  %v1944_v45 = vmax.f32 %v1710_v32, 0.0  ;;  %v1702_v39 = vadd.f32 %v4498_v60, %v1701_v10 }
 0x27d   : > { %v2022_v40 = vmax.f32 %v2020_v50, %v2021_v33  ;;  %v2007_v42 = vrot.slane %v2006_v34, 1  ;;  %v2027_v43 = vmax.f32 %v2025_v25, %v2026_v59  ;;  %v2012_v46 = vrot.slane %v2011_v36, 2  ;;  %v3945_v47 = vpop.f32.mrf.mxu0 }
 0x27e   : > { %v2046_v48 = vmax.f32 %v2044_v38, %v2045_v37  ;;  %v2031_v30 = vrot.slane %v2030_v35, 4  ;;  %v2051_v49 = vsel %vm2001_vm3, %v1944_v45, -inf  ;;  %v1942_v51 = vmax.f32 %v1702_v39, 0.0 }
 0x27f   : > { %v3570_v4 = vpack.c.bf16 %v2022_v40, %v2022_v40  ;;  %v2008_v54 = vmax.f32 %v2006_v34, %v2007_v42  ;;  %v2028_v0 = vrot.slane %v2027_v43, 1  ;;  %v2013_v52 = vmax.f32 %v2011_v36, %v2012_v46  ;;  %v1714_v13 = vpop.f32.mrf.mxu0 }
 0x280   : > { %v2047_v53 = vrot.slane %v2046_v48, 2  ;;  %v2032_v55 = vmax.f32 %v2030_v35, %v2031_v30  ;;  %v2052_v56 = vrot.slane %v2051_v49, 4  ;;  %v2037_v57 = vsel %vm2001_vm3, %v1942_v51, -inf }
 0x281   : > { %v2712_v58 = vunpack.c.l.b16 %v3570_v4  ;;  %v3568_v61 = vpack.c.bf16 %v2008_v54, %v2008_v54  ;;  %v2029_v62 = vmax.f32 %v2027_v43, %v2028_v0  ;;  %v2014_v26 = vrot.slane %v2013_v52, 1  ;;  %v3946_v20 = vpop.f32.mrf.mxu0 }
 0x282   : > { %v2048_v44 = vmax.f32 %v2046_v48, %v2047_v53  ;;  %v2033_v1 = vrot.slane %v2032_v55, 2  ;;  %v2053_v2 = vmax.f32 %v2051_v49, %v2052_v56  ;;  %v2038_v3 = vrot.slane %v2037_v57, 4 }
 0x283   : > { %v2710_v6 = vunpack.c.l.b16 %v3568_v61  ;;  %v3571_v22 = vpack.c.bf16 %v2029_v62, %v2029_v62  ;;  %v2015_v7 = vmax.f32 %v2013_v52, %v2014_v26  ;;  %v1723_v9 = vadd.f32 %v3945_v47, %v4498_v60  ;;  %v1717_v31 = vpop.f32.mrf.mxu0 }
 0x284   : > { %v2049_v11 = vrot.slane %v2048_v44, 1  ;;  %v2034_v63 = vmax.f32 %v2032_v55, %v2033_v1  ;;  %v2054_v5 = vrot.slane %v2053_v2, 2  ;;  %v2039_v8 = vmax.f32 %v2037_v57, %v2038_v3 }
 0x285   : > { %v2713_v12 = vunpack.c.l.b16 %v3571_v22  ;;  %v3569_v14 = vpack.c.bf16 %v2015_v7, %v2015_v7  ;;  %v1947_v15 = vmax.f32 %v1723_v9, 0.0  ;;  %v1715_v16 = vadd.f32 %v4498_v60, %v1714_v13  ;;  %v3949_v18 = vpop.f32.mrf.mxu0 }
 0x286   : > { %v2050_v19 = vmax.f32 %v2048_v44, %v2049_v11  ;;  %v2035_v21 = vrot.slane %v2034_v63, 1  ;;  %v2055_v23 = vmax.f32 %v2053_v2, %v2054_v5  ;;  %v2040_v41 = vrot.slane %v2039_v8, 2 }
 0x287   : > { %v2711_v24 = vunpack.c.l.b16 %v3569_v14  ;;  %v2072_v50 = vsel %vm2001_vm3, %v1947_v15, -inf  ;;  %v1945_v17 = vmax.f32 %v1715_v16, 0.0  ;;  %v1726_v25 = vadd.f32 %v3946_v20, %v4498_v60  ;;  %v1730_v27 = vpop.f32.mrf.mxu0 }
 0x288   : > { %v3574_v28 = vpack.c.bf16 %v2050_v19, %v2050_v19  ;;  %v2036_v38 = vmax.f32 %v2034_v63, %v2035_v21  ;;  %v2056_v29 = vrot.slane %v2055_v23, 1  ;;  %v2041_v32 = vmax.f32 %v2039_v8, %v2040_v41 }
 0x289   : > { %v2775_v33 = vsel %vm2774_vm4, %v2711_v24, %v2710_v6  ;;  %v2073_v34 = vrot.slane %v2072_v50, 4  ;;  %v2058_v59 = vsel %vm2001_vm3, %v1945_v17, -inf  ;;  %v1948_v36 = vmax.f32 %v1726_v25, 0.0  ;;  %v3950_v10 = vpop.f32.mrf.mxu0 }
 0x28a   : > { %v2777_v37 = vsel %vm2776_vm5, %v2712_v58, %v2775_v33  ;;  %v2716_v35 = vunpack.c.l.b16 %v3574_v28  ;;  %v3572_v45 = vpack.c.bf16 %v2036_v38, %v2036_v38  ;;  %v2057_v39 = vmax.f32 %v2055_v23, %v2056_v29 }
 0x28b   : > { %v2779_v40 = vsel %vm2778_vm6, %v2713_v12, %v2777_v37  ;;  %v2042_v42 = vrot.slane %v2041_v32, 1  ;;  %v2074_v43 = vmax.f32 %v2072_v50, %v2073_v34  ;;  %v2059_v46 = vrot.slane %v2058_v59, 4  ;;  %v4531_v47 = vpop.f32.mrf.mxu0 }
 0x28c   : > { %v2714_v48 = vunpack.c.l.b16 %v3572_v45  ;;  %v3575_v30 = vpack.c.bf16 %v2057_v39, %v2057_v39  ;;  %v2079_v49 = vsel %vm2001_vm3, %v1948_v36, -inf  ;;  %v1718_v51 = vadd.f32 %v4498_v60, %v1717_v31 }
 0x28d   : > { %v2043_v4 = vmax.f32 %v2041_v32, %v2042_v42  ;;  %v2075_v54 = vrot.slane %v2074_v43, 2  ;;  %v2060_v0 = vmax.f32 %v2058_v59, %v2059_v46  ;;  %v2080_v52 = vrot.slane %v2079_v49, 4  ;;  %v3953_v13 = vpop.f32.mrf.mxu0 }
 0x28e   : > { %v2781_v53 = vsel %vm2780_vm7, %v2714_v48, %v2779_v40  ;;  %v2717_v55 = vunpack.c.l.b16 %v3575_v30  ;;  %v1946_v56 = vmax.f32 %v1718_v51, 0.0  ;;  %v1739_v57 = vadd.f32 %v3949_v18, %v4498_v60 }
 0x28f   : > { %v3573_v58 = vpack.c.bf16 %v2043_v4, %v2043_v4  ;;  %v2076_v61 = vmax.f32 %v2074_v43, %v2075_v54  ;;  %v2061_v62 = vrot.slane %v2060_v0, 2  ;;  %v2081_v26 = vmax.f32 %v2079_v49, %v2080_v52  ;;  %v1746_v20 = vpop.f32.mrf.mxu0 }
 0x290   : > { %v2065_v44 = vsel %vm2001_vm3, %v1946_v56, -inf  ;;  %v1951_v1 = vmax.f32 %v1739_v57, 0.0  ;;  %v1731_v2 = vadd.f32 %v4498_v60, %v1730_v27  ;;  %v1742_v3 = vadd.f32 %v3950_v10, %v4498_v60 }
 0x291   : > { %v2715_v6 = vunpack.c.l.b16 %v3573_v58  ;;  %v2077_v22 = vrot.slane %v2076_v61, 1  ;;  %v2062_v7 = vmax.f32 %v2060_v0, %v2061_v62  ;;  %v2082_v9 = vrot.slane %v2081_v26, 2  ;;  %v3954_v31 = vpop.f32.mrf.mxu0 }
 0x292   : > { %v2066_v11 = vrot.slane %v2065_v44, 4  ;;  %v2100_v63 = vsel %vm2001_vm3, %v1951_v1, -inf  ;;  %v1949_v5 = vmax.f32 %v1731_v2, 0.0  ;;  %v1952_v8 = vmax.f32 %v1742_v3, 0.0 }
 0x293   : > { %v2783_v12 = vsel %vm2782_vm8, %v2715_v6, %v2781_v53  ;;  %v2078_v14 = vmax.f32 %v2076_v61, %v2077_v22  ;;  %v2063_v15 = vrot.slane %v2062_v7, 1  ;;  %v2083_v16 = vmax.f32 %v2081_v26, %v2082_v9  ;;  %v4549_v18 = vpop.f32.mrf.mxu0 }
 0x294   : > { %v2785_v19 = vsel %vm2784_vm9, %v2716_v35, %v2783_v12  ;;  %v2067_v21 = vmax.f32 %v2065_v44, %v2066_v11  ;;  %v2101_v23 = vrot.slane %v2100_v63, 4  ;;  %v2086_v41 = vsel %vm2001_vm3, %v1949_v5, -inf }
 0x295   : > { %v2787_v24 = vsel %vm2786_vm10, %v2717_v55, %v2785_v19  ;;  %v3578_v50 = vpack.c.bf16 %v2078_v14, %v2078_v14  ;;  %v2064_v17 = vmax.f32 %v2062_v7, %v2063_v15  ;;  %v2084_v25 = vrot.slane %v2083_v16, 1  ;;  %v4559_v27 = vpop.f32.mrf.mxu0 }
 0x296   : > { %v2837_v28 = vpack.c.b16 %v2787_v24, %v2787_v24  ;;  %v2068_v38 = vrot.slane %v2067_v21, 2  ;;  %v2102_v29 = vmax.f32 %v2100_v63, %v2101_v23  ;;  %v2087_v32 = vrot.slane %v2086_v41, 4 }
 0x297   : > { %v3576_v33 = vpack.c.bf16 %v2064_v17, %v2064_v17  ;;  %v2085_v34 = vmax.f32 %v2083_v16, %v2084_v25  ;;  %v2107_v59 = vsel %vm2001_vm3, %v1952_v8, -inf  ;;  %v4562_v36 = vpop.f32.mrf.mxu0  ;;  %v2720_v39 = vunpack.c.l.b16 %v3578_v50 }
 0x298   : > { %2854 = vst.msk [vmem:[%s4556_s11] sm:$0xf] %vm2853_vm11, %v2837_v28  ;;  %v2069_v10 = vmax.f32 %v2067_v21, %v2068_v38  ;;  %v2103_v37 = vrot.slane %v2102_v29, 2  ;;  %v2088_v35 = vmax.f32 %v2086_v41, %v2087_v32  ;;  %v2108_v45 = vrot.slane %v2107_v59, 4 }
 0x299   : > { %v2718_v40 = vunpack.c.l.b16 %v3576_v33  ;;  %v1734_v42 = vadd.f32 %v4498_v60, %v4531_v47  ;;  %v1755_v43 = vadd.f32 %v3953_v13, %v4498_v60  ;;  %v4569_v46 = vpop.f32.mrf.mxu0  ;;  %v3579_v4 = vpack.c.bf16 %v2085_v34, %v2085_v34 }
 0x29a   : > { %v2070_v48 = vrot.slane %v2069_v10, 1  ;;  %v2104_v30 = vmax.f32 %v2102_v29, %v2103_v37  ;;  %v2089_v49 = vrot.slane %v2088_v35, 2  ;;  %v2109_v51 = vmax.f32 %v2107_v59, %v2108_v45 }
 0x29b   : > { %v1950_v54 = vmax.f32 %v1734_v42, 0.0  ;;  %v1955_v0 = vmax.f32 %v1755_v43, 0.0  ;;  %v1747_v52 = vadd.f32 %v4498_v60, %v1746_v20  ;;  %v4572_v53 = vpop.f32.mrf.mxu0  ;;  %v1758_v62 = vadd.f32 %v3954_v31, %v4498_v60 }
 0x29c   : > { %v2071_v55 = vmax.f32 %v2069_v10, %v2070_v48  ;;  %v2105_v56 = vrot.slane %v2104_v30, 1  ;;  %v2090_v57 = vmax.f32 %v2088_v35, %v2089_v49  ;;  %v2110_v58 = vrot.slane %v2109_v51, 2 }
 0x29d   : > { %v2093_v47 = vsel %vm2001_vm3, %v1950_v54, -inf  ;;  %v2128_v13 = vsel %vm2001_vm3, %v1955_v0, -inf  ;;  %v1953_v61 = vmax.f32 %v1747_v52, 0.0  ;;  %v4577_v26 = vpop.f32.mrf.mxu0  ;;  %v1956_v7 = vmax.f32 %v1758_v62, 0.0 }
 0x29e   : > { %v3577_v44 = vpack.c.bf16 %v2071_v55, %v2071_v55  ;;  %v2106_v1 = vmax.f32 %v2104_v30, %v2105_v56  ;;  %v2091_v2 = vrot.slane %v2090_v57, 1  ;;  %v2111_v3 = vmax.f32 %v2109_v51, %v2110_v58 }
 0x29f   : > { %v2094_v20 = vrot.slane %v2093_v47, 4  ;;  %v2129_v6 = vrot.slane %v2128_v13, 4  ;;  %v2114_v22 = vsel %vm2001_vm3, %v1953_v61, -inf  ;;  %v4580_v9 = vpop.f32.mrf.mxu0  ;;  %v2135_v15 = vsel %vm2001_vm3, %v1956_v7, -inf }
 0x2a0   : > { %v2719_v11 = vunpack.c.l.b16 %v3577_v44  ;;  %v3582_v63 = vpack.c.bf16 %v2106_v1, %v2106_v1  ;;  %v2092_v5 = vmax.f32 %v2090_v57, %v2091_v2  ;;  %v2112_v8 = vrot.slane %v2111_v3, 1 }
 0x2a1   : > { %v2095_v12 = vmax.f32 %v2093_v47, %v2094_v20  ;;  %v2130_v14 = vmax.f32 %v2128_v13, %v2129_v6  ;;  %v2115_v31 = vrot.slane %v2114_v22, 4  ;;  %v4583_v16 = vpop.f32.mrf.mxu0  ;;  %v2721_v19 = vunpack.c.l.b16 %v3579_v4 }
 0x2a2   : > { %v2788_v21 = vsel %vm2774_vm4, %v2719_v11, %v2718_v40  ;;  %v3580_v23 = vpack.c.bf16 %v2092_v5, %v2092_v5  ;;  %v2113_v41 = vmax.f32 %v2111_v3, %v2112_v8  ;;  %v2724_v38 = vunpack.c.l.b16 %v3582_v63 }
 0x2a3   : > { %v2789_v24 = vsel %vm2776_vm5, %v2720_v39, %v2788_v21  ;;  %v2096_v50 = vrot.slane %v2095_v12, 2  ;;  %v2131_v17 = vrot.slane %v2130_v14, 2  ;;  %v2116_v25 = vmax.f32 %v2114_v22, %v2115_v31  ;;  %v4587_v28 = vpop.f32.mrf.mxu0 }
 0x2a4   : > { %v2722_v29 = vunpack.c.l.b16 %v3580_v23  ;;  %v2790_v32 = vsel %vm2778_vm6, %v2721_v19, %v2789_v24  ;;  %v2136_v33 = vrot.slane %v2135_v15, 4  ;;  %v1750_v37 = vadd.f32 %v4498_v60, %v4549_v18 }
 0x2a5   : > { %v2097_v34 = vmax.f32 %v2095_v12, %v2096_v50  ;;  %v2132_v59 = vmax.f32 %v2130_v14, %v2131_v17  ;;  %v2117_v10 = vrot.slane %v2116_v25, 2  ;;  %v4592_v35 = vpop.f32.mrf.mxu0  ;;  %v3583_v39 = vpack.c.bf16 %v2113_v41, %v2113_v41 }
 0x2a6   : > { %v2791_v45 = vsel %vm2780_vm7, %v2722_v29, %v2790_v32  ;;  %v2137_v40 = vmax.f32 %v2135_v15, %v2136_v33  ;;  %v1771_v42 = vadd.f32 %v4559_v27, %v4498_v60  ;;  %v1954_v49 = vmax.f32 %v1750_v37, 0.0 }
 0x2a7   : > { %v2098_v43 = vrot.slane %v2097_v34, 1  ;;  %v2133_v48 = vrot.slane %v2132_v59, 1  ;;  %v2118_v30 = vmax.f32 %v2116_v25, %v2117_v10  ;;  %v4597_v51 = vpop.f32.mrf.mxu0  ;;  %v1763_v18 = vadd.f32 %v4498_v60, %v4562_v36 }
 0x2a8   : > { %v2138_v4 = vrot.slane %v2137_v40, 2  ;;  %v1959_v54 = vmax.f32 %v1771_v42, 0.0  ;;  %v1774_v0 = vadd.f32 %v4569_v46, %v4498_v60  ;;  %v2121_v57 = vsel %vm2001_vm3, %v1954_v49, -inf }
 0x2a9   : > { %v2099_v52 = vmax.f32 %v2097_v34, %v2098_v43  ;;  %v2134_v55 = vmax.f32 %v2132_v59, %v2133_v48  ;;  %v2119_v56 = vrot.slane %v2118_v30, 1  ;;  %v4604_v27 = vpop.f32.mrf.mxu0  ;;  %v2122_v47 = vrot.slane %v2121_v57, 4 }
 0x2aa   : > { %v2139_v58 = vmax.f32 %v2137_v40, %v2138_v4  ;;  %v2156_v13 = vsel %vm2001_vm3, %v1959_v54, -inf  ;;  %v1957_v61 = vmax.f32 %v1763_v18, 0.0  ;;  %v1960_v6 = vmax.f32 %v1774_v0, 0.0 }
 0x2ab   : > { %v3581_v62 = vpack.c.bf16 %v2099_v52, %v2099_v52  ;;  %v3586_v44 = vpack.c.bf16 %v2134_v55, %v2134_v55  ;;  %v2120_v1 = vmax.f32 %v2118_v30, %v2119_v56  ;;  %v2157_v2 = vrot.slane %v2156_v13, 4  ;;  %v4607_v36 = vpop.f32.mrf.mxu0 }
 0x2ac   : > { %v2140_v3 = vrot.slane %v2139_v58, 1  ;;  %v2123_v46 = vmax.f32 %v2121_v57, %v2122_v47  ;;  %v2142_v20 = vsel %vm2001_vm3, %v1957_v61, -inf  ;;  %v2725_v22 = vunpack.c.l.b16 %v3583_v39 }
 0x2ad   : > { %v2723_v7 = vunpack.c.l.b16 %v3581_v62  ;;  %v3584_v11 = vpack.c.bf16 %v2120_v1, %v2120_v1  ;;  %v2158_v63 = vmax.f32 %v2156_v13, %v2157_v2  ;;  %v4610_v5 = vpop.f32.mrf.mxu0  ;;  %v2143_v14 = vrot.slane %v2142_v20, 4 }
 0x2ae   : > { %v2141_v8 = vmax.f32 %v2139_v58, %v2140_v3  ;;  %v2124_v12 = vrot.slane %v2123_v46, 2  ;;  %v2163_v31 = vsel %vm2001_vm3, %v1960_v6, -inf  ;;  %v2728_v19 = vunpack.c.l.b16 %v3586_v44 }
 0x2af   : > { %v2792_v15 = vsel %vm2782_vm8, %v2723_v7, %v2791_v45  ;;  %v2159_v21 = vrot.slane %v2158_v63, 2  ;;  %v2164_v23 = vrot.slane %v2163_v31, 4  ;;  %v4614_v41 = vpop.f32.mrf.mxu0  ;;  %v2726_v50 = vunpack.c.l.b16 %v3584_v11 }
 0x2b0   : > { %v2793_v24 = vsel %vm2784_vm9, %v2724_v38, %v2792_v15  ;;  %v2125_v17 = vmax.f32 %v2123_v46, %v2124_v12  ;;  %v2144_v25 = vmax.f32 %v2142_v20, %v2143_v14  ;;  %v1766_v34 = vadd.f32 %v4498_v60, %v4572_v53 }
 0x2b1   : > { %v2794_v29 = vsel %vm2786_vm10, %v2725_v22, %v2793_v24  ;;  %v2160_v32 = vmax.f32 %v2158_v63, %v2159_v21  ;;  %v2165_v33 = vmax.f32 %v2163_v31, %v2164_v23  ;;  %v4620_v59 = vpop.f32.mrf.mxu0  ;;  %v3587_v37 = vpack.c.bf16 %v2141_v8, %v2141_v8 }
 0x2b2   : > { %v2838_v10 = vpack.c.b16 %v2794_v29, %v2794_v29  ;;  %v2126_v45 = vrot.slane %v2125_v17, 1  ;;  %v2145_v39 = vrot.slane %v2144_v25, 2  ;;  %v1958_v38 = vmax.f32 %v1766_v34, 0.0 }
 0x2b3   : > { %v2161_v40 = vrot.slane %v2160_v32, 1  ;;  %v2166_v42 = vrot.slane %v2165_v33, 2  ;;  %v1787_v43 = vadd.f32 %v4577_v26, %v4498_v60  ;;  %v1779_v49 = vadd.f32 %v4498_v60, %v4580_v9  ;;  %v4630_v4 = vpop.f32.mrf.mxu0 }
 0x2b4   : > { %2855 = vst.msk [vmem:[%s4556_s11 + $0x4] sm:$0xf] %vm2853_vm11, %v2838_v10  ;;  %v2127_v48 = vmax.f32 %v2125_v17, %v2126_v45  ;;  %v2146_v30 = vmax.f32 %v2144_v25, %v2145_v39  ;;  %v1790_v53 = vadd.f32 %v4583_v16, %v4498_v60  ;;  %v2149_v0 = vsel %vm2001_vm3, %v1958_v38, -inf }
 0x2b5   : > { %v2162_v54 = vmax.f32 %v2160_v32, %v2161_v40  ;;  %v2167_v18 = vmax.f32 %v2165_v33, %v2166_v42  ;;  %v1963_v52 = vmax.f32 %v1787_v43, 0.0  ;;  %v2150_v26 = vrot.slane %v2149_v0, 4  ;;  %v4634_v1 = vpop.f32.mrf.mxu0 }
 0x2b6   : > { %v3585_v55 = vpack.c.bf16 %v2127_v48, %v2127_v48  ;;  %v2147_v56 = vrot.slane %v2146_v30, 1  ;;  %v1961_v57 = vmax.f32 %v1779_v49, 0.0  ;;  %v1964_v61 = vmax.f32 %v1790_v53, 0.0 }
 0x2b7   : > { %v3590_v58 = vpack.c.bf16 %v2162_v54, %v2162_v54  ;;  %v2168_v47 = vrot.slane %v2167_v18, 1  ;;  %v2184_v13 = vsel %vm2001_vm3, %v1963_v52, -inf  ;;  %v2151_v44 = vmax.f32 %v2149_v0, %v2150_v26  ;;  %v4641_v24 = vpop.f32.mrf.mxu0 }
 0x2b8   : > { %v2727_v9 = vunpack.c.l.b16 %v3585_v55  ;;  %v2148_v62 = vmax.f32 %v2146_v30, %v2147_v56  ;;  %v2185_v16 = vrot.slane %v2184_v13, 4  ;;  %v2729_v2 = vunpack.c.l.b16 %v3587_v37 }
 0x2b9   : > { %v2169_v3 = vmax.f32 %v2167_v18, %v2168_v47  ;;  %v2170_v46 = vsel %vm2001_vm3, %v1961_v57, -inf  ;;  %v2191_v20 = vsel %vm2001_vm3, %v1964_v61, -inf  ;;  %v2152_v7 = vrot.slane %v2151_v44, 2 }
 0x2ba   : > { %v2795_v6 = vsel %vm2774_vm4, %v2727_v9, %v2726_v50  ;;  %v3588_v22 = vpack.c.bf16 %v2148_v62, %v2148_v62  ;;  %v2186_v11 = vmax.f32 %v2184_v13, %v2185_v16  ;;  %v2732_v8 = vunpack.c.l.b16 %v3590_v58 }
 0x2bb   : > { %v2796_v63 = vsel %vm2776_vm5, %v2728_v19, %v2795_v6  ;;  %v2171_v12 = vrot.slane %v2170_v46, 4  ;;  %v2192_v14 = vrot.slane %v2191_v20, 4  ;;  %v2153_v21 = vmax.f32 %v2151_v44, %v2152_v7 }
 0x2bc   : > { %v2730_v31 = vunpack.c.l.b16 %v3588_v22  ;;  %v2797_v15 = vsel %vm2778_vm6, %v2729_v2, %v2796_v63  ;;  %v2187_v23 = vrot.slane %v2186_v11, 2  ;;  %v3591_v17 = vpack.c.bf16 %v2169_v3, %v2169_v3 }
 0x2bd   : > { %v2172_v25 = vmax.f32 %v2170_v46, %v2171_v12  ;;  %v2193_v29 = vmax.f32 %v2191_v20, %v2192_v14  ;;  %v1782_v50 = vadd.f32 %v4498_v60, %v4587_v28  ;;  %v2154_v33 = vrot.slane %v2153_v21, 1  ;;  %v4652_v28 = vpop.f32.mrf.mxu0 }
 0x2be   : > { %v2798_v32 = vsel %vm2780_vm7, %v2730_v31, %v2797_v15  ;;  %v2188_v19 = vmax.f32 %v2186_v11, %v2187_v23  ;;  %v1803_v34 = vadd.f32 %v4592_v35, %v4498_v60  ;;  %v1795_v39 = vadd.f32 %v4498_v60, %v4597_v51 }
 0x2bf   : > { %v2173_v10 = vrot.slane %v2172_v25, 2  ;;  %v2194_v37 = vrot.slane %v2193_v29, 2  ;;  %v1962_v45 = vmax.f32 %v1782_v50, 0.0  ;;  %v2155_v40 = vmax.f32 %v2153_v21, %v2154_v33  ;;  %v4657_v47 = vpop.f32.mrf.mxu0 }
 0x2c0   : > { %v2189_v42 = vrot.slane %v2188_v19, 1  ;;  %v1967_v38 = vmax.f32 %v1803_v34, 0.0  ;;  %v1806_v43 = vadd.f32 %v4604_v27, %v4498_v60  ;;  %v1965_v53 = vmax.f32 %v1795_v39, 0.0 }
 0x2c1   : > { %v2174_v48 = vmax.f32 %v2172_v25, %v2173_v10  ;;  %v2195_v30 = vmax.f32 %v2193_v29, %v2194_v37  ;;  %v2177_v49 = vsel %vm2001_vm3, %v1962_v45, -inf  ;;  %v3589_v35 = vpack.c.bf16 %v2155_v40, %v2155_v40  ;;  %v4663_v14 = vpop.f32.mrf.mxu0 }
 0x2c2   : > { %v2190_v54 = vmax.f32 %v2188_v19, %v2189_v42  ;;  %v2178_v18 = vrot.slane %v2177_v49, 4  ;;  %v2212_v0 = vsel %vm2001_vm3, %v1967_v38, -inf  ;;  %v2198_v56 = vsel %vm2001_vm3, %v1965_v53, -inf }
 0x2c3   : > { %v2175_v52 = vrot.slane %v2174_v48, 1  ;;  %v2196_v51 = vrot.slane %v2195_v30, 1  ;;  %v2213_v55 = vrot.slane %v2212_v0, 4  ;;  %v2731_v26 = vunpack.c.l.b16 %v3589_v35  ;;  %v4675_v39 = vpop.f32.mrf.mxu0 }
 0x2c4   : > { %v3594_v57 = vpack.c.bf16 %v2190_v54, %v2190_v54  ;;  %v2179_v27 = vmax.f32 %v2177_v49, %v2178_v18  ;;  %v2199_v58 = vrot.slane %v2198_v56, 4  ;;  %v1968_v62 = vmax.f32 %v1806_v43, 0.0 }
 0x2c5   : > { %v2176_v13 = vmax.f32 %v2174_v48, %v2175_v52  ;;  %v2197_v61 = vmax.f32 %v2195_v30, %v2196_v51  ;;  %v2214_v9 = vmax.f32 %v2212_v0, %v2213_v55  ;;  %v2733_v44 = vunpack.c.l.b16 %v3591_v17  ;;  %v4680_v52 = vpop.f32.mrf.mxu0 }
 0x2c6   : > { %v2799_v16 = vsel %vm2782_vm8, %v2731_v26, %v2798_v32  ;;  %v2180_v2 = vrot.slane %v2179_v27, 2  ;;  %v2200_v3 = vmax.f32 %v2198_v56, %v2199_v58  ;;  %v2736_v20 = vunpack.c.l.b16 %v3594_v57 }
 0x2c7   : > { %v2800_v46 = vsel %vm2784_vm9, %v2732_v8, %v2799_v16  ;;  %v3592_v6 = vpack.c.bf16 %v2176_v13, %v2176_v13  ;;  %v2215_v22 = vrot.slane %v2214_v9, 2  ;;  %v2219_v12 = vsel %vm2001_vm3, %v1968_v62, -inf }
 0x2c8   : > { %v2801_v7 = vsel %vm2786_vm10, %v2733_v44, %v2800_v46  ;;  %v2181_v11 = vmax.f32 %v2179_v27, %v2180_v2  ;;  %v2201_v63 = vrot.slane %v2200_v3, 2  ;;  %v3595_v21 = vpack.c.bf16 %v2197_v61, %v2197_v61 }
 0x2c9   : > { %v2839_v31 = vpack.c.b16 %v2801_v7, %v2801_v7  ;;  %v2734_v15 = vunpack.c.l.b16 %v3592_v6  ;;  %v2216_v23 = vmax.f32 %v2214_v9, %v2215_v22  ;;  %v2220_v29 = vrot.slane %v2219_v12, 4  ;;  %v4688_v6 = vpop.f32.mrf.mxu0 }
 0x2ca   : > { %v2182_v17 = vrot.slane %v2181_v11, 1  ;;  %v2202_v25 = vmax.f32 %v2200_v3, %v2201_v63  ;;  %v1798_v8 = vadd.f32 %v4498_v60, %v4607_v36  ;;  %v1819_v32 = vadd.f32 %v4610_v5, %v4498_v60 }
 0x2cb   : > { %2856 = vst.msk [vmem:[%s4556_s11 + $0x8] sm:$0xf] %vm2853_vm11, %v2839_v31  ;;  %v2217_v50 = vrot.slane %v2216_v23, 1  ;;  %v1811_v33 = vadd.f32 %v4498_v60, %v4614_v41  ;;  %v1822_v19 = vadd.f32 %v4620_v59, %v4498_v60  ;;  %v2221_v37 = vmax.f32 %v2219_v12, %v2220_v29 }
 0x2cc   : > { %v2183_v34 = vmax.f32 %v2181_v11, %v2182_v17  ;;  %v2203_v10 = vrot.slane %v2202_v25, 1  ;;  %v1966_v45 = vmax.f32 %v1798_v8, 0.0  ;;  %v1971_v36 = vmax.f32 %v1819_v32, 0.0  ;;  %v4696_v32 = vpop.f32.mrf.mxu0 }
 0x2cd   : > { %v2218_v40 = vmax.f32 %v2216_v23, %v2217_v50  ;;  %v1969_v42 = vmax.f32 %v1811_v33, 0.0  ;;  %v1972_v38 = vmax.f32 %v1822_v19, 0.0  ;;  %v2222_v30 = vrot.slane %v2221_v37, 2 }
 0x2ce   : > { %v3593_v43 = vpack.c.bf16 %v2183_v34, %v2183_v34  ;;  %v2204_v48 = vmax.f32 %v2202_v25, %v2203_v10  ;;  %v2205_v5 = vsel %vm2001_vm3, %v1966_v45, -inf  ;;  %v2737_v49 = vunpack.c.l.b16 %v3595_v21 }
 0x2cf   : > { %v2206_v41 = vrot.slane %v2205_v5, 4  ;;  %v2240_v53 = vsel %vm2001_vm3, %v1971_v36, -inf  ;;  %v2226_v59 = vsel %vm2001_vm3, %v1969_v42, -inf  ;;  %v2223_v18 = vmax.f32 %v2221_v37, %v2222_v30 }
 0x2d0   : > { %v2735_v35 = vunpack.c.l.b16 %v3593_v43  ;;  %v3596_v54 = vpack.c.bf16 %v2204_v48, %v2204_v48  ;;  %v2241_v0 = vrot.slane %v2240_v53, 4  ;;  %v3598_v51 = vpack.c.bf16 %v2218_v40, %v2218_v40 }
 0x2d1   : > { %v2207_v55 = vmax.f32 %v2205_v5, %v2206_v41  ;;  %v2227_v56 = vrot.slane %v2226_v59, 4  ;;  %v2247_v26 = vsel %vm2001_vm3, %v1972_v38, -inf  ;;  %v2224_v58 = vrot.slane %v2223_v18, 1 }
 0x2d2   : > { %v2802_v57 = vsel %vm2774_vm4, %v2735_v35, %v2734_v15  ;;  %v2738_v27 = vunpack.c.l.b16 %v3596_v54  ;;  %v2242_v13 = vmax.f32 %v2240_v53, %v2241_v0  ;;  %v2248_v44 = vrot.slane %v2247_v26, 4 }
 0x2d3   : > { %v2803_v61 = vsel %vm2776_vm5, %v2736_v20, %v2802_v57  ;;  %v2208_v9 = vrot.slane %v2207_v55, 2  ;;  %v2228_v62 = vmax.f32 %v2226_v59, %v2227_v56  ;;  %v2225_v2 = vmax.f32 %v2223_v18, %v2224_v58 }
 0x2d4   : > { %v2804_v16 = vsel %vm2778_vm6, %v2737_v49, %v2803_v61  ;;  %v2243_v3 = vrot.slane %v2242_v13, 2  ;;  %v1814_v46 = vadd.f32 %v4498_v60, %v4630_v4  ;;  %v2740_v22 = vunpack.c.l.b16 %v3598_v51  ;;  %v4702_v49 = vpop.f32.mrf.mxu0 }
 0x2d5   : > { %v2209_v7 = vmax.f32 %v2207_v55, %v2208_v9  ;;  %v2229_v11 = vrot.slane %v2228_v62, 2  ;;  %v2249_v63 = vmax.f32 %v2247_v26, %v2248_v44  ;;  %v2805_v12 = vsel %vm2780_vm7, %v2738_v27, %v2804_v16 }
 0x2d6   : > { %v2244_v31 = vmax.f32 %v2242_v13, %v2243_v3  ;;  %v1970_v20 = vmax.f32 %v1814_v46, 0.0  ;;  %v1835_v15 = vadd.f32 %v4634_v1, %v4498_v60  ;;  %v1827_v25 = vadd.f32 %v4498_v60, %v4641_v24  ;;  %v4707_v61 = vpop.f32.mrf.mxu0 }
 0x2d7   : > { %v2210_v21 = vrot.slane %v2209_v7, 1  ;;  %v2230_v23 = vmax.f32 %v2228_v62, %v2229_v11  ;;  %v2250_v17 = vrot.slane %v2249_v63, 2  ;;  %v3599_v4 = vpack.c.bf16 %v2225_v2, %v2225_v2 }
 0x2d8   : > { %v2245_v29 = vrot.slane %v2244_v31, 1  ;;  %v2233_v8 = vsel %vm2001_vm3, %v1970_v20, -inf  ;;  %v1975_v50 = vmax.f32 %v1835_v15, 0.0  ;;  %v1973_v45 = vmax.f32 %v1827_v25, 0.0 }
 0x2d9   : > { %v2211_v33 = vmax.f32 %v2209_v7, %v2210_v21  ;;  %v2231_v19 = vrot.slane %v2230_v23, 1  ;;  %v2251_v34 = vmax.f32 %v2249_v63, %v2250_v17  ;;  %v2234_v10 = vrot.slane %v2233_v8, 4 }
 0x2da   : > { %v2246_v37 = vmax.f32 %v2244_v31, %v2245_v29  ;;  %v2268_v1 = vsel %vm2001_vm3, %v1975_v50, -inf  ;;  %v1838_v40 = vadd.f32 %v4652_v28, %v4498_v60  ;;  %v2254_v30 = vsel %vm2001_vm3, %v1973_v45, -inf }
 0x2db   : > { %v3597_v36 = vpack.c.bf16 %v2211_v33, %v2211_v33  ;;  %v2232_v24 = vmax.f32 %v2230_v23, %v2231_v19  ;;  %v2252_v42 = vrot.slane %v2251_v34, 1  ;;  %v2235_v38 = vmax.f32 %v2233_v8, %v2234_v10  ;;  %v4725_v23 = vpop.f32.mrf.mxu0 }
 0x2dc   : > { %v3602_v43 = vpack.c.bf16 %v2246_v37, %v2246_v37  ;;  %v2269_v48 = vrot.slane %v2268_v1, 4  ;;  %v1976_v5 = vmax.f32 %v1838_v40, 0.0  ;;  %v2741_v54 = vunpack.c.l.b16 %v3599_v4 }
 0x2dd   : > { %v2739_v41 = vunpack.c.l.b16 %v3597_v36  ;;  %v3600_v53 = vpack.c.bf16 %v2232_v24, %v2232_v24  ;;  %v2253_v59 = vmax.f32 %v2251_v34, %v2252_v42  ;;  %v2236_v35 = vrot.slane %v2235_v38, 2  ;;  %v4730_v45 = vpop.f32.mrf.mxu0 }
 0x2de   : > { %v2270_v18 = vmax.f32 %v2268_v1, %v2269_v48  ;;  %v2255_v0 = vrot.slane %v2254_v30, 4  ;;  %v2275_v28 = vsel %vm2001_vm3, %v1976_v5, -inf  ;;  %v2744_v55 = vunpack.c.l.b16 %v3602_v43 }
 0x2df   : > { %v2806_v51 = vsel %vm2782_vm8, %v2739_v41, %v2805_v12  ;;  %v2742_v56 = vunpack.c.l.b16 %v3600_v53  ;;  %v2237_v26 = vmax.f32 %v2235_v38, %v2236_v35  ;;  %v2276_v13 = vrot.slane %v2275_v28, 4 }
 0x2e0   : > { %v2807_v57 = vsel %vm2784_vm9, %v2740_v22, %v2806_v51  ;;  %v2271_v27 = vrot.slane %v2270_v18, 2  ;;  %v2256_v58 = vmax.f32 %v2254_v30, %v2255_v0  ;;  %v3603_v62 = vpack.c.bf16 %v2253_v59, %v2253_v59  ;;  %v4738_v0 = vpop.f32.mrf.mxu0 }
 0x2e1   : > { %v2808_v9 = vsel %vm2786_vm10, %v2741_v54, %v2807_v57  ;;  %v2238_v44 = vrot.slane %v2237_v26, 1  ;;  %v1830_v16 = vadd.f32 %v4498_v60, %v4657_v47  ;;  %v2277_v7 = vmax.f32 %v2275_v28, %v2276_v13  ;;  %v4721_v47 = vld [vmem:[%s4838_s6] ss:$0 sm:$0xff] }
 0x2e2   : > { %v2840_v2 = vpack.c.b16 %v2808_v9, %v2808_v9  ;;  %v2272_v3 = vmax.f32 %v2270_v18, %v2271_v27  ;;  %v2257_v46 = vrot.slane %v2256_v58, 2  ;;  %v1851_v22 = vadd.f32 %v4663_v14, %v4498_v60 }
 0x2e3   : > { %v2239_v11 = vmax.f32 %v2237_v26, %v2238_v44  ;;  %v1974_v63 = vmax.f32 %v1830_v16, 0.0  ;;  %v1843_v12 = vadd.f32 %v4498_v60, %v4675_v39  ;;  %v2278_v15 = vrot.slane %v2277_v7, 2 }
 0x2e4   : > { %2857 = vst.msk [vmem:[%s4556_s11 + $0xc] sm:$0xf] %vm2853_vm11, %v2840_v2  ;;  %v2273_v31 = vrot.slane %v2272_v3, 1  ;;  %v2258_v20 = vmax.f32 %v2256_v58, %v2257_v46  ;;  %v1854_v21 = vadd.f32 %v4721_v47, %v4680_v52  ;;  %v1979_v25 = vmax.f32 %v1851_v22, 0.0  ;;  %v3986_v46 = vpop.f32.mrf.mxu0 }
 0x2e5   : > { %v3601_v17 = vpack.c.bf16 %v2239_v11, %v2239_v11  ;;  %v2261_v14 = vsel %vm2001_vm3, %v1974_v63, -inf  ;;  %v1977_v60 = vmax.f32 %v1843_v12, 0.0  ;;  %v2279_v29 = vmax.f32 %v2277_v7, %v2278_v15 }
 0x2e6   : > { %v2274_v39 = vmax.f32 %v2272_v3, %v2273_v31  ;;  %v2259_v4 = vrot.slane %v2258_v20, 1  ;;  %v2262_v8 = vrot.slane %v2261_v14, 4  ;;  %v2296_v33 = vsel %vm2001_vm3, %v1979_v25, -inf }
 0x2e7   : > { %v2743_v50 = vunpack.c.l.b16 %v3601_v17  ;;  %v2282_v19 = vsel %vm2001_vm3, %v1977_v60, -inf  ;;  %v1980_v34 = vmax.f32 %v1854_v21, 0.0  ;;  %v2280_v52 = vrot.slane %v2279_v29, 1 }
 0x2e8   : > { %v3606_v10 = vpack.c.bf16 %v2274_v39, %v2274_v39  ;;  %v2260_v37 = vmax.f32 %v2258_v20, %v2259_v4  ;;  %v2263_v1 = vmax.f32 %v2261_v14, %v2262_v8  ;;  %v2297_v36 = vrot.slane %v2296_v33, 4  ;;  %v4750_v39 = vpop.f32.mrf.mxu0 }
 0x2e9   : > { %v2809_v40 = vsel %vm2774_vm4, %v2743_v50, %v2742_v56  ;;  %v2283_v24 = vrot.slane %v2282_v19, 4  ;;  %v2303_v42 = vsel %vm2001_vm3, %v1980_v34, -inf  ;;  %v2745_v38 = vunpack.c.l.b16 %v3603_v62 }
 0x2ea   : > { %v2810_v43 = vsel %vm2776_vm5, %v2744_v55, %v2809_v40  ;;  %v3604_v48 = vpack.c.bf16 %v2260_v37, %v2260_v37  ;;  %v2281_v30 = vmax.f32 %v2279_v29, %v2280_v52  ;;  %v2264_v5 = vrot.slane %v2263_v1, 2 }
 0x2eb   : > { %v2298_v41 = vmax.f32 %v2296_v33, %v2297_v36  ;;  %v2284_v53 = vmax.f32 %v2282_v19, %v2283_v24  ;;  %v2748_v59 = vunpack.c.l.b16 %v3606_v10  ;;  %v2811_v35 = vsel %vm2778_vm6, %v2745_v38, %v2810_v43  ;;  %v3989_v43 = vpop.f32.mrf.mxu0 }
 0x2ec   : > { %v2304_v54 = vrot.slane %v2303_v42, 4  ;;  %v1846_v18 = vadd.f32 %v4721_v47, %v4688_v6  ;;  %v2265_v28 = vmax.f32 %v2263_v1, %v2264_v5  ;;  %v1867_v55 = vadd.f32 %v4721_v47, %v4696_v32 }
 0x2ed   : > { %v2299_v51 = vrot.slane %v2298_v41, 2  ;;  %v2285_v56 = vrot.slane %v2284_v53, 2  ;;  %v2746_v26 = vunpack.c.l.b16 %v3604_v48  ;;  %v3607_v57 = vpack.c.bf16 %v2281_v30, %v2281_v30 }
 0x2ee   : > { %v2305_v27 = vmax.f32 %v2303_v42, %v2304_v54  ;;  %v1978_v58 = vmax.f32 %v1846_v18, 0.0  ;;  %v2266_v13 = vrot.slane %v2265_v28, 1  ;;  %v1983_v44 = vmax.f32 %v1867_v55, 0.0 }
 0x2ef   : > { %v2300_v9 = vmax.f32 %v2298_v41, %v2299_v51  ;;  %v2286_v62 = vmax.f32 %v2284_v53, %v2285_v56  ;;  %v1859_v6 = vadd.f32 %v4721_v47, %v4702_v49  ;;  %v1870_v3 = vadd.f32 %v4721_v47, %v4707_v61 }
 0x2f0   : > { %v2306_v16 = vrot.slane %v2305_v27, 2  ;;  %v2289_v2 = vsel %vm2001_vm3, %v1978_v58, -inf  ;;  %v2267_v7 = vmax.f32 %v2265_v28, %v2266_v13  ;;  %v2324_v12 = vsel %vm2001_vm3, %v1983_v44, -inf }
 0x2f1   : > { %v2301_v32 = vrot.slane %v2300_v9, 1  ;;  %v2287_v11 = vrot.slane %v2286_v62, 1  ;;  %v2290_v63 = vrot.slane %v2289_v2, 4  ;;  %v1981_v31 = vmax.f32 %v1859_v6, 0.0 }
 0x2f2   : > { %v2307_v22 = vmax.f32 %v2305_v27, %v2306_v16  ;;  %v1984_v20 = vmax.f32 %v1870_v3, 0.0  ;;  %v3605_v15 = vpack.c.bf16 %v2267_v7, %v2267_v7  ;;  %v2325_v60 = vrot.slane %v2324_v12, 4 }
 0x2f3   : > { %v2302_v21 = vmax.f32 %v2300_v9, %v2301_v32  ;;  %v2288_v17 = vmax.f32 %v2286_v62, %v2287_v11  ;;  %v2291_v14 = vmax.f32 %v2289_v2, %v2290_v63  ;;  %v2310_v49 = vsel %vm2001_vm3, %v1981_v31, -inf }
 0x2f4   : > { %v2308_v25 = vrot.slane %v2307_v22, 1  ;;  %v2331_v61 = vsel %vm2001_vm3, %v1984_v20, -inf  ;;  %v2812_v4 = vsel %vm2780_vm7, %v2746_v26, %v2811_v35  ;;  %v2747_v29 = vunpack.c.l.b16 %v3605_v15 }
 0x2f5   : > { %v3608_v8 = vpack.c.bf16 %v2288_v17, %v2288_v17  ;;  %v2292_v50 = vrot.slane %v2291_v14, 2  ;;  %v2326_v19 = vmax.f32 %v2324_v12, %v2325_v60  ;;  %v2311_v34 = vrot.slane %v2310_v49, 4 }
 0x2f6   : > { %v2309_v33 = vmax.f32 %v2307_v22, %v2308_v25  ;;  %v2332_v10 = vrot.slane %v2331_v61, 4  ;;  %v2749_v37 = vunpack.c.l.b16 %v3607_v57  ;;  %v2813_v52 = vsel %vm2782_vm8, %v2747_v29, %v2812_v4 }
 0x2f7   : > { %v3610_v1 = vpack.c.bf16 %v2302_v21, %v2302_v21  ;;  %v2293_v40 = vmax.f32 %v2291_v14, %v2292_v50  ;;  %v2814_v36 = vsel %vm2784_vm9, %v2748_v59, %v2813_v52  ;;  %v2750_v24 = vunpack.c.l.b16 %v3608_v8 }
 0x2f8   : > { %v2327_v42 = vrot.slane %v2326_v19, 2  ;;  %v2312_v38 = vmax.f32 %v2310_v49, %v2311_v34  ;;  %v2815_v48 = vsel %vm2786_vm10, %v2749_v37, %v2814_v36  ;;  %v2333_v5 = vmax.f32 %v2331_v61, %v2332_v10 }
 0x2f9   : > { %v2294_v30 = vrot.slane %v2293_v40, 1  ;;  %v1862_v41 = vadd.f32 %v4721_v47, %v4725_v23  ;;  %v2841_v53 = vpack.c.b16 %v2815_v48, %v2815_v48  ;;  %v3611_v35 = vpack.c.bf16 %v2309_v33, %v2309_v33  ;;  %v1890_v23 = vpop.f32.mrf.mxu0 }
 0x2fa   : > { %v2328_v54 = vmax.f32 %v2326_v19, %v2327_v42  ;;  %v2313_v18 = vrot.slane %v2312_v38, 2  ;;  %v2334_v51 = vrot.slane %v2333_v5, 2  ;;  %v1883_v59 = vadd.f32 %v4721_v47, %v4730_v45 }
 0x2fb   : > { %v2295_v28 = vmax.f32 %v2293_v40, %v2294_v30  ;;  %v1982_v56 = vmax.f32 %v1862_v41, 0.0  ;;  %2858 = vst.msk [vmem:[%s4556_s11 + $0x10] sm:$0xf] %vm2853_vm11, %v2841_v53  ;;  %v1875_v57 = vadd.f32 %v4721_v47, %v4738_v0  ;;  %v1886_v27 = vadd.f32 %v4721_v47, %v3986_v46  ;;  %v3990_v46 = vpop.f32.mrf.mxu0 }
 0x2fc   : > { %v2329_v55 = vrot.slane %v2328_v54, 1  ;;  %v2314_v26 = vmax.f32 %v2312_v38, %v2313_v18  ;;  %v2335_v13 = vmax.f32 %v2333_v5, %v2334_v51  ;;  %v1987_v62 = vmax.f32 %v1883_v59, 0.0 }
 0x2fd   : > { %v3609_v58 = vpack.c.bf16 %v2295_v28, %v2295_v28  ;;  %v2317_v9 = vsel %vm2001_vm3, %v1982_v56, -inf  ;;  %v1985_v6 = vmax.f32 %v1875_v57, 0.0  ;;  %v1988_v32 = vmax.f32 %v1886_v27, 0.0  ;;  %v1893_v33 = vpop.f32.mrf.mxu0 }
 0x2fe   : > { %v2330_v44 = vmax.f32 %v2328_v54, %v2329_v55  ;;  %v2315_v16 = vrot.slane %v2314_v26, 1  ;;  %v2318_v2 = vrot.slane %v2317_v9, 4  ;;  %v2336_v3 = vrot.slane %v2335_v13, 1 }
 0x2ff   : > { %v2751_v45 = vunpack.c.l.b16 %v3609_v58  ;;  %v2352_v7 = vsel %vm2001_vm3, %v1987_v62, -inf  ;;  %v2752_v11 = vunpack.c.l.b16 %v3610_v1  ;;  %v2338_v20 = vsel %vm2001_vm3, %v1985_v6, -inf  ;;  %v3993_v53 = vpop.f32.mrf.mxu0 }
 0x300   : > { %v2316_v63 = vmax.f32 %v2314_v26, %v2315_v16  ;;  %v2319_v0 = vmax.f32 %v2317_v9, %v2318_v2  ;;  %v2353_v22 = vrot.slane %v2352_v7, 4  ;;  %v2337_v31 = vmax.f32 %v2335_v13, %v2336_v3 }
 0x301   : > { %v2816_v12 = vsel %vm2774_vm4, %v2751_v45, %v2750_v24  ;;  %v2359_v15 = vsel %vm2001_vm3, %v1988_v32, -inf  ;;  %v2753_v21 = vunpack.c.l.b16 %v3611_v35  ;;  %v3614_v60 = vpack.c.bf16 %v2330_v44, %v2330_v44  ;;  %v1906_v62 = vpop.f32.mrf.mxu0 }
 0x302   : > { %v2817_v17 = vsel %vm2776_vm5, %v2752_v11, %v2816_v12  ;;  %v3612_v14 = vpack.c.bf16 %v2316_v63, %v2316_v63  ;;  %v2320_v25 = vrot.slane %v2319_v0, 2  ;;  %v2354_v49 = vmax.f32 %v2352_v7, %v2353_v22 }
 0x303   : > { %v2339_v61 = vrot.slane %v2338_v20, 4  ;;  %v2818_v4 = vsel %vm2778_vm6, %v2753_v21, %v2817_v17  ;;  %v2360_v8 = vrot.slane %v2359_v15, 4  ;;  %v1878_v50 = vadd.f32 %v4721_v47, %v4750_v39  ;;  %v3994_v12 = vpop.f32.mrf.mxu0 }
 0x304   : > { %v2321_v29 = vmax.f32 %v2319_v0, %v2320_v25  ;;  %v3615_v19 = vpack.c.bf16 %v2337_v31, %v2337_v31  ;;  %v2355_v34 = vrot.slane %v2354_v49, 2  ;;  %v1899_v37 = vadd.f32 %v4721_v47, %v3989_v43 }
 0x305   : > { %v2340_v10 = vmax.f32 %v2338_v20, %v2339_v61  ;;  %v2754_v52 = vunpack.c.l.b16 %v3612_v14  ;;  %v2361_v40 = vmax.f32 %v2359_v15, %v2360_v8  ;;  %v1986_v36 = vmax.f32 %v1878_v50, 0.0 }
 0x306   : > { %v2322_v1 = vrot.slane %v2321_v29, 1  ;;  %v2356_v24 = vmax.f32 %v2354_v49, %v2355_v34  ;;  %v1991_v38 = vmax.f32 %v1899_v37, 0.0  ;;  %v1891_v48 = vadd.f32 %v4721_v47, %v1890_v23 }
 0x307   : > { %v2341_v42 = vrot.slane %v2340_v10, 2  ;;  %v2362_v5 = vrot.slane %v2361_v40, 2  ;;  %v2345_v41 = vsel %vm2001_vm3, %v1986_v36, -inf  ;;  %v1902_v39 = vadd.f32 %v4721_v47, %v3990_v46 }
 0x308   : > { %v2323_v30 = vmax.f32 %v2321_v29, %v2322_v1  ;;  %v2357_v35 = vrot.slane %v2356_v24, 1  ;;  %v2346_v18 = vrot.slane %v2345_v41, 4  ;;  %v2380_v43 = vsel %vm2001_vm3, %v1991_v38, -inf }
 0x309   : > { %v2342_v54 = vmax.f32 %v2340_v10, %v2341_v42  ;;  %v2363_v51 = vmax.f32 %v2361_v40, %v2362_v5  ;;  %v2381_v56 = vrot.slane %v2380_v43, 4  ;;  %v1989_v59 = vmax.f32 %v1891_v48, 0.0  ;;  %v1909_v10 = vpop.f32.mrf.mxu0 }
 0x30a   : > { %v3613_v28 = vpack.c.bf16 %v2323_v30, %v2323_v30  ;;  %v2756_v55 = vunpack.c.l.b16 %v3614_v60  ;;  %v2757_v26 = vunpack.c.l.b16 %v3615_v19  ;;  %v2347_v57 = vmax.f32 %v2345_v41, %v2346_v18 }
 0x30b   : > { %v1992_v27 = vmax.f32 %v1902_v39, 0.0  ;;  %v2343_v58 = vrot.slane %v2342_v54, 1  ;;  %v2382_v13 = vmax.f32 %v2380_v43, %v2381_v56  ;;  %v2366_v9 = vsel %vm2001_vm3, %v1989_v59, -inf }
 0x30c   : > { %v2755_v23 = vunpack.c.l.b16 %v3613_v28  ;;  %v2819_v44 = vsel %vm2780_vm7, %v2754_v52, %v2818_v4  ;;  %v2358_v16 = vmax.f32 %v2356_v24, %v2357_v35  ;;  %v2348_v2 = vrot.slane %v2347_v57, 2 }
 0x30d   : > { %v2367_v6 = vrot.slane %v2366_v9, 4  ;;  %v2364_v3 = vrot.slane %v2363_v51, 1  ;;  %v2383_v7 = vrot.slane %v2382_v13, 2  ;;  %v2387_v32 = vsel %vm2001_vm3, %v1992_v27, -inf }
 0x30e   : > { %v2820_v45 = vsel %vm2782_vm8, %v2755_v23, %v2819_v44  ;;  %v2349_v63 = vmax.f32 %v2347_v57, %v2348_v2  ;;  %v2344_v22 = vmax.f32 %v2342_v54, %v2343_v58  ;;  %v3618_v20 = vpack.c.bf16 %v2358_v16, %v2358_v16 }
 0x30f   : > { %v2821_v11 = vsel %vm2784_vm9, %v2756_v55, %v2820_v45  ;;  %v2368_v46 = vmax.f32 %v2366_v9, %v2367_v6  ;;  %v2388_v21 = vrot.slane %v2387_v32, 4  ;;  %v2365_v17 = vmax.f32 %v2363_v51, %v2364_v3 }
 0x310   : > { %v2822_v0 = vsel %vm2786_vm10, %v2757_v26, %v2821_v11  ;;  %v2350_v15 = vrot.slane %v2349_v63, 1  ;;  %v2384_v14 = vmax.f32 %v2382_v13, %v2383_v7  ;;  %v1894_v60 = vadd.f32 %v4721_v47, %v1893_v33 }
 0x311   : > { %v2842_v31 = vpack.c.b16 %v2822_v0, %v2822_v0  ;;  %v2369_v25 = vrot.slane %v2368_v46, 2  ;;  %v2389_v61 = vmax.f32 %v2387_v32, %v2388_v21  ;;  %v1915_v4 = vadd.f32 %v4721_v47, %v3993_v53  ;;  %v3997_v53 = vpop.f32.mrf.mxu0 }
 0x312   : > { %v2351_v49 = vmax.f32 %v2349_v63, %v2350_v15  ;;  %v1907_v29 = vadd.f32 %v4721_v47, %v1906_v62  ;;  %v3616_v8 = vpack.c.bf16 %v2344_v22, %v2344_v22  ;;  %v1990_v19 = vmax.f32 %v1894_v60, 0.0 }
 0x313   : > { %2859 = vst.msk [vmem:[%s4556_s11 + $0x14] sm:$0xf] %vm2853_vm11, %v2842_v31  ;;  %v2370_v50 = vmax.f32 %v2368_v46, %v2369_v25  ;;  %v1918_v34 = vadd.f32 %v4721_v47, %v3994_v12  ;;  %v2390_v52 = vrot.slane %v2389_v61, 2  ;;  %v1995_v1 = vmax.f32 %v1915_v4, 0.0  ;;  %v1922_v13 = vpop.f32.mrf.mxu0 }
 0x314   : > { %v3617_v37 = vpack.c.bf16 %v2351_v49, %v2351_v49  ;;  %v1993_v40 = vmax.f32 %v1907_v29, 0.0  ;;  %v2385_v36 = vrot.slane %v2384_v14, 1  ;;  %v2373_v24 = vsel %vm2001_vm3, %v1990_v19, -inf }
 0x315   : > { %v2371_v33 = vrot.slane %v2370_v50, 1  ;;  %v1996_v42 = vmax.f32 %v1918_v34, 0.0  ;;  %v2391_v48 = vmax.f32 %v2389_v61, %v2390_v52  ;;  %v2374_v30 = vrot.slane %v2373_v24, 4  ;;  %v3998_v31 = vpop.f32.mrf.mxu0 }
 0x316   : > { %v2759_v38 = vunpack.c.l.b16 %v3617_v37  ;;  %v2408_v5 = vsel %vm2001_vm3, %v1995_v1, -inf  ;;  %v2758_v41 = vunpack.c.l.b16 %v3616_v8  ;;  %v2394_v39 = vsel %vm2001_vm3, %v1993_v40, -inf }
 0x317   : > { %v3619_v35 = vpack.c.bf16 %v2365_v17, %v2365_v17  ;;  %v2372_v54 = vmax.f32 %v2370_v50, %v2371_v33  ;;  %v2375_v18 = vmax.f32 %v2373_v24, %v2374_v30  ;;  %v2395_v43 = vrot.slane %v2394_v39, 4 }
 0x318   : > { %v2823_v28 = vsel %vm2774_vm4, %v2759_v38, %v2758_v41  ;;  %v2392_v51 = vrot.slane %v2391_v48, 1  ;;  %v2409_v56 = vrot.slane %v2408_v5, 4  ;;  %v2415_v59 = vsel %vm2001_vm3, %v1996_v42, -inf }
 0x319   : > { %v2760_v55 = vunpack.c.l.b16 %v3618_v20  ;;  %v2386_v26 = vmax.f32 %v2384_v14, %v2385_v36  ;;  %v2376_v57 = vrot.slane %v2375_v18, 2  ;;  %v2396_v27 = vmax.f32 %v2394_v39, %v2395_v43 }
 0x31a   : > { %v2416_v23 = vrot.slane %v2415_v59, 4  ;;  %v1910_v58 = vadd.f32 %v4721_v47, %v1909_v10  ;;  %v3620_v62 = vpack.c.bf16 %v2372_v54, %v2372_v54  ;;  %v1931_v16 = vadd.f32 %v4721_v47, %v3997_v53 }
 0x31b   : > { %v2824_v9 = vsel %vm2776_vm5, %v2760_v55, %v2823_v28  ;;  %v2377_v44 = vmax.f32 %v2375_v18, %v2376_v57  ;;  %v2761_v2 = vunpack.c.l.b16 %v3619_v35  ;;  %v2393_v6 = vmax.f32 %v2391_v48, %v2392_v51 }
 0x31c   : > { %v2410_v45 = vmax.f32 %v2408_v5, %v2409_v56  ;;  %v1994_v3 = vmax.f32 %v1910_v58, 0.0  ;;  %v3622_v7 = vpack.c.bf16 %v2386_v26, %v2386_v26  ;;  %v2397_v11 = vrot.slane %v2396_v27, 2  ;;  %v1925_v5 = vpop.f32.mrf.mxu0 }
 0x31d   : > { %v2378_v32 = vrot.slane %v2377_v44, 1  ;;  %v1999_v63 = vmax.f32 %v1931_v16, 0.0  ;;  %v2825_v0 = vsel %vm2778_vm6, %v2761_v2, %v2824_v9  ;;  %v2417_v22 = vmax.f32 %v2415_v59, %v2416_v23 }
 0x31e   : > { %v2401_v46 = vsel %vm2001_vm3, %v1994_v3, -inf  ;;  %v1923_v12 = vadd.f32 %v4721_v47, %v1922_v13  ;;  %v2762_v20 = vunpack.c.l.b16 %v3620_v62  ;;  %v3623_v14 = vpack.c.bf16 %v2393_v6, %v2393_v6 }
 0x31f   : > { %v2379_v15 = vmax.f32 %v2377_v44, %v2378_v32  ;;  %v2402_v21 = vrot.slane %v2401_v46, 4  ;;  %v2436_v17 = vsel %vm2001_vm3, %v1999_v63, -inf  ;;  %v2411_v25 = vrot.slane %v2410_v45, 2 }
 0x320   : > { %v2437_v60 = vrot.slane %v2436_v17, 4  ;;  %v1997_v49 = vmax.f32 %v1923_v12, 0.0  ;;  %v2398_v4 = vmax.f32 %v2396_v27, %v2397_v11  ;;  %v1934_v8 = vadd.f32 %v4721_v47, %v3998_v31 }
 0x321   : > { %v3621_v61 = vpack.c.bf16 %v2379_v15, %v2379_v15  ;;  %v2403_v29 = vmax.f32 %v2401_v46, %v2402_v21  ;;  %v2764_v50 = vunpack.c.l.b16 %v3622_v7  ;;  %v2418_v19 = vrot.slane %v2417_v22, 2 }
 0x322   : > { %v2422_v34 = vsel %vm2001_vm3, %v1997_v49, -inf  ;;  %v2826_v10 = vsel %vm2780_vm7, %v2762_v20, %v2825_v0  ;;  %v2765_v40 = vunpack.c.l.b16 %v3623_v14  ;;  %v2412_v36 = vmax.f32 %v2410_v45, %v2411_v25 }
 0x323   : > { %v2763_v37 = vunpack.c.l.b16 %v3621_v61  ;;  %v2404_v52 = vrot.slane %v2403_v29, 2  ;;  %v2423_v1 = vrot.slane %v2422_v34, 4  ;;  %v2438_v33 = vmax.f32 %v2436_v17, %v2437_v60 }
 0x324   : > { %v2000_v24 = vmax.f32 %v1934_v8, 0.0  ;;  %v2399_v38 = vrot.slane %v2398_v4, 1  ;;  %v2419_v39 = vmax.f32 %v2417_v22, %v2418_v19  ;;  %v2413_v51 = vrot.slane %v2412_v36, 1 }
 0x325   : > { %v2827_v42 = vsel %vm2782_vm8, %v2763_v37, %v2826_v10  ;;  %v2405_v48 = vmax.f32 %v2403_v29, %v2404_v52  ;;  %v2424_v30 = vmax.f32 %v2422_v34, %v2423_v1  ;;  %v2439_v56 = vrot.slane %v2438_v33, 2 }
 0x326   : > { %v2828_v41 = vsel %vm2784_vm9, %v2764_v50, %v2827_v42  ;;  %v2443_v53 = vsel %vm2001_vm3, %v2000_v24, -inf  ;;  %v1926_v59 = vadd.f32 %v4721_v47, %v1925_v5  ;;  %v2400_v55 = vmax.f32 %v2398_v4, %v2399_v38 }
 0x327   : > { %v2829_v35 = vsel %vm2786_vm10, %v2765_v40, %v2828_v41  ;;  %v2406_v54 = vrot.slane %v2405_v48, 1  ;;  %v2425_v18 = vrot.slane %v2424_v30, 2  ;;  %v2444_v43 = vrot.slane %v2443_v53, 4 }
 0x328   : > { %v2843_v28 = vpack.c.b16 %v2829_v35, %v2829_v35  ;;  %v1998_v23 = vmax.f32 %v1926_v59, 0.0  ;;  %v2420_v58 = vrot.slane %v2419_v39, 1  ;;  %v2414_v62 = vmax.f32 %v2412_v36, %v2413_v51 }
 0x329   : > { %v2407_v26 = vmax.f32 %v2405_v48, %v2406_v54  ;;  %v2426_v57 = vmax.f32 %v2424_v30, %v2425_v18  ;;  %v2445_v27 = vmax.f32 %v2443_v53, %v2444_v43  ;;  %v2440_v44 = vmax.f32 %v2438_v33, %v2439_v56 }
 0x32a   : > { %2860 = vst.msk [vmem:[%s4556_s11 + $0x18] sm:$0xf] %vm2853_vm11, %v2843_v28  ;;  %v2429_v2 = vsel %vm2001_vm3, %v1998_v23, -inf  ;;  %v3624_v6 = vpack.c.bf16 %v2400_v55, %v2400_v55  ;;  %v2421_v7 = vmax.f32 %v2419_v39, %v2420_v58  ;;  %v3626_v11 = vpack.c.bf16 %v2414_v62, %v2414_v62 }
 0x32b   : > { %v3625_v13 = vpack.c.bf16 %v2407_v26, %v2407_v26  ;;  %v2446_v9 = vrot.slane %v2445_v27, 2  ;;  %v2427_v16 = vrot.slane %v2426_v57, 1  ;;  %v2430_v3 = vrot.slane %v2429_v2, 4 }
 0x32c   : > { %v2441_v63 = vrot.slane %v2440_v44, 1  ;;  %v2766_v22 = vunpack.c.l.b16 %v3624_v6  ;;  %v3627_v31 = vpack.c.bf16 %v2421_v7, %v2421_v7  ;;  %v2768_v21 = vunpack.c.l.b16 %v3626_v11 }
 0x32d   : > { %v2447_v45 = vmax.f32 %v2445_v27, %v2446_v9  ;;  %v2767_v47 = vunpack.c.l.b16 %v3625_v13  ;;  %v2431_v32 = vmax.f32 %v2429_v2, %v2430_v3  ;;  %v2428_v0 = vmax.f32 %v2426_v57, %v2427_v16 }
 0x32e   : > { %v2442_v17 = vmax.f32 %v2440_v44, %v2441_v63  ;;  %v2769_v61 = vunpack.c.l.b16 %v3627_v31 }
 0x32f   : > { %v2448_v46 = vrot.slane %v2447_v45, 1  ;;  %v2432_v12 = vrot.slane %v2431_v32, 2  ;;  %v2830_v20 = vsel %vm2774_vm4, %v2767_v47, %v2766_v22  ;;  %v3628_v14 = vpack.c.bf16 %v2428_v0, %v2428_v0 }
 0x330   : > { %v2831_v49 = vsel %vm2776_vm5, %v2768_v21, %v2830_v20  ;;  %v3630_v29 = vpack.c.bf16 %v2442_v17, %v2442_v17 }
 0x331   : > { %v2433_v15 = vmax.f32 %v2431_v32, %v2432_v12  ;;  %v2449_v25 = vmax.f32 %v2447_v45, %v2448_v46  ;;  %v2770_v8 = vunpack.c.l.b16 %v3628_v14  ;;  %v2832_v50 = vsel %vm2778_vm6, %v2769_v61, %v2831_v49 }
 0x332   : > { %v2772_v37 = vunpack.c.l.b16 %v3630_v29 }
 0x333   : > { %v2434_v60 = vrot.slane %v2433_v15, 1  ;;  %v3631_v19 = vpack.c.bf16 %v2449_v25, %v2449_v25  ;;  %v2833_v52 = vsel %vm2780_vm7, %v2770_v8, %v2832_v50 }
 0x335   : > { %v2435_v4 = vmax.f32 %v2433_v15, %v2434_v60  ;;  %v2773_v1 = vunpack.c.l.b16 %v3631_v19 }
 0x337   : > { %v3629_v34 = vpack.c.bf16 %v2435_v4, %v2435_v4 }
 0x339   : > { %v2771_v10 = vunpack.c.l.b16 %v3629_v34 }
 0x33b   : > { %v2834_v40 = vsel %vm2782_vm8, %v2771_v10, %v2833_v52 }
 0x33c   : > { %v2835_v36 = vsel %vm2784_vm9, %v2772_v37, %v2834_v40 }
 0x33d   : > { %v2836_v33 = vsel %vm2786_vm10, %v2773_v1, %v2835_v36 }
 0x33e   : > { %v2844_v24 = vpack.c.b16 %v2836_v33, %v2836_v33 }
 0x340   : > { %2861 = vst.msk [vmem:[%s4556_s11 + $0x1c] sm:$0xf] %vm2853_vm11, %v2844_v24 }
 0x341 PF: > { %s17_s26 = sadd.s32 1, %s4086_s26   ;;  %s4841_s24 = smov %s4082_s25 }
 0x342   : > { %p14_p6 = scmp.ge.s32.totalorder %s17_s26, 4   ;;  %s4842_s25 = smov %s4844_s27 }
 0x344   :  { %16 = sbr.rel (!%p14_p6) target bundleno = 2 (0x2), region = 86 }

// kernel: _lambda_.10
= control target key start
LH: loop header
LB: loop body
LE: loop exit
PB: predicated region body
PF: predicated region fallthrough
CT: control target
= control target key end

     0   :  { %s2486_s24 = smov 0   ;;  %s2488_s25 = smov 0   ;;  %s2796_s0 = inlined_call_operand.vmem [shape: bf16[64,8,72], index: 0, kind: input, shape index: {}]   ;;  %s2797_s1 = inlined_call_operand.vmem [shape: bf16[72,64], index: 1, kind: input, shape index: {}]   ;;  %s2798_s2 = inlined_call_operand.vmem [shape: f32[1,64], index: 2, kind: input, shape index: {}]   ;;  %s2799_s3 = inlined_call_operand.vmem [shape: bf16[64,64], index: 3, kind: input, shape index: {}]   ;;  %s2800_s4 = inlined_call_operand.vmem [shape: f32[1,64], index: 4, kind: input, shape index: {}]   ;;  %s2801_s5 = inlined_call_operand.vmem [shape: bf16[64,128], index: 5, kind: input, shape index: {}]   ;;  %s2802_s6 = inlined_call_operand.vmem [shape: f32[1,128], index: 6, kind: input, shape index: {}]   ;;  %s2803_s7 = inlined_call_operand.vmem [shape: bf16[64,128], index: 7, kind: output, shape index: {}]  }
   0x1   :  { %s2490_s26 = smov 0  }
   0x2 LB: > { %s29_s27 = sadd.s32 1, %s2440_s25  ;;  %p1962_p0 = scmp.ge.s32.totalorder %s2444_s26, 1  ;;  %s2444_s26 = sphi %s2490_s26, %s17_s26   ;;  %s2440_s25 = sphi %s2488_s25, %s2806_s25   ;;  %s2436_s24 = sphi %s2486_s24, %s2805_s24  }
   0x3   : > { %p31_p1 = scmp.ge.s32.totalorder %s29_s27, 2  ;;  %p255_p2 = scmp.lt.s32.totalorder %s2444_s26, 3 }
   0x5   : > { %s2808_s27 = smov (%p31_p1, %s29_s27), 0  ;;  %p256_p3 = pnand %p1962_p0, %p255_p2 }
   0x6   : > { %s1963_s9 = sshll.u32 (!%p256_p3), %s2436_s24, 5  ;;  %s1965_s23 = sshll.u32 (!%p256_p3), %s2436_s24, 2 }
   0x7   : > { %259 = sbr.rel (%p256_p3) target bundleno = 746 (0x2ea), region = 48  ;;  %p291_p4 = scmp.lt.s32.totalorder (!%p256_p3), %s1963_s9, 63 }
   0x8   : > { %p2714_p5 = scmp.lt.s32.totalorder (!%p256_p3), %s1965_s23, 7 }
   0xc   : > { %v2393_v0 = vld [vmem:[%s2797_s1 + $0x20] ss:$0 sps:$4 sm:$0xff]   ;;  %vm510_vm0 = vcmask 1043456   ;;  %v2394_v1 = vld [vmem:[%s2797_s1 + $0x18] sm:$0xff]   ;;  %v2395_v3 = vld [vmem:[%s2797_s1 + $0x10] sm:$0xff]   ;;  %s2810_s9 = smov (!%p291_p4, %s1963_s9), 63 }
   0xd   : > { %2368 = vmatprep.subr.msk.bf16.mxu0 %vm510_vm0, %v2393_v0  ;;  %v512_v2 = vsel %vm510_vm0, %v2393_v0, 0  ;;  %v2414_v4 = vld [vmem:[%s2799_s3 + $0x18] sm:$0xff]   ;;  %v2415_v5 = vld [vmem:[%s2799_s3 + $0x10] sm:$0xff]   ;;  %v2396_v6 = vld [vmem:[%s2797_s1 + $0x8] sm:$0xff]   ;;  %s1964_s18 = sshll.u32 %s2810_s9, 2  ;;  %vm461_vm1 = vcmask 588800  }
   0xe   : > { %2239 = vmatpush3.bf16.msra.mxu0 %v512_v2  ;;  %2360 = vmatprep.subr.bf16.mxu1 %v2414_v4  ;;  %s2528_s21 = scalar_lea.vmem %s2796_s0, %s1964_s18  ;;  %v2416_v8 = vld [vmem:[%s2799_s3 + $0x8] sm:$0xff]   ;;  %v2397_v9 = vld [vmem:[%s2797_s1] sm:$0xff]   ;;  %v2574_v26 = vld [vmem:[%s2801_s5 + $0x18] sm:$0xff]   ;;  %vm762_vm2 = vcmask 523264   ;;  %vm1656_vm3 = vcmask 1041409   ;;  %vm1658_vm4 = vcmask 1042434  }
   0xf   : > { %2240 = vmatprep.subr.bf16.mxu0 %v2394_v1  ;;  %2364 = vmatpush3.bf16.msra.mxu1 %v2414_v4  ;;  %v2398_v7 = vld [vmem:[%s2528_s21] sm:$0xff]   ;;  %v2399_v11 = vld [vmem:[%s2528_s21 + $0x8] sm:$0xff]   ;;  %v2400_v12 = vld [vmem:[%s2528_s21 + $0x10] sm:$0xff]   ;;  %vm1660_vm5 = vcmask 1043459   ;;  %vm1662_vm6 = vcmask 1044484   ;;  %vm1664_vm7 = vcmask 1045509  }
  0x10   : > { %2361 = vmatprep.subr.bf16.mxu1 %v2415_v5  ;;  %2248 = vmatprep.mubr.msk.bf16.mxu0 %vm461_vm1, %v2398_v7  ;;  %v2417_v10 = vld [vmem:[%s2799_s3] sm:$0xff]   ;;  %v2401_v13 = vld [vmem:[%s2528_s21 + $0x18] sm:$0xff]   ;;  %v2403_v15 = vld [vmem:[%s2528_s21 + $0x28] sm:$0xff]   ;;  %vm1666_vm8 = vcmask 1046534   ;;  %vm1668_vm9 = vcmask 1047559   ;;  %s2812_s23 = smov (!%p2714_p5, %s1965_s23), 7 }
  0x11   : > { %v2402_v14 = vld [vmem:[%s2528_s21 + $0x20] sm:$0xff]   ;;  %v2404_v16 = vld [vmem:[%s2528_s21 + $0x30] sm:$0xff]   ;;  %v2405_v17 = vld [vmem:[%s2528_s21 + $0x38] sm:$0xff]   ;;  %s1966_s24 = sshll.u32 %s2812_s23, 2 }
  0x12   : > { %2241 = vmatpush3.bf16.msra.mxu0 %v2394_v1  ;;  %v2406_v18 = vld [vmem:[%s2528_s21 + $0x40] sm:$0xff]   ;;  %v2407_v19 = vld [vmem:[%s2528_s21 + $0x48] sm:$0xff]   ;;  %v2408_v20 = vld [vmem:[%s2528_s21 + $0x50] sm:$0xff]   ;;  %s2738_s8 = scalar_lea.vmem %s2803_s7, %s1966_s24 }
  0x13   : > { %2242 = vmatprep.subr.bf16.mxu0 %v2395_v3  ;;  %2365 = vmatpush3.bf16.msra.mxu1 %v2415_v5  ;;  %v2409_v21 = vld [vmem:[%s2528_s21 + $0x58] sm:$0xff]   ;;  %v2410_v22 = vld [vmem:[%s2528_s21 + $0x60] sm:$0xff]   ;;  %v2411_v23 = vld [vmem:[%s2528_s21 + $0x68] sm:$0xff]  }
  0x14   : > { %2362 = vmatprep.subr.bf16.mxu1 %v2416_v8  ;;  %v2412_v24 = vld [vmem:[%s2528_s21 + $0x70] sm:$0xff]   ;;  %v2413_v25 = vld [vmem:[%s2528_s21 + $0x78] sm:$0xff]   ;;  %v2580_v29 = vld [vmem:[%s2798_s2] ss:$0 sm:$0xff] }
  0x16   : > { %2243 = vmatpush3.bf16.msra.mxu0 %v2395_v3 }
  0x17   : > { %2244 = vmatprep.subr.bf16.mxu0 %v2396_v6  ;;  %2366 = vmatpush3.bf16.msra.mxu1 %v2416_v8 }
  0x18   : > { %2363 = vmatprep.subr.bf16.mxu1 %v2417_v10 }
  0x1a   : > { %2245 = vmatpush3.bf16.msra.mxu0 %v2396_v6 }
  0x1b   : > { %2246 = vmatprep.subr.bf16.mxu0 %v2397_v9  ;;  %2367 = vmatpush3.bf16.msra.mxu1 %v2417_v10 }
  0x1c   : > { %2320 = vmatprep.subr.bf16.mxu1 %v2574_v26 }
  0x1e   : > { %2247 = vmatpush3.bf16.msra.mxu0 %v2397_v9 }
  0x1f   : > { %2280 = vmatprep.subr.bf16.mxu0 %v2414_v4 }
  0x21   : > { %2249 = vmatmul.mubr.msk.bf16.vlgmr.msra.gmra.mxu0 %vm461_vm1, %v2399_v11 }
  0x22   : > { %2252 = vmatprep.mubr.msk.bf16.mxu0 %vm461_vm1, %v2400_v12  ;;  %2281 = vmatpush3.bf16.msra.mxu0 %v2414_v4 }
  0x23   : > { %2282 = vmatprep.subr.bf16.mxu0 %v2415_v5 }
  0x26   : > { %2283 = vmatpush3.bf16.msra.mxu0 %v2415_v5 }
  0x27   : > { %2284 = vmatprep.subr.bf16.mxu0 %v2416_v8 }
  0x29   : > { %2253 = vmatmul.mubr.msk.bf16.gmra.mxu0 %vm461_vm1, %v2401_v13 }
  0x2a   : > { %2256 = vmatprep.mubr.msk.bf16.mxu0 %vm461_vm1, %v2402_v14  ;;  %2285 = vmatpush3.bf16.msra.mxu0 %v2416_v8 }
  0x2b   : > { %2286 = vmatprep.subr.bf16.mxu0 %v2417_v10 }
  0x2e   : > { %2287 = vmatpush3.bf16.msra.mxu0 %v2417_v10 }
  0x31   : > { %2257 = vmatmul.mubr.msk.bf16.gmra.mxu0 %vm461_vm1, %v2403_v15 }
  0x32   : > { %2260 = vmatprep.mubr.msk.bf16.mxu0 %vm461_vm1, %v2404_v16 }
  0x39   : > { %2261 = vmatmul.mubr.msk.bf16.gmra.mxu0 %vm461_vm1, %v2405_v17 }
  0x3a   : > { %2264 = vmatprep.mubr.msk.bf16.mxu0 %vm461_vm1, %v2406_v18 }
  0x41   : > { %2265 = vmatmul.mubr.msk.bf16.gmra.mxu0 %vm461_vm1, %v2407_v19 }
  0x42   : > { %2268 = vmatprep.mubr.msk.bf16.mxu0 %vm461_vm1, %v2408_v20 }
  0x49   : > { %2269 = vmatmul.mubr.msk.bf16.gmra.mxu0 %vm461_vm1, %v2409_v21 }
  0x4a   : > { %2272 = vmatprep.mubr.msk.bf16.mxu0 %vm461_vm1, %v2410_v22 }
  0x51   : > { %2273 = vmatmul.mubr.msk.bf16.gmra.mxu0 %vm461_vm1, %v2411_v23  ;;  %v2419_v23 = vld [vmem:[%s2801_s5 + $0x10] sm:$0xff]  }
  0x52   : > { %2276 = vmatprep.mubr.msk.bf16.mxu0 %vm461_vm1, %v2412_v24 }
  0x59   : > { %2277 = vmatmul.mubr.msk.bf16.gmra.mxu0 %vm461_vm1, %v2413_v25 }
  0xe1   : > { %v2250_v27 = vpop.f32.mrf.mxu0 }
  0xe2   : > { %v557_v33 = vadd.f32 %v2250_v27, %v2580_v29 }
  0xe3   : > { %v548_v28 = vpop.f32.mrf.mxu0 }
  0xe4   : > { %v549_v31 = vadd.f32 %v2580_v29, %v548_v28  ;;  %v677_v40 = vmax.f32 %v557_v33, 0.0  ;;  %v2420_v33 = vld [vmem:[%s2801_s5 + $0x8] sm:$0xff]  }
  0xe5   : > { %v2251_v30 = vpop.f32.mrf.mxu0 }
  0xe6   : > { %v560_v32 = vadd.f32 %v2251_v30, %v2580_v29  ;;  %v675_v38 = vmax.f32 %v549_v31, 0.0 }
  0xe7   : > { %v551_v34 = vpop.f32.mrf.mxu0 }
  0xe8   : > { %v552_v35 = vadd.f32 %v2580_v29, %v551_v34  ;;  %v678_v36 = vmax.f32 %v560_v32, 0.0 }
  0xe9   : > { %v2254_v37 = vpop.f32.mrf.mxu0 }
  0xea   : > { %v676_v39 = vmax.f32 %v552_v35, 0.0  ;;  %v708_v43 = vpack.c.bf16 %v678_v36, %v677_v40  ;;  %v573_v47 = vadd.f32 %v2254_v37, %v2580_v29 }
  0xeb   : > { %v564_v41 = vpop.f32.mrf.mxu0 }
  0xec   : > { %v707_v42 = vpack.c.bf16 %v676_v39, %v675_v38  ;;  %v565_v45 = vadd.f32 %v2580_v29, %v564_v41  ;;  %v681_v54 = vmax.f32 %v573_v47, 0.0 }
  0xed   : > { %v2255_v44 = vpop.f32.mrf.mxu0 }
  0xee   : > { %v576_v46 = vadd.f32 %v2255_v44, %v2580_v29  ;;  %2288 = vmatprep.mubr.msk.bf16.mxu0 %vm762_vm2, %v707_v42  ;;  %v679_v52 = vmax.f32 %v565_v45, 0.0 }
  0xef   : > { %v567_v48 = vpop.f32.mrf.mxu0  ;;  %2289 = vmatmul.mubr.msk.bf16.vlgmr.msra.gmra.mxu0 %vm762_vm2, %v708_v43 }
  0xf0   : > { %v568_v49 = vadd.f32 %v2580_v29, %v567_v48  ;;  %v682_v50 = vmax.f32 %v576_v46, 0.0 }
  0xf1   : > { %v2258_v51 = vpop.f32.mrf.mxu0 }
  0xf2   : > { %v680_v53 = vmax.f32 %v568_v49, 0.0  ;;  %v710_v57 = vpack.c.bf16 %v682_v50, %v681_v54  ;;  %v589_v61 = vadd.f32 %v2258_v51, %v2580_v29 }
  0xf3   : > { %v580_v55 = vpop.f32.mrf.mxu0 }
  0xf4   : > { %v709_v56 = vpack.c.bf16 %v680_v53, %v679_v52  ;;  %v581_v59 = vadd.f32 %v2580_v29, %v580_v55  ;;  %v685_v4 = vmax.f32 %v589_v61, 0.0 }
  0xf5   : > { %v2259_v58 = vpop.f32.mrf.mxu0 }
  0xf6   : > { %v592_v60 = vadd.f32 %v2259_v58, %v2580_v29  ;;  %2292 = vmatprep.mubr.msk.bf16.mxu0 %vm762_vm2, %v709_v56  ;;  %v683_v2 = vmax.f32 %v581_v59, 0.0 }
  0xf7   : > { %v583_v62 = vpop.f32.mrf.mxu0  ;;  %2293 = vmatmul.mubr.msk.bf16.gmra.mxu0 %vm762_vm2, %v710_v57 }
  0xf8   : > { %v584_v63 = vadd.f32 %v2580_v29, %v583_v62  ;;  %v686_v0 = vmax.f32 %v592_v60, 0.0 }
  0xf9   : > { %v2262_v1 = vpop.f32.mrf.mxu0 }
  0xfa   : > { %v684_v3 = vmax.f32 %v584_v63, 0.0  ;;  %v712_v7 = vpack.c.bf16 %v686_v0, %v685_v4  ;;  %v605_v11 = vadd.f32 %v2262_v1, %v2580_v29 }
  0xfb   : > { %v596_v5 = vpop.f32.mrf.mxu0 }
  0xfc   : > { %v711_v6 = vpack.c.bf16 %v684_v3, %v683_v2  ;;  %v597_v9 = vadd.f32 %v2580_v29, %v596_v5  ;;  %v689_v18 = vmax.f32 %v605_v11, 0.0 }
  0xfd   : > { %v2263_v8 = vpop.f32.mrf.mxu0 }
  0xfe   : > { %v608_v10 = vadd.f32 %v2263_v8, %v2580_v29  ;;  %2296 = vmatprep.mubr.msk.bf16.mxu0 %vm762_vm2, %v711_v6  ;;  %v687_v16 = vmax.f32 %v597_v9, 0.0 }
  0xff   : > { %v599_v12 = vpop.f32.mrf.mxu0  ;;  %2297 = vmatmul.mubr.msk.bf16.gmra.mxu0 %vm762_vm2, %v712_v7 }
 0x100   : > { %v600_v13 = vadd.f32 %v2580_v29, %v599_v12  ;;  %v690_v14 = vmax.f32 %v608_v10, 0.0 }
 0x101   : > { %v2266_v15 = vpop.f32.mrf.mxu0 }
 0x102   : > { %v688_v17 = vmax.f32 %v600_v13, 0.0  ;;  %v714_v21 = vpack.c.bf16 %v690_v14, %v689_v18  ;;  %v621_v27 = vadd.f32 %v2266_v15, %v2580_v29  ;;  %v2421_v15 = vld [vmem:[%s2801_s5] sm:$0xff]  }
 0x103   : > { %v612_v19 = vpop.f32.mrf.mxu0 }
 0x104   : > { %v713_v20 = vpack.c.bf16 %v688_v17, %v687_v16  ;;  %v613_v24 = vadd.f32 %v2580_v29, %v612_v19  ;;  %v693_v36 = vmax.f32 %v621_v27, 0.0 }
 0x105   : > { %v2267_v22 = vpop.f32.mrf.mxu0 }
 0x106   : > { %v624_v25 = vadd.f32 %v2267_v22, %v2580_v29  ;;  %2300 = vmatprep.mubr.msk.bf16.mxu1 %vm762_vm2, %v713_v20  ;;  %v691_v34 = vmax.f32 %v613_v24, 0.0 }
 0x107   : > { %v615_v28 = vpop.f32.mrf.mxu0  ;;  %2301 = vmatmul.mubr.msk.bf16.vlgmr.msra.gmra.mxu1 %vm762_vm2, %v714_v21 }
 0x108   : > { %v616_v30 = vadd.f32 %v2580_v29, %v615_v28  ;;  %2321 = vmatpush3.bf16.msra.mxu1 %v2574_v26  ;;  %v694_v31 = vmax.f32 %v624_v25, 0.0 }
 0x109   : > { %v2270_v32 = vpop.f32.mrf.mxu0  ;;  %2322 = vmatprep.subr.bf16.mxu1 %v2419_v23 }
 0x10a   : > { %v692_v35 = vmax.f32 %v616_v30, 0.0  ;;  %v716_v39 = vpack.c.bf16 %v694_v31, %v693_v36  ;;  %v637_v42 = vadd.f32 %v2270_v32, %v2580_v29 }
 0x10b   : > { %v628_v37 = vpop.f32.mrf.mxu0 }
 0x10c   : > { %v715_v38 = vpack.c.bf16 %v692_v35, %v691_v34  ;;  %2323 = vmatpush3.bf16.msra.mxu1 %v2419_v23  ;;  %v629_v41 = vadd.f32 %v2580_v29, %v628_v37  ;;  %v697_v49 = vmax.f32 %v637_v42, 0.0 }
 0x10d   : > { %v2271_v40 = vpop.f32.mrf.mxu0  ;;  %2324 = vmatprep.subr.bf16.mxu1 %v2420_v33 }
 0x10e   : > { %v640_v26 = vadd.f32 %v2271_v40, %v2580_v29  ;;  %2304 = vmatprep.mubr.msk.bf16.mxu1 %vm762_vm2, %v715_v38  ;;  %v695_v47 = vmax.f32 %v629_v41, 0.0 }
 0x10f   : > { %v631_v43 = vpop.f32.mrf.mxu0  ;;  %2305 = vmatmul.mubr.msk.bf16.gmra.mxu1 %vm762_vm2, %v716_v39 }
 0x110   : > { %v632_v44 = vadd.f32 %v2580_v29, %v631_v43  ;;  %2325 = vmatpush3.bf16.msra.mxu1 %v2420_v33  ;;  %v698_v45 = vmax.f32 %v640_v26, 0.0 }
 0x111   : > { %v2274_v46 = vpop.f32.mrf.mxu0  ;;  %2326 = vmatprep.subr.bf16.mxu1 %v2421_v15 }
 0x112   : > { %v696_v48 = vmax.f32 %v632_v44, 0.0  ;;  %v718_v52 = vpack.c.bf16 %v698_v45, %v697_v49  ;;  %v653_v56 = vadd.f32 %v2274_v46, %v2580_v29 }
 0x113   : > { %v644_v50 = vpop.f32.mrf.mxu0 }
 0x114   : > { %v717_v51 = vpack.c.bf16 %v696_v48, %v695_v47  ;;  %v645_v54 = vadd.f32 %v2580_v29, %v644_v50  ;;  %v701_v63 = vmax.f32 %v653_v56, 0.0  ;;  %2327 = vmatpush3.bf16.msra.mxu1 %v2421_v15 }
 0x115   : > { %v2275_v53 = vpop.f32.mrf.mxu0 }
 0x116   : > { %v656_v55 = vadd.f32 %v2275_v53, %v2580_v29  ;;  %2308 = vmatprep.mubr.msk.bf16.mxu1 %vm762_vm2, %v717_v51  ;;  %v699_v61 = vmax.f32 %v645_v54, 0.0 }
 0x117   : > { %v647_v57 = vpop.f32.mrf.mxu0  ;;  %2309 = vmatmul.mubr.msk.bf16.gmra.mxu1 %vm762_vm2, %v718_v52 }
 0x118   : > { %v648_v58 = vadd.f32 %v2580_v29, %v647_v57  ;;  %v702_v59 = vmax.f32 %v656_v55, 0.0 }
 0x119   : > { %v2278_v60 = vpop.f32.mrf.mxu0 }
 0x11a   : > { %v700_v62 = vmax.f32 %v648_v58, 0.0  ;;  %v720_v2 = vpack.c.bf16 %v702_v59, %v701_v63  ;;  %v669_v6 = vadd.f32 %v2278_v60, %v2580_v29 }
 0x11b   : > { %v660_v0 = vpop.f32.mrf.mxu0 }
 0x11c   : > { %v719_v1 = vpack.c.bf16 %v700_v62, %v699_v61  ;;  %v661_v4 = vadd.f32 %v2580_v29, %v660_v0  ;;  %v705_v12 = vmax.f32 %v669_v6, 0.0 }
 0x11d   : > { %v2279_v3 = vpop.f32.mrf.mxu0 }
 0x11e   : > { %v672_v5 = vadd.f32 %v2279_v3, %v2580_v29  ;;  %2312 = vmatprep.mubr.msk.bf16.mxu1 %vm762_vm2, %v719_v1  ;;  %v703_v10 = vmax.f32 %v661_v4, 0.0 }
 0x11f   : > { %v663_v7 = vpop.f32.mrf.mxu0  ;;  %2313 = vmatmul.mubr.msk.bf16.gmra.mxu1 %vm762_vm2, %v720_v2 }
 0x120   : > { %v664_v8 = vadd.f32 %v2580_v29, %v663_v7  ;;  %v706_v9 = vmax.f32 %v672_v5, 0.0  ;;  %v2643_v29 = vld [vmem:[%s2800_s4] ss:$0 sm:$0xff] }
 0x122   : > { %v704_v11 = vmax.f32 %v664_v8, 0.0  ;;  %v722_v14 = vpack.c.bf16 %v706_v9, %v705_v12 }
 0x124   : > { %v721_v13 = vpack.c.bf16 %v704_v11, %v703_v10 }
 0x126   : > { %2316 = vmatprep.mubr.msk.bf16.mxu1 %vm762_vm2, %v721_v13 }
 0x127   : > { %2317 = vmatmul.mubr.msk.bf16.gmra.mxu1 %vm762_vm2, %v722_v14 }
 0x1af   : > { %v2290_v16 = vpop.f32.mrf.mxu0 }
 0x1b0   : > { %v854_v21 = vadd.f32 %v2290_v16, %v2643_v29 }
 0x1b1   : > { %v845_v17 = vpop.f32.mrf.mxu0 }
 0x1b2   : > { %v846_v19 = vadd.f32 %v2643_v29, %v845_v17  ;;  %v974_v30 = vmax.f32 %v854_v21, 0.0 }
 0x1b3   : > { %v2291_v18 = vpop.f32.mrf.mxu0 }
 0x1b4   : > { %v857_v20 = vadd.f32 %v2291_v18, %v2643_v29  ;;  %v972_v27 = vmax.f32 %v846_v19, 0.0 }
 0x1b5   : > { %v848_v22 = vpop.f32.mrf.mxu0 }
 0x1b6   : > { %v849_v23 = vadd.f32 %v2643_v29, %v848_v22  ;;  %v975_v24 = vmax.f32 %v857_v20, 0.0 }
 0x1b7   : > { %v2294_v25 = vpop.f32.mrf.mxu0 }
 0x1b8   : > { %v973_v28 = vmax.f32 %v849_v23, 0.0  ;;  %v1005_v33 = vpack.c.bf16 %v975_v24, %v974_v30  ;;  %v870_v37 = vadd.f32 %v2294_v25, %v2643_v29 }
 0x1b9   : > { %v861_v31 = vpop.f32.mrf.mxu0 }
 0x1ba   : > { %v1004_v32 = vpack.c.bf16 %v973_v28, %v972_v27  ;;  %v862_v35 = vadd.f32 %v2643_v29, %v861_v31  ;;  %v978_v43 = vmax.f32 %v870_v37, 0.0 }
 0x1bb   : > { %v2295_v34 = vpop.f32.mrf.mxu0 }
 0x1bc   : > { %v873_v36 = vadd.f32 %v2295_v34, %v2643_v29  ;;  %2328 = vmatprep.mubr.msk.bf16.mxu1 %vm762_vm2, %v1004_v32  ;;  %v976_v26 = vmax.f32 %v862_v35, 0.0 }
 0x1bd   : > { %v864_v38 = vpop.f32.mrf.mxu0  ;;  %2329 = vmatmul.mubr.msk.bf16.vlgmr.msra.gmra.mxu1 %vm762_vm2, %v1005_v33 }
 0x1be   : > { %v865_v39 = vadd.f32 %v2643_v29, %v864_v38  ;;  %v979_v40 = vmax.f32 %v873_v36, 0.0 }
 0x1bf   : > { %v2298_v41 = vpop.f32.mrf.mxu0 }
 0x1c0   : > { %v977_v42 = vmax.f32 %v865_v39, 0.0  ;;  %v1007_v46 = vpack.c.bf16 %v979_v40, %v978_v43  ;;  %v886_v50 = vadd.f32 %v2298_v41, %v2643_v29 }
 0x1c1   : > { %v877_v44 = vpop.f32.mrf.mxu0 }
 0x1c2   : > { %v1006_v45 = vpack.c.bf16 %v977_v42, %v976_v26  ;;  %v878_v48 = vadd.f32 %v2643_v29, %v877_v44  ;;  %v982_v57 = vmax.f32 %v886_v50, 0.0 }
 0x1c3   : > { %v2299_v47 = vpop.f32.mrf.mxu0 }
 0x1c4   : > { %v889_v49 = vadd.f32 %v2299_v47, %v2643_v29  ;;  %2332 = vmatprep.mubr.msk.bf16.mxu1 %vm762_vm2, %v1006_v45  ;;  %v980_v55 = vmax.f32 %v878_v48, 0.0 }
 0x1c5   : > { %v880_v51 = vpop.f32.mrf.mxu0  ;;  %2333 = vmatmul.mubr.msk.bf16.gmra.mxu1 %vm762_vm2, %v1007_v46 }
 0x1c6   : > { %v881_v52 = vadd.f32 %v2643_v29, %v880_v51  ;;  %v983_v53 = vmax.f32 %v889_v49, 0.0 }
 0x1c7   : > { %v2302_v54 = vpop.f32.mrf.mxu1 }
 0x1c8   : > { %v981_v56 = vmax.f32 %v881_v52, 0.0  ;;  %v1009_v60 = vpack.c.bf16 %v983_v53, %v982_v57  ;;  %v902_v0 = vadd.f32 %v2302_v54, %v2643_v29 }
 0x1c9   : > { %v893_v58 = vpop.f32.mrf.mxu1 }
 0x1ca   : > { %v1008_v59 = vpack.c.bf16 %v981_v56, %v980_v55  ;;  %v894_v62 = vadd.f32 %v2643_v29, %v893_v58  ;;  %v986_v7 = vmax.f32 %v902_v0, 0.0 }
 0x1cb   : > { %v2303_v61 = vpop.f32.mrf.mxu1 }
 0x1cc   : > { %v905_v63 = vadd.f32 %v2303_v61, %v2643_v29  ;;  %2336 = vmatprep.mubr.msk.bf16.mxu1 %vm762_vm2, %v1008_v59  ;;  %v984_v5 = vmax.f32 %v894_v62, 0.0 }
 0x1cd   : > { %v896_v1 = vpop.f32.mrf.mxu1  ;;  %2337 = vmatmul.mubr.msk.bf16.gmra.mxu1 %vm762_vm2, %v1009_v60 }
 0x1ce   : > { %v897_v2 = vadd.f32 %v2643_v29, %v896_v1  ;;  %v987_v3 = vmax.f32 %v905_v63, 0.0 }
 0x1cf   : > { %v2306_v4 = vpop.f32.mrf.mxu1 }
 0x1d0   : > { %v985_v6 = vmax.f32 %v897_v2, 0.0  ;;  %v1011_v10 = vpack.c.bf16 %v987_v3, %v986_v7  ;;  %v918_v14 = vadd.f32 %v2306_v4, %v2643_v29  ;;  %v2696_v2 = vld [vmem:[%s2802_s6] ss:$0 sm:$0xff] }
 0x1d1   : > { %v909_v8 = vpop.f32.mrf.mxu1 }
 0x1d2   : > { %v1010_v9 = vpack.c.bf16 %v985_v6, %v984_v5  ;;  %v910_v12 = vadd.f32 %v2643_v29, %v909_v8  ;;  %v990_v21 = vmax.f32 %v918_v14, 0.0 }
 0x1d3   : > { %v2307_v11 = vpop.f32.mrf.mxu1 }
 0x1d4   : > { %v921_v13 = vadd.f32 %v2307_v11, %v2643_v29  ;;  %2340 = vmatprep.mubr.msk.bf16.mxu1 %vm762_vm2, %v1010_v9  ;;  %v988_v19 = vmax.f32 %v910_v12, 0.0 }
 0x1d5   : > { %v912_v15 = vpop.f32.mrf.mxu1  ;;  %2341 = vmatmul.mubr.msk.bf16.gmra.mxu1 %vm762_vm2, %v1011_v10 }
 0x1d6   : > { %v913_v16 = vadd.f32 %v2643_v29, %v912_v15  ;;  %v991_v17 = vmax.f32 %v921_v13, 0.0 }
 0x1d7   : > { %v2310_v18 = vpop.f32.mrf.mxu1 }
 0x1d8   : > { %v989_v20 = vmax.f32 %v913_v16, 0.0  ;;  %v1013_v24 = vpack.c.bf16 %v991_v17, %v990_v21  ;;  %v934_v30 = vadd.f32 %v2310_v18, %v2643_v29 }
 0x1d9   : > { %v925_v22 = vpop.f32.mrf.mxu1 }
 0x1da   : > { %v1012_v23 = vpack.c.bf16 %v989_v20, %v988_v19  ;;  %v926_v27 = vadd.f32 %v2643_v29, %v925_v22  ;;  %v994_v37 = vmax.f32 %v934_v30, 0.0 }
 0x1db   : > { %v2311_v25 = vpop.f32.mrf.mxu1 }
 0x1dc   : > { %v937_v28 = vadd.f32 %v2311_v25, %v2643_v29  ;;  %2344 = vmatprep.mubr.msk.bf16.mxu1 %vm762_vm2, %v1012_v23  ;;  %v992_v35 = vmax.f32 %v926_v27, 0.0 }
 0x1dd   : > { %v928_v31 = vpop.f32.mrf.mxu1  ;;  %2345 = vmatmul.mubr.msk.bf16.gmra.mxu1 %vm762_vm2, %v1013_v24 }
 0x1de   : > { %v929_v32 = vadd.f32 %v2643_v29, %v928_v31  ;;  %v995_v33 = vmax.f32 %v937_v28, 0.0 }
 0x1df   : > { %v2314_v34 = vpop.f32.mrf.mxu1 }
 0x1e0   : > { %v993_v36 = vmax.f32 %v929_v32, 0.0  ;;  %v1015_v40 = vpack.c.bf16 %v995_v33, %v994_v37  ;;  %v950_v43 = vadd.f32 %v2314_v34, %v2643_v29 }
 0x1e1   : > { %v941_v38 = vpop.f32.mrf.mxu1 }
 0x1e2   : > { %v1014_v39 = vpack.c.bf16 %v993_v36, %v992_v35  ;;  %v942_v26 = vadd.f32 %v2643_v29, %v941_v38  ;;  %v998_v50 = vmax.f32 %v950_v43, 0.0 }
 0x1e3   : > { %v2315_v41 = vpop.f32.mrf.mxu1 }
 0x1e4   : > { %v953_v42 = vadd.f32 %v2315_v41, %v2643_v29  ;;  %2348 = vmatprep.mubr.msk.bf16.mxu1 %vm762_vm2, %v1014_v39  ;;  %v996_v48 = vmax.f32 %v942_v26, 0.0 }
 0x1e5   : > { %v944_v44 = vpop.f32.mrf.mxu1  ;;  %2349 = vmatmul.mubr.msk.bf16.gmra.mxu1 %vm762_vm2, %v1015_v40 }
 0x1e6   : > { %v945_v45 = vadd.f32 %v2643_v29, %v944_v44  ;;  %v999_v46 = vmax.f32 %v953_v42, 0.0 }
 0x1e7   : > { %v2318_v47 = vpop.f32.mrf.mxu1 }
 0x1e8   : > { %v997_v49 = vmax.f32 %v945_v45, 0.0  ;;  %v1017_v53 = vpack.c.bf16 %v999_v46, %v998_v50  ;;  %v966_v57 = vadd.f32 %v2318_v47, %v2643_v29 }
 0x1e9   : > { %v957_v51 = vpop.f32.mrf.mxu1 }
 0x1ea   : > { %v1016_v52 = vpack.c.bf16 %v997_v49, %v996_v48  ;;  %v958_v55 = vadd.f32 %v2643_v29, %v957_v51  ;;  %v1002_v63 = vmax.f32 %v966_v57, 0.0 }
 0x1eb   : > { %v2319_v54 = vpop.f32.mrf.mxu1 }
 0x1ec   : > { %v969_v56 = vadd.f32 %v2319_v54, %v2643_v29  ;;  %2352 = vmatprep.mubr.msk.bf16.mxu1 %vm762_vm2, %v1016_v52  ;;  %v1000_v61 = vmax.f32 %v958_v55, 0.0 }
 0x1ed   : > { %v960_v58 = vpop.f32.mrf.mxu1  ;;  %2353 = vmatmul.mubr.msk.bf16.gmra.mxu1 %vm762_vm2, %v1017_v53 }
 0x1ee   : > { %v961_v59 = vadd.f32 %v2643_v29, %v960_v58  ;;  %v1003_v60 = vmax.f32 %v969_v56, 0.0 }
 0x1f0   : > { %v1001_v62 = vmax.f32 %v961_v59, 0.0  ;;  %v1019_v1 = vpack.c.bf16 %v1003_v60, %v1002_v63 }
 0x1f2   : > { %v1018_v0 = vpack.c.bf16 %v1001_v62, %v1000_v61 }
 0x1f4   : > { %2356 = vmatprep.mubr.msk.bf16.mxu1 %vm762_vm2, %v1018_v0 }
 0x1f5   : > { %2357 = vmatmul.mubr.msk.bf16.gmra.mxu1 %vm762_vm2, %v1019_v1 }
 0x27d   : > { %v2330_v3 = vpop.f32.mrf.mxu1 }
 0x27e   : > { %v1150_v4 = vadd.f32 %v2330_v3, %v2696_v2 }
 0x27f   : > { %v1141_v5 = vpop.f32.mrf.mxu1 }
 0x280   : > { %v1270_v29 = vmax.f32 %v1150_v4, 0.0  ;;  %v1142_v6 = vadd.f32 %v2696_v2, %v1141_v5 }
 0x281   : > { %v2331_v7 = vpop.f32.mrf.mxu1 }
 0x282   : > { %v1312_v8 = vrot.slane %v1270_v29, 4  ;;  %v1268_v9 = vmax.f32 %v1142_v6, 0.0  ;;  %v1153_v10 = vadd.f32 %v2331_v7, %v2696_v2 }
 0x283   : > { %v1144_v11 = vpop.f32.mrf.mxu1 }
 0x284   : > { %v1313_v12 = vmax.f32 %v1270_v29, %v1312_v8  ;;  %v1300_v13 = vrot.slane %v1268_v9, 4  ;;  %v1271_v14 = vmax.f32 %v1153_v10, 0.0  ;;  %v1145_v15 = vadd.f32 %v2696_v2, %v1144_v11 }
 0x285   : > { %v2334_v16 = vpop.f32.mrf.mxu1 }
 0x286   : > { %v1314_v17 = vrot.slane %v1313_v12, 2  ;;  %v1301_v18 = vmax.f32 %v1268_v9, %v1300_v13  ;;  %v1318_v19 = vrot.slane %v1271_v14, 4  ;;  %v1269_v20 = vmax.f32 %v1145_v15, 0.0 }
 0x287   : > { %v1166_v21 = vadd.f32 %v2334_v16, %v2696_v2  ;;  %v1157_v22 = vpop.f32.mrf.mxu1 }
 0x288   : > { %v1315_v23 = vmax.f32 %v1313_v12, %v1314_v17  ;;  %v1302_v24 = vrot.slane %v1301_v18, 2  ;;  %v1319_v25 = vmax.f32 %v1271_v14, %v1318_v19  ;;  %v1306_v27 = vrot.slane %v1269_v20, 4 }
 0x289   : > { %v1274_v28 = vmax.f32 %v1166_v21, 0.0  ;;  %v1158_v30 = vadd.f32 %v2696_v2, %v1157_v22  ;;  %v2335_v31 = vpop.f32.mrf.mxu1 }
 0x28a   : > { %v1316_v32 = vrot.slane %v1315_v23, 1  ;;  %v1303_v33 = vmax.f32 %v1301_v18, %v1302_v24  ;;  %v1320_v34 = vrot.slane %v1319_v25, 2  ;;  %v1307_v35 = vmax.f32 %v1269_v20, %v1306_v27 }
 0x28b   : > { %v1336_v36 = vrot.slane %v1274_v28, 4  ;;  %v1272_v37 = vmax.f32 %v1158_v30, 0.0  ;;  %v1169_v38 = vadd.f32 %v2335_v31, %v2696_v2  ;;  %v1160_v39 = vpop.f32.mrf.mxu1 }
 0x28c   : > { %v1317_v40 = vmax.f32 %v1315_v23, %v1316_v32  ;;  %v1304_v41 = vrot.slane %v1303_v33, 1  ;;  %v1321_v26 = vmax.f32 %v1319_v25, %v1320_v34  ;;  %v1308_v42 = vrot.slane %v1307_v35, 2 }
 0x28d   : > { %v1337_v43 = vmax.f32 %v1274_v28, %v1336_v36  ;;  %v1324_v44 = vrot.slane %v1272_v37, 4  ;;  %v1275_v45 = vmax.f32 %v1169_v38, 0.0  ;;  %v1161_v46 = vadd.f32 %v2696_v2, %v1160_v39  ;;  %v2338_v47 = vpop.f32.mrf.mxu1 }
 0x28e   : > { %v2115_v48 = vpack.c.bf16 %v1317_v40, %v1317_v40  ;;  %v1305_v49 = vmax.f32 %v1303_v33, %v1304_v41  ;;  %v1322_v50 = vrot.slane %v1321_v26, 1  ;;  %v1309_v51 = vmax.f32 %v1307_v35, %v1308_v42 }
 0x28f   : > { %v1338_v52 = vrot.slane %v1337_v43, 2  ;;  %v1325_v53 = vmax.f32 %v1272_v37, %v1324_v44  ;;  %v1342_v54 = vrot.slane %v1275_v45, 4  ;;  %v1273_v55 = vmax.f32 %v1161_v46, 0.0  ;;  %v1173_v56 = vpop.f32.mrf.mxu1 }
 0x290   : > { %v1626_v57 = vunpack.c.l.b16 %v2115_v48  ;;  %v2113_v58 = vpack.c.bf16 %v1305_v49, %v1305_v49  ;;  %v1323_v59 = vmax.f32 %v1321_v26, %v1322_v50  ;;  %v1310_v60 = vrot.slane %v1309_v51, 1 }
 0x291   : > { %v1339_v61 = vmax.f32 %v1337_v43, %v1338_v52  ;;  %v1326_v62 = vrot.slane %v1325_v53, 2  ;;  %v1343_v63 = vmax.f32 %v1275_v45, %v1342_v54  ;;  %v1330_v0 = vrot.slane %v1273_v55, 4  ;;  %v2339_v1 = vpop.f32.mrf.mxu1 }
 0x292   : > { %v1624_v3 = vunpack.c.l.b16 %v2113_v58  ;;  %v2116_v4 = vpack.c.bf16 %v1323_v59, %v1323_v59  ;;  %v1311_v5 = vmax.f32 %v1309_v51, %v1310_v60  ;;  %v1182_v29 = vadd.f32 %v2338_v47, %v2696_v2 }
 0x293   : > { %v1340_v6 = vrot.slane %v1339_v61, 1  ;;  %v1327_v7 = vmax.f32 %v1325_v53, %v1326_v62  ;;  %v1344_v8 = vrot.slane %v1343_v63, 2  ;;  %v1331_v9 = vmax.f32 %v1273_v55, %v1330_v0  ;;  %v1176_v10 = vpop.f32.mrf.mxu1 }
 0x294   : > { %v1627_v11 = vunpack.c.l.b16 %v2116_v4  ;;  %v2114_v12 = vpack.c.bf16 %v1311_v5, %v1311_v5  ;;  %v1278_v13 = vmax.f32 %v1182_v29, 0.0  ;;  %v1174_v14 = vadd.f32 %v2696_v2, %v1173_v56 }
 0x295   : > { %v1341_v15 = vmax.f32 %v1339_v61, %v1340_v6  ;;  %v1328_v16 = vrot.slane %v1327_v7, 1  ;;  %v1345_v17 = vmax.f32 %v1343_v63, %v1344_v8  ;;  %v1332_v18 = vrot.slane %v1331_v9, 2  ;;  %v2342_v19 = vpop.f32.mrf.mxu1 }
 0x296   : > { %v1625_v20 = vunpack.c.l.b16 %v2114_v12  ;;  %v1360_v21 = vrot.slane %v1278_v13, 4  ;;  %v1276_v22 = vmax.f32 %v1174_v14, 0.0  ;;  %v1185_v23 = vadd.f32 %v2339_v1, %v2696_v2 }
 0x297   : > { %v2119_v24 = vpack.c.bf16 %v1341_v15, %v1341_v15  ;;  %v1329_v25 = vmax.f32 %v1327_v7, %v1328_v16  ;;  %v1346_v27 = vrot.slane %v1345_v17, 1  ;;  %v1333_v28 = vmax.f32 %v1331_v9, %v1332_v18  ;;  %v1189_v30 = vpop.f32.mrf.mxu1 }
 0x298   : > { %v1657_v31 = vsel %vm1656_vm3, %v1625_v20, %v1624_v3  ;;  %v1361_v32 = vmax.f32 %v1278_v13, %v1360_v21  ;;  %v1348_v33 = vrot.slane %v1276_v22, 4  ;;  %v1279_v34 = vmax.f32 %v1185_v23, 0.0 }
 0x299   : > { %v1659_v35 = vsel %vm1658_vm4, %v1626_v57, %v1657_v31  ;;  %v2117_v36 = vpack.c.bf16 %v1329_v25, %v1329_v25  ;;  %v1347_v37 = vmax.f32 %v1345_v17, %v1346_v27  ;;  %v2343_v38 = vpop.f32.mrf.mxu1  ;;  %v1334_v40 = vrot.slane %v1333_v28, 1 }
 0x29a   : > { %v1661_v39 = vsel %vm1660_vm5, %v1627_v11, %v1659_v35  ;;  %v1362_v41 = vrot.slane %v1361_v32, 2  ;;  %v1349_v26 = vmax.f32 %v1276_v22, %v1348_v33  ;;  %v1630_v42 = vunpack.c.l.b16 %v2119_v24 }
 0x29b   : > { %v1628_v43 = vunpack.c.l.b16 %v2117_v36  ;;  %v1366_v44 = vrot.slane %v1279_v34, 4  ;;  %v1177_v45 = vadd.f32 %v2696_v2, %v1176_v10  ;;  %v1192_v46 = vpop.f32.mrf.mxu1  ;;  %v1335_v47 = vmax.f32 %v1333_v28, %v1334_v40 }
 0x29c   : > { %v1363_v48 = vmax.f32 %v1361_v32, %v1362_v41  ;;  %v1350_v49 = vrot.slane %v1349_v26, 2  ;;  %v1198_v50 = vadd.f32 %v2342_v19, %v2696_v2  ;;  %v2120_v52 = vpack.c.bf16 %v1347_v37, %v1347_v37 }
 0x29d   : > { %v1663_v51 = vsel %vm1662_vm6, %v1628_v43, %v1661_v39  ;;  %v1367_v53 = vmax.f32 %v1279_v34, %v1366_v44  ;;  %v1277_v54 = vmax.f32 %v1177_v45, 0.0  ;;  %v2346_v55 = vpop.f32.mrf.mxu1  ;;  %v2118_v56 = vpack.c.bf16 %v1335_v47, %v1335_v47 }
 0x29e   : > { %v1364_v57 = vrot.slane %v1363_v48, 1  ;;  %v1351_v58 = vmax.f32 %v1349_v26, %v1350_v49  ;;  %v1282_v59 = vmax.f32 %v1198_v50, 0.0  ;;  %v1190_v62 = vadd.f32 %v2696_v2, %v1189_v30 }
 0x29f   : > { %v1368_v60 = vrot.slane %v1367_v53, 2  ;;  %v1354_v61 = vrot.slane %v1277_v54, 4  ;;  %v1201_v63 = vadd.f32 %v2343_v38, %v2696_v2  ;;  %v1205_v0 = vpop.f32.mrf.mxu1  ;;  %v1629_v1 = vunpack.c.l.b16 %v2118_v56 }
 0x2a0   : > { %v1365_v3 = vmax.f32 %v1363_v48, %v1364_v57  ;;  %v1352_v4 = vrot.slane %v1351_v58, 1  ;;  %v1384_v5 = vrot.slane %v1282_v59, 4  ;;  %v1631_v29 = vunpack.c.l.b16 %v2120_v52 }
 0x2a1   : > { %v1369_v6 = vmax.f32 %v1367_v53, %v1368_v60  ;;  %v1355_v7 = vmax.f32 %v1277_v54, %v1354_v61  ;;  %v1280_v8 = vmax.f32 %v1190_v62, 0.0  ;;  %v2347_v9 = vpop.f32.mrf.mxu1  ;;  %v1665_v10 = vsel %vm1664_vm7, %v1629_v1, %v1663_v51 }
 0x2a2   : > { %v1353_v11 = vmax.f32 %v1351_v58, %v1352_v4  ;;  %v1385_v12 = vmax.f32 %v1282_v59, %v1384_v5  ;;  %v1283_v13 = vmax.f32 %v1201_v63, 0.0  ;;  %v1667_v14 = vsel %vm1666_vm8, %v1630_v42, %v1665_v10 }
 0x2a3   : > { %v2123_v15 = vpack.c.bf16 %v1365_v3, %v1365_v3  ;;  %v1356_v16 = vrot.slane %v1355_v7, 2  ;;  %v1372_v17 = vrot.slane %v1280_v8, 4  ;;  %v2733_v18 = vpop.f32.mrf.mxu1  ;;  %v1669_v19 = vsel %vm1668_vm9, %v1631_v29, %v1667_v14 }
 0x2a4   : > { %v1370_v20 = vrot.slane %v1369_v6, 1  ;;  %v1386_v21 = vrot.slane %v1385_v12, 2  ;;  %v1691_v22 = vpack.c.b16 %v1669_v19, %v1669_v19  ;;  %v2121_v23 = vpack.c.bf16 %v1353_v11, %v1353_v11 }
 0x2a5   : > { %v1357_v24 = vmax.f32 %v1355_v7, %v1356_v16  ;;  %v1373_v25 = vmax.f32 %v1280_v8, %v1372_v17  ;;  %v2350_v27 = vpop.f32.mrf.mxu1  ;;  %v1390_v30 = vrot.slane %v1283_v13, 4  ;;  %v1193_v31 = vadd.f32 %v2696_v2, %v1192_v46 }
 0x2a6   : > { %v1387_v28 = vmax.f32 %v1385_v12, %v1386_v21  ;;  %1699 = vst [vmem:[%s2738_s8] sm:$0xf] %v1691_v22  ;;  %v1634_v32 = vunpack.c.l.b16 %v2123_v15  ;;  %v1214_v35 = vadd.f32 %v2346_v55, %v2696_v2  ;;  %v1371_v37 = vmax.f32 %v1369_v6, %v1370_v20 }
 0x2a7   : > { %v1358_v33 = vrot.slane %v1357_v24, 1  ;;  %v1374_v34 = vrot.slane %v1373_v25, 2  ;;  %v1221_v36 = vpop.f32.mrf.mxu1  ;;  %v1391_v38 = vmax.f32 %v1283_v13, %v1390_v30  ;;  %v1281_v39 = vmax.f32 %v1193_v31, 0.0 }
 0x2a8   : > { %v1206_v40 = vadd.f32 %v2696_v2, %v1205_v0  ;;  %v1632_v41 = vunpack.c.l.b16 %v2121_v23  ;;  %v1286_v43 = vmax.f32 %v1214_v35, 0.0  ;;  %v1388_v45 = vrot.slane %v1387_v28, 1 }
 0x2a9   : > { %v1359_v26 = vmax.f32 %v1357_v24, %v1358_v33  ;;  %v1375_v42 = vmax.f32 %v1373_v25, %v1374_v34  ;;  %v2351_v44 = vpop.f32.mrf.mxu1  ;;  %v1392_v47 = vrot.slane %v1391_v38, 2  ;;  %v1378_v46 = vrot.slane %v1281_v39, 4 }
 0x2aa   : > { %v1284_v48 = vmax.f32 %v1206_v40, 0.0  ;;  %v1408_v51 = vrot.slane %v1286_v43, 4  ;;  %v1217_v52 = vadd.f32 %v2347_v9, %v2696_v2  ;;  %v2124_v53 = vpack.c.bf16 %v1371_v37, %v1371_v37 }
 0x2ab   : > { %v2122_v49 = vpack.c.bf16 %v1359_v26, %v1359_v26  ;;  %v1376_v50 = vrot.slane %v1375_v42, 1  ;;  %v1393_v54 = vmax.f32 %v1391_v38, %v1392_v47  ;;  %v1379_v55 = vmax.f32 %v1281_v39, %v1378_v46  ;;  %v2746_v57 = vpop.f32.mrf.mxu1 }
 0x2ac   : > { %v1396_v56 = vrot.slane %v1284_v48, 4  ;;  %v1409_v60 = vmax.f32 %v1286_v43, %v1408_v51  ;;  %v1287_v61 = vmax.f32 %v1217_v52, 0.0  ;;  %v1389_v62 = vmax.f32 %v1387_v28, %v1388_v45 }
 0x2ad   : > { %v1633_v58 = vunpack.c.l.b16 %v2122_v49  ;;  %v1377_v59 = vmax.f32 %v1375_v42, %v1376_v50  ;;  %v1394_v63 = vrot.slane %v1393_v54, 1  ;;  %v1380_v0 = vrot.slane %v1379_v55, 2  ;;  %v2354_v8 = vpop.f32.mrf.mxu1 }
 0x2ae   : > { %v1397_v1 = vmax.f32 %v1284_v48, %v1396_v56  ;;  %v1410_v5 = vrot.slane %v1409_v60, 2  ;;  %v1414_v29 = vrot.slane %v1287_v61, 4  ;;  %v1635_v9 = vunpack.c.l.b16 %v2124_v53 }
 0x2af   : > { %v1670_v3 = vsel %vm1656_vm3, %v1633_v58, %v1632_v41  ;;  %v2125_v4 = vpack.c.bf16 %v1377_v59, %v1377_v59  ;;  %v1381_v6 = vmax.f32 %v1379_v55, %v1380_v0  ;;  %v1395_v11 = vmax.f32 %v1393_v54, %v1394_v63  ;;  %v1237_v28 = vpop.f32.mrf.mxu1 }
 0x2b0   : > { %v1398_v7 = vrot.slane %v1397_v1, 2  ;;  %v1671_v10 = vsel %vm1658_vm4, %v1634_v32, %v1670_v3  ;;  %v1415_v12 = vmax.f32 %v1287_v61, %v1414_v29  ;;  %v1411_v14 = vmax.f32 %v1409_v60, %v1410_v5 }
 0x2b1   : > { %v1382_v13 = vrot.slane %v1381_v6, 1  ;;  %v1209_v16 = vadd.f32 %v2696_v2, %v2733_v18  ;;  %v2127_v17 = vpack.c.bf16 %v1389_v62, %v1389_v62  ;;  %v1636_v19 = vunpack.c.l.b16 %v2125_v4  ;;  %v2355_v45 = vpop.f32.mrf.mxu1 }
 0x2b2   : > { %v1399_v15 = vmax.f32 %v1397_v1, %v1398_v7  ;;  %v1416_v20 = vrot.slane %v1415_v12, 2  ;;  %v1230_v21 = vadd.f32 %v2350_v27, %v2696_v2  ;;  %v1672_v22 = vsel %vm1660_vm5, %v1635_v9, %v1671_v10 }
 0x2b3   : > { %v1383_v23 = vmax.f32 %v1381_v6, %v1382_v13  ;;  %v1285_v25 = vmax.f32 %v1209_v16, 0.0  ;;  %v2128_v30 = vpack.c.bf16 %v1395_v11, %v1395_v11  ;;  %v1222_v33 = vadd.f32 %v2696_v2, %v1221_v36  ;;  %v1240_v61 = vpop.f32.mrf.mxu1 }
 0x2b4   : > { %v1400_v24 = vrot.slane %v1399_v15, 1  ;;  %v1417_v31 = vmax.f32 %v1415_v12, %v1416_v20  ;;  %v1290_v32 = vmax.f32 %v1230_v21, 0.0  ;;  %v1412_v35 = vrot.slane %v1411_v14, 1 }
 0x2b5   : > { %v2126_v34 = vpack.c.bf16 %v1383_v23, %v1383_v23  ;;  %v1402_v37 = vrot.slane %v1285_v25, 4  ;;  %v1233_v18 = vadd.f32 %v2351_v44, %v2696_v2  ;;  %v1638_v38 = vunpack.c.l.b16 %v2127_v17 }
 0x2b6   : > { %v1401_v39 = vmax.f32 %v1399_v15, %v1400_v24  ;;  %v1432_v40 = vrot.slane %v1290_v32, 4  ;;  %v1288_v27 = vmax.f32 %v1222_v33, 0.0  ;;  %v1673_v41 = vsel %vm1662_vm6, %v1636_v19, %v1672_v22 }
 0x2b7   : > { %v1637_v26 = vunpack.c.l.b16 %v2126_v34  ;;  %v1403_v42 = vmax.f32 %v1285_v25, %v1402_v37  ;;  %v1291_v43 = vmax.f32 %v1233_v18, 0.0  ;;  %v1639_v47 = vunpack.c.l.b16 %v2128_v30 }
 0x2b8   : > { %v1418_v46 = vrot.slane %v1417_v31, 1  ;;  %v1433_v48 = vmax.f32 %v1290_v32, %v1432_v40  ;;  %v1420_v49 = vrot.slane %v1288_v27, 4  ;;  %v1413_v50 = vmax.f32 %v1411_v14, %v1412_v35  ;;  %v2358_v14 = vpop.f32.mrf.mxu1 }
 0x2b9   : > { %v1674_v36 = vsel %vm1664_vm7, %v1637_v26, %v1673_v41  ;;  %v1404_v51 = vrot.slane %v1403_v42, 2  ;;  %v1438_v52 = vrot.slane %v1291_v43, 4  ;;  %v2129_v53 = vpack.c.bf16 %v1401_v39, %v1401_v39 }
 0x2ba   : > { %v1675_v44 = vsel %vm1666_vm8, %v1638_v38, %v1674_v36  ;;  %v1434_v54 = vrot.slane %v1433_v48, 2  ;;  %v1421_v55 = vmax.f32 %v1288_v27, %v1420_v49  ;;  %v1225_v60 = vadd.f32 %v2696_v2, %v2746_v57  ;;  %v1253_v33 = vpop.f32.mrf.mxu1 }
 0x2bb   : > { %v1676_v56 = vsel %vm1668_vm9, %v1639_v47, %v1675_v44  ;;  %v1405_v58 = vmax.f32 %v1403_v42, %v1404_v51  ;;  %v1439_v59 = vmax.f32 %v1291_v43, %v1438_v52  ;;  %v1419_v63 = vmax.f32 %v1417_v31, %v1418_v46 }
 0x2bc   : > { %v1692_v62 = vpack.c.b16 %v1676_v56, %v1676_v56  ;;  %v1435_v0 = vmax.f32 %v1433_v48, %v1434_v54  ;;  %v1422_v1 = vrot.slane %v1421_v55, 2  ;;  %v1289_v5 = vmax.f32 %v1225_v60, 0.0 }
 0x2bd   : > { %v1406_v3 = vrot.slane %v1405_v58, 1  ;;  %v1440_v4 = vrot.slane %v1439_v59, 2  ;;  %v1246_v29 = vadd.f32 %v2354_v8, %v2696_v2  ;;  %v1238_v9 = vadd.f32 %v2696_v2, %v1237_v28 }
 0x2be   : > { %1700 = vst [vmem:[%s2738_s8 + $0x4] sm:$0xf] %v1692_v62  ;;  %v1436_v6 = vrot.slane %v1435_v0, 1  ;;  %v1423_v7 = vmax.f32 %v1421_v55, %v1422_v1  ;;  %v1249_v10 = vadd.f32 %v2355_v45, %v2696_v2  ;;  %v1426_v57 = vrot.slane %v1289_v5, 4  ;;  %v2359_v45 = vpop.f32.mrf.mxu1 }
 0x2bf   : > { %v1407_v11 = vmax.f32 %v1405_v58, %v1406_v3  ;;  %v1441_v12 = vmax.f32 %v1439_v59, %v1440_v4  ;;  %v1294_v13 = vmax.f32 %v1246_v29, 0.0  ;;  %v1292_v16 = vmax.f32 %v1238_v9, 0.0 }
 0x2c0   : > { %v1424_v15 = vrot.slane %v1423_v7, 1  ;;  %v1295_v17 = vmax.f32 %v1249_v10, 0.0  ;;  %v1427_v21 = vmax.f32 %v1289_v5, %v1426_v57  ;;  %v2131_v8 = vpack.c.bf16 %v1413_v50, %v1413_v50 }
 0x2c1   : > { %v2130_v19 = vpack.c.bf16 %v1407_v11, %v1407_v11  ;;  %v1442_v20 = vrot.slane %v1441_v12, 1  ;;  %v1456_v22 = vrot.slane %v1294_v13, 4  ;;  %v1640_v23 = vunpack.c.l.b16 %v2129_v53 }
 0x2c2   : > { %v1425_v24 = vmax.f32 %v1423_v7, %v1424_v15  ;;  %v1444_v25 = vrot.slane %v1292_v16, 4  ;;  %v2132_v30 = vpack.c.bf16 %v1419_v63, %v1419_v63  ;;  %v1437_v31 = vmax.f32 %v1435_v0, %v1436_v6 }
 0x2c3   : > { %v1641_v28 = vunpack.c.l.b16 %v2130_v19  ;;  %v1428_v32 = vrot.slane %v1427_v21, 2  ;;  %v1457_v34 = vmax.f32 %v1294_v13, %v1456_v22  ;;  %v1462_v37 = vrot.slane %v1295_v17, 4  ;;  %v1256_v13 = vpop.f32.mrf.mxu1 }
 0x2c4   : > { %v1445_v35 = vmax.f32 %v1292_v16, %v1444_v25  ;;  %v1443_v38 = vmax.f32 %v1441_v12, %v1442_v20  ;;  %v1642_v40 = vunpack.c.l.b16 %v2131_v8  ;;  %v2133_v27 = vpack.c.bf16 %v1425_v24, %v1425_v24 }
 0x2c5   : > { %v1677_v18 = vsel %vm1656_vm3, %v1641_v28, %v1640_v23  ;;  %v1429_v39 = vmax.f32 %v1427_v21, %v1428_v32  ;;  %v1643_v26 = vunpack.c.l.b16 %v2132_v30  ;;  %v2135_v42 = vpack.c.bf16 %v1437_v31, %v1437_v31 }
 0x2c6   : > { %v1446_v41 = vrot.slane %v1445_v35, 2  ;;  %v1678_v47 = vsel %vm1658_vm4, %v1642_v40, %v1677_v18  ;;  %v1458_v46 = vrot.slane %v1457_v34, 2  ;;  %v1463_v48 = vmax.f32 %v1295_v17, %v1462_v37 }
 0x2c7   : > { %v1430_v43 = vrot.slane %v1429_v39, 1  ;;  %v1241_v49 = vadd.f32 %v2696_v2, %v1240_v61  ;;  %v2136_v36 = vpack.c.bf16 %v1443_v38, %v1443_v38  ;;  %v1262_v51 = vadd.f32 %v2358_v14, %v2696_v2 }
 0x2c8   : > { %v1254_v52 = vadd.f32 %v2696_v2, %v1253_v33  ;;  %v1644_v44 = vunpack.c.l.b16 %v2133_v27  ;;  %v1447_v53 = vmax.f32 %v1445_v35, %v1446_v41  ;;  %v1265_v55 = vadd.f32 %v2359_v45, %v2696_v2 }
 0x2c9   : > { %v1431_v50 = vmax.f32 %v1429_v39, %v1430_v43  ;;  %v1293_v54 = vmax.f32 %v1241_v49, 0.0  ;;  %v1679_v56 = vsel %vm1660_vm5, %v1643_v26, %v1678_v47  ;;  %v1298_v59 = vmax.f32 %v1262_v51, 0.0 }
 0x2ca   : > { %v1296_v60 = vmax.f32 %v1254_v52, 0.0  ;;  %v1459_v62 = vmax.f32 %v1457_v34, %v1458_v46  ;;  %v1464_v63 = vrot.slane %v1463_v48, 2  ;;  %v1299_v61 = vmax.f32 %v1265_v55, 0.0 }
 0x2cb   : > { %v2134_v58 = vpack.c.bf16 %v1431_v50, %v1431_v50  ;;  %v1450_v0 = vrot.slane %v1293_v54, 4  ;;  %v1646_v1 = vunpack.c.l.b16 %v2135_v42  ;;  %v1480_v4 = vrot.slane %v1298_v59, 4 }
 0x2cc   : > { %v1468_v5 = vrot.slane %v1296_v60, 4  ;;  %v1680_v29 = vsel %vm1662_vm6, %v1644_v44, %v1679_v56  ;;  %v1448_v6 = vrot.slane %v1447_v53, 1  ;;  %v1486_v9 = vrot.slane %v1299_v61, 4 }
 0x2cd   : > { %v1645_v3 = vunpack.c.l.b16 %v2134_v58  ;;  %v1451_v7 = vmax.f32 %v1293_v54, %v1450_v0  ;;  %v1647_v10 = vunpack.c.l.b16 %v2136_v36  ;;  %v1481_v12 = vmax.f32 %v1298_v59, %v1480_v4 }
 0x2ce   : > { %v1469_v57 = vmax.f32 %v1296_v60, %v1468_v5  ;;  %v1460_v15 = vrot.slane %v1459_v62, 1  ;;  %v1465_v16 = vmax.f32 %v1463_v48, %v1464_v63  ;;  %v1487_v22 = vmax.f32 %v1299_v61, %v1486_v9 }
 0x2cf   : > { %v1681_v11 = vsel %vm1664_vm7, %v1645_v3, %v1680_v29  ;;  %v1452_v17 = vrot.slane %v1451_v7, 2  ;;  %v1482_v20 = vrot.slane %v1481_v12, 2  ;;  %v1449_v23 = vmax.f32 %v1447_v53, %v1448_v6 }
 0x2d0   : > { %v1682_v14 = vsel %vm1666_vm8, %v1646_v1, %v1681_v11  ;;  %v1470_v21 = vrot.slane %v1469_v57, 2  ;;  %v1257_v25 = vadd.f32 %v2696_v2, %v1256_v13  ;;  %v1488_v28 = vrot.slane %v1487_v22, 2 }
 0x2d1   : > { %v1683_v19 = vsel %vm1668_vm9, %v1647_v10, %v1682_v14  ;;  %v1453_v24 = vmax.f32 %v1451_v7, %v1452_v17  ;;  %v1466_v31 = vrot.slane %v1465_v16, 1  ;;  %v1461_v34 = vmax.f32 %v1459_v62, %v1460_v15 }
 0x2d2   : > { %v1693_v8 = vpack.c.b16 %v1683_v19, %v1683_v19  ;;  %v1471_v30 = vmax.f32 %v1469_v57, %v1470_v21  ;;  %v1297_v33 = vmax.f32 %v1257_v25, 0.0  ;;  %v1483_v35 = vmax.f32 %v1481_v12, %v1482_v20 }
 0x2d3   : > { %v1454_v32 = vrot.slane %v1453_v24, 1  ;;  %v2137_v18 = vpack.c.bf16 %v1449_v23, %v1449_v23  ;;  %v1489_v39 = vmax.f32 %v1487_v22, %v1488_v28  ;;  %v1467_v27 = vmax.f32 %v1465_v16, %v1466_v31 }
 0x2d4   : > { %1701 = vst [vmem:[%s2738_s8 + $0x8] sm:$0xf] %v1693_v8  ;;  %v1472_v37 = vrot.slane %v1471_v30, 1  ;;  %v1474_v40 = vrot.slane %v1297_v33, 4  ;;  %v2139_v42 = vpack.c.bf16 %v1461_v34, %v1461_v34  ;;  %v1484_v43 = vrot.slane %v1483_v35, 1 }
 0x2d5   : > { %v1455_v38 = vmax.f32 %v1453_v24, %v1454_v32  ;;  %v1648_v2 = vunpack.c.l.b16 %v2137_v18  ;;  %v1490_v46 = vrot.slane %v1489_v39, 1  ;;  %v2140_v49 = vpack.c.bf16 %v1467_v27, %v1467_v27 }
 0x2d6   : > { %v1475_v26 = vmax.f32 %v1297_v33, %v1474_v40  ;;  %v1473_v45 = vmax.f32 %v1471_v30, %v1472_v37  ;;  %v1650_v51 = vunpack.c.l.b16 %v2139_v42  ;;  %v1485_v52 = vmax.f32 %v1483_v35, %v1484_v43 }
 0x2d7   : > { %v2138_v41 = vpack.c.bf16 %v1455_v38, %v1455_v38  ;;  %v1491_v53 = vmax.f32 %v1489_v39, %v1490_v46  ;;  %v1651_v56 = vunpack.c.l.b16 %v2140_v49 }
 0x2d8   : > { %v1476_v48 = vrot.slane %v1475_v26, 2  ;;  %v2141_v44 = vpack.c.bf16 %v1473_v45, %v1473_v45  ;;  %v2143_v59 = vpack.c.bf16 %v1485_v52, %v1485_v52 }
 0x2d9   : > { %v1649_v47 = vunpack.c.l.b16 %v2138_v41  ;;  %v2144_v63 = vpack.c.bf16 %v1491_v53, %v1491_v53 }
 0x2da   : > { %v1477_v50 = vmax.f32 %v1475_v26, %v1476_v48  ;;  %v1652_v60 = vunpack.c.l.b16 %v2141_v44  ;;  %v1654_v1 = vunpack.c.l.b16 %v2143_v59 }
 0x2db   : > { %v1684_v36 = vsel %vm1656_vm3, %v1649_v47, %v1648_v2  ;;  %v1655_v4 = vunpack.c.l.b16 %v2144_v63 }
 0x2dc   : > { %v1478_v54 = vrot.slane %v1477_v50, 1  ;;  %v1685_v55 = vsel %vm1658_vm4, %v1650_v51, %v1684_v36 }
 0x2dd   : > { %v1686_v62 = vsel %vm1660_vm5, %v1651_v56, %v1685_v55 }
 0x2de   : > { %v1479_v58 = vmax.f32 %v1477_v50, %v1478_v54  ;;  %v1687_v3 = vsel %vm1662_vm6, %v1652_v60, %v1686_v62 }
 0x2e0   : > { %v2142_v0 = vpack.c.bf16 %v1479_v58, %v1479_v58 }
 0x2e2   : > { %v1653_v61 = vunpack.c.l.b16 %v2142_v0 }
 0x2e4   : > { %v1688_v5 = vsel %vm1664_vm7, %v1653_v61, %v1687_v3 }
 0x2e5   : > { %v1689_v29 = vsel %vm1666_vm8, %v1654_v1, %v1688_v5 }
 0x2e6   : > { %v1690_v6 = vsel %vm1668_vm9, %v1655_v4, %v1689_v29 }
 0x2e7   : > { %v1694_v7 = vpack.c.b16 %v1690_v6, %v1690_v6 }
 0x2e9   : > { %1702 = vst [vmem:[%s2738_s8 + $0xc] sm:$0xf] %v1694_v7 }
 0x2ea PF: > { %s17_s26 = sadd.s32 1, %s2444_s26   ;;  %s2805_s24 = smov %s2440_s25 }
 0x2eb   : > { %p14_p6 = scmp.ge.s32.totalorder %s17_s26, 4   ;;  %s2806_s25 = smov %s2808_s27 }
 0x2ed   :  { %16 = sbr.rel (!%p14_p6) target bundleno = 2 (0x2), region = 86 }

// kernel: _lambda_.11
= control target key start
LH: loop header
LB: loop body
LE: loop exit
PB: predicated region body
PF: predicated region fallthrough
CT: control target
= control target key end

     0   :  { %s2047_s24 = smov 0   ;;  %s2049_s25 = smov 0   ;;  %s2372_s0 = inlined_call_operand.vmem [shape: bf16[32,8,136], index: 0, kind: input, shape index: {}]   ;;  %s2373_s1 = inlined_call_operand.vmem [shape: bf16[136,128], index: 1, kind: input, shape index: {}]   ;;  %s2374_s2 = inlined_call_operand.vmem [shape: f32[1,128], index: 2, kind: input, shape index: {}]   ;;  %s2375_s3 = inlined_call_operand.vmem [shape: bf16[128,128], index: 3, kind: input, shape index: {}]   ;;  %s2376_s4 = inlined_call_operand.vmem [shape: f32[1,128], index: 4, kind: input, shape index: {}]   ;;  %s2377_s5 = inlined_call_operand.vmem [shape: bf16[128,256], index: 5, kind: input, shape index: {}]   ;;  %s2378_s6 = inlined_call_operand.vmem [shape: f32[1,256], index: 6, kind: input, shape index: {}]   ;;  %s2379_s7 = inlined_call_operand.vmem [shape: bf16[32,256], index: 7, kind: output, shape index: {}]  }
   0x1   :  { %s2051_s26 = smov 0  }
   0x2 LB: > { %s29_s27 = sadd.s32 1, %s2000_s25  ;;  %p1694_p0 = scmp.ge.s32.totalorder %s2004_s26, 1  ;;  %s2004_s26 = sphi %s2051_s26, %s17_s26   ;;  %s2000_s25 = sphi %s2049_s25, %s2382_s25   ;;  %s1996_s24 = sphi %s2047_s24, %s2381_s24  }
   0x3   : > { %p31_p1 = scmp.ge.s32.totalorder %s29_s27, 2  ;;  %p257_p2 = scmp.lt.s32.totalorder %s2004_s26, 3 }
   0x5   : > { %s2384_s27 = smov (%p31_p1, %s29_s27), 0  ;;  %p258_p3 = pnand %p1694_p0, %p257_p2 }
   0x6   : > { %s1695_s9 = sshll.u32 (!%p258_p3), %s1996_s24, 4  ;;  %s1698_s29 = sshll.u32 (!%p258_p3), %s1996_s24, 1 }
   0x7   : > { %261 = sbr.rel (%p258_p3) target bundleno = 751 (0x2ef), region = 48  ;;  %p296_p4 = scmp.lt.s32.totalorder (!%p258_p3), %s1695_s9, 31 }
   0x8   : > { %p2296_p5 = scmp.lt.s32.totalorder (!%p258_p3), %s1698_s29, 3 }
   0xc   : > { %v1917_v0 = vld [vmem:[%s2373_s1 + $0x38] sm:$0xff]   ;;  %v2006_v1 = vmov 0   ;;  %v1918_v2 = vld [vmem:[%s2373_s1 + $0x30] sm:$0xff]   ;;  %s2386_s9 = smov (!%p296_p4, %s1695_s9), 31  ;;  %v1919_v3 = vld [vmem:[%s2373_s1 + $0x28] sm:$0xff]   ;;  %vm477_vm0 = vcmask 64512  }
   0xd   : > { %506 = vmatprep.subr.bf16.mxu0 %v2006_v1  ;;  %s1794_s12 = sshll.u32 %s2386_s9, 3  ;;  %v1920_v4 = vld [vmem:[%s2373_s1 + $0x20] sm:$0xff]   ;;  %v1921_v6 = vld [vmem:[%s2373_s1 + $0x18] sm:$0xff]   ;;  %v1922_v7 = vld [vmem:[%s2373_s1 + $0x10] sm:$0xff]   ;;  %vm502_vm1 = vcmask 1043456   ;;  %vm1412_vm2 = vcmask 1041409  }
   0xe   : > { %507 = vmatpush1.bf16.msra.mxu0 %v1917_v0  ;;  %s2083_s15 = scalar_lea.vmem %s2372_s0, %s1794_s12  ;;  %v1950_v8 = vld [vmem:[%s2375_s3 + $0x38] sm:$0xff]   ;;  %v1951_v9 = vld [vmem:[%s2375_s3 + $0x30] sm:$0xff]   ;;  %v1923_v10 = vld [vmem:[%s2373_s1 + $0x8] sm:$0xff]   ;;  %vm1414_vm3 = vcmask 1042434   ;;  %vm1416_vm4 = vcmask 1043459   ;;  %vm1418_vm5 = vcmask 1044484  }
   0xf   : > { %508 = vmatprep.subr.bf16.mxu0 %v2006_v1  ;;  %v1928_v5 = vld [vmem:[%s2083_s15 + $0x4] ss:$8 sps:$4 sm:$0xff]   ;;  %1844 = vmatprep.subr.bf16.mxu1 %v1950_v8  ;;  %v1925_v13 = vld [vmem:[%s2373_s1 + $0x40] ss:$0 sps:$4 sm:$0xff]   ;;  %v1929_v17 = vld [vmem:[%s2083_s15 + $0x14] ss:$8 sps:$4 sm:$0xff]  }
  0x10   : > { %1727 = vmatprep.mubr.msk.bf16.mxu0 %vm477_vm0, %v1928_v5  ;;  %1845 = vmatpush3.bf16.msra.mxu1 %v1950_v8  ;;  %v1952_v11 = vld [vmem:[%s2375_s3 + $0x28] sm:$0xff]   ;;  %v1924_v12 = vld [vmem:[%s2373_s1] sm:$0xff]   ;;  %v504_v15 = vsel %vm502_vm1, %v1925_v13, 0  ;;  %v1931_v18 = vld [vmem:[%s2083_s15 + $0x10] ss:$8 sps:$4 sm:$0xff]   ;;  %vm1420_vm6 = vcmask 1045509  }
  0x11   : > { %1846 = vmatprep.subr.bf16.mxu1 %v1951_v9  ;;  %v1953_v14 = vld [vmem:[%s2375_s3 + $0x20] sm:$0xff]   ;;  %v1935_v21 = vld [vmem:[%s2083_s15 + $0x34] ss:$8 sps:$4 sm:$0xff]   ;;  %v1937_v22 = vld [vmem:[%s2083_s15 + $0x30] ss:$8 sps:$4 sm:$0xff]   ;;  %vm1422_vm7 = vcmask 1046534  }
  0x12   : > { %509 = vmatpush1.bf16.msra.mxu0 %v1918_v2  ;;  %v1926_v16 = vld [vmem:[%s2083_s15] ss:$8 sps:$4 sm:$0xff]   ;;  %v1932_v19 = vld [vmem:[%s2083_s15 + $0x24] ss:$8 sps:$4 sm:$0xff]   ;;  %v1941_v25 = vld [vmem:[%s2083_s15 + $0x54] ss:$8 sps:$4 sm:$0xff]  }
  0x13   : > { %510 = vmatprep.subr.bf16.mxu0 %v2006_v1  ;;  %v1934_v20 = vld [vmem:[%s2083_s15 + $0x20] ss:$8 sps:$4 sm:$0xff]   ;;  %v1938_v23 = vld [vmem:[%s2083_s15 + $0x44] ss:$8 sps:$4 sm:$0xff]   ;;  %v1943_v26 = vld [vmem:[%s2083_s15 + $0x50] ss:$8 sps:$4 sm:$0xff]  }
  0x14   : > { %1847 = vmatpush3.bf16.msra.mxu1 %v1951_v9  ;;  %v1940_v24 = vld [vmem:[%s2083_s15 + $0x40] ss:$8 sps:$4 sm:$0xff]   ;;  %v1944_v27 = vld [vmem:[%s2083_s15 + $0x64] ss:$8 sps:$4 sm:$0xff]   ;;  %v1947_v29 = vld [vmem:[%s2083_s15 + $0x74] ss:$8 sps:$4 sm:$0xff]  }
  0x15   : > { %1848 = vmatprep.subr.bf16.mxu1 %v1952_v11  ;;  %v1946_v28 = vld [vmem:[%s2083_s15 + $0x60] ss:$8 sps:$4 sm:$0xff]   ;;  %v1949_v30 = vld [vmem:[%s2083_s15 + $0x70] ss:$8 sps:$4 sm:$0xff]   ;;  %v1960_v35 = vld [vmem:[%s2377_s5 + $0x74] ss:$8 sps:$4 sm:$0xff]  }
  0x16   : > { %511 = vmatpush1.bf16.msra.mxu0 %v1919_v3  ;;  %v1954_v31 = vld [vmem:[%s2375_s3 + $0x18] sm:$0xff]   ;;  %v1955_v32 = vld [vmem:[%s2375_s3 + $0x10] sm:$0xff]   ;;  %v1956_v33 = vld [vmem:[%s2375_s3 + $0x8] sm:$0xff]   ;;  %vm1424_vm8 = vcmask 1047559   ;;  %s2388_s29 = smov (!%p2296_p5, %s1698_s29), 3 }
  0x17   : > { %512 = vmatprep.subr.bf16.mxu0 %v2006_v1  ;;  %v1957_v34 = vld [vmem:[%s2375_s3] sm:$0xff]   ;;  %v1958_v36 = vld [vmem:[%s2377_s5 + $0x70] ss:$8 sps:$4 sm:$0xff]   ;;  %v1966_v39 = vld [vmem:[%s2377_s5 + $0x54] ss:$8 sps:$4 sm:$0xff]   ;;  %s1795_s24 = sshll.u32 %s2388_s29, 3 }
  0x18   : > { %1849 = vmatpush3.bf16.msra.mxu1 %v1952_v11  ;;  %v1963_v37 = vld [vmem:[%s2377_s5 + $0x64] ss:$8 sps:$4 sm:$0xff]   ;;  %v1961_v38 = vld [vmem:[%s2377_s5 + $0x60] ss:$8 sps:$4 sm:$0xff]   ;;  %v1964_v40 = vld [vmem:[%s2377_s5 + $0x50] ss:$8 sps:$4 sm:$0xff]   ;;  %s2329_s10 = scalar_lea.vmem %s2379_s7, %s1795_s24 }
  0x19   : > { %1850 = vmatprep.subr.bf16.mxu1 %v1953_v14  ;;  %v1969_v41 = vld [vmem:[%s2377_s5 + $0x44] ss:$8 sps:$4 sm:$0xff]   ;;  %v1967_v42 = vld [vmem:[%s2377_s5 + $0x40] ss:$8 sps:$4 sm:$0xff]   ;;  %v1972_v43 = vld [vmem:[%s2377_s5 + $0x34] ss:$8 sps:$4 sm:$0xff]  }
  0x1a   : > { %513 = vmatpush1.bf16.msra.mxu0 %v1920_v4  ;;  %v1970_v44 = vld [vmem:[%s2377_s5 + $0x30] ss:$8 sps:$4 sm:$0xff]   ;;  %v1975_v45 = vld [vmem:[%s2377_s5 + $0x24] ss:$8 sps:$4 sm:$0xff]   ;;  %v1973_v46 = vld [vmem:[%s2377_s5 + $0x20] ss:$8 sps:$4 sm:$0xff]  }
  0x1b   : > { %514 = vmatprep.subr.bf16.mxu0 %v2006_v1  ;;  %v2197_v47 = vld [vmem:[%s2374_s2] ss:$0 sm:$0xff] }
  0x1c   : > { %1851 = vmatpush3.bf16.msra.mxu1 %v1953_v14 }
  0x1d   : > { %1852 = vmatprep.subr.bf16.mxu1 %v1954_v31 }
  0x1e   : > { %515 = vmatpush1.bf16.msra.mxu0 %v1921_v6 }
  0x1f   : > { %516 = vmatprep.subr.bf16.mxu0 %v2006_v1 }
  0x20   : > { %1853 = vmatpush3.bf16.msra.mxu1 %v1954_v31 }
  0x21   : > { %1854 = vmatprep.subr.bf16.mxu1 %v1955_v32 }
  0x22   : > { %517 = vmatpush1.bf16.msra.mxu0 %v1922_v7 }
  0x23   : > { %518 = vmatprep.subr.bf16.mxu0 %v2006_v1 }
  0x24   : > { %1855 = vmatpush3.bf16.msra.mxu1 %v1955_v32 }
  0x25   : > { %1856 = vmatprep.subr.bf16.mxu1 %v1956_v33 }
  0x26   : > { %519 = vmatpush1.bf16.msra.mxu0 %v1923_v10 }
  0x27   : > { %520 = vmatprep.subr.bf16.mxu0 %v2006_v1 }
  0x28   : > { %1857 = vmatpush3.bf16.msra.mxu1 %v1956_v33 }
  0x29   : > { %1858 = vmatprep.subr.bf16.mxu1 %v1957_v34 }
  0x2a   : > { %521 = vmatpush1.bf16.msra.mxu0 %v1924_v12 }
  0x2b   : > { %536 = vmatprep.subr.bf16.mxu0 %v2006_v1 }
  0x2c   : > { %1859 = vmatpush3.bf16.msra.mxu1 %v1957_v34 }
  0x2d   : > { %1876 = vmatprep.subr.bf16.mxu1 %v1960_v35 }
  0x2e   : > { %537 = vmatpush2.bf16.msra.mxu0 %v504_v15 }
  0x2f   : > { %927 = vmatprep.subr.bf16.mxu0 %v1960_v35 }
  0x31   : > { %539 = vmatmul.mubr.bf16.vlgmr.msra.gmra.mxu0 %v1926_v16 }
  0x32   : > { %1728 = vmatprep.mubr.msk.bf16.mxu0 %vm477_vm0, %v1929_v17  ;;  %928 = vmatpush1.bf16.msra.mxu0 %v1958_v36 }
  0x33   : > { %929 = vmatprep.subr.bf16.mxu0 %v1963_v37 }
  0x36   : > { %930 = vmatpush1.bf16.msra.mxu0 %v1961_v38 }
  0x37   : > { %931 = vmatprep.subr.bf16.mxu0 %v1966_v39 }
  0x39   : > { %547 = vmatmul.mubr.bf16.gmra.mxu0 %v1931_v18 }
  0x3a   : > { %1729 = vmatprep.mubr.msk.bf16.mxu0 %vm477_vm0, %v1932_v19  ;;  %932 = vmatpush1.bf16.msra.mxu0 %v1964_v40 }
  0x3b   : > { %933 = vmatprep.subr.bf16.mxu0 %v1969_v41 }
  0x3e   : > { %934 = vmatpush1.bf16.msra.mxu0 %v1967_v42 }
  0x3f   : > { %935 = vmatprep.subr.bf16.mxu0 %v1972_v43 }
  0x41   : > { %555 = vmatmul.mubr.bf16.gmra.mxu0 %v1934_v20 }
  0x42   : > { %1730 = vmatprep.mubr.msk.bf16.mxu0 %vm477_vm0, %v1935_v21  ;;  %936 = vmatpush1.bf16.msra.mxu0 %v1970_v44 }
  0x43   : > { %937 = vmatprep.subr.bf16.mxu0 %v1975_v45 }
  0x46   : > { %938 = vmatpush1.bf16.msra.mxu0 %v1973_v46 }
  0x49   : > { %563 = vmatmul.mubr.bf16.gmra.mxu0 %v1937_v22 }
  0x4a   : > { %1731 = vmatprep.mubr.msk.bf16.mxu0 %vm477_vm0, %v1938_v23 }
  0x51   : > { %571 = vmatmul.mubr.bf16.gmra.mxu0 %v1940_v24 }
  0x52   : > { %1732 = vmatprep.mubr.msk.bf16.mxu0 %vm477_vm0, %v1941_v25 }
  0x59   : > { %579 = vmatmul.mubr.bf16.gmra.mxu0 %v1943_v26 }
  0x5a   : > { %1733 = vmatprep.mubr.msk.bf16.mxu0 %vm477_vm0, %v1944_v27 }
  0x61   : > { %587 = vmatmul.mubr.bf16.gmra.mxu0 %v1946_v28 }
  0x62   : > { %1734 = vmatprep.mubr.msk.bf16.mxu0 %vm477_vm0, %v1947_v29 }
  0x69   : > { %595 = vmatmul.mubr.bf16.gmra.mxu0 %v1949_v30 }
  0x6a   : > { %959 = vmatprep.mubr.bf16.mxu0 %v2006_v1 }
  0xf1   : > { %v540_v48 = vpop.f32.mrf.mxu0 }
  0xf2   : > { %v541_v50 = vadd.f32 %v2197_v47, %v540_v48 }
  0xf3   : > { %v542_v49 = vpop.f32.mrf.mxu0 }
  0xf4   : > { %v603_v54 = vmax.f32 %v541_v50, 0.0 }
  0xf5   : > { %v543_v51 = vpop.f32.mrf.mxu0 }
  0xf6   : > { %v544_v52 = vadd.f32 %v2197_v47, %v543_v51 }
  0xf7   : > { %v545_v53 = vpop.f32.mrf.mxu0 }
  0xf8   : > { %v604_v55 = vmax.f32 %v544_v52, 0.0 }
  0xf9   : > { %v548_v56 = vpop.f32.mrf.mxu0 }
  0xfa   : > { %v619_v57 = vpack.c.bf16 %v604_v55, %v603_v54  ;;  %v549_v59 = vadd.f32 %v2197_v47, %v548_v56 }
  0xfb   : > { %v550_v58 = vpop.f32.mrf.mxu0 }
  0xfc   : > { %1860 = vmatprep.mubr.bf16.mxu1 %v619_v57  ;;  %v605_v63 = vmax.f32 %v549_v59, 0.0  ;;  %v1978_v58 = vld [vmem:[%s2377_s5 + $0x14] ss:$8 sps:$4 sm:$0xff]   ;;  %v1976_v59 = vld [vmem:[%s2377_s5 + $0x10] ss:$8 sps:$4 sm:$0xff]  }
  0xfd   : > { %v551_v60 = vpop.f32.mrf.mxu0  ;;  %939 = vmatprep.subr.bf16.mxu0 %v1978_v58 }
  0xfe   : > { %v552_v61 = vadd.f32 %v2197_v47, %v551_v60  ;;  %940 = vmatpush1.bf16.msra.mxu0 %v1976_v59  ;;  %v1979_v60 = vld [vmem:[%s2377_s5] ss:$8 sps:$4 sm:$0xff]  }
  0xff   : > { %v553_v62 = vpop.f32.mrf.mxu0 }
 0x100   : > { %v606_v0 = vmax.f32 %v552_v61, 0.0  ;;  %v2231_v62 = vld [vmem:[%s2376_s4] ss:$0 sm:$0xff] }
 0x101   : > { %v556_v2 = vpop.f32.mrf.mxu0 }
 0x102   : > { %v620_v3 = vpack.c.bf16 %v606_v0, %v605_v63  ;;  %v557_v5 = vadd.f32 %v2197_v47, %v556_v2 }
 0x103   : > { %v558_v4 = vpop.f32.mrf.mxu0 }
 0x104   : > { %1861 = vmatmul.mubr.bf16.vlgmr.msra.gmra.mxu1 %v620_v3  ;;  %v607_v9 = vmax.f32 %v557_v5, 0.0 }
 0x105   : > { %v559_v6 = vpop.f32.mrf.mxu0  ;;  %1884 = vmatpush1.bf16.msra.mxu1 %v1958_v36 }
 0x106   : > { %v560_v7 = vadd.f32 %v2197_v47, %v559_v6  ;;  %1877 = vmatprep.subr.bf16.mxu1 %v1963_v37 }
 0x107   : > { %v561_v8 = vpop.f32.mrf.mxu0 }
 0x108   : > { %v608_v10 = vmax.f32 %v560_v7, 0.0 }
 0x109   : > { %v564_v11 = vpop.f32.mrf.mxu0  ;;  %1885 = vmatpush1.bf16.msra.mxu1 %v1961_v38 }
 0x10a   : > { %v621_v12 = vpack.c.bf16 %v608_v10, %v607_v9  ;;  %1878 = vmatprep.subr.bf16.mxu1 %v1966_v39  ;;  %v565_v14 = vadd.f32 %v2197_v47, %v564_v11 }
 0x10b   : > { %v566_v13 = vpop.f32.mrf.mxu0 }
 0x10c   : > { %1864 = vmatprep.mubr.bf16.mxu1 %v621_v12  ;;  %v609_v18 = vmax.f32 %v565_v14, 0.0 }
 0x10d   : > { %v567_v15 = vpop.f32.mrf.mxu0  ;;  %1886 = vmatpush1.bf16.msra.mxu1 %v1964_v40 }
 0x10e   : > { %v568_v16 = vadd.f32 %v2197_v47, %v567_v15  ;;  %1879 = vmatprep.subr.bf16.mxu1 %v1969_v41 }
 0x10f   : > { %v569_v17 = vpop.f32.mrf.mxu0 }
 0x110   : > { %v610_v19 = vmax.f32 %v568_v16, 0.0 }
 0x111   : > { %v572_v20 = vpop.f32.mrf.mxu0  ;;  %1887 = vmatpush1.bf16.msra.mxu1 %v1967_v42 }
 0x112   : > { %v622_v21 = vpack.c.bf16 %v610_v19, %v609_v18  ;;  %1880 = vmatprep.subr.bf16.mxu1 %v1972_v43  ;;  %v573_v23 = vadd.f32 %v2197_v47, %v572_v20 }
 0x113   : > { %v574_v22 = vpop.f32.mrf.mxu0 }
 0x114   : > { %1865 = vmatmul.mubr.bf16.gmra.mxu1 %v622_v21  ;;  %v611_v27 = vmax.f32 %v573_v23, 0.0 }
 0x115   : > { %v575_v24 = vpop.f32.mrf.mxu0  ;;  %1888 = vmatpush1.bf16.msra.mxu1 %v1970_v44 }
 0x116   : > { %v576_v25 = vadd.f32 %v2197_v47, %v575_v24  ;;  %1881 = vmatprep.subr.bf16.mxu1 %v1975_v45 }
 0x117   : > { %v577_v26 = vpop.f32.mrf.mxu0 }
 0x118   : > { %v612_v28 = vmax.f32 %v576_v25, 0.0 }
 0x119   : > { %v580_v29 = vpop.f32.mrf.mxu0  ;;  %1889 = vmatpush1.bf16.msra.mxu1 %v1973_v46 }
 0x11a   : > { %v623_v30 = vpack.c.bf16 %v612_v28, %v611_v27  ;;  %v581_v32 = vadd.f32 %v2197_v47, %v580_v29  ;;  %1882 = vmatprep.subr.bf16.mxu1 %v1978_v58 }
 0x11b   : > { %v582_v31 = vpop.f32.mrf.mxu0 }
 0x11c   : > { %1868 = vmatprep.mubr.bf16.mxu1 %v623_v30  ;;  %v613_v36 = vmax.f32 %v581_v32, 0.0 }
 0x11d   : > { %v583_v33 = vpop.f32.mrf.mxu0  ;;  %1890 = vmatpush1.bf16.msra.mxu1 %v1976_v59  ;;  %v835_v59 = vld [vmem:[%s2378_s6] sm:$0x3] }
 0x11e   : > { %v584_v34 = vadd.f32 %v2197_v47, %v583_v33 }
 0x11f   : > { %v585_v35 = vpop.f32.mrf.mxu0 }
 0x120   : > { %v614_v37 = vmax.f32 %v584_v34, 0.0 }
 0x121   : > { %v588_v38 = vpop.f32.mrf.mxu0 }
 0x122   : > { %v624_v39 = vpack.c.bf16 %v614_v37, %v613_v36  ;;  %v589_v41 = vadd.f32 %v2197_v47, %v588_v38 }
 0x123   : > { %v590_v40 = vpop.f32.mrf.mxu0 }
 0x124   : > { %1869 = vmatmul.mubr.bf16.gmra.mxu1 %v624_v39  ;;  %v615_v45 = vmax.f32 %v589_v41, 0.0 }
 0x125   : > { %v591_v42 = vpop.f32.mrf.mxu0 }
 0x126   : > { %v592_v43 = vadd.f32 %v2197_v47, %v591_v42 }
 0x127   : > { %v593_v44 = vpop.f32.mrf.mxu0 }
 0x128   : > { %v616_v46 = vmax.f32 %v592_v43, 0.0 }
 0x129   : > { %v596_v48 = vpop.f32.mrf.mxu0 }
 0x12a   : > { %v625_v49 = vpack.c.bf16 %v616_v46, %v615_v45  ;;  %v597_v51 = vadd.f32 %v2197_v47, %v596_v48 }
 0x12b   : > { %v598_v50 = vpop.f32.mrf.mxu0 }
 0x12c   : > { %1872 = vmatprep.mubr.bf16.mxu1 %v625_v49  ;;  %v617_v55 = vmax.f32 %v597_v51, 0.0 }
 0x12d   : > { %v599_v52 = vpop.f32.mrf.mxu0 }
 0x12e   : > { %v600_v53 = vadd.f32 %v2197_v47, %v599_v52  ;;  %v1981_v47 = vld [vmem:[%s2377_s5 + $0x4] ss:$8 sps:$4 sm:$0xff]  }
 0x12f   : > { %v601_v54 = vpop.f32.mrf.mxu0  ;;  %1883 = vmatprep.subr.bf16.mxu1 %v1981_v47  ;;  %941 = vmatprep.subr.bf16.mxu0 %v1981_v47 }
 0x130   : > { %v618_v56 = vmax.f32 %v600_v53, 0.0  ;;  %1891 = vmatpush1.bf16.msra.mxu1 %v1979_v60  ;;  %942 = vmatpush1.bf16.msra.mxu0 %v1979_v60 }
 0x132   : > { %v626_v57 = vpack.c.bf16 %v618_v56, %v617_v55  ;;  %v837_v56 = vlaneseq }
 0x134   : > { %1873 = vmatmul.mubr.bf16.gmra.mxu1 %v626_v57  ;;  %v838_v57 = vshrl.u32 %v837_v56, 7 }
 0x135   : > { %969 = vmatprep.mubr.bf16.mxu1 %v2006_v1 }
 0x136   : > { %v839_v58 = vsub.s32 0, %v838_v57  ;;  %v843_v47 = vsub.s32 1, %v838_v57 }
 0x138   : > { %v2258_v60 = vrot.slane %v835_v59, %v839_v58 }
 0x1c4   : > { %v1862_v61 = vpop.f32.mrf.mxu1 }
 0x1c5   : > { %v741_v0 = vadd.f32 %v1862_v61, %v2231_v62  ;;  %v2260_v61 = vrot.slane %v835_v59, %v843_v47 }
 0x1c6   : > { %v732_v63 = vpop.f32.mrf.mxu1 }
 0x1c7   : > { %v733_v3 = vadd.f32 %v2231_v62, %v732_v63  ;;  %v797_v6 = vmax.f32 %v741_v0, 0.0 }
 0x1c8   : > { %v1863_v2 = vpop.f32.mrf.mxu1 }
 0x1c9   : > { %v744_v4 = vadd.f32 %v1863_v2, %v2231_v62  ;;  %v795_v9 = vmax.f32 %v733_v3, 0.0 }
 0x1ca   : > { %v735_v5 = vpop.f32.mrf.mxu1 }
 0x1cb   : > { %v798_v7 = vmax.f32 %v744_v4, 0.0  ;;  %v736_v8 = vadd.f32 %v2231_v62, %v735_v5 }
 0x1cd   : > { %v812_v10 = vpack.c.bf16 %v798_v7, %v797_v6  ;;  %v796_v11 = vmax.f32 %v736_v8, 0.0 }
 0x1cf   : > { %v811_v12 = vpack.c.bf16 %v796_v11, %v795_v9  ;;  %970 = vmatmul.mubr.bf16.vlgmr.msra.gmra.mxu1 %v812_v10 }
 0x1d0   : > { %979 = vmatprep.mubr.bf16.mxu1 %v2006_v1 }
 0x1d1   : > { %960 = vmatmul.mubr.bf16.vlgmr.msra.gmra.mxu0 %v811_v12 }
 0x1d4   : > { %v1866_v13 = vpop.f32.mrf.mxu1 }
 0x1d5   : > { %v757_v23 = vadd.f32 %v1866_v13, %v2231_v62 }
 0x1d6   : > { %v748_v14 = vpop.f32.mrf.mxu1 }
 0x1d7   : > { %v749_v16 = vadd.f32 %v2231_v62, %v748_v14  ;;  %v801_v26 = vmax.f32 %v757_v23, 0.0 }
 0x1d8   : > { %v1867_v15 = vpop.f32.mrf.mxu1 }
 0x1d9   : > { %v799_v19 = vmax.f32 %v749_v16, 0.0  ;;  %v760_v21 = vadd.f32 %v1867_v15, %v2231_v62 }
 0x1da   : > { %v751_v17 = vpop.f32.mrf.mxu1 }
 0x1db   : > { %v752_v18 = vadd.f32 %v2231_v62, %v751_v17  ;;  %v802_v24 = vmax.f32 %v760_v21, 0.0 }
 0x1dd   : > { %v800_v20 = vmax.f32 %v752_v18, 0.0  ;;  %v814_v28 = vpack.c.bf16 %v802_v24, %v801_v26 }
 0x1df   : > { %v813_v22 = vpack.c.bf16 %v800_v20, %v799_v19 }
 0x1e1   : > { %980 = vmatmul.mubr.bf16.gmra.mxu1 %v813_v22 }
 0x1e2   : > { %989 = vmatprep.mubr.bf16.mxu1 %v2006_v1 }
 0x1e4   : > { %v1870_v25 = vpop.f32.mrf.mxu1 }
 0x1e5   : > { %v773_v37 = vadd.f32 %v1870_v25, %v2231_v62 }
 0x1e6   : > { %v764_v27 = vpop.f32.mrf.mxu1 }
 0x1e7   : > { %v765_v30 = vadd.f32 %v2231_v62, %v764_v27  ;;  %v805_v40 = vmax.f32 %v773_v37, 0.0 }
 0x1e8   : > { %v1871_v29 = vpop.f32.mrf.mxu1 }
 0x1e9   : > { %990 = vmatmul.mubr.bf16.gmra.mxu1 %v814_v28  ;;  %v803_v33 = vmax.f32 %v765_v30, 0.0  ;;  %v776_v35 = vadd.f32 %v1871_v29, %v2231_v62 }
 0x1ea   : > { %v767_v31 = vpop.f32.mrf.mxu1  ;;  %999 = vmatprep.mubr.bf16.mxu1 %v2006_v1 }
 0x1eb   : > { %v768_v32 = vadd.f32 %v2231_v62, %v767_v31  ;;  %v806_v38 = vmax.f32 %v776_v35, 0.0 }
 0x1ed   : > { %v804_v34 = vmax.f32 %v768_v32, 0.0  ;;  %v816_v42 = vpack.c.bf16 %v806_v38, %v805_v40 }
 0x1ef   : > { %v815_v36 = vpack.c.bf16 %v804_v34, %v803_v33 }
 0x1f1   : > { %1000 = vmatmul.mubr.bf16.gmra.mxu1 %v815_v36 }
 0x1f2   : > { %1009 = vmatprep.mubr.bf16.mxu1 %v2006_v1 }
 0x1f4   : > { %v1874_v39 = vpop.f32.mrf.mxu1 }
 0x1f5   : > { %v789_v52 = vadd.f32 %v1874_v39, %v2231_v62 }
 0x1f6   : > { %v780_v41 = vpop.f32.mrf.mxu1 }
 0x1f7   : > { %v781_v44 = vadd.f32 %v2231_v62, %v780_v41  ;;  %v809_v54 = vmax.f32 %v789_v52, 0.0 }
 0x1f8   : > { %v1875_v43 = vpop.f32.mrf.mxu1 }
 0x1f9   : > { %1010 = vmatmul.mubr.bf16.gmra.mxu1 %v816_v42  ;;  %v807_v48 = vmax.f32 %v781_v44, 0.0  ;;  %v792_v50 = vadd.f32 %v1875_v43, %v2231_v62 }
 0x1fa   : > { %v783_v45 = vpop.f32.mrf.mxu1  ;;  %1019 = vmatprep.mubr.bf16.mxu1 %v2006_v1 }
 0x1fb   : > { %v784_v46 = vadd.f32 %v2231_v62, %v783_v45  ;;  %v810_v53 = vmax.f32 %v792_v50, 0.0 }
 0x1fd   : > { %v808_v49 = vmax.f32 %v784_v46, 0.0  ;;  %v818_v55 = vpack.c.bf16 %v810_v53, %v809_v54 }
 0x1ff   : > { %v817_v51 = vpack.c.bf16 %v808_v49, %v807_v48 }
 0x201   : > { %1020 = vmatmul.mubr.bf16.gmra.mxu1 %v817_v51 }
 0x202   : > { %1029 = vmatprep.mubr.bf16.mxu1 %v2006_v1 }
 0x209   : > { %1030 = vmatmul.mubr.bf16.gmra.mxu1 %v818_v55 }
 0x28f   : > { %v971_v62 = vpop.f32.mrf.mxu1 }
 0x290   : > { %v972_v63 = vadd.f32 %v971_v62, %v2258_v60 }
 0x291   : > { %v961_v1 = vpop.f32.mrf.mxu0  ;;  %v973_v0 = vpop.f32.mrf.mxu1 }
 0x292   : > { %v1044_v2 = vmax.f32 %v972_v63, 0.0  ;;  %v962_v3 = vadd.f32 %v961_v1, %v2258_v60  ;;  %v974_v4 = vadd.f32 %v973_v0, %v2260_v61 }
 0x293   : > { %v963_v5 = vpop.f32.mrf.mxu0  ;;  %v975_v6 = vpop.f32.mrf.mxu1 }
 0x294   : > { %v1096_v7 = vrot.slane %v1044_v2, 4  ;;  %v1040_v8 = vmax.f32 %v962_v3, 0.0  ;;  %v1045_v9 = vmax.f32 %v974_v4, 0.0  ;;  %v964_v10 = vadd.f32 %v963_v5, %v2260_v61 }
 0x295   : > { %v976_v11 = vadd.f32 %v975_v6, %v2258_v60  ;;  %v965_v12 = vpop.f32.mrf.mxu0  ;;  %v977_v13 = vpop.f32.mrf.mxu1 }
 0x296   : > { %v1102_v14 = vrot.slane %v1045_v9, 4  ;;  %v1041_v15 = vmax.f32 %v964_v10, 0.0  ;;  %v1097_v16 = vmax.f32 %v1044_v2, %v1096_v7  ;;  %v966_v18 = vadd.f32 %v965_v12, %v2258_v60 }
 0x297   : > { %v1046_v17 = vmax.f32 %v976_v11, 0.0  ;;  %v978_v19 = vadd.f32 %v977_v13, %v2260_v61  ;;  %v967_v20 = vpop.f32.mrf.mxu0  ;;  %v1072_v21 = vrot.slane %v1040_v8, 4 }
 0x298   : > { %v1103_v22 = vmax.f32 %v1045_v9, %v1102_v14  ;;  %v1078_v23 = vrot.slane %v1041_v15, 4  ;;  %v1042_v25 = vmax.f32 %v966_v18, 0.0  ;;  %v968_v27 = vadd.f32 %v967_v20, %v2260_v61 }
 0x299   : > { %v1108_v24 = vrot.slane %v1046_v17, 4  ;;  %v1047_v26 = vmax.f32 %v978_v19, 0.0  ;;  %v1098_v29 = vrot.slane %v1097_v16, 2  ;;  %v1073_v33 = vmax.f32 %v1040_v8, %v1072_v21 }
 0x29a   : > { %v1104_v28 = vrot.slane %v1103_v22, 2  ;;  %v1079_v30 = vmax.f32 %v1041_v15, %v1078_v23  ;;  %v1084_v31 = vrot.slane %v1042_v25, 4  ;;  %v1043_v32 = vmax.f32 %v968_v27, 0.0 }
 0x29b   : > { %v1109_v35 = vmax.f32 %v1046_v17, %v1108_v24  ;;  %v1114_v36 = vrot.slane %v1047_v26, 4  ;;  %v1099_v39 = vmax.f32 %v1097_v16, %v1098_v29  ;;  %v1074_v42 = vrot.slane %v1073_v33, 2 }
 0x29c   : > { %v1105_v34 = vmax.f32 %v1103_v22, %v1104_v28  ;;  %v1090_v37 = vrot.slane %v1043_v32, 4  ;;  %v1085_v38 = vmax.f32 %v1042_v25, %v1084_v31  ;;  %v1080_v40 = vrot.slane %v1079_v30, 2 }
 0x29d   : > { %v1110_v44 = vrot.slane %v1109_v35, 2  ;;  %v1115_v45 = vmax.f32 %v1047_v26, %v1114_v36  ;;  %v1100_v51 = vrot.slane %v1099_v39, 1  ;;  %v1075_v55 = vmax.f32 %v1073_v33, %v1074_v42 }
 0x29e   : > { %v1091_v41 = vmax.f32 %v1043_v32, %v1090_v37  ;;  %v1106_v43 = vrot.slane %v1105_v34, 1  ;;  %v1086_v49 = vrot.slane %v1085_v38, 2  ;;  %v1081_v52 = vmax.f32 %v1079_v30, %v1080_v40 }
 0x29f   : > { %v1111_v58 = vmax.f32 %v1109_v35, %v1110_v44  ;;  %v1116_v59 = vrot.slane %v1115_v45, 2  ;;  %v1101_v2 = vmax.f32 %v1099_v39, %v1100_v51  ;;  %v1076_v7 = vrot.slane %v1075_v55, 1 }
 0x2a0   : > { %v1092_v46 = vrot.slane %v1091_v41, 2  ;;  %v1107_v57 = vmax.f32 %v1105_v34, %v1106_v43  ;;  %v1087_v63 = vmax.f32 %v1085_v38, %v1086_v49  ;;  %v1082_v3 = vrot.slane %v1081_v52, 1 }
 0x2a1   : > { %v981_v48 = vpop.f32.mrf.mxu1  ;;  %v1112_v12 = vrot.slane %v1111_v58, 1  ;;  %v1117_v13 = vmax.f32 %v1115_v45, %v1116_v59  ;;  %v1077_v28 = vmax.f32 %v1075_v55, %v1076_v7 }
 0x2a2   : > { %v982_v50 = vadd.f32 %v981_v48, %v2258_v60  ;;  %v1093_v53 = vmax.f32 %v1091_v41, %v1092_v46  ;;  %v2274_v11 = vpack.c.bf16 %v1107_v57, %v1101_v2  ;;  %v1088_v16 = vrot.slane %v1087_v63, 1 }
 0x2a3   : > { %v983_v54 = vpop.f32.mrf.mxu1  ;;  %v1083_v20 = vmax.f32 %v1081_v52, %v1082_v3  ;;  %v1113_v29 = vmax.f32 %v1111_v58, %v1112_v12  ;;  %v1118_v35 = vrot.slane %v1117_v13, 1 }
 0x2a4   : > { %v1048_v56 = vmax.f32 %v982_v50, 0.0  ;;  %v984_v47 = vadd.f32 %v983_v54, %v2260_v61  ;;  %v1094_v4 = vrot.slane %v1093_v53, 1  ;;  %v1384_v33 = vunpack.c.l.b16 %v2274_v11 }
 0x2a5   : > { %v985_v62 = vpop.f32.mrf.mxu1  ;;  %v1089_v34 = vmax.f32 %v1087_v63, %v1088_v16  ;;  %v1385_v37 = vunpack.c.h.b16 %v2274_v11  ;;  %v2280_v38 = vpack.c.bf16 %v1083_v20, %v1077_v28  ;;  %v1119_v52 = vmax.f32 %v1117_v13, %v1118_v35 }
 0x2a6   : > { %v1120_v1 = vrot.slane %v1048_v56, 4  ;;  %v986_v0 = vadd.f32 %v985_v62, %v2258_v60  ;;  %v1049_v5 = vmax.f32 %v984_v47, 0.0  ;;  %v1095_v21 = vmax.f32 %v1093_v53, %v1094_v4 }
 0x2a7   : > { %v987_v6 = vpop.f32.mrf.mxu1 }
 0x2a8   : > { %v1121_v8 = vmax.f32 %v1048_v56, %v1120_v1  ;;  %v1050_v9 = vmax.f32 %v986_v0, 0.0  ;;  %v988_v10 = vadd.f32 %v987_v6, %v2260_v61  ;;  %v1126_v14 = vrot.slane %v1049_v5, 4 }
 0x2a9   : > { %v991_v15 = vpop.f32.mrf.mxu1  ;;  %v2282_v42 = vpack.c.bf16 %v1095_v21, %v1089_v34  ;;  %v1380_v56 = vunpack.c.l.b16 %v2280_v38  ;;  %v1381_v21 = vunpack.c.h.b16 %v2280_v38 }
 0x2aa   : > { %v1132_v17 = vrot.slane %v1050_v9, 4  ;;  %v1051_v18 = vmax.f32 %v988_v10, 0.0  ;;  %v992_v19 = vadd.f32 %v991_v15, %v2258_v60  ;;  %v1127_v22 = vmax.f32 %v1049_v5, %v1126_v14 }
 0x2ab   : > { %v993_v23 = vpop.f32.mrf.mxu1  ;;  %v1122_v24 = vrot.slane %v1121_v8, 2  ;;  %v1382_v62 = vunpack.c.l.b16 %v2282_v42  ;;  %v1383_v7 = vunpack.c.h.b16 %v2282_v42 }
 0x2ac   : > { %v1133_v25 = vmax.f32 %v1050_v9, %v1132_v17  ;;  %v1138_v26 = vrot.slane %v1051_v18, 4  ;;  %v1052_v27 = vmax.f32 %v992_v19, 0.0  ;;  %v1128_v30 = vrot.slane %v1127_v22, 2 }
 0x2ad   : > { %v994_v31 = vadd.f32 %v993_v23, %v2260_v61  ;;  %v995_v32 = vpop.f32.mrf.mxu1  ;;  %v1123_v43 = vmax.f32 %v1121_v8, %v1122_v24 }
 0x2ae   : > { %v1134_v36 = vrot.slane %v1133_v25, 2  ;;  %v1129_v39 = vmax.f32 %v1127_v22, %v1128_v30  ;;  %v1139_v40 = vmax.f32 %v1051_v18, %v1138_v26  ;;  %v1144_v44 = vrot.slane %v1052_v27, 4 }
 0x2af   : > { %v997_v41 = vpop.f32.mrf.mxu1  ;;  %v1053_v45 = vmax.f32 %v994_v31, 0.0  ;;  %v996_v49 = vadd.f32 %v995_v32, %v2258_v60  ;;  %v1124_v63 = vrot.slane %v1123_v43, 1  ;;  %v1799_v22 = vpack.c.bf16 %v1119_v52, %v1113_v29 }
 0x2b0   : > { %v1135_v46 = vmax.f32 %v1133_v25, %v1134_v36  ;;  %v1140_v48 = vrot.slane %v1139_v40, 2  ;;  %v998_v50 = vadd.f32 %v997_v41, %v2260_v61  ;;  %v1130_v53 = vrot.slane %v1129_v39, 1 }
 0x2b1   : > { %v1001_v51 = vpop.f32.mrf.mxu1  ;;  %v1145_v54 = vmax.f32 %v1052_v27, %v1144_v44  ;;  %v1150_v55 = vrot.slane %v1053_v45, 4  ;;  %v1054_v58 = vmax.f32 %v996_v49, 0.0  ;;  %v1125_v17 = vmax.f32 %v1123_v43, %v1124_v63 }
 0x2b2   : > { %v1141_v57 = vmax.f32 %v1139_v40, %v1140_v48  ;;  %v1055_v59 = vmax.f32 %v998_v50, 0.0  ;;  %v1136_v2 = vrot.slane %v1135_v46, 1  ;;  %v1131_v8 = vmax.f32 %v1129_v39, %v1130_v53 }
 0x2b3   : > { %v1003_v47 = vpop.f32.mrf.mxu1  ;;  %v1146_v1 = vrot.slane %v1145_v54, 2  ;;  %v1151_v0 = vmax.f32 %v1053_v45, %v1150_v55  ;;  %v1156_v4 = vrot.slane %v1054_v58, 4  ;;  %v1002_v14 = vadd.f32 %v1001_v51, %v2258_v60 }
 0x2b4   : > { %v1142_v3 = vrot.slane %v1141_v57, 1  ;;  %v1162_v5 = vrot.slane %v1055_v59, 4  ;;  %v1004_v15 = vadd.f32 %v1003_v47, %v2260_v61  ;;  %v1137_v23 = vmax.f32 %v1135_v46, %v1136_v2 }
 0x2b5   : > { %v1005_v6 = vpop.f32.mrf.mxu1  ;;  %v1147_v9 = vmax.f32 %v1145_v54, %v1146_v1  ;;  %v1152_v10 = vrot.slane %v1151_v0, 2  ;;  %v1157_v13 = vmax.f32 %v1054_v58, %v1156_v4  ;;  %v1413_v26 = vsel %vm1412_vm2, %v1382_v62, %v1380_v56 }
 0x2b6   : > { %v1143_v12 = vmax.f32 %v1141_v57, %v1142_v3  ;;  %v1163_v20 = vmax.f32 %v1055_v59, %v1162_v5  ;;  %v1800_v27 = vpack.c.bf16 %v1131_v8, %v1125_v17  ;;  %v1056_v34 = vmax.f32 %v1002_v14, 0.0 }
 0x2b7   : > { %v1007_v16 = vpop.f32.mrf.mxu1  ;;  %v1148_v18 = vrot.slane %v1147_v9, 1  ;;  %v1153_v19 = vmax.f32 %v1151_v0, %v1152_v10  ;;  %v1158_v24 = vrot.slane %v1157_v13, 2  ;;  %v1057_v35 = vmax.f32 %v1004_v15, 0.0 }
 0x2b8   : > { %v1164_v30 = vrot.slane %v1163_v20, 2  ;;  %v1801_v31 = vpack.c.bf16 %v1143_v12, %v1137_v23  ;;  %v1426_v36 = vsel %vm1412_vm2, %v1383_v7, %v1381_v21  ;;  %v1386_v41 = vunpack.c.l.b16 %v1799_v22 }
 0x2b9   : > { %v1011_v25 = vpop.f32.mrf.mxu1  ;;  %v1154_v28 = vrot.slane %v1153_v19, 1  ;;  %v1159_v32 = vmax.f32 %v1157_v13, %v1158_v24  ;;  %v1149_v38 = vmax.f32 %v1147_v9, %v1148_v18  ;;  %v1415_v42 = vsel %vm1414_vm3, %v1384_v33, %v1413_v26 }
 0x2ba   : > { %v1165_v40 = vmax.f32 %v1163_v20, %v1164_v30  ;;  %v1174_v44 = vrot.slane %v1057_v35, 4  ;;  %v1387_v46 = vunpack.c.h.b16 %v1799_v22  ;;  %v1388_v48 = vunpack.c.l.b16 %v1800_v27 }
 0x2bb   : > { %v1013_v29 = vpop.f32.mrf.mxu1  ;;  %v1155_v39 = vmax.f32 %v1153_v19, %v1154_v28  ;;  %v1160_v43 = vrot.slane %v1159_v32, 1  ;;  %v1427_v51 = vsel %vm1414_vm3, %v1385_v37, %v1426_v36  ;;  %v1389_v52 = vunpack.c.h.b16 %v1800_v27 }
 0x2bc   : > { %v1166_v50 = vrot.slane %v1165_v40, 1  ;;  %v1390_v53 = vunpack.c.l.b16 %v1801_v31  ;;  %v1168_v54 = vrot.slane %v1056_v34, 4  ;;  %v1417_v33 = vsel %vm1416_vm4, %v1386_v41, %v1415_v42 }
 0x2bd   : > { %v1015_v45 = vpop.f32.mrf.mxu1  ;;  %v1802_v49 = vpack.c.bf16 %v1155_v39, %v1149_v38  ;;  %v1391_v56 = vunpack.c.h.b16 %v1801_v31  ;;  %v1161_v57 = vmax.f32 %v1159_v32, %v1160_v43  ;;  %v1175_v62 = vmax.f32 %v1057_v35, %v1174_v44 }
 0x2be   : > { %v1167_v58 = vmax.f32 %v1165_v40, %v1166_v50  ;;  %v1006_v11 = vadd.f32 %v1005_v6, %v2258_v60  ;;  %v1419_v63 = vsel %vm1418_vm5, %v1388_v48, %v1417_v33  ;;  %v1428_v1 = vsel %vm1416_vm4, %v1387_v46, %v1427_v51 }
 0x2bf   : > { %v1017_v55 = vpop.f32.mrf.mxu1  ;;  %v1392_v59 = vunpack.c.l.b16 %v1802_v49  ;;  %v1393_v47 = vunpack.c.h.b16 %v1802_v49  ;;  %v1008_v2 = vadd.f32 %v1007_v16, %v2260_v61  ;;  %v1429_v3 = vsel %vm1418_vm5, %v1389_v52, %v1428_v1 }
 0x2c0   : > { %v1803_v0 = vpack.c.bf16 %v1167_v58, %v1161_v57  ;;  %v1421_v4 = vsel %vm1420_vm6, %v1390_v53, %v1419_v63  ;;  %v1169_v5 = vmax.f32 %v1056_v34, %v1168_v54  ;;  %v1012_v7 = vadd.f32 %v1011_v25, %v2258_v60 }
 0x2c1   : > { %v1021_v37 = vpop.f32.mrf.mxu1  ;;  %v1430_v9 = vsel %vm1420_vm6, %v1391_v56, %v1429_v3  ;;  %v1014_v12 = vadd.f32 %v1013_v29, %v2260_v61  ;;  %v1423_v13 = vsel %vm1422_vm7, %v1392_v59, %v1421_v4  ;;  %v1176_v15 = vrot.slane %v1175_v62, 2 }
 0x2c2   : > { %v1394_v6 = vunpack.c.l.b16 %v1803_v0  ;;  %v1395_v10 = vunpack.c.h.b16 %v1803_v0  ;;  %v1431_v14 = vsel %vm1422_vm7, %v1393_v47, %v1430_v9  ;;  %v1058_v16 = vmax.f32 %v1006_v11, 0.0 }
 0x2c3   : > { %v1023_v8 = vpop.f32.mrf.mxu1  ;;  %v1059_v20 = vmax.f32 %v1008_v2, 0.0  ;;  %v1016_v21 = vadd.f32 %v1015_v45, %v2258_v60  ;;  %v1060_v23 = vmax.f32 %v1012_v7, 0.0  ;;  %v1170_v24 = vrot.slane %v1169_v5, 2 }
 0x2c4   : > { %v1425_v18 = vsel %vm1424_vm8, %v1394_v6, %v1423_v13  ;;  %v1432_v19 = vsel %vm1424_vm8, %v1395_v10, %v1431_v14  ;;  %v1061_v25 = vmax.f32 %v1014_v12, 0.0  ;;  %v1018_v26 = vadd.f32 %v1017_v55, %v2260_v61 }
 0x2c5   : > { %v1025_v17 = vpop.f32.mrf.mxu1  ;;  %v1447_v22 = vpack.c.b16 %v1432_v19, %v1425_v18  ;;  %v1180_v27 = vrot.slane %v1058_v16, 4  ;;  %v1022_v28 = vadd.f32 %v1021_v37, %v2258_v60  ;;  %v1177_v31 = vmax.f32 %v1175_v62, %v1176_v15 }
 0x2c6   : > { %v1186_v32 = vrot.slane %v1059_v20, 4  ;;  %v1062_v34 = vmax.f32 %v1016_v21, 0.0  ;;  %v1063_v35 = vmax.f32 %v1018_v26, 0.0  ;;  %v1192_v29 = vrot.slane %v1060_v23, 4 }
 0x2c7   : > { %1451 = vst [vmem:[%s2329_s10] sm:$0xff] %v1447_v22  ;;  %v1027_v30 = vpop.f32.mrf.mxu1  ;;  %v1171_v36 = vmax.f32 %v1169_v5, %v1170_v24  ;;  %v1198_v38 = vrot.slane %v1061_v25, 4  ;;  %v1181_v40 = vmax.f32 %v1058_v16, %v1180_v27  ;;  %v1064_v41 = vmax.f32 %v1022_v28, 0.0 }
 0x2c8   : > { %v1210_v39 = vrot.slane %v1063_v35, 4  ;;  %v1024_v42 = vadd.f32 %v1023_v8, %v2260_v61  ;;  %v1026_v43 = vadd.f32 %v1025_v17, %v2258_v60  ;;  %v1178_v45 = vrot.slane %v1177_v31, 1 }
 0x2c9   : > { %v1031_v44 = vpop.f32.mrf.mxu1  ;;  %v1187_v46 = vmax.f32 %v1059_v20, %v1186_v32  ;;  %v1204_v48 = vrot.slane %v1062_v34, 4  ;;  %v1193_v49 = vmax.f32 %v1060_v23, %v1192_v29  ;;  %v1172_v52 = vrot.slane %v1171_v36, 1 }
 0x2ca   : > { %v1065_v50 = vmax.f32 %v1024_v42, 0.0  ;;  %v1066_v51 = vmax.f32 %v1026_v43, 0.0  ;;  %v1199_v53 = vmax.f32 %v1061_v25, %v1198_v38  ;;  %v1211_v54 = vmax.f32 %v1063_v35, %v1210_v39 }
 0x2cb   : > { %v1182_v55 = vrot.slane %v1181_v40, 2  ;;  %v1216_v33 = vrot.slane %v1064_v41, 4  ;;  %v1028_v57 = vadd.f32 %v1027_v30, %v2260_v61  ;;  %v1033_v58 = vpop.f32.mrf.mxu1  ;;  %v1179_v59 = vmax.f32 %v1177_v31, %v1178_v45 }
 0x2cc   : > { %v1222_v56 = vrot.slane %v1065_v50, 4  ;;  %v1188_v47 = vrot.slane %v1187_v46, 2  ;;  %v1205_v62 = vmax.f32 %v1062_v34, %v1204_v48  ;;  %v1228_v11 = vrot.slane %v1066_v51, 4 }
 0x2cd   : > { %v1194_v37 = vrot.slane %v1193_v49, 2  ;;  %v1173_v1 = vmax.f32 %v1171_v36, %v1172_v52  ;;  %v1200_v0 = vrot.slane %v1199_v53, 2  ;;  %v1212_v2 = vrot.slane %v1211_v54, 2  ;;  %v1035_v8 = vpop.f32.mrf.mxu1 }
 0x2ce   : > { %v1223_v63 = vmax.f32 %v1065_v50, %v1222_v56  ;;  %v1183_v3 = vmax.f32 %v1181_v40, %v1182_v55  ;;  %v1217_v4 = vmax.f32 %v1064_v41, %v1216_v33  ;;  %v1067_v5 = vmax.f32 %v1028_v57, 0.0 }
 0x2cf   : > { %v1032_v7 = vadd.f32 %v1031_v44, %v2258_v60  ;;  %v2341_v9 = vpack.c.bf16 %v1179_v59, %v1173_v1  ;;  %v1189_v6 = vmax.f32 %v1187_v46, %v1188_v47  ;;  %v1206_v10 = vrot.slane %v1205_v62, 2  ;;  %v1037_v35 = vpop.f32.mrf.mxu1 }
 0x2d0   : > { %v1229_v12 = vmax.f32 %v1066_v51, %v1228_v11  ;;  %v1195_v13 = vmax.f32 %v1193_v49, %v1194_v37  ;;  %v1224_v14 = vrot.slane %v1223_v63, 2  ;;  %v1234_v15 = vrot.slane %v1067_v5, 4 }
 0x2d1   : > { %v1068_v16 = vmax.f32 %v1032_v7, 0.0  ;;  %v1201_v17 = vmax.f32 %v1199_v53, %v1200_v0  ;;  %v1213_v18 = vmax.f32 %v1211_v54, %v1212_v2  ;;  %v1034_v19 = vadd.f32 %v1033_v58, %v2260_v61 }
 0x2d2   : > { %v1036_v20 = vadd.f32 %v1035_v8, %v2258_v60  ;;  %v1184_v21 = vrot.slane %v1183_v3, 1  ;;  %v1218_v22 = vrot.slane %v1217_v4, 2  ;;  %v1235_v23 = vmax.f32 %v1067_v5, %v1234_v15 }
 0x2d3   : > { %v1240_v24 = vrot.slane %v1068_v16, 4  ;;  %v1190_v25 = vrot.slane %v1189_v6, 1  ;;  %v1207_v26 = vmax.f32 %v1205_v62, %v1206_v10  ;;  %v1230_v27 = vrot.slane %v1229_v12, 2 }
 0x2d4   : > { %v1069_v28 = vmax.f32 %v1034_v19, 0.0  ;;  %v1225_v30 = vmax.f32 %v1223_v63, %v1224_v14  ;;  %v1236_v31 = vrot.slane %v1235_v23, 2  ;;  %v1070_v34 = vmax.f32 %v1036_v20, 0.0 }
 0x2d5   : > { %v1241_v32 = vmax.f32 %v1068_v16, %v1240_v24  ;;  %v1196_v29 = vrot.slane %v1195_v13, 1  ;;  %v1202_v36 = vrot.slane %v1201_v17, 1  ;;  %v1214_v38 = vrot.slane %v1213_v18, 1 }
 0x2d6   : > { %v1246_v39 = vrot.slane %v1069_v28, 4  ;;  %v1219_v40 = vmax.f32 %v1217_v4, %v1218_v22  ;;  %v1237_v41 = vmax.f32 %v1235_v23, %v1236_v31  ;;  %v1252_v42 = vrot.slane %v1070_v34, 4 }
 0x2d7   : > { %v1242_v60 = vrot.slane %v1241_v32, 2  ;;  %v1185_v43 = vmax.f32 %v1183_v3, %v1184_v21  ;;  %v1231_v44 = vmax.f32 %v1229_v12, %v1230_v27  ;;  %v1038_v46 = vadd.f32 %v1037_v35, %v2260_v61 }
 0x2d8   : > { %v1247_v45 = vmax.f32 %v1069_v28, %v1246_v39  ;;  %v1191_v48 = vmax.f32 %v1189_v6, %v1190_v25  ;;  %v1208_v49 = vrot.slane %v1207_v26, 1  ;;  %v1226_v50 = vrot.slane %v1225_v30, 1 }
 0x2d9   : > { %v1243_v51 = vmax.f32 %v1241_v32, %v1242_v60  ;;  %v1238_v52 = vrot.slane %v1237_v41, 1  ;;  %v1253_v54 = vmax.f32 %v1070_v34, %v1252_v42  ;;  %v1071_v55 = vmax.f32 %v1038_v46, 0.0 }
 0x2da   : > { %v1248_v53 = vrot.slane %v1247_v45, 2  ;;  %v1197_v33 = vmax.f32 %v1195_v13, %v1196_v29  ;;  %v1203_v56 = vmax.f32 %v1201_v17, %v1202_v36  ;;  %v1215_v57 = vmax.f32 %v1213_v18, %v1214_v38 }
 0x2db   : > { %v1220_v58 = vrot.slane %v1219_v40, 1  ;;  %v1232_v59 = vrot.slane %v1231_v44, 1  ;;  %v1254_v62 = vrot.slane %v1253_v54, 2  ;;  %v1258_v11 = vrot.slane %v1071_v55, 4 }
 0x2dc   : > { %v1249_v47 = vmax.f32 %v1247_v45, %v1248_v53  ;;  %v1805_v37 = vpack.c.bf16 %v1191_v48, %v1185_v43  ;;  %v1209_v63 = vmax.f32 %v1207_v26, %v1208_v49  ;;  %v1227_v1 = vmax.f32 %v1225_v30, %v1226_v50 }
 0x2dd   : > { %v1244_v61 = vrot.slane %v1243_v51, 1  ;;  %v1239_v0 = vmax.f32 %v1237_v41, %v1238_v52  ;;  %v1255_v3 = vmax.f32 %v1253_v54, %v1254_v62  ;;  %v1259_v4 = vmax.f32 %v1071_v55, %v1258_v11 }
 0x2de   : > { %v1250_v2 = vrot.slane %v1249_v47, 1  ;;  %v1806_v5 = vpack.c.bf16 %v1203_v56, %v1197_v33  ;;  %v1221_v7 = vmax.f32 %v1219_v40, %v1220_v58  ;;  %v1807_v8 = vpack.c.bf16 %v1215_v57, %v1209_v63 }
 0x2df   : > { %v1233_v6 = vmax.f32 %v1231_v44, %v1232_v59  ;;  %v1260_v12 = vrot.slane %v1259_v4, 2  ;;  %v1398_v13 = vunpack.c.l.b16 %v1805_v37  ;;  %v1399_v14 = vunpack.c.h.b16 %v1805_v37 }
 0x2e0   : > { %v1251_v10 = vmax.f32 %v1249_v47, %v1250_v2  ;;  %v1808_v15 = vpack.c.bf16 %v1227_v1, %v1221_v7  ;;  %v1245_v16 = vmax.f32 %v1243_v51, %v1244_v61  ;;  %v1396_v17 = vunpack.c.l.b16 %v2341_v9 }
 0x2e1   : > { %v1809_v18 = vpack.c.bf16 %v1239_v0, %v1233_v6  ;;  %v1256_v19 = vrot.slane %v1255_v3, 1  ;;  %v1261_v20 = vmax.f32 %v1259_v4, %v1260_v12  ;;  %v1397_v21 = vunpack.c.h.b16 %v2341_v9 }
 0x2e2   : > { %v1400_v22 = vunpack.c.l.b16 %v1806_v5  ;;  %v1401_v23 = vunpack.c.h.b16 %v1806_v5  ;;  %v1810_v24 = vpack.c.bf16 %v1251_v10, %v1245_v16  ;;  %v1402_v25 = vunpack.c.l.b16 %v1807_v8 }
 0x2e3   : > { %v1403_v26 = vunpack.c.h.b16 %v1807_v8  ;;  %v1262_v27 = vrot.slane %v1261_v20, 1  ;;  %v1433_v28 = vsel %vm1412_vm2, %v1398_v13, %v1396_v17  ;;  %v1440_v30 = vsel %vm1412_vm2, %v1399_v14, %v1397_v21 }
 0x2e4   : > { %v1404_v31 = vunpack.c.l.b16 %v1808_v15  ;;  %v1405_v32 = vunpack.c.h.b16 %v1808_v15  ;;  %v1406_v34 = vunpack.c.l.b16 %v1809_v18  ;;  %v1407_v35 = vunpack.c.h.b16 %v1809_v18 }
 0x2e5   : > { %v1257_v29 = vmax.f32 %v1255_v3, %v1256_v19  ;;  %v1263_v36 = vmax.f32 %v1261_v20, %v1262_v27  ;;  %v1434_v38 = vsel %vm1414_vm3, %v1400_v22, %v1433_v28  ;;  %v1441_v9 = vsel %vm1414_vm3, %v1401_v23, %v1440_v30 }
 0x2e6   : > { %v1408_v39 = vunpack.c.l.b16 %v1810_v24  ;;  %v1409_v40 = vunpack.c.h.b16 %v1810_v24  ;;  %v1435_v41 = vsel %vm1416_vm4, %v1402_v25, %v1434_v38  ;;  %v1442_v60 = vsel %vm1416_vm4, %v1403_v26, %v1441_v9 }
 0x2e7   : > { %v1811_v42 = vpack.c.bf16 %v1263_v36, %v1257_v29  ;;  %v1436_v43 = vsel %vm1418_vm5, %v1404_v31, %v1435_v41  ;;  %v1443_v44 = vsel %vm1418_vm5, %v1405_v32, %v1442_v60 }
 0x2e8   : > { %v1437_v45 = vsel %vm1420_vm6, %v1406_v34, %v1436_v43  ;;  %v1444_v46 = vsel %vm1420_vm6, %v1407_v35, %v1443_v44 }
 0x2e9   : > { %v1410_v48 = vunpack.c.l.b16 %v1811_v42  ;;  %v1411_v49 = vunpack.c.h.b16 %v1811_v42  ;;  %v1438_v50 = vsel %vm1422_vm7, %v1408_v39, %v1437_v45  ;;  %v1445_v51 = vsel %vm1422_vm7, %v1409_v40, %v1444_v46 }
 0x2eb   : > { %v1439_v52 = vsel %vm1424_vm8, %v1410_v48, %v1438_v50  ;;  %v1446_v53 = vsel %vm1424_vm8, %v1411_v49, %v1445_v51 }
 0x2ec   : > { %v1448_v54 = vpack.c.b16 %v1446_v53, %v1439_v52 }
 0x2ee   : > { %1452 = vst [vmem:[%s2329_s10 + $0x8] sm:$0xff] %v1448_v54 }
 0x2ef PF: > { %s17_s26 = sadd.s32 1, %s2004_s26   ;;  %s2381_s24 = smov %s2000_s25 }
 0x2f0   : > { %p14_p6 = scmp.ge.s32.totalorder %s17_s26, 4   ;;  %s2382_s25 = smov %s2384_s27 }
 0x2f2   :  { %16 = sbr.rel (!%p14_p6) target bundleno = 2 (0x2), region = 86 }

// kernel: neg.18
= control target key start
LH: loop header
LB: loop body
LE: loop exit
PB: predicated region body
PF: predicated region fallthrough
CT: control target
= control target key end

     0   :  { %s72_s0 = inlined_call_operand.vmem [shape: f32[2,32,16], index: 0, kind: input, shape index: {}]   ;;  %s73_s1 = inlined_call_operand.vmem [shape: f32[2,32,16], index: 1, kind: output, shape index: {}]  }
   0x1   :  { %v2_v0 = vld [vmem:[%s72_s0] sm:$0xff]  ;;  %v32_v1 = vld [vmem:[%s72_s0 + $0x10] sm:$0xff]  ;;  %v34_v2 = vld [vmem:[%s72_s0 + $0x8] sm:$0xff] }
   0x2   :  { %v5_v3 = vxor.u32 2147483648, %v2_v0  ;;  %v12_v4 = vxor.u32 2147483648, %v32_v1  ;;  %v20_v5 = vxor.u32 2147483648, %v34_v2  ;;  %v36_v6 = vld [vmem:[%s72_s0 + $0x18] sm:$0xff] }
   0x3   :  { %v28_v7 = vxor.u32 2147483648, %v36_v6 }
   0x4   :  { %7 = vst [vmem:[%s73_s1] sm:$0xff] %v5_v3  ;;  %33 = vst [vmem:[%s73_s1 + $0x10] sm:$0xff] %v12_v4 }
   0x5   :  { %35 = vst [vmem:[%s73_s1 + $0x8] sm:$0xff] %v20_v5  ;;  %37 = vst [vmem:[%s73_s1 + $0x18] sm:$0xff] %v28_v7 }

// kernel: _lambda_.13
= control target key start
LH: loop header
LB: loop body
LE: loop exit
PB: predicated region body
PF: predicated region fallthrough
CT: control target
= control target key end

     0   :  { %s2378_s18 = smov 0   ;;  %s2995_s0 = inlined_call_operand.vmem [shape: bf16[32,1280], index: 0, kind: input, shape index: {}]   ;;  %s2996_s1 = inlined_call_operand.vmem [shape: bf16[1280,256], index: 1, kind: input, shape index: {}]   ;;  %s2997_s2 = inlined_call_operand.vmem [shape: f32[1,256], index: 2, kind: input, shape index: {}]   ;;  %s2998_s3 = inlined_call_operand.vmem [shape: bf16[256,256], index: 3, kind: input, shape index: {}]   ;;  %s2999_s4 = inlined_call_operand.vmem [shape: f32[1,256], index: 4, kind: input, shape index: {}]   ;;  %s3000_s5 = inlined_call_operand.vmem [shape: bf16[32,256], index: 5, kind: output, shape index: {}]  }
   0x1 LB: > { %s1809_s19 = sadd.s32 4294967295, %s2346_s18   ;;  %p1813_p0 = scmp.ge.s32.totalorder %s2346_s18, 1  ;;  %s2346_s18 = sphi %s2378_s18, %s15_s18  }
   0x2   : > { %p189_p1 = scmp.lt.s32.totalorder %s2346_s18, 3 }
   0x4   : > { %p190_p2 = pnand %p1813_p0, %p189_p1 }
   0x5   : > { %s1814_s7 = sshll.u32 (!%p190_p2), %s1809_s19, 1 }
   0x6   : > { %193 = sbr.rel (%p190_p2) target bundleno = 616 (0x268), region = 40  ;;  %p220_p3 = scmp.lt.s32.totalorder (!%p190_p2), %s1814_s7, 3 }
   0xb   : > { %v2037_v0 = vld [vmem:[%s2996_s1 + $0x74] ss:$8 sps:$4 sm:$0xff]   ;;  %v2039_v1 = vld [vmem:[%s2996_s1 + $0x70] ss:$8 sps:$4 sm:$0xff]   ;;  %v2043_v4 = vld [vmem:[%s2996_s1 + $0x64] ss:$8 sps:$4 sm:$0xff]  }
   0xc   : > { %1265 = vmatprep.subr.bf16.mxu0 %v2037_v0  ;;  %v2040_v2 = vld [vmem:[%s2996_s1 + $0x174] ss:$8 sps:$4 sm:$0xff]   ;;  %v2042_v3 = vld [vmem:[%s2996_s1 + $0x170] ss:$8 sps:$4 sm:$0xff]   ;;  %v2045_v5 = vld [vmem:[%s2996_s1 + $0x60] ss:$8 sps:$4 sm:$0xff]  }
   0xd   : > { %1266 = vmatpush1.bf16.msra.mxu0 %v2039_v1  ;;  %1308 = vmatprep.subr.bf16.mxu1 %v2040_v2  ;;  %v2046_v6 = vld [vmem:[%s2996_s1 + $0x164] ss:$8 sps:$4 sm:$0xff]   ;;  %v2048_v7 = vld [vmem:[%s2996_s1 + $0x160] ss:$8 sps:$4 sm:$0xff]   ;;  %v2049_v8 = vld [vmem:[%s2996_s1 + $0x54] ss:$8 sps:$4 sm:$0xff]  }
   0xe   : > { %1309 = vmatpush1.bf16.msra.mxu1 %v2042_v3  ;;  %1267 = vmatprep.subr.bf16.mxu0 %v2043_v4  ;;  %v2051_v9 = vld [vmem:[%s2996_s1 + $0x50] ss:$8 sps:$4 sm:$0xff]   ;;  %v2052_v10 = vld [vmem:[%s2996_s1 + $0x154] ss:$8 sps:$4 sm:$0xff]   ;;  %v2055_v11 = vld [vmem:[%s2996_s1 + $0x44] ss:$8 sps:$4 sm:$0xff]  }
   0xf   : > { %1310 = vmatprep.subr.bf16.mxu1 %v2046_v6  ;;  %v2054_v12 = vld [vmem:[%s2996_s1 + $0x150] ss:$8 sps:$4 sm:$0xff]   ;;  %v2058_v13 = vld [vmem:[%s2996_s1 + $0x144] ss:$8 sps:$4 sm:$0xff]   ;;  %v2057_v14 = vld [vmem:[%s2996_s1 + $0x40] ss:$8 sps:$4 sm:$0xff]  }
  0x10   : > { %v2061_v15 = vld [vmem:[%s2996_s1 + $0x34] ss:$8 sps:$4 sm:$0xff]   ;;  %v2060_v16 = vld [vmem:[%s2996_s1 + $0x140] ss:$8 sps:$4 sm:$0xff]   ;;  %v2063_v18 = vld [vmem:[%s2996_s1 + $0x30] ss:$8 sps:$4 sm:$0xff]  }
  0x11   : > { %1268 = vmatpush1.bf16.msra.mxu0 %v2045_v5  ;;  %v2064_v17 = vld [vmem:[%s2996_s1 + $0x134] ss:$8 sps:$4 sm:$0xff]   ;;  %v2067_v19 = vld [vmem:[%s2996_s1 + $0x24] ss:$8 sps:$4 sm:$0xff]   ;;  %v2066_v20 = vld [vmem:[%s2996_s1 + $0x130] ss:$8 sps:$4 sm:$0xff]  }
  0x12   : > { %1269 = vmatprep.subr.bf16.mxu0 %v2049_v8  ;;  %1311 = vmatpush1.bf16.msra.mxu1 %v2048_v7  ;;  %v2070_v21 = vld [vmem:[%s2996_s1 + $0x124] ss:$8 sps:$4 sm:$0xff]   ;;  %v2069_v22 = vld [vmem:[%s2996_s1 + $0x20] ss:$8 sps:$4 sm:$0xff]   ;;  %v2073_v23 = vld [vmem:[%s2996_s1 + $0x14] ss:$8 sps:$4 sm:$0xff]  }
  0x13   : > { %1312 = vmatprep.subr.bf16.mxu1 %v2052_v10  ;;  %v2072_v24 = vld [vmem:[%s2996_s1 + $0x120] ss:$8 sps:$4 sm:$0xff]   ;;  %v2076_v25 = vld [vmem:[%s2996_s1 + $0x114] ss:$8 sps:$4 sm:$0xff]   ;;  %v2075_v26 = vld [vmem:[%s2996_s1 + $0x10] ss:$8 sps:$4 sm:$0xff]  }
  0x14   : > { %v2079_v27 = vld [vmem:[%s2996_s1 + $0x4] ss:$8 sps:$4 sm:$0xff]   ;;  %v2078_v28 = vld [vmem:[%s2996_s1 + $0x110] ss:$8 sps:$4 sm:$0xff]   ;;  %v2081_v30 = vld [vmem:[%s2996_s1] ss:$8 sps:$4 sm:$0xff]  }
  0x15   : > { %1270 = vmatpush1.bf16.msra.mxu0 %v2051_v9  ;;  %v2082_v29 = vld [vmem:[%s2996_s1 + $0x104] ss:$8 sps:$4 sm:$0xff]   ;;  %v2085_v31 = vld [vmem:[%s2996_s1 + $0xf4] ss:$8 sps:$4 sm:$0xff]   ;;  %v2084_v32 = vld [vmem:[%s2996_s1 + $0x100] ss:$8 sps:$4 sm:$0xff]  }
  0x16   : > { %1271 = vmatprep.subr.bf16.mxu0 %v2055_v11  ;;  %1313 = vmatpush1.bf16.msra.mxu1 %v2054_v12  ;;  %v2088_v33 = vld [vmem:[%s2996_s1 + $0x1f4] ss:$8 sps:$4 sm:$0xff]   ;;  %v2087_v34 = vld [vmem:[%s2996_s1 + $0xf0] ss:$8 sps:$4 sm:$0xff]   ;;  %v2091_v35 = vld [vmem:[%s2996_s1 + $0xe4] ss:$8 sps:$4 sm:$0xff]  }
  0x17   : > { %1314 = vmatprep.subr.bf16.mxu1 %v2058_v13  ;;  %s3002_s7 = smov (!%p220_p3, %s1814_s7), 3  ;;  %v2090_v36 = vld [vmem:[%s2996_s1 + $0x1f0] ss:$8 sps:$4 sm:$0xff]   ;;  %v2094_v37 = vld [vmem:[%s2996_s1 + $0x1e4] ss:$8 sps:$4 sm:$0xff]  }
  0x18   : > { %v2093_v38 = vld [vmem:[%s2996_s1 + $0xe0] ss:$8 sps:$4 sm:$0xff]   ;;  %v2097_v39 = vld [vmem:[%s2996_s1 + $0xd4] ss:$8 sps:$4 sm:$0xff]   ;;  %s2028_s6 = smul.u32 40, %s3002_s7 }
  0x19   : > { %1272 = vmatpush1.bf16.msra.mxu0 %v2057_v14  ;;  %v2096_v40 = vld [vmem:[%s2996_s1 + $0x1e0] ss:$8 sps:$4 sm:$0xff]   ;;  %v2100_v41 = vld [vmem:[%s2996_s1 + $0x1d4] ss:$8 sps:$4 sm:$0xff]   ;;  %v2099_v42 = vld [vmem:[%s2996_s1 + $0xd0] ss:$8 sps:$4 sm:$0xff]  }
  0x1a   : > { %1273 = vmatprep.subr.bf16.mxu0 %v2061_v15  ;;  %1315 = vmatpush1.bf16.msra.mxu1 %v2060_v16  ;;  %v2103_v43 = vld [vmem:[%s2996_s1 + $0xc4] ss:$8 sps:$4 sm:$0xff]   ;;  %s2526_s17 = scalar_lea.vmem %s2995_s0, %s2028_s6  ;;  %v2102_v44 = vld [vmem:[%s2996_s1 + $0x1d0] ss:$8 sps:$4 sm:$0xff]   ;;  %v2105_v46 = vld [vmem:[%s2996_s1 + $0xc0] ss:$8 sps:$4 sm:$0xff]  }
  0x1b   : > { %1316 = vmatprep.subr.bf16.mxu1 %v2064_v17  ;;  %v2106_v45 = vld [vmem:[%s2996_s1 + $0x1c4] ss:$8 sps:$4 sm:$0xff]   ;;  %v2109_v48 = vld [vmem:[%s2996_s1 + $0xb4] ss:$8 sps:$4 sm:$0xff]   ;;  %v2108_v49 = vld [vmem:[%s2996_s1 + $0x1c0] ss:$8 sps:$4 sm:$0xff]  }
  0x1c   : > { %v2134_v47 = vld [vmem:[%s2526_s17 + $0x4] ss:$40 sps:$4 sm:$0xff]   ;;  %v2112_v50 = vld [vmem:[%s2996_s1 + $0x1b4] ss:$8 sps:$4 sm:$0xff]   ;;  %v2111_v52 = vld [vmem:[%s2996_s1 + $0xb0] ss:$8 sps:$4 sm:$0xff]  }
  0x1d   : > { %1274 = vmatpush1.bf16.msra.mxu0 %v2063_v18  ;;  %1297 = vmatprep.mubr.bf16.mxu0 %v2134_v47  ;;  %v2141_v51 = vld [vmem:[%s2526_s17 + $0xc] ss:$40 sps:$4 sm:$0xff]   ;;  %v2114_v54 = vld [vmem:[%s2996_s1 + $0x1b0] ss:$8 sps:$4 sm:$0xff]   ;;  %v2117_v56 = vld [vmem:[%s2996_s1 + $0xa0] ss:$8 sps:$4 sm:$0xff]  }
  0x1e   : > { %1275 = vmatprep.subr.bf16.mxu0 %v2067_v19  ;;  %1317 = vmatpush1.bf16.msra.mxu1 %v2066_v20  ;;  %v2115_v53 = vld [vmem:[%s2996_s1 + $0xa4] ss:$8 sps:$4 sm:$0xff]   ;;  %v2121_v57 = vld [vmem:[%s2996_s1 + $0x94] ss:$8 sps:$4 sm:$0xff]   ;;  %v2120_v58 = vld [vmem:[%s2996_s1 + $0x1a0] ss:$8 sps:$4 sm:$0xff]  }
  0x1f   : > { %1318 = vmatprep.subr.bf16.mxu1 %v2070_v21  ;;  %1340 = vmatprep.mubr.bf16.mxu1 %v2141_v51  ;;  %v2118_v55 = vld [vmem:[%s2996_s1 + $0x1a4] ss:$8 sps:$4 sm:$0xff]   ;;  %v2124_v59 = vld [vmem:[%s2996_s1 + $0x194] ss:$8 sps:$4 sm:$0xff]   ;;  %v2123_v60 = vld [vmem:[%s2996_s1 + $0x90] ss:$8 sps:$4 sm:$0xff]  }
  0x20   : > { %v2127_v61 = vld [vmem:[%s2996_s1 + $0x84] ss:$8 sps:$4 sm:$0xff]   ;;  %v2126_v62 = vld [vmem:[%s2996_s1 + $0x190] ss:$8 sps:$4 sm:$0xff]   ;;  %v2129_v0 = vld [vmem:[%s2996_s1 + $0x80] ss:$8 sps:$4 sm:$0xff]  }
  0x21   : > { %1276 = vmatpush1.bf16.msra.mxu0 %v2069_v22  ;;  %v2130_v63 = vld [vmem:[%s2996_s1 + $0x184] ss:$8 sps:$4 sm:$0xff]   ;;  %v2138_v1 = vld [vmem:[%s2996_s1 + $0x274] ss:$8 sps:$4 sm:$0xff]   ;;  %v2135_v2 = vld [vmem:[%s2996_s1 + $0x180] ss:$8 sps:$4 sm:$0xff]  }
  0x22   : > { %1277 = vmatprep.subr.bf16.mxu0 %v2073_v23  ;;  %1319 = vmatpush1.bf16.msra.mxu1 %v2072_v24  ;;  %v2132_v3 = vld [vmem:[%s2526_s17] ss:$40 sps:$4 sm:$0xff]   ;;  %v2144_v4 = vld [vmem:[%s2996_s1 + $0x374] ss:$8 sps:$4 sm:$0xff]   ;;  %v2136_v5 = vld [vmem:[%s2996_s1 + $0x270] ss:$8 sps:$4 sm:$0xff]  }
  0x23   : > { %1320 = vmatprep.subr.bf16.mxu1 %v2076_v25  ;;  %v2139_v6 = vld [vmem:[%s2526_s17 + $0x8] ss:$40 sps:$4 sm:$0xff]   ;;  %v2147_v7 = vld [vmem:[%s2996_s1 + $0x264] ss:$8 sps:$4 sm:$0xff]   ;;  %v2153_v11 = vld [vmem:[%s2996_s1 + $0x254] ss:$8 sps:$4 sm:$0xff]  }
  0x24   : > { %v2142_v8 = vld [vmem:[%s2996_s1 + $0x370] ss:$8 sps:$4 sm:$0xff]   ;;  %v2150_v9 = vld [vmem:[%s2996_s1 + $0x364] ss:$8 sps:$4 sm:$0xff]   ;;  %v2145_v10 = vld [vmem:[%s2996_s1 + $0x260] ss:$8 sps:$4 sm:$0xff]  }
  0x25   : > { %1278 = vmatpush1.bf16.msra.mxu0 %v2075_v26  ;;  %v2148_v12 = vld [vmem:[%s2996_s1 + $0x360] ss:$8 sps:$4 sm:$0xff]   ;;  %v2156_v13 = vld [vmem:[%s2996_s1 + $0x354] ss:$8 sps:$4 sm:$0xff]   ;;  %v2151_v14 = vld [vmem:[%s2996_s1 + $0x250] ss:$8 sps:$4 sm:$0xff]  }
  0x26   : > { %1279 = vmatprep.subr.bf16.mxu0 %v2079_v27  ;;  %1321 = vmatpush1.bf16.msra.mxu1 %v2078_v28  ;;  %v2159_v15 = vld [vmem:[%s2996_s1 + $0x244] ss:$8 sps:$4 sm:$0xff]   ;;  %v2154_v16 = vld [vmem:[%s2996_s1 + $0x350] ss:$8 sps:$4 sm:$0xff]   ;;  %v2157_v18 = vld [vmem:[%s2996_s1 + $0x240] ss:$8 sps:$4 sm:$0xff]  }
  0x27   : > { %1322 = vmatprep.subr.bf16.mxu1 %v2082_v29  ;;  %v2162_v17 = vld [vmem:[%s2996_s1 + $0x344] ss:$8 sps:$4 sm:$0xff]   ;;  %v2165_v19 = vld [vmem:[%s2996_s1 + $0x234] ss:$8 sps:$4 sm:$0xff]   ;;  %v2160_v20 = vld [vmem:[%s2996_s1 + $0x340] ss:$8 sps:$4 sm:$0xff]  }
  0x28   : > { %v2168_v21 = vld [vmem:[%s2996_s1 + $0x334] ss:$8 sps:$4 sm:$0xff]   ;;  %v2163_v22 = vld [vmem:[%s2996_s1 + $0x230] ss:$8 sps:$4 sm:$0xff]   ;;  %v2171_v23 = vld [vmem:[%s2996_s1 + $0x224] ss:$8 sps:$4 sm:$0xff]  }
  0x29   : > { %1280 = vmatpush1.bf16.msra.mxu0 %v2081_v30  ;;  %v2166_v24 = vld [vmem:[%s2996_s1 + $0x330] ss:$8 sps:$4 sm:$0xff]   ;;  %v2174_v25 = vld [vmem:[%s2996_s1 + $0x324] ss:$8 sps:$4 sm:$0xff]   ;;  %v2169_v26 = vld [vmem:[%s2996_s1 + $0x220] ss:$8 sps:$4 sm:$0xff]  }
  0x2a   : > { %1281 = vmatprep.subr.bf16.mxu0 %v2085_v31  ;;  %1323 = vmatpush1.bf16.msra.mxu1 %v2084_v32  ;;  %v2177_v27 = vld [vmem:[%s2996_s1 + $0x214] ss:$8 sps:$4 sm:$0xff]   ;;  %v2172_v28 = vld [vmem:[%s2996_s1 + $0x320] ss:$8 sps:$4 sm:$0xff]   ;;  %v2175_v30 = vld [vmem:[%s2996_s1 + $0x210] ss:$8 sps:$4 sm:$0xff]  }
  0x2b   : > { %1324 = vmatprep.subr.bf16.mxu1 %v2088_v33  ;;  %v2180_v29 = vld [vmem:[%s2996_s1 + $0x314] ss:$8 sps:$4 sm:$0xff]   ;;  %v2178_v31 = vld [vmem:[%s2996_s1 + $0x310] ss:$8 sps:$4 sm:$0xff]   ;;  %v2183_v32 = vld [vmem:[%s2996_s1 + $0x204] ss:$8 sps:$4 sm:$0xff]  }
  0x2c   : > { %v2237_v33 = vld [vmem:[%s2526_s17 + $0x14] ss:$40 sps:$4 sm:$0xff]   ;;  %v2210_v51 = vld [vmem:[%s2996_s1 + $0x3c4] ss:$8 sps:$4 sm:$0xff]   ;;  %s2025_s6 = sshll.u32 %s3002_s7, 3 }
  0x2d   : > { %1282 = vmatpush2.bf16.msra.mxu0 %v2087_v34  ;;  %v2186_v34 = vld [vmem:[%s2996_s1 + $0x304] ss:$8 sps:$4 sm:$0xff]   ;;  %v2204_v47 = vld [vmem:[%s2996_s1 + $0x3d4] ss:$8 sps:$4 sm:$0xff]   ;;  %s231_s10 = scalar_lea.vmem %s3000_s5, %s2025_s6 }
  0x2e   : > { %1283 = vmatprep.subr.bf16.mxu0 %v2091_v35  ;;  %1325 = vmatpush2.bf16.msra.mxu1 %v2090_v36  ;;  %v2181_v35 = vld [vmem:[%s2996_s1 + $0x200] ss:$8 sps:$4 sm:$0xff]   ;;  %v2243_v36 = vld [vmem:[%s2526_s17 + $0x1c] ss:$40 sps:$4 sm:$0xff]  }
  0x2f   : > { %1326 = vmatprep.subr.bf16.mxu1 %v2094_v37  ;;  %v2189_v37 = vld [vmem:[%s2996_s1 + $0x2f4] ss:$8 sps:$4 sm:$0xff]  }
  0x31   : > { %1284 = vmatpush2.bf16.msra.mxu0 %v2093_v38  ;;  %v2184_v38 = vld [vmem:[%s2996_s1 + $0x300] ss:$8 sps:$4 sm:$0xff]  }
  0x32   : > { %1285 = vmatprep.subr.bf16.mxu0 %v2097_v39  ;;  %1327 = vmatpush2.bf16.msra.mxu1 %v2096_v40  ;;  %v2192_v39 = vld [vmem:[%s2996_s1 + $0x3f4] ss:$8 sps:$4 sm:$0xff]   ;;  %v2187_v40 = vld [vmem:[%s2996_s1 + $0x2f0] ss:$8 sps:$4 sm:$0xff]  }
  0x33   : > { %1328 = vmatprep.subr.bf16.mxu1 %v2100_v41  ;;  %v2195_v41 = vld [vmem:[%s2996_s1 + $0x2e4] ss:$8 sps:$4 sm:$0xff]  }
  0x35   : > { %1286 = vmatpush2.bf16.msra.mxu0 %v2099_v42  ;;  %v2190_v42 = vld [vmem:[%s2996_s1 + $0x3f0] ss:$8 sps:$4 sm:$0xff]  }
  0x36   : > { %1287 = vmatprep.subr.bf16.mxu0 %v2103_v43  ;;  %1329 = vmatpush2.bf16.msra.mxu1 %v2102_v44  ;;  %v2198_v43 = vld [vmem:[%s2996_s1 + $0x3e4] ss:$8 sps:$4 sm:$0xff]   ;;  %v2193_v44 = vld [vmem:[%s2996_s1 + $0x2e0] ss:$8 sps:$4 sm:$0xff]  }
  0x37   : > { %1330 = vmatprep.subr.bf16.mxu1 %v2106_v45  ;;  %v2201_v45 = vld [vmem:[%s2996_s1 + $0x2d4] ss:$8 sps:$4 sm:$0xff]  }
  0x39   : > { %1288 = vmatpush2.bf16.msra.mxu0 %v2105_v46  ;;  %v2196_v46 = vld [vmem:[%s2996_s1 + $0x3e0] ss:$8 sps:$4 sm:$0xff]  }
  0x3a   : > { %1289 = vmatprep.subr.bf16.mxu0 %v2109_v48  ;;  %1331 = vmatpush2.bf16.msra.mxu1 %v2108_v49  ;;  %v2199_v48 = vld [vmem:[%s2996_s1 + $0x2d0] ss:$8 sps:$4 sm:$0xff]   ;;  %v2207_v49 = vld [vmem:[%s2996_s1 + $0x2c4] ss:$8 sps:$4 sm:$0xff]  }
  0x3b   : > { %1332 = vmatprep.subr.bf16.mxu1 %v2112_v50  ;;  %v2202_v50 = vld [vmem:[%s2996_s1 + $0x3d0] ss:$8 sps:$4 sm:$0xff]  }
  0x3d   : > { %1290 = vmatpush2.bf16.msra.mxu0 %v2111_v52  ;;  %v2205_v52 = vld [vmem:[%s2996_s1 + $0x2c0] ss:$8 sps:$4 sm:$0xff]  }
  0x3e   : > { %1291 = vmatprep.subr.bf16.mxu0 %v2115_v53  ;;  %1333 = vmatpush2.bf16.msra.mxu1 %v2114_v54  ;;  %v2213_v53 = vld [vmem:[%s2996_s1 + $0x2b4] ss:$8 sps:$4 sm:$0xff]   ;;  %v2208_v54 = vld [vmem:[%s2996_s1 + $0x3c0] ss:$8 sps:$4 sm:$0xff]  }
  0x3f   : > { %1334 = vmatprep.subr.bf16.mxu1 %v2118_v55  ;;  %v2216_v55 = vld [vmem:[%s2996_s1 + $0x3b4] ss:$8 sps:$4 sm:$0xff]  }
  0x41   : > { %1292 = vmatpush2.bf16.msra.mxu0 %v2117_v56  ;;  %v2211_v56 = vld [vmem:[%s2996_s1 + $0x2b0] ss:$8 sps:$4 sm:$0xff]  }
  0x42   : > { %1293 = vmatprep.subr.bf16.mxu0 %v2121_v57  ;;  %1335 = vmatpush2.bf16.msra.mxu1 %v2120_v58  ;;  %v2214_v57 = vld [vmem:[%s2996_s1 + $0x3b0] ss:$8 sps:$4 sm:$0xff]   ;;  %v2219_v58 = vld [vmem:[%s2996_s1 + $0x2a4] ss:$8 sps:$4 sm:$0xff]  }
  0x43   : > { %1336 = vmatprep.subr.bf16.mxu1 %v2124_v59  ;;  %v2217_v59 = vld [vmem:[%s2996_s1 + $0x2a0] ss:$8 sps:$4 sm:$0xff]  }
  0x45   : > { %1294 = vmatpush2.bf16.msra.mxu0 %v2123_v60  ;;  %v2222_v60 = vld [vmem:[%s2996_s1 + $0x3a4] ss:$8 sps:$4 sm:$0xff]  }
  0x46   : > { %1295 = vmatprep.subr.bf16.mxu0 %v2127_v61  ;;  %1337 = vmatpush2.bf16.msra.mxu1 %v2126_v62  ;;  %v2225_v61 = vld [vmem:[%s2996_s1 + $0x294] ss:$8 sps:$4 sm:$0xff]   ;;  %v2220_v62 = vld [vmem:[%s2996_s1 + $0x3a0] ss:$8 sps:$4 sm:$0xff]  }
  0x47   : > { %1338 = vmatprep.subr.bf16.mxu1 %v2130_v63  ;;  %v2228_v63 = vld [vmem:[%s2996_s1 + $0x394] ss:$8 sps:$4 sm:$0xff]  }
  0x49   : > { %1296 = vmatpush2.bf16.msra.mxu0 %v2129_v0  ;;  %v2223_v0 = vld [vmem:[%s2996_s1 + $0x290] ss:$8 sps:$4 sm:$0xff]  }
  0x4a   : > { %1351 = vmatprep.subr.bf16.mxu0 %v2138_v1  ;;  %1339 = vmatpush2.bf16.msra.mxu1 %v2135_v2  ;;  %v2231_v1 = vld [vmem:[%s2996_s1 + $0x284] ss:$8 sps:$4 sm:$0xff]   ;;  %v2226_v2 = vld [vmem:[%s2996_s1 + $0x390] ss:$8 sps:$4 sm:$0xff]  }
  0x4b   : > { %1394 = vmatprep.subr.bf16.mxu1 %v2144_v4  ;;  %v2229_v4 = vld [vmem:[%s2996_s1 + $0x280] ss:$8 sps:$4 sm:$0xff]  }
  0x4c   : > { %1298 = vmatmul.mubr.bf16.vlgmr.msra.gmra.mxu0 %v2132_v3  ;;  %v2234_v3 = vld [vmem:[%s2996_s1 + $0x384] ss:$8 sps:$4 sm:$0xff]  }
  0x4d   : > { %1352 = vmatpush1.bf16.msra.mxu0 %v2136_v5  ;;  %1341 = vmatmul.mubr.bf16.vlgmr.msra.gmra.mxu1 %v2139_v6  ;;  %v2240_v5 = vld [vmem:[%s2996_s1 + $0x474] ss:$8 sps:$4 sm:$0xff]   ;;  %v2232_v6 = vld [vmem:[%s2996_s1 + $0x380] ss:$8 sps:$4 sm:$0xff]  }
  0x4e   : > { %1353 = vmatprep.subr.bf16.mxu0 %v2147_v7  ;;  %1395 = vmatpush1.bf16.msra.mxu1 %v2142_v8  ;;  %v2235_v7 = vld [vmem:[%s2526_s17 + $0x10] ss:$40 sps:$4 sm:$0xff]  }
  0x4f   : > { %1396 = vmatprep.subr.bf16.mxu1 %v2150_v9  ;;  %1383 = vmatprep.mubr.bf16.mxu0 %v2237_v33  ;;  %v2238_v8 = vld [vmem:[%s2996_s1 + $0x470] ss:$8 sps:$4 sm:$0xff]   ;;  %v2291_v9 = vld [vmem:[%s2526_s17 + $0x24] ss:$40 sps:$4 sm:$0xff]   ;;  %v2279_v33 = vld [vmem:[%s2996_s1 + $0x4b4] ss:$8 sps:$4 sm:$0xff]  }
  0x50   : > { %1426 = vmatprep.mubr.bf16.mxu1 %v2243_v36  ;;  %v2280_v36 = vld [vmem:[%s2996_s1 + $0x4a0] ss:$8 sps:$4 sm:$0xff]  }
  0x51   : > { %1354 = vmatpush1.bf16.msra.mxu0 %v2145_v10  ;;  %v2241_v10 = vld [vmem:[%s2526_s17 + $0x18] ss:$40 sps:$4 sm:$0xff]  }
  0x52   : > { %1355 = vmatprep.subr.bf16.mxu0 %v2153_v11  ;;  %1397 = vmatpush1.bf16.msra.mxu1 %v2148_v12  ;;  %v2246_v11 = vld [vmem:[%s2996_s1 + $0x464] ss:$8 sps:$4 sm:$0xff]   ;;  %v2244_v12 = vld [vmem:[%s2996_s1 + $0x460] ss:$8 sps:$4 sm:$0xff]  }
  0x53   : > { %1398 = vmatprep.subr.bf16.mxu1 %v2156_v13  ;;  %v2249_v13 = vld [vmem:[%s2996_s1 + $0x454] ss:$8 sps:$4 sm:$0xff]  }
  0x55   : > { %1356 = vmatpush1.bf16.msra.mxu0 %v2151_v14  ;;  %v2247_v14 = vld [vmem:[%s2996_s1 + $0x450] ss:$8 sps:$4 sm:$0xff]  }
  0x56   : > { %1357 = vmatprep.subr.bf16.mxu0 %v2159_v15  ;;  %1399 = vmatpush1.bf16.msra.mxu1 %v2154_v16  ;;  %v2252_v15 = vld [vmem:[%s2996_s1 + $0x444] ss:$8 sps:$4 sm:$0xff]   ;;  %v2250_v16 = vld [vmem:[%s2996_s1 + $0x440] ss:$8 sps:$4 sm:$0xff]  }
  0x57   : > { %1400 = vmatprep.subr.bf16.mxu1 %v2162_v17  ;;  %v2255_v17 = vld [vmem:[%s2996_s1 + $0x434] ss:$8 sps:$4 sm:$0xff]  }
  0x59   : > { %1358 = vmatpush1.bf16.msra.mxu0 %v2157_v18  ;;  %v2253_v18 = vld [vmem:[%s2996_s1 + $0x430] ss:$8 sps:$4 sm:$0xff]  }
  0x5a   : > { %1359 = vmatprep.subr.bf16.mxu0 %v2165_v19  ;;  %1401 = vmatpush1.bf16.msra.mxu1 %v2160_v20  ;;  %v2258_v19 = vld [vmem:[%s2996_s1 + $0x424] ss:$8 sps:$4 sm:$0xff]   ;;  %v2256_v20 = vld [vmem:[%s2996_s1 + $0x420] ss:$8 sps:$4 sm:$0xff]  }
  0x5b   : > { %1402 = vmatprep.subr.bf16.mxu1 %v2168_v21  ;;  %v2261_v21 = vld [vmem:[%s2996_s1 + $0x414] ss:$8 sps:$4 sm:$0xff]  }
  0x5d   : > { %1360 = vmatpush1.bf16.msra.mxu0 %v2163_v22  ;;  %v2259_v22 = vld [vmem:[%s2996_s1 + $0x410] ss:$8 sps:$4 sm:$0xff]  }
  0x5e   : > { %1361 = vmatprep.subr.bf16.mxu0 %v2171_v23  ;;  %1403 = vmatpush1.bf16.msra.mxu1 %v2166_v24  ;;  %v2264_v23 = vld [vmem:[%s2996_s1 + $0x404] ss:$8 sps:$4 sm:$0xff]   ;;  %v2262_v24 = vld [vmem:[%s2996_s1 + $0x400] ss:$8 sps:$4 sm:$0xff]  }
  0x5f   : > { %1404 = vmatprep.subr.bf16.mxu1 %v2174_v25  ;;  %v2267_v25 = vld [vmem:[%s2996_s1 + $0x4f4] ss:$8 sps:$4 sm:$0xff]  }
  0x61   : > { %1362 = vmatpush1.bf16.msra.mxu0 %v2169_v26  ;;  %v2265_v26 = vld [vmem:[%s2996_s1 + $0x4f0] ss:$8 sps:$4 sm:$0xff]  }
  0x62   : > { %1363 = vmatprep.subr.bf16.mxu0 %v2177_v27  ;;  %1405 = vmatpush1.bf16.msra.mxu1 %v2172_v28  ;;  %v2270_v27 = vld [vmem:[%s2996_s1 + $0x4e4] ss:$8 sps:$4 sm:$0xff]   ;;  %v2268_v28 = vld [vmem:[%s2996_s1 + $0x4e0] ss:$8 sps:$4 sm:$0xff]  }
  0x63   : > { %1406 = vmatprep.subr.bf16.mxu1 %v2180_v29  ;;  %v2273_v29 = vld [vmem:[%s2996_s1 + $0x4d4] ss:$8 sps:$4 sm:$0xff]  }
  0x65   : > { %1364 = vmatpush1.bf16.msra.mxu0 %v2175_v30  ;;  %v2271_v30 = vld [vmem:[%s2996_s1 + $0x4d0] ss:$8 sps:$4 sm:$0xff]  }
  0x66   : > { %1365 = vmatprep.subr.bf16.mxu0 %v2183_v32  ;;  %1407 = vmatpush1.bf16.msra.mxu1 %v2178_v31  ;;  %v2276_v31 = vld [vmem:[%s2996_s1 + $0x4c4] ss:$8 sps:$4 sm:$0xff]   ;;  %v2274_v32 = vld [vmem:[%s2996_s1 + $0x4c0] ss:$8 sps:$4 sm:$0xff]  }
  0x67   : > { %1408 = vmatprep.subr.bf16.mxu1 %v2186_v34  ;;  %v2277_v34 = vld [vmem:[%s2996_s1 + $0x4b0] ss:$8 sps:$4 sm:$0xff]  }
  0x69   : > { %1366 = vmatpush1.bf16.msra.mxu0 %v2181_v35  ;;  %v2282_v35 = vld [vmem:[%s2996_s1 + $0x4a4] ss:$8 sps:$4 sm:$0xff]  }
  0x6a   : > { %1367 = vmatprep.subr.bf16.mxu0 %v2189_v37  ;;  %1409 = vmatpush1.bf16.msra.mxu1 %v2184_v38  ;;  %v2285_v37 = vld [vmem:[%s2996_s1 + $0x494] ss:$8 sps:$4 sm:$0xff]   ;;  %v2283_v38 = vld [vmem:[%s2996_s1 + $0x490] ss:$8 sps:$4 sm:$0xff]  }
  0x6b   : > { %1410 = vmatprep.subr.bf16.mxu1 %v2192_v39  ;;  %v2288_v39 = vld [vmem:[%s2996_s1 + $0x484] ss:$8 sps:$4 sm:$0xff]  }
  0x6d   : > { %1368 = vmatpush2.bf16.msra.mxu0 %v2187_v40  ;;  %v2286_v40 = vld [vmem:[%s2996_s1 + $0x480] ss:$8 sps:$4 sm:$0xff]  }
  0x6e   : > { %1369 = vmatprep.subr.bf16.mxu0 %v2195_v41  ;;  %1411 = vmatpush2.bf16.msra.mxu1 %v2190_v42  ;;  %v2289_v41 = vld [vmem:[%s2526_s17 + $0x20] ss:$40 sps:$4 sm:$0xff]   ;;  %v2292_v42 = vld [vmem:[%s2998_s3 + $0x70] ss:$8 sps:$4 sm:$0xff]  }
  0x6f   : > { %1412 = vmatprep.subr.bf16.mxu1 %v2198_v43  ;;  %v2294_v43 = vld [vmem:[%s2998_s3 + $0x74] ss:$8 sps:$4 sm:$0xff]  }
  0x71   : > { %1370 = vmatpush2.bf16.msra.mxu0 %v2193_v44  ;;  %v2297_v44 = vld [vmem:[%s2998_s3 + $0x64] ss:$8 sps:$4 sm:$0xff]  }
  0x72   : > { %1371 = vmatprep.subr.bf16.mxu0 %v2201_v45  ;;  %1413 = vmatpush2.bf16.msra.mxu1 %v2196_v46  ;;  %v2295_v45 = vld [vmem:[%s2998_s3 + $0x60] ss:$8 sps:$4 sm:$0xff]   ;;  %v2300_v46 = vld [vmem:[%s2998_s3 + $0x54] ss:$8 sps:$4 sm:$0xff]  }
  0x73   : > { %1414 = vmatprep.subr.bf16.mxu1 %v2204_v47  ;;  %v2298_v47 = vld [vmem:[%s2998_s3 + $0x50] ss:$8 sps:$4 sm:$0xff]  }
  0x75   : > { %1372 = vmatpush2.bf16.msra.mxu0 %v2199_v48  ;;  %v2303_v48 = vld [vmem:[%s2998_s3 + $0x44] ss:$8 sps:$4 sm:$0xff]  }
  0x76   : > { %1373 = vmatprep.subr.bf16.mxu0 %v2207_v49  ;;  %1415 = vmatpush2.bf16.msra.mxu1 %v2202_v50  ;;  %v2301_v49 = vld [vmem:[%s2998_s3 + $0x40] ss:$8 sps:$4 sm:$0xff]   ;;  %v2306_v50 = vld [vmem:[%s2998_s3 + $0x34] ss:$8 sps:$4 sm:$0xff]  }
  0x77   : > { %1416 = vmatprep.subr.bf16.mxu1 %v2210_v51  ;;  %v2304_v51 = vld [vmem:[%s2998_s3 + $0x30] ss:$8 sps:$4 sm:$0xff]  }
  0x79   : > { %1374 = vmatpush2.bf16.msra.mxu0 %v2205_v52  ;;  %v2309_v52 = vld [vmem:[%s2998_s3 + $0x24] ss:$8 sps:$4 sm:$0xff]  }
  0x7a   : > { %1375 = vmatprep.subr.bf16.mxu0 %v2213_v53  ;;  %1417 = vmatpush2.bf16.msra.mxu1 %v2208_v54  ;;  %v2307_v53 = vld [vmem:[%s2998_s3 + $0x20] ss:$8 sps:$4 sm:$0xff]   ;;  %v2312_v54 = vld [vmem:[%s2998_s3 + $0x14] ss:$8 sps:$4 sm:$0xff]  }
  0x7b   : > { %1418 = vmatprep.subr.bf16.mxu1 %v2216_v55  ;;  %v2310_v55 = vld [vmem:[%s2998_s3 + $0x10] ss:$8 sps:$4 sm:$0xff]  }
  0x7d   : > { %1376 = vmatpush2.bf16.msra.mxu0 %v2211_v56  ;;  %v2315_v56 = vld [vmem:[%s2998_s3 + $0x4] ss:$8 sps:$4 sm:$0xff]  }
  0x7e   : > { %1377 = vmatprep.subr.bf16.mxu0 %v2219_v58  ;;  %1419 = vmatpush2.bf16.msra.mxu1 %v2214_v57  ;;  %v2313_v57 = vld [vmem:[%s2998_s3] ss:$8 sps:$4 sm:$0xff]   ;;  %v2318_v58 = vld [vmem:[%s2998_s3 + $0xf4] ss:$8 sps:$4 sm:$0xff]  }
  0x7f   : > { %1420 = vmatprep.subr.bf16.mxu1 %v2222_v60  ;;  %v2321_v60 = vld [vmem:[%s2998_s3 + $0xe4] ss:$8 sps:$4 sm:$0xff]  }
  0x81   : > { %1378 = vmatpush2.bf16.msra.mxu0 %v2217_v59  ;;  %v2316_v59 = vld [vmem:[%s2998_s3 + $0xf0] ss:$8 sps:$4 sm:$0xff]  }
  0x82   : > { %1379 = vmatprep.subr.bf16.mxu0 %v2225_v61  ;;  %1421 = vmatpush2.bf16.msra.mxu1 %v2220_v62  ;;  %v2319_v61 = vld [vmem:[%s2998_s3 + $0xe0] ss:$8 sps:$4 sm:$0xff]   ;;  %v2324_v62 = vld [vmem:[%s2998_s3 + $0xd4] ss:$8 sps:$4 sm:$0xff]  }
  0x83   : > { %1422 = vmatprep.subr.bf16.mxu1 %v2228_v63  ;;  %v2322_v63 = vld [vmem:[%s2998_s3 + $0xd0] ss:$8 sps:$4 sm:$0xff]  }
  0x85   : > { %1380 = vmatpush2.bf16.msra.mxu0 %v2223_v0  ;;  %v2327_v0 = vld [vmem:[%s2998_s3 + $0xc4] ss:$8 sps:$4 sm:$0xff]  }
  0x86   : > { %1381 = vmatprep.subr.bf16.mxu0 %v2231_v1  ;;  %1423 = vmatpush2.bf16.msra.mxu1 %v2226_v2  ;;  %v2325_v1 = vld [vmem:[%s2998_s3 + $0xc0] ss:$8 sps:$4 sm:$0xff]   ;;  %v2330_v2 = vld [vmem:[%s2998_s3 + $0xb4] ss:$8 sps:$4 sm:$0xff]  }
  0x87   : > { %1424 = vmatprep.subr.bf16.mxu1 %v2234_v3  ;;  %v2328_v3 = vld [vmem:[%s2998_s3 + $0xb0] ss:$8 sps:$4 sm:$0xff]  }
  0x89   : > { %1382 = vmatpush2.bf16.msra.mxu0 %v2229_v4  ;;  %v2333_v4 = vld [vmem:[%s2998_s3 + $0xa4] ss:$8 sps:$4 sm:$0xff]  }
  0x8a   : > { %1437 = vmatprep.subr.bf16.mxu0 %v2240_v5  ;;  %1425 = vmatpush2.bf16.msra.mxu1 %v2232_v6  ;;  %v2331_v5 = vld [vmem:[%s2998_s3 + $0xa0] ss:$8 sps:$4 sm:$0xff]   ;;  %v2336_v6 = vld [vmem:[%s2998_s3 + $0x94] ss:$8 sps:$4 sm:$0xff]  }
  0x8b   : > { %1690 = vmatprep.subr.bf16.mxu1 %v2294_v43 }
  0x8c   : > { %1384 = vmatmul.mubr.bf16.vlgmr.msra.gmra.mxu0 %v2235_v7  ;;  %v2334_v7 = vld [vmem:[%s2998_s3 + $0x90] ss:$8 sps:$4 sm:$0xff]  }
  0x8d   : > { %1438 = vmatpush1.bf16.msra.mxu0 %v2238_v8  ;;  %1469 = vmatprep.mubr.bf16.mxu0 %v2291_v9  ;;  %v2339_v8 = vld [vmem:[%s2998_s3 + $0x84] ss:$8 sps:$4 sm:$0xff]   ;;  %v2337_v9 = vld [vmem:[%s2998_s3 + $0x80] ss:$8 sps:$4 sm:$0xff]  }
  0x8e   : > { %1427 = vmatmul.mubr.bf16.vlgmr.msra.gmra.mxu1 %v2241_v10  ;;  %1439 = vmatprep.subr.bf16.mxu0 %v2246_v11 }
  0x8f   : > { %1691 = vmatpush1.bf16.msra.mxu1 %v2292_v42 }
  0x90   : > { %1692 = vmatprep.subr.bf16.mxu1 %v2297_v44 }
  0x91   : > { %1440 = vmatpush1.bf16.msra.mxu0 %v2244_v12 }
  0x92   : > { %1441 = vmatprep.subr.bf16.mxu0 %v2249_v13  ;;  %v405_v13 = vlaneseq }
  0x93   : > { %1693 = vmatpush1.bf16.msra.mxu1 %v2295_v45 }
  0x94   : > { %1694 = vmatprep.subr.bf16.mxu1 %v2300_v46 }
  0x95   : > { %1442 = vmatpush1.bf16.msra.mxu0 %v2247_v14 }
  0x96   : > { %1443 = vmatprep.subr.bf16.mxu0 %v2252_v15 }
  0x97   : > { %1695 = vmatpush1.bf16.msra.mxu1 %v2298_v47 }
  0x98   : > { %1696 = vmatprep.subr.bf16.mxu1 %v2303_v48 }
  0x99   : > { %1444 = vmatpush1.bf16.msra.mxu0 %v2250_v16  ;;  %v406_v16 = vshrl.u32 %v405_v13, 7 }
  0x9a   : > { %1445 = vmatprep.subr.bf16.mxu0 %v2255_v17 }
  0x9b   : > { %1697 = vmatpush1.bf16.msra.mxu1 %v2301_v49 }
  0x9c   : > { %1698 = vmatprep.subr.bf16.mxu1 %v2306_v50 }
  0x9d   : > { %1446 = vmatpush1.bf16.msra.mxu0 %v2253_v18 }
  0x9e   : > { %1447 = vmatprep.subr.bf16.mxu0 %v2258_v19  ;;  %v411_v19 = vsub.s32 1, %v406_v16 }
  0x9f   : > { %1699 = vmatpush1.bf16.msra.mxu1 %v2304_v51 }
  0xa0   : > { %1700 = vmatprep.subr.bf16.mxu1 %v2309_v52 }
  0xa1   : > { %1448 = vmatpush1.bf16.msra.mxu0 %v2256_v20  ;;  %v403_v20 = vld [vmem:[%s2997_s2] sm:$0x3] }
  0xa2   : > { %1449 = vmatprep.subr.bf16.mxu0 %v2261_v21  ;;  %v407_v21 = vsub.s32 0, %v406_v16 }
  0xa3   : > { %1701 = vmatpush1.bf16.msra.mxu1 %v2307_v53 }
  0xa4   : > { %1702 = vmatprep.subr.bf16.mxu1 %v2312_v54 }
  0xa5   : > { %1450 = vmatpush1.bf16.msra.mxu0 %v2259_v22 }
  0xa6   : > { %1451 = vmatprep.subr.bf16.mxu0 %v2264_v23 }
  0xa7   : > { %1703 = vmatpush1.bf16.msra.mxu1 %v2310_v55 }
  0xa8   : > { %1704 = vmatprep.subr.bf16.mxu1 %v2315_v56 }
  0xa9   : > { %1452 = vmatpush1.bf16.msra.mxu0 %v2262_v24  ;;  %v412_v24 = vrot.slane %v403_v20, %v411_v19 }
  0xaa   : > { %1453 = vmatprep.subr.bf16.mxu0 %v2267_v25  ;;  %v408_v25 = vrot.slane %v403_v20, %v407_v21 }
  0xab   : > { %1705 = vmatpush1.bf16.msra.mxu1 %v2313_v57 }
  0xac   : > { %1706 = vmatprep.subr.bf16.mxu1 %v2318_v58 }
  0xad   : > { %1454 = vmatpush2.bf16.msra.mxu0 %v2265_v26 }
  0xae   : > { %1455 = vmatprep.subr.bf16.mxu0 %v2270_v27 }
  0xaf   : > { %1707 = vmatpush2.bf16.msra.mxu1 %v2316_v59 }
  0xb0   : > { %1708 = vmatprep.subr.bf16.mxu1 %v2321_v60 }
  0xb1   : > { %1456 = vmatpush2.bf16.msra.mxu0 %v2268_v28 }
  0xb2   : > { %1457 = vmatprep.subr.bf16.mxu0 %v2273_v29 }
  0xb3   : > { %1709 = vmatpush2.bf16.msra.mxu1 %v2319_v61 }
  0xb4   : > { %1710 = vmatprep.subr.bf16.mxu1 %v2324_v62 }
  0xb5   : > { %1458 = vmatpush2.bf16.msra.mxu0 %v2271_v30 }
  0xb6   : > { %1459 = vmatprep.subr.bf16.mxu0 %v2276_v31 }
  0xb7   : > { %1711 = vmatpush2.bf16.msra.mxu1 %v2322_v63  ;;  %v1518_v63 = vld [vmem:[%s2999_s4] sm:$0x3] }
  0xb8   : > { %1712 = vmatprep.subr.bf16.mxu1 %v2327_v0  ;;  %v1523_v0 = vrot.slane %v1518_v63, %v407_v21 }
  0xb9   : > { %1460 = vmatpush2.bf16.msra.mxu0 %v2274_v32 }
  0xba   : > { %1461 = vmatprep.subr.bf16.mxu0 %v2279_v33 }
  0xbb   : > { %1713 = vmatpush2.bf16.msra.mxu1 %v2325_v1  ;;  %v1527_v1 = vrot.slane %v1518_v63, %v411_v19 }
  0xbc   : > { %1714 = vmatprep.subr.bf16.mxu1 %v2330_v2 }
  0xbd   : > { %1462 = vmatpush2.bf16.msra.mxu0 %v2277_v34 }
  0xbe   : > { %1463 = vmatprep.subr.bf16.mxu0 %v2282_v35 }
  0xbf   : > { %1715 = vmatpush2.bf16.msra.mxu1 %v2328_v3 }
  0xc0   : > { %1716 = vmatprep.subr.bf16.mxu1 %v2333_v4 }
  0xc1   : > { %1464 = vmatpush2.bf16.msra.mxu0 %v2280_v36 }
  0xc2   : > { %1465 = vmatprep.subr.bf16.mxu0 %v2285_v37 }
  0xc3   : > { %1717 = vmatpush2.bf16.msra.mxu1 %v2331_v5 }
  0xc4   : > { %1718 = vmatprep.subr.bf16.mxu1 %v2336_v6 }
  0xc5   : > { %1466 = vmatpush2.bf16.msra.mxu0 %v2283_v38 }
  0xc6   : > { %1467 = vmatprep.subr.bf16.mxu0 %v2288_v39 }
  0xc7   : > { %1719 = vmatpush2.bf16.msra.mxu1 %v2334_v7 }
  0xc8   : > { %1720 = vmatprep.subr.bf16.mxu1 %v2339_v8 }
  0xc9   : > { %1468 = vmatpush2.bf16.msra.mxu0 %v2286_v40 }
  0xcb   : > { %1721 = vmatpush2.bf16.msra.mxu1 %v2337_v9 }
  0xcc   : > { %1470 = vmatmul.mubr.bf16.vlgmr.msra.gmra.mxu0 %v2289_v41 }
 0x10c   : > { %v1299_v10 = vpop.f32.mrf.mxu0 }
 0x10d   : > { %v1342_v12 = vpop.f32.mrf.mxu1  ;;  %v1300_v30 = vadd.f32 %v1299_v10, %v408_v25 }
 0x10e   : > { %v1301_v11 = vpop.f32.mrf.mxu0 }
 0x10f   : > { %v1344_v15 = vpop.f32.mrf.mxu1  ;;  %v1302_v28 = vadd.f32 %v1301_v11, %v412_v24  ;;  %v1343_v36 = vadd.f32 %v1342_v12, %v1300_v30 }
 0x110   : > { %v1303_v14 = vpop.f32.mrf.mxu0 }
 0x111   : > { %v1346_v18 = vpop.f32.mrf.mxu1  ;;  %v1304_v29 = vadd.f32 %v1303_v14, %v408_v25  ;;  %v1345_v34 = vadd.f32 %v1344_v15, %v1302_v28 }
 0x112   : > { %v1305_v17 = vpop.f32.mrf.mxu0 }
 0x113   : > { %v1348_v23 = vpop.f32.mrf.mxu1  ;;  %v1306_v33 = vadd.f32 %v1305_v17, %v412_v24  ;;  %v1347_v35 = vadd.f32 %v1346_v18, %v1304_v29 }
 0x115   : > { %v1349_v39 = vadd.f32 %v1348_v23, %v1306_v33 }
 0x14c   : > { %v1385_v22 = vpop.f32.mrf.mxu0 }
 0x14d   : > { %v1386_v42 = vadd.f32 %v1385_v22, %v1343_v36 }
 0x14e   : > { %v1387_v26 = vpop.f32.mrf.mxu0  ;;  %v1428_v27 = vpop.f32.mrf.mxu1 }
 0x14f   : > { %v1388_v40 = vadd.f32 %v1387_v26, %v1345_v34  ;;  %v1429_v49 = vadd.f32 %v1428_v27, %v1386_v42 }
 0x150   : > { %v1389_v31 = vpop.f32.mrf.mxu0  ;;  %v1430_v32 = vpop.f32.mrf.mxu1 }
 0x151   : > { %v1390_v41 = vadd.f32 %v1389_v31, %v1347_v35  ;;  %v1431_v47 = vadd.f32 %v1430_v32, %v1388_v40 }
 0x152   : > { %v1391_v37 = vpop.f32.mrf.mxu0  ;;  %v1432_v38 = vpop.f32.mrf.mxu1 }
 0x153   : > { %v1392_v44 = vadd.f32 %v1391_v37, %v1349_v39  ;;  %v1433_v48 = vadd.f32 %v1432_v38, %v1390_v41 }
 0x154   : > { %v1434_v45 = vpop.f32.mrf.mxu1 }
 0x155   : > { %v1435_v51 = vadd.f32 %v1434_v45, %v1392_v44 }
 0x18c   : > { %v1471_v43 = vpop.f32.mrf.mxu0 }
 0x18d   : > { %v1472_v54 = vadd.f32 %v1471_v43, %v1429_v49 }
 0x18e   : > { %v1473_v46 = vpop.f32.mrf.mxu0 }
 0x18f   : > { %v1474_v52 = vadd.f32 %v1473_v46, %v1431_v47  ;;  %v1480_v60 = vmax.f32 %v1472_v54, 0.0 }
 0x190   : > { %v1475_v50 = vpop.f32.mrf.mxu0 }
 0x191   : > { %v1476_v53 = vadd.f32 %v1475_v50, %v1433_v48  ;;  %v1481_v58 = vmax.f32 %v1474_v52, 0.0 }
 0x192   : > { %v1477_v55 = vpop.f32.mrf.mxu0 }
 0x193   : > { %v1478_v56 = vadd.f32 %v1477_v55, %v1435_v51  ;;  %v1482_v57 = vmax.f32 %v1476_v53, 0.0 }
 0x195   : > { %v1483_v59 = vmax.f32 %v1478_v56, 0.0  ;;  %v1484_v62 = vpack.c.bf16 %v1482_v57, %v1480_v60 }
 0x197   : > { %v1485_v61 = vpack.c.bf16 %v1483_v59, %v1481_v58 }
 0x199   : > { %1722 = vmatprep.mubr.bf16.mxu1 %v1485_v61 }
 0x19a   : > { %1723 = vmatmul.mubr.bf16.vlgmr.msra.gmra.mxu1 %v1484_v62 }
 0x25a   : > { %v1724_v2 = vpop.f32.mrf.mxu1 }
 0x25b   : > { %v1725_v3 = vadd.f32 %v1724_v2, %v1523_v0 }
 0x25c   : > { %v1726_v4 = vpop.f32.mrf.mxu1 }
 0x25d   : > { %v1727_v5 = vadd.f32 %v1726_v4, %v1527_v1  ;;  %v1733_v7 = vmax.f32 %v1725_v3, 0.0 }
 0x25e   : > { %v1728_v6 = vpop.f32.mrf.mxu1 }
 0x25f   : > { %v1734_v8 = vmax.f32 %v1727_v5, 0.0  ;;  %v1729_v9 = vadd.f32 %v1728_v6, %v1523_v0 }
 0x260   : > { %v1730_v10 = vpop.f32.mrf.mxu1 }
 0x261   : > { %v2026_v11 = vpack.c.bf16 %v1734_v8, %v1733_v7  ;;  %v1731_v12 = vadd.f32 %v1730_v10, %v1527_v1  ;;  %v1735_v13 = vmax.f32 %v1729_v9, 0.0 }
 0x263   : > { %1749 = vst [vmem:[%s231_s10] sm:$0xff] %v2026_v11  ;;  %v1736_v14 = vmax.f32 %v1731_v12, 0.0 }
 0x265   : > { %v2027_v15 = vpack.c.bf16 %v1736_v14, %v1735_v13 }
 0x267   : > { %1750 = vst [vmem:[%s231_s10 + $0x8] sm:$0xff] %v2027_v15 }
 0x268 PF: > { %s15_s18 = sadd.s32 1, %s2346_s18  }
 0x269   : > { %p12_p4 = scmp.ge.s32.totalorder %s15_s18, 4  }
 0x26b   :  { %14 = sbr.rel (!%p12_p4) target bundleno = 1 (0x1), region = 70 }

// kernel: _lambda_.12
= control target key start
LH: loop header
LB: loop body
LE: loop exit
PB: predicated region body
PF: predicated region fallthrough
CT: control target
= control target key end

     0   :  { %v4267_v1 = vmov 0   ;;  %vm282_vm0 = vcmask 1043456   ;;  %vm275_vm1 = vcmask 64512   ;;  %vm3330_vm2 = vcmask 1041409   ;;  %s5835_s1 = inlined_call_operand.vmem [shape: bf16[264,256], index: 1, kind: input, shape index: {}]   ;;  %s5836_s0 = inlined_call_operand.vmem [shape: bf16[2,16,264], index: 0, kind: input, shape index: {}]   ;;  %s5837_s3 = inlined_call_operand.vmem [shape: bf16[256,512], index: 3, kind: input, shape index: {}]   ;;  %s5838_s5 = inlined_call_operand.vmem [shape: bf16[512,1024], index: 5, kind: input, shape index: {}]   ;;  %s5839_s2 = inlined_call_operand.vmem [shape: f32[1,256], index: 2, kind: input, shape index: {}]   ;;  %s5840_s4 = inlined_call_operand.vmem [shape: f32[1,512], index: 4, kind: input, shape index: {}]   ;;  %s5841_s6 = inlined_call_operand.vmem [shape: f32[1,1024], index: 6, kind: input, shape index: {}]   ;;  %s5842_s7 = inlined_call_operand.vmem [shape: bf16[2,1024], index: 7, kind: output, shape index: {}]  }
   0x1   :  { %v4113_v0 = vld [vmem:[%s5835_s1 + $0x74] ss:$8 sps:$4 sm:$0xff]   ;;  %374 = vmatprep.mubr.bf16.mxu1 %v4267_v1  ;;  %v4115_v2 = vld [vmem:[%s5835_s1 + $0x70] ss:$8 sps:$4 sm:$0xff]   ;;  %v4116_v3 = vld [vmem:[%s5835_s1 + $0x64] ss:$8 sps:$4 sm:$0xff]  }
   0x2   :  { %289 = vmatprep.subr.bf16.mxu0 %v4113_v0  ;;  %v4118_v4 = vld [vmem:[%s5835_s1 + $0x60] ss:$8 sps:$4 sm:$0xff]   ;;  %v4119_v5 = vld [vmem:[%s5835_s1 + $0x54] ss:$8 sps:$4 sm:$0xff]   ;;  %v4121_v6 = vld [vmem:[%s5835_s1 + $0x50] ss:$8 sps:$4 sm:$0xff]  }
   0x3   :  { %290 = vmatpush1.bf16.msra.mxu0 %v4115_v2  ;;  %v4122_v7 = vld [vmem:[%s5835_s1 + $0x44] ss:$8 sps:$4 sm:$0xff]   ;;  %v4124_v8 = vld [vmem:[%s5835_s1 + $0x40] ss:$8 sps:$4 sm:$0xff]   ;;  %v4125_v9 = vld [vmem:[%s5835_s1 + $0x34] ss:$8 sps:$4 sm:$0xff]  }
   0x4   :  { %291 = vmatprep.subr.bf16.mxu0 %v4116_v3  ;;  %v4127_v10 = vld [vmem:[%s5835_s1 + $0x30] ss:$8 sps:$4 sm:$0xff]   ;;  %v4128_v11 = vld [vmem:[%s5835_s1 + $0x24] ss:$8 sps:$4 sm:$0xff]   ;;  %v4130_v12 = vld [vmem:[%s5835_s1 + $0x20] ss:$8 sps:$4 sm:$0xff]  }
   0x5   :  { %v67_v13 = vld [vmem:[%s5835_s1 + $0x100] sm:$0xff]  ;;  %v4131_v14 = vld [vmem:[%s5835_s1 + $0x14] ss:$8 sps:$4 sm:$0xff]   ;;  %v4133_v19 = vld [vmem:[%s5835_s1 + $0x10] ss:$8 sps:$4 sm:$0xff]  }
   0x6   :  { %v3734_v15 = vcombine.high %v67_v13, %v67_v13  ;;  %v3733_v16 = vcombine.low %v67_v13, %v67_v13  ;;  %v4162_v18 = vld [vmem:[%s5836_s0 + $0x8] ss:$12 sps:$4 sm:$0xff]   ;;  %v4166_v20 = vld [vmem:[%s5836_s0 + $0x4] ss:$12 sps:$4 sm:$0xff]   ;;  %v4170_v26 = vld [vmem:[%s5836_s0 + $0x20] ss:$12 sps:$4 sm:$0xff]  }
   0x7   :  { %292 = vmatpush1.bf16.msra.mxu0 %v4118_v4  ;;  %v4134_v21 = vld [vmem:[%s5835_s1 + $0x4] ss:$8 sps:$4 sm:$0xff]   ;;  %321 = vmatprep.mubr.bf16.mxu0 %v4166_v20  ;;  %v4136_v22 = vld [vmem:[%s5835_s1] ss:$8 sps:$4 sm:$0xff]   ;;  %v4137_v25 = vld [vmem:[%s5835_s1 + $0xf4] ss:$8 sps:$4 sm:$0xff]  }
   0x8   :  { %293 = vmatprep.subr.bf16.mxu0 %v4119_v5  ;;  %3735 = vmatprep.subr.msk.bf16.mxu1 %vm282_vm0, %v3734_v15  ;;  %v284_v17 = vsel %vm282_vm0, %v3733_v16, 0  ;;  %v4171_v23 = vld [vmem:[%s5837_s3 + $0xe0] ss:$16 sps:$4 sm:$0xff]   ;;  %v4173_v24 = vld [vmem:[%s5837_s3 + $0xe4] ss:$16 sps:$4 sm:$0xff]  }
   0x9   :  { %357 = vmatpush1.bf16.msra.mxu1 %v284_v17  ;;  %v4179_v27 = vld [vmem:[%s5837_s3 + $0xc4] ss:$16 sps:$4 sm:$0xff]   ;;  %v4139_v28 = vld [vmem:[%s5835_s1 + $0xf0] ss:$8 sps:$4 sm:$0xff]   ;;  %v4142_v32 = vld [vmem:[%s5835_s1 + $0xe0] ss:$8 sps:$4 sm:$0xff]  }
   0xa   :  { %813 = vmatprep.subr.bf16.mxu1 %v4173_v24  ;;  %v4177_v29 = vld [vmem:[%s5837_s3 + $0xc0] ss:$16 sps:$4 sm:$0xff]   ;;  %v4140_v30 = vld [vmem:[%s5835_s1 + $0xe4] ss:$8 sps:$4 sm:$0xff]   ;;  %v4143_v34 = vld [vmem:[%s5835_s1 + $0xd4] ss:$8 sps:$4 sm:$0xff]  }
   0xb   :  { %294 = vmatpush1.bf16.msra.mxu0 %v4121_v6  ;;  %v4185_v31 = vld [vmem:[%s5837_s3 + $0xa4] ss:$16 sps:$4 sm:$0xff]   ;;  %v4183_v33 = vld [vmem:[%s5837_s3 + $0xa0] ss:$16 sps:$4 sm:$0xff]   ;;  %v4176_v58 = vld [vmem:[%s5837_s3 + $0xec] ss:$16 sps:$4 sm:$0xff]  }
   0xc   :  { %295 = vmatprep.subr.bf16.mxu0 %v4122_v7  ;;  %3736 = vmatmul.mubr.msk.bf16.vlgmr.msra.gmra.mxu1 %vm275_vm1, %v4162_v18  ;;  %v4191_v35 = vld [vmem:[%s5837_s3 + $0x84] ss:$16 sps:$4 sm:$0xff]   ;;  %v4145_v36 = vld [vmem:[%s5835_s1 + $0xd0] ss:$8 sps:$4 sm:$0xff]   ;;  %v4148_v40 = vld [vmem:[%s5835_s1 + $0xc0] ss:$8 sps:$4 sm:$0xff]  }
   0xd   :  { %384 = vmatprep.mubr.bf16.mxu1 %v4267_v1  ;;  %814 = vmatpush1.bf16.msra.mxu1 %v4171_v23  ;;  %v4189_v37 = vld [vmem:[%s5837_s3 + $0x80] ss:$16 sps:$4 sm:$0xff]   ;;  %v4146_v38 = vld [vmem:[%s5835_s1 + $0xc4] ss:$8 sps:$4 sm:$0xff]   ;;  %v4149_v42 = vld [vmem:[%s5835_s1 + $0xb4] ss:$8 sps:$4 sm:$0xff]  }
   0xe   :  { %815 = vmatprep.subr.bf16.mxu1 %v4179_v27  ;;  %v4197_v39 = vld [vmem:[%s5837_s3 + $0x64] ss:$16 sps:$4 sm:$0xff]   ;;  %v4195_v41 = vld [vmem:[%s5837_s3 + $0x60] ss:$16 sps:$4 sm:$0xff]   ;;  %v4167_v61 = vld [vmem:[%s5836_s0 + $0x1c] ss:$12 sps:$4 sm:$0xff]  }
   0xf   :  { %296 = vmatpush1.bf16.msra.mxu0 %v4124_v8  ;;  %v4203_v43 = vld [vmem:[%s5837_s3 + $0x44] ss:$16 sps:$4 sm:$0xff]   ;;  %v4151_v44 = vld [vmem:[%s5835_s1 + $0xb0] ss:$8 sps:$4 sm:$0xff]   ;;  %v4154_v48 = vld [vmem:[%s5835_s1 + $0xa0] ss:$8 sps:$4 sm:$0xff]  }
  0x10   :  { %297 = vmatprep.subr.bf16.mxu0 %v4125_v9  ;;  %v4201_v45 = vld [vmem:[%s5837_s3 + $0x40] ss:$16 sps:$4 sm:$0xff]   ;;  %v4152_v46 = vld [vmem:[%s5835_s1 + $0xa4] ss:$8 sps:$4 sm:$0xff]   ;;  %v4155_v50 = vld [vmem:[%s5835_s1 + $0x94] ss:$8 sps:$4 sm:$0xff]  }
  0x11   :  { %816 = vmatpush1.bf16.msra.mxu1 %v4177_v29  ;;  %v4209_v47 = vld [vmem:[%s5837_s3 + $0x24] ss:$16 sps:$4 sm:$0xff]   ;;  %v4207_v49 = vld [vmem:[%s5837_s3 + $0x20] ss:$16 sps:$4 sm:$0xff]   ;;  %v4174_v62 = vld [vmem:[%s5837_s3 + $0xe8] ss:$16 sps:$4 sm:$0xff]  }
  0x12   :  { %817 = vmatprep.subr.bf16.mxu1 %v4185_v31  ;;  %v4215_v51 = vld [vmem:[%s5837_s3 + $0x4] ss:$16 sps:$4 sm:$0xff]   ;;  %v4158_v52 = vld [vmem:[%s5835_s1 + $0x90] ss:$8 sps:$4 sm:$0xff]   ;;  %v4163_v56 = vld [vmem:[%s5835_s1 + $0x80] ss:$8 sps:$4 sm:$0xff]  }
  0x13   :  { %298 = vmatpush1.bf16.msra.mxu0 %v4127_v10  ;;  %v4160_v53 = vld [vmem:[%s5835_s1 + $0x84] ss:$8 sps:$4 sm:$0xff]   ;;  %v4213_v54 = vld [vmem:[%s5837_s3] ss:$16 sps:$4 sm:$0xff]   ;;  %v4180_v2 = vld [vmem:[%s5837_s3 + $0xc8] ss:$16 sps:$4 sm:$0xff]  }
  0x14   :  { %299 = vmatprep.subr.bf16.mxu0 %v4128_v11  ;;  %3737 = vmatmul.mubr.msk.bf16.gmra.mxu1 %vm275_vm1, %v4170_v26  ;;  %v4221_v55 = vld [vmem:[%s5837_s3 + $0x1e4] ss:$16 sps:$4 sm:$0xff]   ;;  %v4219_v57 = vld [vmem:[%s5837_s3 + $0x1e0] ss:$16 sps:$4 sm:$0xff]   ;;  %v4182_v63 = vld [vmem:[%s5837_s3 + $0xcc] ss:$16 sps:$4 sm:$0xff]  }
  0x15   :  { %818 = vmatpush1.bf16.msra.mxu1 %v4183_v33  ;;  %v4227_v59 = vld [vmem:[%s5837_s3 + $0x1c4] ss:$16 sps:$4 sm:$0xff]   ;;  %v4164_v60 = vld [vmem:[%s5836_s0] ss:$12 sps:$4 sm:$0xff]   ;;  %v4186_v6 = vld [vmem:[%s5837_s3 + $0xa8] ss:$16 sps:$4 sm:$0xff]  }
  0x16   :  { %819 = vmatprep.subr.bf16.mxu1 %v4191_v35  ;;  %v4225_v0 = vld [vmem:[%s5837_s3 + $0x1c0] ss:$16 sps:$4 sm:$0xff]   ;;  %v4233_v1 = vld [vmem:[%s5837_s3 + $0x1a4] ss:$16 sps:$4 sm:$0xff]   ;;  %v4188_v3 = vld [vmem:[%s5837_s3 + $0xac] ss:$16 sps:$4 sm:$0xff]  }
  0x17   :  { %300 = vmatpush1.bf16.msra.mxu0 %v4130_v12  ;;  %v4231_v4 = vld [vmem:[%s5837_s3 + $0x1a0] ss:$16 sps:$4 sm:$0xff]   ;;  %v4169_v5 = vld [vmem:[%s5836_s0 + $0x18] ss:$12 sps:$4 sm:$0xff]   ;;  %v4194_v7 = vld [vmem:[%s5837_s3 + $0x8c] ss:$16 sps:$4 sm:$0xff]  }
  0x18   :  { %301 = vmatprep.subr.bf16.mxu0 %v4131_v14  ;;  %v4192_v8 = vld [vmem:[%s5837_s3 + $0x88] ss:$16 sps:$4 sm:$0xff]   ;;  %v4200_v9 = vld [vmem:[%s5837_s3 + $0x6c] ss:$16 sps:$4 sm:$0xff]   ;;  %v4237_v16 = vld [vmem:[%s5837_s3 + $0x180] ss:$16 sps:$4 sm:$0xff]  }
  0x19   :  { %820 = vmatpush1.bf16.msra.mxu1 %v4189_v37  ;;  %v4198_v10 = vld [vmem:[%s5837_s3 + $0x68] ss:$16 sps:$4 sm:$0xff]   ;;  %v4206_v11 = vld [vmem:[%s5837_s3 + $0x4c] ss:$16 sps:$4 sm:$0xff]   ;;  %v4239_v17 = vld [vmem:[%s5837_s3 + $0x184] ss:$16 sps:$4 sm:$0xff]  }
  0x1a   :  { %821 = vmatprep.subr.bf16.mxu1 %v4197_v39  ;;  %v4204_v12 = vld [vmem:[%s5837_s3 + $0x48] ss:$16 sps:$4 sm:$0xff]   ;;  %v4212_v13 = vld [vmem:[%s5837_s3 + $0x2c] ss:$16 sps:$4 sm:$0xff]   ;;  %v4245_v27 = vld [vmem:[%s5837_s3 + $0x164] ss:$16 sps:$4 sm:$0xff]  }
  0x1b   :  { %302 = vmatpush1.bf16.msra.mxu0 %v4133_v19  ;;  %v4210_v14 = vld [vmem:[%s5837_s3 + $0x28] ss:$16 sps:$4 sm:$0xff]   ;;  %v4218_v15 = vld [vmem:[%s5837_s3 + $0xc] ss:$16 sps:$4 sm:$0xff]   ;;  %v4243_v29 = vld [vmem:[%s5837_s3 + $0x160] ss:$16 sps:$4 sm:$0xff]  }
  0x1c   :  { %303 = vmatprep.subr.bf16.mxu0 %v4134_v21  ;;  %v4216_v18 = vld [vmem:[%s5837_s3 + $0x8] ss:$16 sps:$4 sm:$0xff]   ;;  %v4224_v19 = vld [vmem:[%s5837_s3 + $0x1ec] ss:$16 sps:$4 sm:$0xff]   ;;  %v4251_v31 = vld [vmem:[%s5837_s3 + $0x144] ss:$16 sps:$4 sm:$0xff]  }
  0x1d   :  { %822 = vmatpush1.bf16.msra.mxu1 %v4195_v41  ;;  %v4222_v20 = vld [vmem:[%s5837_s3 + $0x1e8] ss:$16 sps:$4 sm:$0xff]   ;;  %v4230_v21 = vld [vmem:[%s5837_s3 + $0x1cc] ss:$16 sps:$4 sm:$0xff]   ;;  %v4249_v33 = vld [vmem:[%s5837_s3 + $0x140] ss:$16 sps:$4 sm:$0xff]  }
  0x1e   :  { %823 = vmatprep.subr.bf16.mxu1 %v4203_v43  ;;  %v4236_v23 = vld [vmem:[%s5837_s3 + $0x1ac] ss:$16 sps:$4 sm:$0xff]   ;;  %v4234_v24 = vld [vmem:[%s5837_s3 + $0x1a8] ss:$16 sps:$4 sm:$0xff]   ;;  %v4257_v35 = vld [vmem:[%s5837_s3 + $0x124] ss:$16 sps:$4 sm:$0xff]  }
  0x1f   :  { %304 = vmatpush1.bf16.msra.mxu0 %v4136_v22  ;;  %v4228_v22 = vld [vmem:[%s5837_s3 + $0x1c8] ss:$16 sps:$4 sm:$0xff]   ;;  %v4255_v37 = vld [vmem:[%s5837_s3 + $0x120] ss:$16 sps:$4 sm:$0xff]   ;;  %v4263_v39 = vld [vmem:[%s5837_s3 + $0x104] ss:$16 sps:$4 sm:$0xff]  }
  0x20   :  { %305 = vmatprep.subr.bf16.mxu0 %v4137_v25  ;;  %v4242_v25 = vld [vmem:[%s5837_s3 + $0x18c] ss:$16 sps:$4 sm:$0xff]   ;;  %v4240_v26 = vld [vmem:[%s5837_s3 + $0x188] ss:$16 sps:$4 sm:$0xff]   ;;  %v4261_v41 = vld [vmem:[%s5837_s3 + $0x100] ss:$16 sps:$4 sm:$0xff]  }
  0x21   :  { %824 = vmatpush1.bf16.msra.mxu1 %v4201_v45  ;;  %v4624_v43 = vld [vmem:[%s5838_s5 + $0x1c0] sm:$0xff] }
  0x22   :  { %825 = vmatprep.subr.bf16.mxu1 %v4209_v47  ;;  %v4634_v45 = vld [vmem:[%s5838_s5 + $0x5c0] sm:$0xff] }
  0x23   :  { %306 = vmatpush2.bf16.msra.mxu0 %v4139_v28  ;;  %v4248_v28 = vld [vmem:[%s5837_s3 + $0x16c] ss:$16 sps:$4 sm:$0xff]  }
  0x24   :  { %307 = vmatprep.subr.bf16.mxu0 %v4140_v30  ;;  %v4246_v30 = vld [vmem:[%s5837_s3 + $0x168] ss:$16 sps:$4 sm:$0xff]  }
  0x25   :  { %826 = vmatpush1.bf16.msra.mxu1 %v4207_v49 }
  0x26   :  { %827 = vmatprep.subr.bf16.mxu1 %v4215_v51 }
  0x27   :  { %308 = vmatpush2.bf16.msra.mxu0 %v4142_v32  ;;  %v4254_v32 = vld [vmem:[%s5837_s3 + $0x14c] ss:$16 sps:$4 sm:$0xff]  }
  0x28   :  { %309 = vmatprep.subr.bf16.mxu0 %v4143_v34  ;;  %v4252_v34 = vld [vmem:[%s5837_s3 + $0x148] ss:$16 sps:$4 sm:$0xff]  }
  0x29   :  { %828 = vmatpush1.bf16.msra.mxu1 %v4213_v54 }
  0x2a   :  { %829 = vmatprep.subr.bf16.mxu1 %v4221_v55 }
  0x2b   :  { %310 = vmatpush2.bf16.msra.mxu0 %v4145_v36  ;;  %v4260_v36 = vld [vmem:[%s5837_s3 + $0x12c] ss:$16 sps:$4 sm:$0xff]  }
  0x2c   :  { %311 = vmatprep.subr.bf16.mxu0 %v4146_v38  ;;  %v4258_v38 = vld [vmem:[%s5837_s3 + $0x128] ss:$16 sps:$4 sm:$0xff]  }
  0x2d   :  { %830 = vmatpush2.bf16.msra.mxu1 %v4219_v57 }
  0x2e   :  { %831 = vmatprep.subr.bf16.mxu1 %v4227_v59 }
  0x2f   :  { %312 = vmatpush2.bf16.msra.mxu0 %v4148_v40  ;;  %v4266_v40 = vld [vmem:[%s5837_s3 + $0x10c] ss:$16 sps:$4 sm:$0xff]  }
  0x30   :  { %313 = vmatprep.subr.bf16.mxu0 %v4149_v42  ;;  %v4264_v42 = vld [vmem:[%s5837_s3 + $0x108] ss:$16 sps:$4 sm:$0xff]  }
  0x31   :  { %832 = vmatpush2.bf16.msra.mxu1 %v4225_v0 }
  0x32   :  { %833 = vmatprep.subr.bf16.mxu1 %v4233_v1 }
  0x33   :  { %314 = vmatpush2.bf16.msra.mxu0 %v4151_v44  ;;  %v4629_v44 = vld [vmem:[%s5838_s5 + $0x1e0] sm:$0xff] }
  0x34   :  { %315 = vmatprep.subr.bf16.mxu0 %v4152_v46  ;;  %v3858_v46 = vcombine.low %v4624_v43, %v4629_v44  ;;  %v3859_v47 = vcombine.high %v4624_v43, %v4629_v44  ;;  %v1103_v43 = vld [vmem:[%s5838_s5 + $0x500] sm:$0xff] }
  0x35   :  { %834 = vmatpush2.bf16.msra.mxu1 %v4231_v4  ;;  %v1107_v44 = vld [vmem:[%s5838_s5 + $0x520] sm:$0xff] }
  0x36   :  { %835 = vmatprep.subr.bf16.mxu1 %v4239_v17  ;;  %v991_v17 = vld [vmem:[%s5838_s5 + $0x180] sm:$0xff] }
  0x37   :  { %316 = vmatpush2.bf16.msra.mxu0 %v4154_v48  ;;  %v4643_v48 = vld [vmem:[%s5838_s5 + $0x5e0] sm:$0xff] }
  0x38   :  { %317 = vmatprep.subr.bf16.mxu0 %v4155_v50  ;;  %v3986_v49 = vcombine.low %v4634_v45, %v4643_v48  ;;  %v3987_v50 = vcombine.high %v4634_v45, %v4643_v48 }
  0x39   :  { %836 = vmatpush2.bf16.msra.mxu1 %v4237_v16 }
  0x3a   :  { %837 = vmatprep.subr.bf16.mxu1 %v4245_v27 }
  0x3b   :  { %318 = vmatpush2.bf16.msra.mxu0 %v4158_v52  ;;  %v70_v52 = vlaneseq }
  0x3c   :  { %319 = vmatprep.subr.bf16.mxu0 %v4160_v53 }
  0x3d   :  { %838 = vmatpush2.bf16.msra.mxu1 %v4243_v29  ;;  %v4649_v54 = vshrl.u32 %v70_v52, 7 }
  0x3e   :  { %839 = vmatprep.subr.bf16.mxu1 %v4251_v31 }
  0x3f   :  { %320 = vmatpush2.bf16.msra.mxu0 %v4163_v56  ;;  %5850 = vst [vmem:[#allocation2_spill] sm:$0xff] %v4649_v54  ;;  %v4652_v55 = vsub.s32 1, %v4649_v54  ;;  %v4655_v56 = vsub.s32 0, %v4649_v54 }
  0x40   :  { %866 = vmatprep.subr.bf16.mxu0 %v4176_v58  ;;  %v68_v58 = vld [vmem:[%s5839_s2] sm:$0x3] }
  0x41   :  { %840 = vmatpush2.bf16.msra.mxu1 %v4249_v33  ;;  %v77_v59 = vrot.slane %v68_v58, %v4652_v55 }
  0x42   :  { %322 = vmatmul.mubr.bf16.vlgmr.msra.gmra.mxu0 %v4164_v60  ;;  %841 = vmatprep.subr.bf16.mxu1 %v4257_v35  ;;  %v73_v60 = vrot.slane %v68_v58, %v4655_v56  ;;  %v983_v35 = vld [vmem:[%s5838_s5 + $0x140] sm:$0xff] }
  0x43   :  { %331 = vmatprep.mubr.bf16.mxu0 %v4167_v61  ;;  %867 = vmatpush1.bf16.msra.mxu0 %v4174_v62  ;;  %v975_v58 = vld [vmem:[%s5838_s5 + $0x100] sm:$0xff] }
  0x44   :  { %868 = vmatprep.subr.bf16.mxu0 %v4182_v63 }
  0x45   :  { %842 = vmatpush2.bf16.msra.mxu1 %v4255_v37 }
  0x46   :  { %843 = vmatprep.subr.bf16.mxu1 %v4263_v39  ;;  %v1111_v39 = vld [vmem:[%s5838_s5 + $0x540] sm:$0xff] }
  0x47   :  { %869 = vmatpush1.bf16.msra.mxu0 %v4180_v2 }
  0x48   :  { %870 = vmatprep.subr.bf16.mxu0 %v4188_v3 }
  0x49   :  { %844 = vmatpush2.bf16.msra.mxu1 %v4261_v41 }
  0x4a   :  { %332 = vmatmul.mubr.bf16.gmra.mxu0 %v4169_v5  ;;  %2521 = vmatprep.subr.bf16.mxu1 %v3859_v47 }
  0x4b   :  { %871 = vmatpush1.bf16.msra.mxu0 %v4186_v6 }
  0x4c   :  { %872 = vmatprep.subr.bf16.mxu0 %v4194_v7 }
  0x4f   :  { %873 = vmatpush1.bf16.msra.mxu0 %v4192_v8 }
  0x50   :  { %874 = vmatprep.subr.bf16.mxu0 %v4200_v9 }
  0x53   :  { %875 = vmatpush1.bf16.msra.mxu0 %v4198_v10 }
  0x54   :  { %876 = vmatprep.subr.bf16.mxu0 %v4206_v11 }
  0x57   :  { %877 = vmatpush1.bf16.msra.mxu0 %v4204_v12 }
  0x58   :  { %878 = vmatprep.subr.bf16.mxu0 %v4212_v13 }
  0x5b   :  { %879 = vmatpush1.bf16.msra.mxu0 %v4210_v14 }
  0x5c   :  { %880 = vmatprep.subr.bf16.mxu0 %v4218_v15 }
  0x5f   :  { %881 = vmatpush1.bf16.msra.mxu0 %v4216_v18 }
  0x60   :  { %882 = vmatprep.subr.bf16.mxu0 %v4224_v19 }
  0x63   :  { %883 = vmatpush2.bf16.msra.mxu0 %v4222_v20 }
  0x64   :  { %884 = vmatprep.subr.bf16.mxu0 %v4230_v21  ;;  %v995_v21 = vld [vmem:[%s5838_s5 + $0x1a0] sm:$0xff] }
  0x65   :  { %v3851_v33 = vcombine.high %v991_v17, %v995_v21 }
  0x67   :  { %885 = vmatpush2.bf16.msra.mxu0 %v4228_v22  ;;  %v1119_v22 = vld [vmem:[%s5838_s5 + $0x580] sm:$0xff] }
  0x68   :  { %886 = vmatprep.subr.bf16.mxu0 %v4236_v23  ;;  %v1123_v23 = vld [vmem:[%s5838_s5 + $0x5a0] sm:$0xff] }
  0x69   :  { %v3978_v52 = vcombine.low %v1119_v22, %v1123_v23 }
  0x6b   :  { %887 = vmatpush2.bf16.msra.mxu0 %v4234_v24 }
  0x6c   :  { %888 = vmatprep.subr.bf16.mxu0 %v4242_v25 }
  0x6f   :  { %889 = vmatpush2.bf16.msra.mxu0 %v4240_v26 }
  0x70   :  { %890 = vmatprep.subr.bf16.mxu0 %v4248_v28 }
  0x73   :  { %891 = vmatpush2.bf16.msra.mxu0 %v4246_v30 }
  0x74   :  { %892 = vmatprep.subr.bf16.mxu0 %v4254_v32 }
  0x77   :  { %893 = vmatpush2.bf16.msra.mxu0 %v4252_v34  ;;  %v3979_v34 = vcombine.high %v1119_v22, %v1123_v23  ;;  %v943_v23 = vld [vmem:[%s5838_s5] sm:$0xff] }
  0x78   :  { %894 = vmatprep.subr.bf16.mxu0 %v4260_v36 }
  0x7b   :  { %895 = vmatpush2.bf16.msra.mxu0 %v4258_v38  ;;  %v987_v38 = vld [vmem:[%s5838_s5 + $0x160] sm:$0xff] }
  0x7c   :  { %896 = vmatprep.subr.bf16.mxu0 %v4266_v40  ;;  %v1115_v40 = vld [vmem:[%s5838_s5 + $0x560] sm:$0xff]  ;;  %v3842_v48 = vcombine.low %v983_v35, %v987_v38 }
  0x7f   :  { %897 = vmatpush2.bf16.msra.mxu0 %v4264_v42  ;;  %v3850_v42 = vcombine.low %v991_v17, %v995_v21  ;;  %v1079_v17 = vld [vmem:[%s5838_s5 + $0x440] sm:$0xff] }
  0x80   :  { %2574 = vmatprep.subr.bf16.mxu0 %v3987_v50 }
  0xcc   :  { %v376_v51 = vpop.f32.mrf.mxu1 }
  0xce   :  { %v378_v53 = vpop.f32.mrf.mxu1 }
  0xd0   :  { %v380_v57 = vpop.f32.mrf.mxu1 }
  0xd2   :  { %v382_v62 = vpop.f32.mrf.mxu1 }
  0xd4   :  { %v386_v0 = vpop.f32.mrf.mxu1 }
  0xd6   :  { %v388_v6 = vpop.f32.mrf.mxu1 }
  0xd8   :  { %v390_v16 = vpop.f32.mrf.mxu1 }
  0xda   :  { %v392_v32 = vpop.f32.mrf.mxu1 }
 0x102   :  { %v323_v61 = vpop.f32.mrf.mxu0 }
 0x103   :  { %v324_v2 = vadd.f32 %v323_v61, %v73_v60 }
 0x104   :  { %v325_v63 = vpop.f32.mrf.mxu0 }
 0x105   :  { %v326_v1 = vadd.f32 %v325_v63, %v77_v59  ;;  %v377_v10 = vadd.f32 %v376_v51, %v324_v2  ;;  %v967_v63 = vld [vmem:[%s5838_s5 + $0xc0] sm:$0xff] }
 0x106   :  { %v327_v3 = vpop.f32.mrf.mxu0  ;;  %v1099_v2 = vld [vmem:[%s5838_s5 + $0x4e0] sm:$0xff] }
 0x107   :  { %v328_v4 = vadd.f32 %v327_v3, %v73_v60  ;;  %v379_v7 = vadd.f32 %v378_v53, %v326_v1  ;;  %v395_v24 = vmax.f32 %v377_v10, 0.0  ;;  %v3843_v53 = vcombine.high %v983_v35, %v987_v38  ;;  %v1095_v1 = vld [vmem:[%s5838_s5 + $0x4c0] sm:$0xff] }
 0x108   :  { %v329_v5 = vpop.f32.mrf.mxu0  ;;  %v1091_v10 = vld [vmem:[%s5838_s5 + $0x4a0] sm:$0xff] }
 0x109   :  { %v381_v8 = vadd.f32 %v380_v57, %v328_v4  ;;  %v330_v9 = vadd.f32 %v329_v5, %v77_v59  ;;  %v396_v18 = vmax.f32 %v379_v7, 0.0  ;;  %v3971_v57 = vcombine.high %v1111_v39, %v1115_v40  ;;  %v959_v7 = vld [vmem:[%s5838_s5 + $0x80] sm:$0xff] }
 0x10a   :  { %v333_v11 = vpop.f32.mrf.mxu0  ;;  %v3962_v4 = vcombine.low %v1103_v43, %v1107_v44 }
 0x10b   :  { %v383_v12 = vadd.f32 %v382_v62, %v330_v9  ;;  %v334_v13 = vadd.f32 %v333_v11, %v73_v60  ;;  %v397_v14 = vmax.f32 %v381_v8, 0.0  ;;  %v3963_v62 = vcombine.high %v1103_v43, %v1107_v44  ;;  %v963_v8 = vld [vmem:[%s5838_s5 + $0xa0] sm:$0xff] }
 0x10c   :  { %v335_v15 = vpop.f32.mrf.mxu0  ;;  %v1087_v9 = vld [vmem:[%s5838_s5 + $0x480] sm:$0xff] }
 0x10d   :  { %v398_v19 = vmax.f32 %v383_v12, 0.0  ;;  %v336_v20 = vadd.f32 %v335_v15, %v77_v59  ;;  %v387_v25 = vadd.f32 %v386_v0, %v334_v13  ;;  %v403_v30 = vpack.c.bf16 %v397_v14, %v395_v24  ;;  %v971_v0 = vld [vmem:[%s5838_s5 + $0xe0] sm:$0xff] }
 0x10e   :  { %v337_v26 = vpop.f32.mrf.mxu0  ;;  %v3827_v5 = vcombine.high %v967_v63, %v971_v0  ;;  %v3826_v11 = vcombine.low %v967_v63, %v971_v0  ;;  %v3954_v12 = vcombine.low %v1095_v1, %v1099_v2  ;;  %v3819_v13 = vcombine.high %v959_v7, %v963_v8  ;;  %v951_v15 = vld [vmem:[%s5838_s5 + $0x40] sm:$0xff] }
 0x10f   :  { %v338_v27 = vadd.f32 %v337_v26, %v73_v60  ;;  %v389_v28 = vadd.f32 %v388_v6, %v336_v20  ;;  %v404_v29 = vpack.c.bf16 %v398_v19, %v396_v18  ;;  %v399_v41 = vmax.f32 %v387_v25, 0.0  ;;  %v979_v60 = vld [vmem:[%s5838_s5 + $0x120] sm:$0xff] }
 0x110   :  { %v339_v31 = vpop.f32.mrf.mxu0  ;;  %v3835_v61 = vcombine.high %v975_v58, %v979_v60  ;;  %v3834_v3 = vcombine.low %v975_v58, %v979_v60  ;;  %v3955_v6 = vcombine.high %v1095_v1, %v1099_v2  ;;  %v3947_v14 = vcombine.high %v1087_v9, %v1091_v10  ;;  %v1083_v18 = vld [vmem:[%s5838_s5 + $0x460] sm:$0xff] }
 0x111   :  { %v340_v36 = vadd.f32 %v339_v31, %v77_v59  ;;  %v391_v37 = vadd.f32 %v390_v16, %v338_v27  ;;  %845 = vmatprep.mubr.bf16.mxu1 %v404_v29  ;;  %898 = vmatprep.mubr.bf16.mxu0 %v404_v29  ;;  %v400_v47 = vmax.f32 %v389_v28, 0.0  ;;  %v955_v16 = vld [vmem:[%s5838_s5 + $0x60] sm:$0xff]  ;;  %v3818_v19 = vcombine.low %v959_v7, %v963_v8 }
 0x112   :  { %846 = vmatmul.mubr.bf16.vlgmr.msra.gmra.mxu1 %v403_v30  ;;  %899 = vmatmul.mubr.bf16.vlgmr.msra.gmra.mxu0 %v403_v30  ;;  %v3946_v20 = vcombine.low %v1087_v9, %v1091_v10  ;;  %v3811_v21 = vcombine.high %v951_v15, %v955_v16  ;;  %v3939_v22 = vcombine.high %v1079_v17, %v1083_v18  ;;  %v947_v24 = vld [vmem:[%s5838_s5 + $0x20] sm:$0xff] }
 0x113   :  { %v401_v50 = vmax.f32 %v391_v37, 0.0  ;;  %v393_v51 = vadd.f32 %v392_v32, %v340_v36  ;;  %2522 = vmatpush1.bf16.msra.mxu1 %v3858_v46  ;;  %2575 = vmatpush1.bf16.msra.mxu0 %v3986_v49  ;;  %v3970_v49 = vcombine.low %v1111_v39, %v1115_v40  ;;  %v1071_v25 = vld [vmem:[%s5838_s5 + $0x400] sm:$0xff]  ;;  %v3810_v27 = vcombine.low %v951_v15, %v955_v16 }
 0x114   :  { %2523 = vmatprep.subr.bf16.mxu1 %v3851_v33  ;;  %2576 = vmatprep.subr.bf16.mxu0 %v3979_v34  ;;  %v1075_v26 = vld [vmem:[%s5838_s5 + $0x420] sm:$0xff]  ;;  %v3938_v28 = vcombine.low %v1079_v17, %v1083_v18  ;;  %v3803_v29 = vcombine.high %v943_v23, %v947_v24  ;;  %v3802_v35 = vcombine.low %v943_v23, %v947_v24 }
 0x115   :  { %v402_v59 = vmax.f32 %v393_v51, 0.0  ;;  %v405_v45 = vpack.c.bf16 %v401_v50, %v399_v41  ;;  %v3931_v30 = vcombine.high %v1071_v25, %v1075_v26  ;;  %v1063_v31 = vld [vmem:[%s5838_s5 + $0x3c0] sm:$0xff]  ;;  %v3930_v36 = vcombine.low %v1071_v25, %v1075_v26 }
 0x116   :  { %v1067_v32 = vld [vmem:[%s5838_s5 + $0x3e0] sm:$0xff] }
 0x117   :  { %v406_v46 = vpack.c.bf16 %v402_v59, %v400_v47  ;;  %2524 = vmatpush1.bf16.msra.mxu1 %v3850_v42  ;;  %2577 = vmatpush1.bf16.msra.mxu0 %v3978_v52  ;;  %v1191_v33 = vld [vmem:[%s5838_s5 + $0x7c0] sm:$0xff]  ;;  %v3923_v37 = vcombine.high %v1063_v31, %v1067_v32  ;;  %v3922_v47 = vcombine.low %v1063_v31, %v1067_v32 }
 0x118   :  { %2525 = vmatprep.subr.bf16.mxu1 %v3843_v53  ;;  %2578 = vmatprep.subr.bf16.mxu0 %v3971_v57  ;;  %v1195_v34 = vld [vmem:[%s5838_s5 + $0x7e0] sm:$0xff] }
 0x119   :  { %855 = vmatprep.mubr.bf16.mxu1 %v406_v46  ;;  %908 = vmatprep.mubr.bf16.mxu0 %v406_v46  ;;  %v4051_v38 = vcombine.high %v1191_v33, %v1195_v34  ;;  %v1055_v39 = vld [vmem:[%s5838_s5 + $0x380] sm:$0xff]  ;;  %v4050_v50 = vcombine.low %v1191_v33, %v1195_v34 }
 0x11a   :  { %856 = vmatmul.mubr.bf16.gmra.mxu1 %v405_v45  ;;  %909 = vmatmul.mubr.bf16.gmra.mxu0 %v405_v45  ;;  %v1059_v40 = vld [vmem:[%s5838_s5 + $0x3a0] sm:$0xff] }
 0x11b   :  { %2526 = vmatpush1.bf16.msra.mxu1 %v3842_v48  ;;  %2579 = vmatpush1.bf16.msra.mxu0 %v3970_v49  ;;  %v1183_v41 = vld [vmem:[%s5838_s5 + $0x780] sm:$0xff]  ;;  %v3915_v51 = vcombine.high %v1055_v39, %v1059_v40  ;;  %v3914_v60 = vcombine.low %v1055_v39, %v1059_v40  ;;  %v4868_v40 = vld [vmem:[%s5838_s5 + $0x5e8] sm:$0xff] }
 0x11c   :  { %2527 = vmatprep.subr.bf16.mxu1 %v3835_v61  ;;  %2580 = vmatprep.subr.bf16.mxu0 %v3963_v62  ;;  %v1187_v42 = vld [vmem:[%s5838_s5 + $0x7a0] sm:$0xff] }
 0x11d   :  { %v4043_v52 = vcombine.high %v1183_v41, %v1187_v42  ;;  %v1047_v53 = vld [vmem:[%s5838_s5 + $0x340] sm:$0xff]  ;;  %v4042_v43 = vcombine.low %v1183_v41, %v1187_v42 }
 0x11e   :  { %v1051_v57 = vld [vmem:[%s5838_s5 + $0x360] sm:$0xff] }
 0x11f   :  { %2528 = vmatpush1.bf16.msra.mxu1 %v3834_v3  ;;  %2581 = vmatpush1.bf16.msra.mxu0 %v3962_v4  ;;  %v1175_v58 = vld [vmem:[%s5838_s5 + $0x740] sm:$0xff]  ;;  %v3907_v44 = vcombine.high %v1047_v53, %v1051_v57  ;;  %v3906_v62 = vcombine.low %v1047_v53, %v1051_v57 }
 0x120   :  { %2529 = vmatprep.subr.bf16.mxu1 %v3827_v5  ;;  %2582 = vmatprep.subr.bf16.mxu0 %v3955_v6  ;;  %v1179_v59 = vld [vmem:[%s5838_s5 + $0x760] sm:$0xff] }
 0x121   :  { %v4035_v45 = vcombine.high %v1175_v58, %v1179_v59  ;;  %v1039_v46 = vld [vmem:[%s5838_s5 + $0x300] sm:$0xff]  ;;  %v4034_v63 = vcombine.low %v1175_v58, %v1179_v59 }
 0x122   :  { %v1043_v48 = vld [vmem:[%s5838_s5 + $0x320] sm:$0xff] }
 0x123   :  { %2530 = vmatpush1.bf16.msra.mxu1 %v3826_v11  ;;  %2583 = vmatpush1.bf16.msra.mxu0 %v3954_v12  ;;  %v1167_v49 = vld [vmem:[%s5838_s5 + $0x700] sm:$0xff]  ;;  %v3899_v0 = vcombine.high %v1039_v46, %v1043_v48  ;;  %v3898_v6 = vcombine.low %v1039_v46, %v1043_v48 }
 0x124   :  { %2531 = vmatprep.subr.bf16.mxu1 %v3819_v13  ;;  %2584 = vmatprep.subr.bf16.mxu0 %v3947_v14  ;;  %v1171_v61 = vld [vmem:[%s5838_s5 + $0x720] sm:$0xff] }
 0x125   :  { %v4027_v1 = vcombine.high %v1167_v49, %v1171_v61  ;;  %v1031_v2 = vld [vmem:[%s5838_s5 + $0x2c0] sm:$0xff]  ;;  %v4026_v7 = vcombine.low %v1167_v49, %v1171_v61 }
 0x126   :  { %v1035_v3 = vld [vmem:[%s5838_s5 + $0x2e0] sm:$0xff] }
 0x127   :  { %2532 = vmatpush1.bf16.msra.mxu1 %v3818_v19  ;;  %2585 = vmatpush1.bf16.msra.mxu0 %v3946_v20  ;;  %v1159_v4 = vld [vmem:[%s5838_s5 + $0x6c0] sm:$0xff]  ;;  %v3891_v8 = vcombine.high %v1031_v2, %v1035_v3  ;;  %v3890_v10 = vcombine.low %v1031_v2, %v1035_v3 }
 0x128   :  { %2533 = vmatprep.subr.bf16.mxu1 %v3811_v21  ;;  %2586 = vmatprep.subr.bf16.mxu0 %v3939_v22  ;;  %v1163_v5 = vld [vmem:[%s5838_s5 + $0x6e0] sm:$0xff] }
 0x129   :  { %v4019_v9 = vcombine.high %v1159_v4, %v1163_v5  ;;  %v4018_v11 = vcombine.low %v1159_v4, %v1163_v5  ;;  %v1023_v12 = vld [vmem:[%s5838_s5 + $0x280] sm:$0xff] }
 0x12a   :  { %v1027_v13 = vld [vmem:[%s5838_s5 + $0x2a0] sm:$0xff] }
 0x12b   :  { %2534 = vmatpush1.bf16.msra.mxu1 %v3810_v27  ;;  %2587 = vmatpush1.bf16.msra.mxu0 %v3938_v28  ;;  %v1151_v14 = vld [vmem:[%s5838_s5 + $0x680] sm:$0xff]  ;;  %v3883_v15 = vcombine.high %v1023_v12, %v1027_v13  ;;  %v3882_v17 = vcombine.low %v1023_v12, %v1027_v13 }
 0x12c   :  { %2535 = vmatprep.subr.bf16.mxu1 %v3803_v29  ;;  %2588 = vmatprep.subr.bf16.mxu0 %v3931_v30  ;;  %v1155_v16 = vld [vmem:[%s5838_s5 + $0x6a0] sm:$0xff] }
 0x12d   :  { %v4010_v18 = vcombine.low %v1151_v14, %v1155_v16  ;;  %v4011_v19 = vcombine.high %v1151_v14, %v1155_v16  ;;  %v1015_v20 = vld [vmem:[%s5838_s5 + $0x240] sm:$0xff] }
 0x12e   :  { %v1019_v21 = vld [vmem:[%s5838_s5 + $0x260] sm:$0xff] }
 0x12f   :  { %2536 = vmatpush1.bf16.msra.mxu1 %v3802_v35  ;;  %2589 = vmatpush1.bf16.msra.mxu0 %v3930_v36  ;;  %v1143_v22 = vld [vmem:[%s5838_s5 + $0x640] sm:$0xff]  ;;  %v3875_v23 = vcombine.high %v1015_v20, %v1019_v21  ;;  %v3874_v25 = vcombine.low %v1015_v20, %v1019_v21  ;;  %v4851_v36 = vld [vmem:[%s5838_s5 + $0x1c8] sm:$0xff] }
 0x130   :  { %2537 = vmatprep.subr.bf16.mxu1 %v3923_v37  ;;  %2590 = vmatprep.subr.bf16.mxu0 %v4051_v38  ;;  %v1147_v24 = vld [vmem:[%s5838_s5 + $0x660] sm:$0xff]  ;;  %v4856_v37 = vld [vmem:[%s5838_s5 + $0x1e8] sm:$0xff] }
 0x131   :  { %v4002_v26 = vcombine.low %v1143_v22, %v1147_v24  ;;  %v4003_v27 = vcombine.high %v1143_v22, %v1147_v24  ;;  %v1007_v28 = vld [vmem:[%s5838_s5 + $0x200] sm:$0xff]  ;;  %v4861_v38 = vld [vmem:[%s5838_s5 + $0x5c8] sm:$0xff]  ;;  %v3861_v39 = vcombine.high %v4851_v36, %v4856_v37  ;;  %v3860_v41 = vcombine.low %v4851_v36, %v4856_v37 }
 0x132   :  { %v1011_v29 = vld [vmem:[%s5838_s5 + $0x220] sm:$0xff]  ;;  %v3988_v42 = vcombine.low %v4861_v38, %v4868_v40  ;;  %v980_v37 = vld [vmem:[%s5838_s5 + $0x128] sm:$0xff] }
 0x133   :  { %2538 = vmatpush2.bf16.msra.mxu1 %v3922_v47  ;;  %2591 = vmatpush2.bf16.msra.mxu0 %v4050_v50  ;;  %v1135_v30 = vld [vmem:[%s5838_s5 + $0x600] sm:$0xff]  ;;  %v3867_v31 = vcombine.high %v1007_v28, %v1011_v29  ;;  %v3866_v33 = vcombine.low %v1007_v28, %v1011_v29  ;;  %v3989_v47 = vcombine.high %v4861_v38, %v4868_v40  ;;  %v487_v50 = vsub.s32 3, %v4649_v54  ;;  %v1104_v38 = vld [vmem:[%s5838_s5 + $0x508] sm:$0xff] }
 0x134   :  { %2539 = vmatprep.subr.bf16.mxu1 %v3915_v51  ;;  %2592 = vmatprep.subr.bf16.mxu0 %v4043_v52  ;;  %v1139_v32 = vld [vmem:[%s5838_s5 + $0x620] sm:$0xff]  ;;  %v5843_v51 = vsub.s32 2, %v4649_v54  ;;  %v1108_v40 = vld [vmem:[%s5838_s5 + $0x528] sm:$0xff] }
 0x135   :  { %v3994_v34 = vcombine.low %v1135_v30, %v1139_v32  ;;  %v3995_v35 = vcombine.high %v1135_v30, %v1139_v32  ;;  %v471_v52 = vld [vmem:[%s5840_s4] sm:$0xf] }
 0x136   :  { %v4882_v58 = vrot.slane %v471_v52, %v4652_v55  ;;  %v4886_v59 = vrot.slane %v471_v52, %v487_v50 }
 0x137   :  { %2540 = vmatpush2.bf16.msra.mxu1 %v3914_v60  ;;  %2593 = vmatpush2.bf16.msra.mxu0 %v4042_v43  ;;  %v476_v60 = vrot.slane %v471_v52, %v4655_v56  ;;  %v484_v43 = vrot.slane %v471_v52, %v5843_v51 }
 0x138   :  { %2541 = vmatprep.subr.bf16.mxu1 %v3907_v44  ;;  %2594 = vmatprep.subr.bf16.mxu0 %v4035_v45 }
 0x13b   :  { %2542 = vmatpush2.bf16.msra.mxu1 %v3906_v62  ;;  %2595 = vmatpush2.bf16.msra.mxu0 %v4034_v63 }
 0x13c   :  { %2543 = vmatprep.subr.bf16.mxu1 %v3899_v0  ;;  %2596 = vmatprep.subr.bf16.mxu0 %v4027_v1  ;;  %v4896_v0 = vld [vmem:[%s5838_s5 + $0x188] sm:$0xff] }
 0x13d   :  { %v4901_v1 = vld [vmem:[%s5838_s5 + $0x1a8] sm:$0xff] }
 0x13e   :  { %v3853_v12 = vcombine.high %v4896_v0, %v4901_v1 }
 0x13f   :  { %2544 = vmatpush2.bf16.msra.mxu1 %v3898_v6  ;;  %2597 = vmatpush2.bf16.msra.mxu0 %v4026_v7 }
 0x140   :  { %2545 = vmatprep.subr.bf16.mxu1 %v3891_v8  ;;  %2598 = vmatprep.subr.bf16.mxu0 %v4019_v9 }
 0x143   :  { %2546 = vmatpush2.bf16.msra.mxu1 %v3890_v10  ;;  %2599 = vmatpush2.bf16.msra.mxu0 %v4018_v11 }
 0x144   :  { %2547 = vmatprep.subr.bf16.mxu1 %v3883_v15  ;;  %2600 = vmatprep.subr.bf16.mxu0 %v4011_v19 }
 0x147   :  { %2548 = vmatpush2.bf16.msra.mxu1 %v3882_v17  ;;  %2601 = vmatpush2.bf16.msra.mxu0 %v4010_v18  ;;  %v1120_v17 = vld [vmem:[%s5838_s5 + $0x588] sm:$0xff] }
 0x148   :  { %2549 = vmatprep.subr.bf16.mxu1 %v3875_v23  ;;  %2602 = vmatprep.subr.bf16.mxu0 %v4003_v27  ;;  %v1124_v18 = vld [vmem:[%s5838_s5 + $0x5a8] sm:$0xff] }
 0x149   :  { %v3980_v52 = vcombine.low %v1120_v17, %v1124_v18 }
 0x14b   :  { %2550 = vmatpush2.bf16.msra.mxu1 %v3874_v25  ;;  %2603 = vmatpush2.bf16.msra.mxu0 %v4002_v26 }
 0x14c   :  { %2551 = vmatprep.subr.bf16.mxu1 %v3867_v31  ;;  %2604 = vmatprep.subr.bf16.mxu0 %v3995_v35  ;;  %v984_v35 = vld [vmem:[%s5838_s5 + $0x148] sm:$0xff] }
 0x14f   :  { %2552 = vmatpush2.bf16.msra.mxu1 %v3866_v33  ;;  %2605 = vmatpush2.bf16.msra.mxu0 %v3994_v34  ;;  %v3852_v33 = vcombine.low %v4896_v0, %v4901_v1  ;;  %v3981_v34 = vcombine.high %v1120_v17, %v1124_v18  ;;  %v960_v17 = vld [vmem:[%s5838_s5 + $0x88] sm:$0xff] }
 0x150   :  { %2627 = vmatprep.subr.bf16.mxu1 %v3861_v39  ;;  %2680 = vmatprep.subr.bf16.mxu0 %v3989_v47  ;;  %v964_v18 = vld [vmem:[%s5838_s5 + $0xa8] sm:$0xff] }
 0x1d2   :  { %v847_v53 = vpop.f32.mrf.mxu1  ;;  %v900_v57 = vpop.f32.mrf.mxu0 }
 0x1d3   :  { %v848_v2 = vadd.f32 %v847_v53, %v476_v60  ;;  %v901_v3 = vadd.f32 %v900_v57, %v484_v43  ;;  %v988_v53 = vld [vmem:[%s5838_s5 + $0x168] sm:$0xff] }
 0x1d4   :  { %v849_v44 = vpop.f32.mrf.mxu1  ;;  %v902_v45 = vpop.f32.mrf.mxu0  ;;  %v1112_v57 = vld [vmem:[%s5838_s5 + $0x548] sm:$0xff]  ;;  %v3845_v1 = vcombine.high %v984_v35, %v988_v53  ;;  %v3844_v36 = vcombine.low %v984_v35, %v988_v53 }
 0x1d5   :  { %v850_v49 = vadd.f32 %v849_v44, %v4882_v58  ;;  %v903_v61 = vadd.f32 %v902_v45, %v4886_v59  ;;  %v919_v19 = vmax.f32 %v848_v2, 0.0  ;;  %v921_v20 = vmax.f32 %v901_v3, 0.0  ;;  %v1116_v44 = vld [vmem:[%s5838_s5 + $0x568] sm:$0xff] }
 0x1d6   :  { %v851_v46 = vpop.f32.mrf.mxu1  ;;  %v904_v48 = vpop.f32.mrf.mxu0  ;;  %v3973_v2 = vcombine.high %v1112_v57, %v1116_v44  ;;  %v1072_v53 = vld [vmem:[%s5838_s5 + $0x408] sm:$0xff] }
 0x1d7   :  { %v852_v62 = vadd.f32 %v851_v46, %v476_v60  ;;  %v905_v63 = vadd.f32 %v904_v48, %v484_v43  ;;  %v920_v13 = vmax.f32 %v850_v49, 0.0  ;;  %v922_v14 = vmax.f32 %v903_v61, 0.0 }
 0x1d8   :  { %v853_v4 = vpop.f32.mrf.mxu1  ;;  %v906_v5 = vpop.f32.mrf.mxu0 }
 0x1d9   :  { %v854_v6 = vadd.f32 %v853_v4, %v4882_v58  ;;  %v907_v7 = vadd.f32 %v906_v5, %v4886_v59  ;;  %v923_v8 = vmax.f32 %v852_v62, 0.0  ;;  %v925_v9 = vmax.f32 %v905_v63, 0.0 }
 0x1da   :  { %v857_v10 = vpop.f32.mrf.mxu1  ;;  %v910_v11 = vpop.f32.mrf.mxu0 }
 0x1db   :  { %v924_v15 = vmax.f32 %v854_v6, 0.0  ;;  %v926_v16 = vmax.f32 %v907_v7, 0.0  ;;  %v858_v21 = vadd.f32 %v857_v10, %v476_v60  ;;  %v911_v22 = vadd.f32 %v910_v11, %v484_v43  ;;  %v968_v7 = vld [vmem:[%s5838_s5 + $0xc8] sm:$0xff] }
 0x1dc   :  { %v859_v23 = vpop.f32.mrf.mxu1  ;;  %v912_v24 = vpop.f32.mrf.mxu0  ;;  %v4919_v29 = vpack.c.bf16 %v923_v8, %v919_v19  ;;  %v4921_v30 = vpack.c.bf16 %v925_v9, %v921_v20  ;;  %v3972_v6 = vcombine.low %v1112_v57, %v1116_v44  ;;  %v3965_v9 = vcombine.high %v1104_v38, %v1108_v40  ;;  %v972_v10 = vld [vmem:[%s5838_s5 + $0xe8] sm:$0xff] }
 0x1dd   :  { %v4913_v25 = vpack.c.bf16 %v924_v15, %v920_v13  ;;  %v4915_v26 = vpack.c.bf16 %v926_v16, %v922_v14  ;;  %v860_v27 = vadd.f32 %v859_v23, %v4882_v58  ;;  %v913_v28 = vadd.f32 %v912_v24, %v4886_v59  ;;  %v1096_v11 = vld [vmem:[%s5838_s5 + $0x4c8] sm:$0xff] }
 0x1de   :  { %v861_v31 = vpop.f32.mrf.mxu1  ;;  %v914_v32 = vpop.f32.mrf.mxu0  ;;  %v927_v45 = vmax.f32 %v858_v21, 0.0  ;;  %v3964_v14 = vcombine.low %v1104_v38, %v1108_v40  ;;  %v3829_v15 = vcombine.high %v968_v7, %v972_v10  ;;  %v1088_v19 = vld [vmem:[%s5838_s5 + $0x488] sm:$0xff]  ;;  %v3828_v21 = vcombine.low %v968_v7, %v972_v10 }
 0x1df   :  { %v862_v39 = vadd.f32 %v861_v31, %v476_v60  ;;  %v915_v47 = vadd.f32 %v914_v32, %v484_v43  ;;  %2553 = vmatprep.mubr.bf16.mxu1 %v4913_v25  ;;  %2606 = vmatprep.mubr.bf16.mxu0 %v4915_v26  ;;  %v929_v60 = vmax.f32 %v911_v22, 0.0  ;;  %v928_v43 = vmax.f32 %v860_v27, 0.0  ;;  %v1092_v20 = vld [vmem:[%s5838_s5 + $0x4a8] sm:$0xff] }
 0x1e0   :  { %v930_v46 = vmax.f32 %v913_v28, 0.0  ;;  %v863_v48 = vpop.f32.mrf.mxu1  ;;  %v916_v49 = vpop.f32.mrf.mxu0  ;;  %2554 = vmatmul.mubr.bf16.vlgmr.msra.gmra.mxu1 %v4919_v29  ;;  %2607 = vmatmul.mubr.bf16.vlgmr.msra.gmra.mxu0 %v4921_v30  ;;  %v3821_v23 = vcombine.high %v960_v17, %v964_v18  ;;  %v3949_v24 = vcombine.high %v1088_v19, %v1092_v20  ;;  %v952_v27 = vld [vmem:[%s5838_s5 + $0x48] sm:$0xff] }
 0x1e1   :  { %v931_v61 = vmax.f32 %v862_v39, 0.0  ;;  %v933_v62 = vmax.f32 %v915_v47, 0.0  ;;  %v864_v63 = vadd.f32 %v863_v48, %v4882_v58  ;;  %v917_v0 = vadd.f32 %v916_v49, %v4886_v59  ;;  %2628 = vmatpush1.bf16.msra.mxu1 %v3860_v41  ;;  %2681 = vmatpush1.bf16.msra.mxu0 %v3988_v42  ;;  %v976_v58 = vld [vmem:[%s5838_s5 + $0x108] sm:$0xff] }
 0x1e2   :  { %2629 = vmatprep.subr.bf16.mxu1 %v3853_v12  ;;  %2682 = vmatprep.subr.bf16.mxu0 %v3981_v34  ;;  %v3837_v8 = vcombine.high %v976_v58, %v980_v37  ;;  %v1100_v12 = vld [vmem:[%s5838_s5 + $0x4e8] sm:$0xff]  ;;  %v3836_v13 = vcombine.low %v976_v58, %v980_v37  ;;  %v3948_v34 = vcombine.low %v1088_v19, %v1092_v20 }
 0x1e3   :  { %v932_v3 = vmax.f32 %v864_v63, 0.0  ;;  %v934_v4 = vmax.f32 %v917_v0, 0.0  ;;  %v4952_v5 = vpack.c.bf16 %v931_v61, %v927_v45  ;;  %v4954_v59 = vpack.c.bf16 %v933_v62, %v929_v60  ;;  %v956_v28 = vld [vmem:[%s5838_s5 + $0x68] sm:$0xff] }
 0x1e4   :  { %v3957_v16 = vcombine.high %v1096_v11, %v1100_v12  ;;  %v3956_v22 = vcombine.low %v1096_v11, %v1100_v12  ;;  %v1080_v31 = vld [vmem:[%s5838_s5 + $0x448] sm:$0xff]  ;;  %v3813_v35 = vcombine.high %v952_v27, %v956_v28  ;;  %v3812_v44 = vcombine.low %v952_v27, %v956_v28 }
 0x1e5   :  { %v4965_v41 = vpack.c.bf16 %v932_v3, %v928_v43  ;;  %v4967_v42 = vpack.c.bf16 %v934_v4, %v930_v46  ;;  %2630 = vmatpush1.bf16.msra.mxu1 %v3852_v33  ;;  %2683 = vmatpush1.bf16.msra.mxu0 %v3980_v52  ;;  %v1084_v32 = vld [vmem:[%s5838_s5 + $0x468] sm:$0xff]  ;;  %v3820_v33 = vcombine.low %v960_v17, %v964_v18 }
 0x1e6   :  { %2631 = vmatprep.subr.bf16.mxu1 %v3845_v1  ;;  %2684 = vmatprep.subr.bf16.mxu0 %v3973_v2  ;;  %v3941_v39 = vcombine.high %v1080_v31, %v1084_v32  ;;  %v944_v47 = vld [vmem:[%s5838_s5 + $0x8] sm:$0xff]  ;;  %v3940_v45 = vcombine.low %v1080_v31, %v1084_v32 }
 0x1e7   :  { %2563 = vmatprep.mubr.bf16.mxu1 %v4965_v41  ;;  %2616 = vmatprep.mubr.bf16.mxu0 %v4967_v42  ;;  %v948_v52 = vld [vmem:[%s5838_s5 + $0x28] sm:$0xff] }
 0x1e8   :  { %2564 = vmatmul.mubr.bf16.gmra.mxu1 %v4952_v5  ;;  %2617 = vmatmul.mubr.bf16.gmra.mxu0 %v4954_v59  ;;  %v1076_v57 = vld [vmem:[%s5838_s5 + $0x428] sm:$0xff]  ;;  %v3805_v60 = vcombine.high %v944_v47, %v948_v52  ;;  %v3804_v62 = vcombine.low %v944_v47, %v948_v52 }
 0x1e9   :  { %2632 = vmatpush1.bf16.msra.mxu1 %v3844_v36  ;;  %2685 = vmatpush1.bf16.msra.mxu0 %v3972_v6  ;;  %v3933_v43 = vcombine.high %v1072_v53, %v1076_v57  ;;  %v1064_v46 = vld [vmem:[%s5838_s5 + $0x3c8] sm:$0xff]  ;;  %v3932_v63 = vcombine.low %v1072_v53, %v1076_v57 }
 0x1ea   :  { %2659 = vmatprep.mubr.bf16.mxu1 %v4913_v25  ;;  %2712 = vmatprep.mubr.bf16.mxu0 %v4915_v26  ;;  %v1068_v48 = vld [vmem:[%s5838_s5 + $0x3e8] sm:$0xff] }
 0x1eb   :  { %2633 = vmatprep.subr.bf16.mxu1 %v3837_v8  ;;  %2686 = vmatprep.subr.bf16.mxu0 %v3965_v9  ;;  %v1192_v49 = vld [vmem:[%s5838_s5 + $0x7c8] sm:$0xff]  ;;  %v3925_v0 = vcombine.high %v1064_v46, %v1068_v48  ;;  %v3924_v36 = vcombine.low %v1064_v46, %v1068_v48 }
 0x1ec   :  { %v1196_v61 = vld [vmem:[%s5838_s5 + $0x7e8] sm:$0xff] }
 0x1ed   :  { %2634 = vmatpush1.bf16.msra.mxu1 %v3836_v13  ;;  %2687 = vmatpush1.bf16.msra.mxu0 %v3964_v14  ;;  %v4053_v1 = vcombine.high %v1192_v49, %v1196_v61  ;;  %v1056_v2 = vld [vmem:[%s5838_s5 + $0x388] sm:$0xff]  ;;  %v4052_v37 = vcombine.low %v1192_v49, %v1196_v61 }
 0x1ee   :  { %2635 = vmatprep.subr.bf16.mxu1 %v3829_v15  ;;  %2688 = vmatprep.subr.bf16.mxu0 %v3957_v16  ;;  %v1060_v3 = vld [vmem:[%s5838_s5 + $0x3a8] sm:$0xff] }
 0x1ef   :  { %v1184_v4 = vld [vmem:[%s5838_s5 + $0x788] sm:$0xff]  ;;  %v3917_v38 = vcombine.high %v1056_v2, %v1060_v3  ;;  %v3916_v10 = vcombine.low %v1056_v2, %v1060_v3 }
 0x1f0   :  { %v1188_v58 = vld [vmem:[%s5838_s5 + $0x7a8] sm:$0xff] }
 0x1f1   :  { %2636 = vmatpush1.bf16.msra.mxu1 %v3828_v21  ;;  %2689 = vmatpush1.bf16.msra.mxu0 %v3956_v22  ;;  %v4045_v40 = vcombine.high %v1184_v4, %v1188_v58  ;;  %v1048_v6 = vld [vmem:[%s5838_s5 + $0x348] sm:$0xff]  ;;  %v4044_v11 = vcombine.low %v1184_v4, %v1188_v58 }
 0x1f2   :  { %2637 = vmatprep.subr.bf16.mxu1 %v3821_v23  ;;  %2690 = vmatprep.subr.bf16.mxu0 %v3949_v24  ;;  %v1052_v7 = vld [vmem:[%s5838_s5 + $0x368] sm:$0xff] }
 0x1f3   :  { %v1176_v8 = vld [vmem:[%s5838_s5 + $0x748] sm:$0xff]  ;;  %v3909_v12 = vcombine.high %v1048_v6, %v1052_v7  ;;  %v3908_v18 = vcombine.low %v1048_v6, %v1052_v7  ;;  %v1133_v6 = vld [vmem:[%s5838_s5 + $0x5f0] sm:$0xff] }
 0x1f4   :  { %v1180_v9 = vld [vmem:[%s5838_s5 + $0x768] sm:$0xff] }
 0x1f5   :  { %2638 = vmatpush1.bf16.msra.mxu1 %v3820_v33  ;;  %2691 = vmatpush1.bf16.msra.mxu0 %v3948_v34  ;;  %v4037_v13 = vcombine.high %v1176_v8, %v1180_v9  ;;  %v1040_v14 = vld [vmem:[%s5838_s5 + $0x308] sm:$0xff]  ;;  %v4036_v19 = vcombine.low %v1176_v8, %v1180_v9 }
 0x1f6   :  { %2639 = vmatprep.subr.bf16.mxu1 %v3813_v35  ;;  %2692 = vmatprep.subr.bf16.mxu0 %v3941_v39  ;;  %v1044_v15 = vld [vmem:[%s5838_s5 + $0x328] sm:$0xff] }
 0x1f7   :  { %v1168_v16 = vld [vmem:[%s5838_s5 + $0x708] sm:$0xff]  ;;  %v3901_v20 = vcombine.high %v1040_v14, %v1044_v15  ;;  %v3900_v28 = vcombine.low %v1040_v14, %v1044_v15  ;;  %v1125_v14 = vld [vmem:[%s5838_s5 + $0x5b0] sm:$0xff] }
 0x1f8   :  { %v1172_v17 = vld [vmem:[%s5838_s5 + $0x728] sm:$0xff] }
 0x1f9   :  { %2640 = vmatpush1.bf16.msra.mxu1 %v3812_v44  ;;  %2693 = vmatpush1.bf16.msra.mxu0 %v3940_v45  ;;  %v4029_v21 = vcombine.high %v1168_v16, %v1172_v17  ;;  %v1032_v22 = vld [vmem:[%s5838_s5 + $0x2c8] sm:$0xff]  ;;  %v4028_v31 = vcombine.low %v1168_v16, %v1172_v17 }
 0x1fa   :  { %2641 = vmatprep.subr.bf16.mxu1 %v3805_v60  ;;  %2694 = vmatprep.subr.bf16.mxu0 %v3933_v43  ;;  %v1036_v23 = vld [vmem:[%s5838_s5 + $0x2e8] sm:$0xff] }
 0x1fb   :  { %v1160_v24 = vld [vmem:[%s5838_s5 + $0x6c8] sm:$0xff]  ;;  %v3893_v32 = vcombine.high %v1032_v22, %v1036_v23  ;;  %v3892_v52 = vcombine.low %v1032_v22, %v1036_v23  ;;  %v1117_v22 = vld [vmem:[%s5838_s5 + $0x570] sm:$0xff] }
 0x1fc   :  { %v1164_v27 = vld [vmem:[%s5838_s5 + $0x6e8] sm:$0xff] }
 0x1fd   :  { %2642 = vmatpush1.bf16.msra.mxu1 %v3804_v62  ;;  %2695 = vmatpush1.bf16.msra.mxu0 %v3932_v63  ;;  %v4021_v33 = vcombine.high %v1160_v24, %v1164_v27  ;;  %v1024_v34 = vld [vmem:[%s5838_s5 + $0x288] sm:$0xff]  ;;  %v4020_v53 = vcombine.low %v1160_v24, %v1164_v27 }
 0x1fe   :  { %2643 = vmatprep.subr.bf16.mxu1 %v3925_v0  ;;  %2696 = vmatprep.subr.bf16.mxu0 %v4053_v1  ;;  %v1028_v35 = vld [vmem:[%s5838_s5 + $0x2a8] sm:$0xff] }
 0x1ff   :  { %v1152_v39 = vld [vmem:[%s5838_s5 + $0x688] sm:$0xff]  ;;  %v3885_v57 = vcombine.high %v1024_v34, %v1028_v35  ;;  %v3884_v48 = vcombine.low %v1024_v34, %v1028_v35  ;;  %v1109_v34 = vld [vmem:[%s5838_s5 + $0x530] sm:$0xff] }
 0x200   :  { %v1156_v47 = vld [vmem:[%s5838_s5 + $0x6a8] sm:$0xff] }
 0x201   :  { %2644 = vmatpush2.bf16.msra.mxu1 %v3924_v36  ;;  %2697 = vmatpush2.bf16.msra.mxu0 %v4052_v37  ;;  %v4013_v44 = vcombine.high %v1152_v39, %v1156_v47  ;;  %v1016_v45 = vld [vmem:[%s5838_s5 + $0x248] sm:$0xff]  ;;  %v4012_v49 = vcombine.low %v1152_v39, %v1156_v47  ;;  %v1001_v37 = vld [vmem:[%s5838_s5 + $0x1d0] sm:$0xff] }
 0x202   :  { %2645 = vmatprep.subr.bf16.mxu1 %v3917_v38  ;;  %2698 = vmatprep.subr.bf16.mxu0 %v4045_v40  ;;  %v1020_v60 = vld [vmem:[%s5838_s5 + $0x268] sm:$0xff]  ;;  %v1005_v38 = vld [vmem:[%s5838_s5 + $0x1f0] sm:$0xff] }
 0x203   :  { %v1144_v43 = vld [vmem:[%s5838_s5 + $0x648] sm:$0xff]  ;;  %v3877_v61 = vcombine.high %v1016_v45, %v1020_v60  ;;  %v3876_v3 = vcombine.low %v1016_v45, %v1020_v60  ;;  %v1129_v40 = vld [vmem:[%s5838_s5 + $0x5d0] sm:$0xff]  ;;  %v3863_v9 = vcombine.high %v1001_v37, %v1005_v38  ;;  %v3862_v15 = vcombine.low %v1001_v37, %v1005_v38 }
 0x204   :  { %v1148_v46 = vld [vmem:[%s5838_s5 + $0x668] sm:$0xff]  ;;  %v3990_v16 = vcombine.low %v1129_v40, %v1133_v6  ;;  %v1101_v45 = vld [vmem:[%s5838_s5 + $0x4f0] sm:$0xff] }
 0x205   :  { %2646 = vmatpush2.bf16.msra.mxu1 %v3916_v10  ;;  %2699 = vmatpush2.bf16.msra.mxu0 %v4044_v11  ;;  %v4005_v62 = vcombine.high %v1144_v43, %v1148_v46  ;;  %v1008_v63 = vld [vmem:[%s5838_s5 + $0x208] sm:$0xff]  ;;  %v4004_v4 = vcombine.low %v1144_v43, %v1148_v46  ;;  %v3991_v10 = vcombine.high %v1129_v40, %v1133_v6  ;;  %v993_v11 = vld [vmem:[%s5838_s5 + $0x190] sm:$0xff] }
 0x206   :  { %2647 = vmatprep.subr.bf16.mxu1 %v3909_v12  ;;  %2700 = vmatprep.subr.bf16.mxu0 %v4037_v13  ;;  %v1012_v0 = vld [vmem:[%s5838_s5 + $0x228] sm:$0xff]  ;;  %v997_v12 = vld [vmem:[%s5838_s5 + $0x1b0] sm:$0xff] }
 0x207   :  { %v1136_v1 = vld [vmem:[%s5838_s5 + $0x608] sm:$0xff]  ;;  %v3869_v58 = vcombine.high %v1008_v63, %v1012_v0  ;;  %v3868_v7 = vcombine.low %v1008_v63, %v1012_v0  ;;  %v1121_v13 = vld [vmem:[%s5838_s5 + $0x590] sm:$0xff]  ;;  %v3855_v17 = vcombine.high %v993_v11, %v997_v12  ;;  %v3854_v23 = vcombine.low %v993_v11, %v997_v12 }
 0x208   :  { %v1140_v2 = vld [vmem:[%s5838_s5 + $0x628] sm:$0xff]  ;;  %v3982_v24 = vcombine.low %v1121_v13, %v1125_v14  ;;  %v1093_v63 = vld [vmem:[%s5838_s5 + $0x4b0] sm:$0xff] }
 0x209   :  { %2648 = vmatpush2.bf16.msra.mxu1 %v3908_v18  ;;  %2701 = vmatpush2.bf16.msra.mxu0 %v4036_v19  ;;  %v3997_v36 = vcombine.high %v1136_v1, %v1140_v2  ;;  %v3996_v8 = vcombine.low %v1136_v1, %v1140_v2  ;;  %v3983_v18 = vcombine.high %v1121_v13, %v1125_v14  ;;  %v985_v19 = vld [vmem:[%s5838_s5 + $0x150] sm:$0xff] }
 0x20a   :  { %2649 = vmatprep.subr.bf16.mxu1 %v3901_v20  ;;  %2702 = vmatprep.subr.bf16.mxu0 %v4029_v21  ;;  %v989_v20 = vld [vmem:[%s5838_s5 + $0x170] sm:$0xff] }
 0x20b   :  { %v1113_v21 = vld [vmem:[%s5838_s5 + $0x550] sm:$0xff]  ;;  %v3847_v27 = vcombine.high %v985_v19, %v989_v20  ;;  %v3846_v35 = vcombine.low %v985_v19, %v989_v20 }
 0x20c   :  { %v3974_v39 = vcombine.low %v1113_v21, %v1117_v22  ;;  %v1085_v37 = vld [vmem:[%s5838_s5 + $0x470] sm:$0xff] }
 0x20d   :  { %2650 = vmatpush2.bf16.msra.mxu1 %v3900_v28  ;;  %2703 = vmatpush2.bf16.msra.mxu0 %v4028_v31  ;;  %v3975_v28 = vcombine.high %v1113_v21, %v1117_v22  ;;  %v977_v31 = vld [vmem:[%s5838_s5 + $0x110] sm:$0xff] }
 0x20e   :  { %2651 = vmatprep.subr.bf16.mxu1 %v3893_v32  ;;  %2704 = vmatprep.subr.bf16.mxu0 %v4021_v33  ;;  %v981_v32 = vld [vmem:[%s5838_s5 + $0x130] sm:$0xff] }
 0x20f   :  { %v1105_v33 = vld [vmem:[%s5838_s5 + $0x510] sm:$0xff]  ;;  %v3839_v47 = vcombine.high %v977_v31, %v981_v32  ;;  %v3838_v60 = vcombine.low %v977_v31, %v981_v32 }
 0x210   :  { %v3966_v43 = vcombine.low %v1105_v33, %v1109_v34  ;;  %v1077_v11 = vld [vmem:[%s5838_s5 + $0x430] sm:$0xff] }
 0x211   :  { %2652 = vmatpush2.bf16.msra.mxu1 %v3892_v52  ;;  %2705 = vmatpush2.bf16.msra.mxu0 %v4020_v53  ;;  %v3967_v52 = vcombine.high %v1105_v33, %v1109_v34  ;;  %v969_v53 = vld [vmem:[%s5838_s5 + $0xd0] sm:$0xff] }
 0x212   :  { %2653 = vmatprep.subr.bf16.mxu1 %v3885_v57  ;;  %2706 = vmatprep.subr.bf16.mxu0 %v4013_v44  ;;  %v973_v57 = vld [vmem:[%s5838_s5 + $0xf0] sm:$0xff] }
 0x213   :  { %v1097_v44 = vld [vmem:[%s5838_s5 + $0x4d0] sm:$0xff]  ;;  %v3831_v46 = vcombine.high %v969_v53, %v973_v57  ;;  %v3830_v0 = vcombine.low %v969_v53, %v973_v57 }
 0x214   :  { %v3958_v1 = vcombine.low %v1097_v44, %v1101_v45  ;;  %v1197_v19 = vld [vmem:[%s5838_s5 + $0x7f0] sm:$0xff] }
 0x215   :  { %2654 = vmatpush2.bf16.msra.mxu1 %v3884_v48  ;;  %2707 = vmatpush2.bf16.msra.mxu0 %v4012_v49  ;;  %v3959_v48 = vcombine.high %v1097_v44, %v1101_v45  ;;  %v961_v49 = vld [vmem:[%s5838_s5 + $0x90] sm:$0xff] }
 0x216   :  { %2655 = vmatprep.subr.bf16.mxu1 %v3877_v61  ;;  %2708 = vmatprep.subr.bf16.mxu0 %v4005_v62  ;;  %v965_v61 = vld [vmem:[%s5838_s5 + $0xb0] sm:$0xff] }
 0x217   :  { %v1089_v62 = vld [vmem:[%s5838_s5 + $0x490] sm:$0xff]  ;;  %v3823_v2 = vcombine.high %v961_v49, %v965_v61  ;;  %v3822_v38 = vcombine.low %v961_v49, %v965_v61 }
 0x218   :  { %v3950_v40 = vcombine.low %v1089_v62, %v1093_v63  ;;  %v1189_v31 = vld [vmem:[%s5838_s5 + $0x7b0] sm:$0xff] }
 0x219   :  { %2656 = vmatpush2.bf16.msra.mxu1 %v3876_v3  ;;  %2709 = vmatpush2.bf16.msra.mxu0 %v4004_v4  ;;  %v3951_v3 = vcombine.high %v1089_v62, %v1093_v63  ;;  %v953_v4 = vld [vmem:[%s5838_s5 + $0x50] sm:$0xff] }
 0x21a   :  { %2657 = vmatprep.subr.bf16.mxu1 %v3869_v58  ;;  %2710 = vmatprep.subr.bf16.mxu0 %v3997_v36  ;;  %v957_v58 = vld [vmem:[%s5838_s5 + $0x70] sm:$0xff] }
 0x21b   :  { %v1081_v36 = vld [vmem:[%s5838_s5 + $0x450] sm:$0xff]  ;;  %v3815_v6 = vcombine.high %v953_v4, %v957_v58  ;;  %v3814_v12 = vcombine.low %v953_v4, %v957_v58 }
 0x21c   :  { %v3942_v13 = vcombine.low %v1081_v36, %v1085_v37  ;;  %v1181_v53 = vld [vmem:[%s5838_s5 + $0x770] sm:$0xff] }
 0x21d   :  { %2658 = vmatpush2.bf16.msra.mxu1 %v3868_v7  ;;  %2711 = vmatpush2.bf16.msra.mxu0 %v3996_v8  ;;  %v3943_v7 = vcombine.high %v1081_v36, %v1085_v37  ;;  %v945_v8 = vld [vmem:[%s5838_s5 + $0x10] sm:$0xff] }
 0x21e   :  { %2733 = vmatprep.subr.bf16.mxu1 %v3863_v9  ;;  %2786 = vmatprep.subr.bf16.mxu0 %v3991_v10  ;;  %v949_v9 = vld [vmem:[%s5838_s5 + $0x30] sm:$0xff] }
 0x21f   :  { %v1073_v10 = vld [vmem:[%s5838_s5 + $0x410] sm:$0xff]  ;;  %v3807_v14 = vcombine.high %v945_v8, %v949_v9  ;;  %v3806_v20 = vcombine.low %v945_v8, %v949_v9 }
 0x220   :  { %2660 = vmatmul.mubr.bf16.vlgmr.msra.gmra.mxu1 %v4919_v29  ;;  %2713 = vmatmul.mubr.bf16.vlgmr.msra.gmra.mxu0 %v4921_v30  ;;  %v3934_v21 = vcombine.low %v1073_v10, %v1077_v11  ;;  %v1173_v49 = vld [vmem:[%s5838_s5 + $0x730] sm:$0xff] }
 0x221   :  { %2669 = vmatprep.mubr.bf16.mxu1 %v4965_v41  ;;  %2722 = vmatprep.mubr.bf16.mxu0 %v4967_v42  ;;  %v1165_v4 = vld [vmem:[%s5838_s5 + $0x6f0] sm:$0xff] }
 0x222   :  { %2734 = vmatpush1.bf16.msra.mxu1 %v3862_v15  ;;  %2787 = vmatpush1.bf16.msra.mxu0 %v3990_v16  ;;  %v3935_v15 = vcombine.high %v1073_v10, %v1077_v11  ;;  %v1065_v16 = vld [vmem:[%s5838_s5 + $0x3d0] sm:$0xff] }
 0x223   :  { %2735 = vmatprep.subr.bf16.mxu1 %v3855_v17  ;;  %2788 = vmatprep.subr.bf16.mxu0 %v3983_v18  ;;  %v1069_v17 = vld [vmem:[%s5838_s5 + $0x3f0] sm:$0xff] }
 0x224   :  { %v1193_v18 = vld [vmem:[%s5838_s5 + $0x7d0] sm:$0xff]  ;;  %v3927_v22 = vcombine.high %v1065_v16, %v1069_v17  ;;  %v3926_v32 = vcombine.low %v1065_v16, %v1069_v17 }
 0x225   :  { %v4054_v33 = vcombine.low %v1193_v18, %v1197_v19  ;;  %v1157_v8 = vld [vmem:[%s5838_s5 + $0x6b0] sm:$0xff] }
 0x226   :  { %2736 = vmatpush1.bf16.msra.mxu1 %v3854_v23  ;;  %2789 = vmatpush1.bf16.msra.mxu0 %v3982_v24  ;;  %v4055_v23 = vcombine.high %v1193_v18, %v1197_v19  ;;  %v1057_v24 = vld [vmem:[%s5838_s5 + $0x390] sm:$0xff] }
 0x227   :  { %2737 = vmatprep.subr.bf16.mxu1 %v3847_v27  ;;  %2790 = vmatprep.subr.bf16.mxu0 %v3975_v28  ;;  %v1061_v27 = vld [vmem:[%s5838_s5 + $0x3b0] sm:$0xff] }
 0x228   :  { %2670 = vmatmul.mubr.bf16.gmra.mxu1 %v4952_v5  ;;  %2723 = vmatmul.mubr.bf16.gmra.mxu0 %v4954_v59  ;;  %v1185_v28 = vld [vmem:[%s5838_s5 + $0x790] sm:$0xff]  ;;  %v3919_v34 = vcombine.high %v1057_v24, %v1061_v27  ;;  %v3918_v57 = vcombine.low %v1057_v24, %v1061_v27 }
 0x229   :  { %2765 = vmatprep.mubr.bf16.mxu1 %v4913_v25  ;;  %2818 = vmatprep.mubr.bf16.mxu0 %v4915_v26  ;;  %v4046_v44 = vcombine.low %v1185_v28, %v1189_v31  ;;  %v1149_v16 = vld [vmem:[%s5838_s5 + $0x670] sm:$0xff] }
 0x22a   :  { %2738 = vmatpush1.bf16.msra.mxu1 %v3846_v35  ;;  %2791 = vmatpush1.bf16.msra.mxu0 %v3974_v39  ;;  %v4047_v35 = vcombine.high %v1185_v28, %v1189_v31  ;;  %v1049_v39 = vld [vmem:[%s5838_s5 + $0x350] sm:$0xff] }
 0x22b   :  { %2739 = vmatprep.subr.bf16.mxu1 %v3839_v47  ;;  %2792 = vmatprep.subr.bf16.mxu0 %v3967_v52  ;;  %v1053_v47 = vld [vmem:[%s5838_s5 + $0x370] sm:$0xff] }
 0x22c   :  { %v1177_v52 = vld [vmem:[%s5838_s5 + $0x750] sm:$0xff]  ;;  %v3911_v45 = vcombine.high %v1049_v39, %v1053_v47  ;;  %v3910_v61 = vcombine.low %v1049_v39, %v1053_v47  ;;  %v1134_v39 = vld [vmem:[%s5838_s5 + $0x5f8] sm:$0xff] }
 0x22d   :  { %v4038_v62 = vcombine.low %v1177_v52, %v1181_v53  ;;  %v1141_v24 = vld [vmem:[%s5838_s5 + $0x630] sm:$0xff] }
 0x22e   :  { %2740 = vmatpush1.bf16.msra.mxu1 %v3838_v60  ;;  %2793 = vmatpush1.bf16.msra.mxu0 %v3966_v43  ;;  %v4039_v60 = vcombine.high %v1177_v52, %v1181_v53  ;;  %v1041_v43 = vld [vmem:[%s5838_s5 + $0x310] sm:$0xff] }
 0x22f   :  { %2741 = vmatprep.subr.bf16.mxu1 %v3831_v46  ;;  %2794 = vmatprep.subr.bf16.mxu0 %v3959_v48  ;;  %v1045_v46 = vld [vmem:[%s5838_s5 + $0x330] sm:$0xff] }
 0x230   :  { %v1169_v48 = vld [vmem:[%s5838_s5 + $0x710] sm:$0xff]  ;;  %v3903_v63 = vcombine.high %v1041_v43, %v1045_v46  ;;  %v3902_v58 = vcombine.low %v1041_v43, %v1045_v46  ;;  %v1126_v43 = vld [vmem:[%s5838_s5 + $0x5b8] sm:$0xff] }
 0x231   :  { %v4030_v36 = vcombine.low %v1169_v48, %v1173_v49 }
 0x232   :  { %2742 = vmatpush1.bf16.msra.mxu1 %v3830_v0  ;;  %2795 = vmatpush1.bf16.msra.mxu0 %v3958_v1  ;;  %v4031_v0 = vcombine.high %v1169_v48, %v1173_v49  ;;  %v1033_v1 = vld [vmem:[%s5838_s5 + $0x2d0] sm:$0xff] }
 0x233   :  { %2743 = vmatprep.subr.bf16.mxu1 %v3823_v2  ;;  %2796 = vmatprep.subr.bf16.mxu0 %v3951_v3  ;;  %v1037_v2 = vld [vmem:[%s5838_s5 + $0x2f0] sm:$0xff] }
 0x234   :  { %v1161_v3 = vld [vmem:[%s5838_s5 + $0x6d0] sm:$0xff]  ;;  %v3895_v37 = vcombine.high %v1033_v1, %v1037_v2  ;;  %v3894_v9 = vcombine.low %v1033_v1, %v1037_v2  ;;  %v1118_v1 = vld [vmem:[%s5838_s5 + $0x578] sm:$0xff] }
 0x235   :  { %v4022_v10 = vcombine.low %v1161_v3, %v1165_v4 }
 0x236   :  { %2744 = vmatpush1.bf16.msra.mxu1 %v3822_v38  ;;  %2797 = vmatpush1.bf16.msra.mxu0 %v3950_v40  ;;  %v4023_v38 = vcombine.high %v1161_v3, %v1165_v4  ;;  %v1025_v40 = vld [vmem:[%s5838_s5 + $0x290] sm:$0xff] }
 0x237   :  { %2745 = vmatprep.subr.bf16.mxu1 %v3815_v6  ;;  %2798 = vmatprep.subr.bf16.mxu0 %v3943_v7  ;;  %v1029_v6 = vld [vmem:[%s5838_s5 + $0x2b0] sm:$0xff] }
 0x238   :  { %v1153_v7 = vld [vmem:[%s5838_s5 + $0x690] sm:$0xff]  ;;  %v3887_v11 = vcombine.high %v1025_v40, %v1029_v6  ;;  %v3886_v17 = vcombine.low %v1025_v40, %v1029_v6  ;;  %v1110_v40 = vld [vmem:[%s5838_s5 + $0x538] sm:$0xff] }
 0x239   :  { %v4014_v18 = vcombine.low %v1153_v7, %v1157_v8 }
 0x23a   :  { %2746 = vmatpush1.bf16.msra.mxu1 %v3814_v12  ;;  %2799 = vmatpush1.bf16.msra.mxu0 %v3942_v13  ;;  %v4015_v12 = vcombine.high %v1153_v7, %v1157_v8  ;;  %v1017_v13 = vld [vmem:[%s5838_s5 + $0x250] sm:$0xff] }
 0x23b   :  { %2747 = vmatprep.subr.bf16.mxu1 %v3807_v14  ;;  %2800 = vmatprep.subr.bf16.mxu0 %v3935_v15  ;;  %v1021_v14 = vld [vmem:[%s5838_s5 + $0x270] sm:$0xff] }
 0x23c   :  { %v1145_v15 = vld [vmem:[%s5838_s5 + $0x650] sm:$0xff]  ;;  %v3879_v19 = vcombine.high %v1017_v13, %v1021_v14  ;;  %v3878_v27 = vcombine.low %v1017_v13, %v1021_v14  ;;  %v1102_v13 = vld [vmem:[%s5838_s5 + $0x4f8] sm:$0xff] }
 0x23d   :  { %v4006_v28 = vcombine.low %v1145_v15, %v1149_v16 }
 0x23e   :  { %2748 = vmatpush1.bf16.msra.mxu1 %v3806_v20  ;;  %2801 = vmatpush1.bf16.msra.mxu0 %v3934_v21  ;;  %v4007_v20 = vcombine.high %v1145_v15, %v1149_v16  ;;  %v1009_v21 = vld [vmem:[%s5838_s5 + $0x210] sm:$0xff] }
 0x23f   :  { %2749 = vmatprep.subr.bf16.mxu1 %v3927_v22  ;;  %2802 = vmatprep.subr.bf16.mxu0 %v4055_v23  ;;  %v1013_v22 = vld [vmem:[%s5838_s5 + $0x230] sm:$0xff] }
 0x240   :  { %v1137_v23 = vld [vmem:[%s5838_s5 + $0x610] sm:$0xff]  ;;  %v3871_v31 = vcombine.high %v1009_v21, %v1013_v22  ;;  %v3870_v47 = vcombine.low %v1009_v21, %v1013_v22 }
 0x241   :  { %v3998_v52 = vcombine.low %v1137_v23, %v1141_v24 }
 0x242   :  { %2750 = vmatpush2.bf16.msra.mxu1 %v3926_v32  ;;  %2803 = vmatpush2.bf16.msra.mxu0 %v4054_v33  ;;  %v3999_v32 = vcombine.high %v1137_v23, %v1141_v24  ;;  %v1002_v33 = vld [vmem:[%s5838_s5 + $0x1d8] sm:$0xff] }
 0x243   :  { %2751 = vmatprep.subr.bf16.mxu1 %v3919_v34  ;;  %2804 = vmatprep.subr.bf16.mxu0 %v4047_v35  ;;  %v1006_v34 = vld [vmem:[%s5838_s5 + $0x1f8] sm:$0xff] }
 0x244   :  { %v1130_v35 = vld [vmem:[%s5838_s5 + $0x5d8] sm:$0xff]  ;;  %v3865_v53 = vcombine.high %v1002_v33, %v1006_v34  ;;  %v3864_v46 = vcombine.low %v1002_v33, %v1006_v34 }
 0x245   :  { %v5345_v48 = vcombine.low %v1130_v35, %v1134_v39  ;;  %v954_v24 = vld [vmem:[%s5838_s5 + $0x58] sm:$0xff] }
 0x246   :  { %2752 = vmatpush2.bf16.msra.mxu1 %v3918_v57  ;;  %2805 = vmatpush2.bf16.msra.mxu0 %v4046_v44  ;;  %v5331_v57 = vcombine.high %v1130_v35, %v1134_v39  ;;  %v994_v44 = vld [vmem:[%s5838_s5 + $0x198] sm:$0xff] }
 0x247   :  { %2753 = vmatprep.subr.bf16.mxu1 %v3911_v45  ;;  %2806 = vmatprep.subr.bf16.mxu0 %v4039_v60  ;;  %v998_v45 = vld [vmem:[%s5838_s5 + $0x1b8] sm:$0xff] }
 0x248   :  { %v1122_v60 = vld [vmem:[%s5838_s5 + $0x598] sm:$0xff]  ;;  %v3857_v49 = vcombine.high %v994_v44, %v998_v45  ;;  %v3856_v2 = vcombine.low %v994_v44, %v998_v45 }
 0x249   :  { %v5367_v3 = vcombine.low %v1122_v60, %v1126_v43  ;;  %v946_v39 = vld [vmem:[%s5838_s5 + $0x18] sm:$0xff] }
 0x24a   :  { %2754 = vmatpush2.bf16.msra.mxu1 %v3910_v61  ;;  %2807 = vmatpush2.bf16.msra.mxu0 %v4038_v62  ;;  %v5348_v61 = vcombine.high %v1122_v60, %v1126_v43  ;;  %v986_v62 = vld [vmem:[%s5838_s5 + $0x158] sm:$0xff] }
 0x24b   :  { %2755 = vmatprep.subr.bf16.mxu1 %v3903_v63  ;;  %2808 = vmatprep.subr.bf16.mxu0 %v4031_v0  ;;  %v990_v63 = vld [vmem:[%s5838_s5 + $0x178] sm:$0xff] }
 0x24c   :  { %v1114_v0 = vld [vmem:[%s5838_s5 + $0x558] sm:$0xff]  ;;  %v3849_v4 = vcombine.high %v986_v62, %v990_v63  ;;  %v3848_v6 = vcombine.low %v986_v62, %v990_v63 }
 0x24d   :  { %v5385_v7 = vcombine.low %v1114_v0, %v1118_v1  ;;  %v1194_v62 = vld [vmem:[%s5838_s5 + $0x7d8] sm:$0xff] }
 0x24e   :  { %2756 = vmatpush2.bf16.msra.mxu1 %v3902_v58  ;;  %2809 = vmatpush2.bf16.msra.mxu0 %v4030_v36  ;;  %v5370_v58 = vcombine.high %v1114_v0, %v1118_v1  ;;  %v978_v36 = vld [vmem:[%s5838_s5 + $0x118] sm:$0xff] }
 0x24f   :  { %2757 = vmatprep.subr.bf16.mxu1 %v3895_v37  ;;  %2810 = vmatprep.subr.bf16.mxu0 %v4023_v38  ;;  %v982_v37 = vld [vmem:[%s5838_s5 + $0x138] sm:$0xff] }
 0x250   :  { %v1106_v38 = vld [vmem:[%s5838_s5 + $0x518] sm:$0xff]  ;;  %v3841_v8 = vcombine.high %v978_v36, %v982_v37  ;;  %v3840_v14 = vcombine.low %v978_v36, %v982_v37 }
 0x251   :  { %v5407_v15 = vcombine.low %v1106_v38, %v1110_v40  ;;  %v1198_v63 = vld [vmem:[%s5838_s5 + $0x7f8] sm:$0xff] }
 0x252   :  { %2758 = vmatpush2.bf16.msra.mxu1 %v3894_v9  ;;  %2811 = vmatpush2.bf16.msra.mxu0 %v4022_v10  ;;  %v5388_v9 = vcombine.high %v1106_v38, %v1110_v40  ;;  %v970_v10 = vld [vmem:[%s5838_s5 + $0xd8] sm:$0xff] }
 0x253   :  { %2759 = vmatprep.subr.bf16.mxu1 %v3887_v11  ;;  %2812 = vmatprep.subr.bf16.mxu0 %v4015_v12  ;;  %v974_v11 = vld [vmem:[%s5838_s5 + $0xf8] sm:$0xff] }
 0x254   :  { %v1098_v12 = vld [vmem:[%s5838_s5 + $0x4d8] sm:$0xff]  ;;  %v3833_v16 = vcombine.high %v970_v10, %v974_v11 }
 0x255   :  { %v5425_v21 = vcombine.low %v1098_v12, %v1102_v13  ;;  %v1058_v36 = vld [vmem:[%s5838_s5 + $0x398] sm:$0xff] }
 0x256   :  { %2760 = vmatpush2.bf16.msra.mxu1 %v3886_v17  ;;  %2813 = vmatpush2.bf16.msra.mxu0 %v4014_v18  ;;  %v5410_v17 = vcombine.high %v1098_v12, %v1102_v13  ;;  %v962_v18 = vld [vmem:[%s5838_s5 + $0x98] sm:$0xff] }
 0x257   :  { %2761 = vmatprep.subr.bf16.mxu1 %v3879_v19  ;;  %2814 = vmatprep.subr.bf16.mxu0 %v4007_v20  ;;  %v1094_v19 = vld [vmem:[%s5838_s5 + $0x4b8] sm:$0xff]  ;;  %v3832_v20 = vcombine.low %v970_v10, %v974_v11 }
 0x258   :  { %v1062_v37 = vld [vmem:[%s5838_s5 + $0x3b8] sm:$0xff] }
 0x259   :  { %v1186_v38 = vld [vmem:[%s5838_s5 + $0x798] sm:$0xff]  ;;  %v3921_v10 = vcombine.high %v1058_v36, %v1062_v37 }
 0x25a   :  { %2762 = vmatpush2.bf16.msra.mxu1 %v3878_v27  ;;  %2815 = vmatpush2.bf16.msra.mxu0 %v4006_v28  ;;  %v958_v27 = vld [vmem:[%s5838_s5 + $0x78] sm:$0xff] }
 0x25b   :  { %2763 = vmatprep.subr.bf16.mxu1 %v3871_v31  ;;  %2816 = vmatprep.subr.bf16.mxu0 %v3999_v32  ;;  %v1082_v28 = vld [vmem:[%s5838_s5 + $0x458] sm:$0xff]  ;;  %v3817_v34 = vcombine.high %v954_v24, %v958_v27  ;;  %v3816_v44 = vcombine.low %v954_v24, %v958_v27 }
 0x25c   :  { %v1086_v31 = vld [vmem:[%s5838_s5 + $0x478] sm:$0xff] }
 0x25d   :  { %v5446_v35 = vcombine.high %v1082_v28, %v1086_v31  ;;  %v5461_v45 = vcombine.low %v1082_v28, %v1086_v31  ;;  %v1190_v40 = vld [vmem:[%s5838_s5 + $0x7b8] sm:$0xff] }
 0x25e   :  { %2764 = vmatpush2.bf16.msra.mxu1 %v3870_v47  ;;  %2817 = vmatpush2.bf16.msra.mxu0 %v3998_v52  ;;  %v950_v47 = vld [vmem:[%s5838_s5 + $0x38] sm:$0xff]  ;;  %v5500_v11 = vcombine.high %v1186_v38, %v1190_v40 }
 0x25f   :  { %2839 = vmatprep.subr.bf16.mxu1 %v3865_v53  ;;  %2892 = vmatprep.subr.bf16.mxu0 %v5331_v57  ;;  %v1074_v52 = vld [vmem:[%s5838_s5 + $0x418] sm:$0xff]  ;;  %v3809_v60 = vcombine.high %v946_v39, %v950_v47  ;;  %v3808_v0 = vcombine.low %v946_v39, %v950_v47 }
 0x260   :  { %v1078_v53 = vld [vmem:[%s5838_s5 + $0x438] sm:$0xff] }
 0x261   :  { %2766 = vmatmul.mubr.bf16.vlgmr.msra.gmra.mxu1 %v4919_v29  ;;  %2819 = vmatmul.mubr.bf16.vlgmr.msra.gmra.mxu0 %v4921_v30  ;;  %v5464_v43 = vcombine.high %v1074_v52, %v1078_v53  ;;  %v5479_v1 = vcombine.low %v1074_v52, %v1078_v53  ;;  %v1050_v12 = vld [vmem:[%s5838_s5 + $0x358] sm:$0xff] }
 0x262   :  { %2775 = vmatprep.mubr.bf16.mxu1 %v4965_v41  ;;  %2828 = vmatprep.mubr.bf16.mxu0 %v4967_v42  ;;  %v1054_v13 = vld [vmem:[%s5838_s5 + $0x378] sm:$0xff] }
 0x263   :  { %2840 = vmatpush1.bf16.msra.mxu1 %v3864_v46  ;;  %2893 = vmatpush1.bf16.msra.mxu0 %v5345_v48  ;;  %v1066_v46 = vld [vmem:[%s5838_s5 + $0x3d8] sm:$0xff]  ;;  %v3912_v28 = vcombine.low %v1050_v12, %v1054_v13 }
 0x264   :  { %2841 = vmatprep.subr.bf16.mxu1 %v3857_v49  ;;  %2894 = vmatprep.subr.bf16.mxu0 %v5348_v61  ;;  %v1070_v49 = vld [vmem:[%s5838_s5 + $0x3f8] sm:$0xff] }
 0x265   :  { %v1170_v24 = vld [vmem:[%s5838_s5 + $0x718] sm:$0xff] }
 0x266   :  { %v1174_v27 = vld [vmem:[%s5838_s5 + $0x738] sm:$0xff] }
 0x267   :  { %2842 = vmatpush1.bf16.msra.mxu1 %v3856_v2  ;;  %2895 = vmatpush1.bf16.msra.mxu0 %v5367_v3  ;;  %v3929_v2 = vcombine.high %v1066_v46, %v1070_v49  ;;  %v1034_v39 = vld [vmem:[%s5838_s5 + $0x2d8] sm:$0xff] }
 0x268   :  { %2843 = vmatprep.subr.bf16.mxu1 %v3849_v4  ;;  %2896 = vmatprep.subr.bf16.mxu0 %v5370_v58  ;;  %v5482_v4 = vcombine.high %v1194_v62, %v1198_v63  ;;  %v1038_v47 = vld [vmem:[%s5838_s5 + $0x2f8] sm:$0xff] }
 0x269   :  { %2776 = vmatmul.mubr.bf16.gmra.mxu1 %v4952_v5  ;;  %2829 = vmatmul.mubr.bf16.gmra.mxu0 %v4954_v59  ;;  %v1162_v52 = vld [vmem:[%s5838_s5 + $0x6d8] sm:$0xff] }
 0x26a   :  { %2871 = vmatprep.mubr.bf16.mxu1 %v4913_v25  ;;  %2924 = vmatprep.mubr.bf16.mxu0 %v4915_v26  ;;  %v966_v25 = vld [vmem:[%s5838_s5 + $0xb8] sm:$0xff] }
 0x26b   :  { %2844 = vmatpush1.bf16.msra.mxu1 %v3848_v6  ;;  %2897 = vmatpush1.bf16.msra.mxu0 %v5385_v7  ;;  %v1090_v26 = vld [vmem:[%s5838_s5 + $0x498] sm:$0xff]  ;;  %v3825_v22 = vcombine.high %v962_v18, %v966_v25  ;;  %v3824_v32 = vcombine.low %v962_v18, %v966_v25  ;;  %v3928_v6 = vcombine.low %v1066_v46, %v1070_v49 }
 0x26c   :  { %2845 = vmatprep.subr.bf16.mxu1 %v3841_v8  ;;  %2898 = vmatprep.subr.bf16.mxu0 %v5388_v9  ;;  %v5428_v23 = vcombine.high %v1090_v26, %v1094_v19  ;;  %v5443_v33 = vcombine.low %v1090_v26, %v1094_v19  ;;  %v5497_v8 = vcombine.low %v1194_v62, %v1198_v63  ;;  %v1166_v53 = vld [vmem:[%s5838_s5 + $0x6f8] sm:$0xff] }
 0x26d   :  { %v3920_v18 = vcombine.low %v1058_v36, %v1062_v37  ;;  %v5515_v25 = vcombine.low %v1186_v38, %v1190_v40  ;;  %v3913_v26 = vcombine.high %v1050_v12, %v1054_v13  ;;  %v3897_v46 = vcombine.high %v1034_v39, %v1038_v47  ;;  %v1026_v62 = vld [vmem:[%s5838_s5 + $0x298] sm:$0xff] }
 0x26e   :  { %v5554_v49 = vcombine.high %v1162_v52, %v1166_v53  ;;  %v1030_v63 = vld [vmem:[%s5838_s5 + $0x2b8] sm:$0xff]  ;;  %v3896_v36 = vcombine.low %v1034_v39, %v1038_v47  ;;  %v5569_v37 = vcombine.low %v1162_v52, %v1166_v53  ;;  %v5613_v52 = vld [vmem:[%s5841_s6] sm:$0xff] }
 0x26f   :  { %2846 = vmatpush1.bf16.msra.mxu1 %v3840_v14  ;;  %2899 = vmatpush1.bf16.msra.mxu0 %v5407_v15  ;;  %v1178_v14 = vld [vmem:[%s5838_s5 + $0x758] sm:$0xff]  ;;  %v3889_v38 = vcombine.high %v1026_v62, %v1030_v63 }
 0x270   :  { %2847 = vmatprep.subr.bf16.mxu1 %v3833_v16  ;;  %2900 = vmatprep.subr.bf16.mxu0 %v5410_v17  ;;  %v1182_v16 = vld [vmem:[%s5838_s5 + $0x778] sm:$0xff] }
 0x271   :  { %v5518_v19 = vcombine.high %v1178_v14, %v1182_v16  ;;  %v5533_v31 = vcombine.low %v1178_v14, %v1182_v16  ;;  %v1146_v12 = vld [vmem:[%s5838_s5 + $0x658] sm:$0xff]  ;;  %v3888_v14 = vcombine.low %v1026_v62, %v1030_v63  ;;  %v5626_v62 = vrot.slane %v5613_v52, %v4652_v55 }
 0x272   :  { %v1150_v13 = vld [vmem:[%s5838_s5 + $0x678] sm:$0xff] }
 0x273   :  { %2848 = vmatpush1.bf16.msra.mxu1 %v3832_v20  ;;  %2901 = vmatpush1.bf16.msra.mxu0 %v5425_v21  ;;  %v1042_v20 = vld [vmem:[%s5838_s5 + $0x318] sm:$0xff] }
 0x274   :  { %2849 = vmatprep.subr.bf16.mxu1 %v3825_v22  ;;  %2902 = vmatprep.subr.bf16.mxu0 %v5428_v23  ;;  %v1046_v22 = vld [vmem:[%s5838_s5 + $0x338] sm:$0xff] }
 0x277   :  { %2850 = vmatpush1.bf16.msra.mxu1 %v3824_v32  ;;  %2903 = vmatpush1.bf16.msra.mxu0 %v5443_v33  ;;  %v3905_v32 = vcombine.high %v1042_v20, %v1046_v22 }
 0x278   :  { %2851 = vmatprep.subr.bf16.mxu1 %v3817_v34  ;;  %2904 = vmatprep.subr.bf16.mxu0 %v5446_v35  ;;  %v5536_v34 = vcombine.high %v1170_v24, %v1174_v27 }
 0x27b   :  { %2852 = vmatpush1.bf16.msra.mxu1 %v3816_v44  ;;  %2905 = vmatpush1.bf16.msra.mxu0 %v5461_v45  ;;  %v3904_v44 = vcombine.low %v1042_v20, %v1046_v22  ;;  %v1010_v20 = vld [vmem:[%s5838_s5 + $0x218] sm:$0xff] }
 0x27c   :  { %2853 = vmatprep.subr.bf16.mxu1 %v3809_v60  ;;  %2906 = vmatprep.subr.bf16.mxu0 %v5464_v43  ;;  %v5551_v60 = vcombine.low %v1170_v24, %v1174_v27  ;;  %v1014_v22 = vld [vmem:[%s5838_s5 + $0x238] sm:$0xff] }
 0x27d   :  { %v1138_v24 = vld [vmem:[%s5838_s5 + $0x618] sm:$0xff]  ;;  %v3873_v39 = vcombine.high %v1010_v20, %v1014_v22  ;;  %v3872_v53 = vcombine.low %v1010_v20, %v1014_v22 }
 0x27e   :  { %v1142_v27 = vld [vmem:[%s5838_s5 + $0x638] sm:$0xff] }
 0x27f   :  { %2854 = vmatpush1.bf16.msra.mxu1 %v3808_v0  ;;  %2907 = vmatpush1.bf16.msra.mxu0 %v5479_v1  ;;  %v1154_v0 = vld [vmem:[%s5838_s5 + $0x698] sm:$0xff]  ;;  %v5608_v47 = vcombine.high %v1138_v24, %v1142_v27 }
 0x280   :  { %2855 = vmatprep.subr.bf16.mxu1 %v3929_v2  ;;  %2908 = vmatprep.subr.bf16.mxu0 %v5482_v4  ;;  %v1158_v2 = vld [vmem:[%s5838_s5 + $0x6b8] sm:$0xff] }
 0x281   :  { %v5572_v40 = vcombine.high %v1154_v0, %v1158_v2  ;;  %v5587_v16 = vcombine.low %v1154_v0, %v1158_v2 }
 0x283   :  { %2856 = vmatpush2.bf16.msra.mxu1 %v3928_v6  ;;  %2909 = vmatpush2.bf16.msra.mxu0 %v5497_v8  ;;  %v1018_v6 = vld [vmem:[%s5838_s5 + $0x258] sm:$0xff] }
 0x284   :  { %2857 = vmatprep.subr.bf16.mxu1 %v3921_v10  ;;  %2910 = vmatprep.subr.bf16.mxu0 %v5500_v11  ;;  %v1022_v10 = vld [vmem:[%s5838_s5 + $0x278] sm:$0xff] }
 0x287   :  { %2858 = vmatpush2.bf16.msra.mxu1 %v3920_v18  ;;  %2911 = vmatpush2.bf16.msra.mxu0 %v5515_v25  ;;  %v3881_v18 = vcombine.high %v1018_v6, %v1022_v10 }
 0x288   :  { %2859 = vmatprep.subr.bf16.mxu1 %v3913_v26  ;;  %2912 = vmatprep.subr.bf16.mxu0 %v5518_v19  ;;  %v5590_v26 = vcombine.high %v1146_v12, %v1150_v13 }
 0x28b   :  { %2860 = vmatpush2.bf16.msra.mxu1 %v3912_v28  ;;  %2913 = vmatpush2.bf16.msra.mxu0 %v5533_v31  ;;  %v3880_v28 = vcombine.low %v1018_v6, %v1022_v10 }
 0x28c   :  { %2861 = vmatprep.subr.bf16.mxu1 %v3905_v32  ;;  %2914 = vmatprep.subr.bf16.mxu0 %v5536_v34  ;;  %v5605_v32 = vcombine.low %v1146_v12, %v1150_v13 }
 0x28f   :  { %2862 = vmatpush2.bf16.msra.mxu1 %v3904_v44  ;;  %2915 = vmatpush2.bf16.msra.mxu0 %v5551_v60  ;;  %v5616_v44 = vcombine.low %v1138_v24, %v1142_v27 }
 0x290   :  { %2863 = vmatprep.subr.bf16.mxu1 %v3897_v46  ;;  %2916 = vmatprep.subr.bf16.mxu0 %v5554_v49  ;;  %v5621_v46 = vrot.slane %v5613_v52, %v4655_v56 }
 0x293   :  { %2864 = vmatpush2.bf16.msra.mxu1 %v3896_v36  ;;  %2917 = vmatpush2.bf16.msra.mxu0 %v5569_v37 }
 0x294   :  { %2865 = vmatprep.subr.bf16.mxu1 %v3889_v38  ;;  %2918 = vmatprep.subr.bf16.mxu0 %v5572_v40 }
 0x297   :  { %2866 = vmatpush2.bf16.msra.mxu1 %v3888_v14  ;;  %2919 = vmatpush2.bf16.msra.mxu0 %v5587_v16 }
 0x298   :  { %2867 = vmatprep.subr.bf16.mxu1 %v3881_v18  ;;  %2920 = vmatprep.subr.bf16.mxu0 %v5590_v26 }
 0x29b   :  { %2868 = vmatpush2.bf16.msra.mxu1 %v3880_v28  ;;  %2921 = vmatpush2.bf16.msra.mxu0 %v5605_v32 }
 0x29c   :  { %2869 = vmatprep.subr.bf16.mxu1 %v3873_v39  ;;  %2922 = vmatprep.subr.bf16.mxu0 %v5608_v47 }
 0x29f   :  { %2870 = vmatpush2.bf16.msra.mxu1 %v3872_v53  ;;  %2923 = vmatpush2.bf16.msra.mxu0 %v5616_v44 }
 0x2a0   :  { %4078 = vmatprep.subr.bf16.mxu1 %v5331_v57  ;;  %v2555_v63 = vpop.f32.mrf.mxu1  ;;  %v2608_v0 = vpop.f32.mrf.mxu0 }
 0x2a1   :  { %v2556_v2 = vadd.f32 %v2555_v63, %v5621_v46 }
 0x2a2   :  { %2872 = vmatmul.mubr.bf16.vlgmr.msra.gmra.mxu1 %v4919_v29  ;;  %2925 = vmatmul.mubr.bf16.vlgmr.msra.gmra.mxu0 %v4921_v30  ;;  %v2557_v36 = vpop.f32.mrf.mxu1  ;;  %v2610_v56 = vpop.f32.mrf.mxu0 }
 0x2a3   :  { %2881 = vmatprep.mubr.bf16.mxu1 %v4965_v41  ;;  %4094 = vmatpush1.bf16.msra.mxu1 %v5345_v48  ;;  %v2558_v38 = vadd.f32 %v2557_v36, %v5626_v62  ;;  %v2609_v6 = vadd.f32 %v2608_v0, %v2556_v2 }
 0x2a4   :  { %4079 = vmatprep.subr.bf16.mxu1 %v5348_v61  ;;  %v2559_v55 = vpop.f32.mrf.mxu1  ;;  %v2612_v57 = vpop.f32.mrf.mxu0 }
 0x2a5   :  { %v2560_v10 = vadd.f32 %v2559_v55, %v5621_v46  ;;  %v2611_v13 = vadd.f32 %v2610_v56, %v2558_v38  ;;  %v2945_v41 = vmax.f32 %v2609_v6, 0.0 }
 0x2a6   :  { %v2561_v12 = vpop.f32.mrf.mxu1  ;;  %v2614_v14 = vpop.f32.mrf.mxu0 }
 0x2a7   :  { %v2613_v29 = vadd.f32 %v2612_v57, %v2560_v10  ;;  %4095 = vmatpush1.bf16.msra.mxu1 %v5367_v3  ;;  %v2562_v30 = vadd.f32 %v2561_v12, %v5626_v62  ;;  %v2946_v61 = vmax.f32 %v2611_v13, 0.0 }
 0x2a8   :  { %4080 = vmatprep.subr.bf16.mxu1 %v5370_v58 }
 0x2a9   :  { %v2953_v48 = vmax.f32 %v2613_v29, 0.0  ;;  %v2615_v18 = vadd.f32 %v2614_v14, %v2562_v30 }
 0x2aa   :  { %2882 = vmatmul.mubr.bf16.gmra.mxu1 %v4952_v5 }
 0x2ab   :  { %v2977_v20 = vmax.f32 %v2945_v41, %v2953_v48  ;;  %v2954_v22 = vmax.f32 %v2615_v18, 0.0  ;;  %4096 = vmatpush1.bf16.msra.mxu1 %v5385_v7  ;;  %2934 = vmatprep.mubr.bf16.mxu1 %v4967_v42 }
 0x2ac   :  { %4081 = vmatprep.subr.bf16.mxu1 %v5388_v9 }
 0x2ad   :  { %v2978_v3 = vrot.slane %v2977_v20, 4  ;;  %v2984_v24 = vmax.f32 %v2946_v61, %v2954_v22 }
 0x2af   :  { %v2979_v27 = vmax.f32 %v2977_v20, %v2978_v3  ;;  %v2985_v28 = vrot.slane %v2984_v24, 4  ;;  %4097 = vmatpush1.bf16.msra.mxu1 %v5407_v15  ;;  %v1231_v3 = vsub.s32 7, %v4649_v54 }
 0x2b0   :  { %4082 = vmatprep.subr.bf16.mxu1 %v5410_v17 }
 0x2b1   :  { %v2980_v58 = vrot.slane %v2979_v27, 2  ;;  %v2986_v39 = vmax.f32 %v2984_v24, %v2985_v28  ;;  %v1227_v28 = vsub.s32 6, %v4649_v54 }
 0x2b3   :  { %v2981_v5 = vmax.f32 %v2979_v27, %v2980_v58  ;;  %v2987_v53 = vrot.slane %v2986_v39, 2  ;;  %4098 = vmatpush1.bf16.msra.mxu1 %v5425_v21  ;;  %v2565_v21 = vpop.f32.mrf.mxu1  ;;  %v1223_v27 = vsub.s32 5, %v4649_v54  ;;  %v5745_v17 = vrot.slane %v5613_v52, %v1227_v28 }
 0x2b4   :  { %4083 = vmatprep.subr.bf16.mxu1 %v5428_v23 }
 0x2b5   :  { %v2982_v7 = vrot.slane %v2981_v5, 1  ;;  %v2988_v42 = vmax.f32 %v2986_v39, %v2987_v53  ;;  %v5676_v23 = vpop.f32.mrf.mxu1  ;;  %v1219_v39 = vsub.s32 4, %v4649_v54  ;;  %v2566_v53 = vadd.f32 %v2565_v21, %v5621_v46 }
 0x2b7   :  { %v2989_v63 = vrot.slane %v2988_v42, 1  ;;  %4099 = vmatpush1.bf16.msra.mxu1 %v5443_v33  ;;  %v5650_v9 = vmax.f32 %v2981_v5, %v2982_v7  ;;  %v2618_v33 = vpop.f32.mrf.mxu0  ;;  %v5735_v5 = vrot.slane %v5613_v52, %v1231_v3  ;;  %v1216_v7 = vrot.slane %v5613_v52, %v487_v50 }
 0x2b8   :  { %4084 = vmatprep.subr.bf16.mxu1 %v5446_v35  ;;  %v5678_v35 = vpop.f32.mrf.mxu1  ;;  %v5752_v21 = vrot.slane %v5613_v52, %v1219_v39 }
 0x2b9   :  { %5851 = vst [vmem:[#allocation3_spill] sm:$0xff] %v5650_v9  ;;  %v5652_v15 = vmax.f32 %v2988_v42, %v2989_v63  ;;  %5857 = vst [vmem:[#allocation9_spill] sm:$0xff] %v5735_v5  ;;  %v5742_v63 = vrot.slane %v5613_v52, %v1223_v27  ;;  %v5858_v9 = vsub.s32 2, %v4649_v54 }
 0x2bb   :  { %5852 = vst [vmem:[#allocation4_spill] sm:$0xff] %v5652_v15  ;;  %4100 = vmatpush1.bf16.msra.mxu1 %v5461_v45  ;;  %v5680_v45 = vpop.f32.mrf.mxu0  ;;  %v1212_v3 = vrot.slane %v5613_v52, %v5858_v9  ;;  %v2568_v52 = vadd.f32 %v5676_v23, %v5626_v62 }
 0x2bc   :  { %4085 = vmatprep.subr.bf16.mxu1 %v5464_v43  ;;  %v5682_v43 = vpop.f32.mrf.mxu1 }
 0x2bf   :  { %4101 = vmatpush1.bf16.msra.mxu1 %v5479_v1  ;;  %v5684_v1 = vpop.f32.mrf.mxu0 }
 0x2c0   :  { %4086 = vmatprep.subr.bf16.mxu1 %v5482_v4 }
 0x2c3   :  { %4102 = vmatpush2.bf16.msra.mxu1 %v5497_v8  ;;  %v5688_v8 = vpop.f32.mrf.mxu0 }
 0x2c4   :  { %4087 = vmatprep.subr.bf16.mxu1 %v5500_v11 }
 0x2c7   :  { %4103 = vmatpush2.bf16.msra.mxu1 %v5515_v25 }
 0x2c8   :  { %4088 = vmatprep.subr.bf16.mxu1 %v5518_v19 }
 0x2cb   :  { %4104 = vmatpush2.bf16.msra.mxu1 %v5533_v31 }
 0x2cc   :  { %4089 = vmatprep.subr.bf16.mxu1 %v5536_v34 }
 0x2cf   :  { %4105 = vmatpush2.bf16.msra.mxu1 %v5551_v60 }
 0x2d0   :  { %4090 = vmatprep.subr.bf16.mxu1 %v5554_v49 }
 0x2d3   :  { %4106 = vmatpush2.bf16.msra.mxu1 %v5569_v37 }
 0x2d4   :  { %4091 = vmatprep.subr.bf16.mxu1 %v5572_v40 }
 0x2d7   :  { %4107 = vmatpush2.bf16.msra.mxu1 %v5587_v16 }
 0x2d8   :  { %4092 = vmatprep.subr.bf16.mxu1 %v5590_v26 }
 0x2db   :  { %4108 = vmatpush2.bf16.msra.mxu1 %v5605_v32 }
 0x2dc   :  { %4093 = vmatprep.subr.bf16.mxu1 %v5608_v47 }
 0x2df   :  { %4109 = vmatpush2.bf16.msra.mxu1 %v5616_v44 }
 0x2e0   :  { %v5686_v4 = vpop.f32.mrf.mxu1  ;;  %v5690_v25 = vpop.f32.mrf.mxu0 }
 0x2e2   :  { %2935 = vmatmul.mubr.bf16.vlgmr.msra.gmra.mxu1 %v4954_v59  ;;  %v2663_v11 = vpop.f32.mrf.mxu1  ;;  %v5692_v19 = vpop.f32.mrf.mxu0 }
 0x2e4   :  { %v2665_v59 = vpop.f32.mrf.mxu1  ;;  %v5694_v34 = vpop.f32.mrf.mxu0 }
 0x2e5   :  { %v2666_v28 = vadd.f32 %v2665_v59, %v1212_v3 }
 0x2e6   :  { %v2667_v31 = vpop.f32.mrf.mxu1  ;;  %v2720_v49 = vpop.f32.mrf.mxu0 }
 0x2e7   :  { %v2668_v15 = vadd.f32 %v2667_v31, %v1216_v7 }
 0x2e8   :  { %v5696_v60 = vpop.f32.mrf.mxu1  ;;  %v5700_v40 = vpop.f32.mrf.mxu0 }
 0x2ea   :  { %v5698_v37 = vpop.f32.mrf.mxu1  ;;  %v5704_v26 = vpop.f32.mrf.mxu0 }
 0x2ec   :  { %v5702_v16 = vpop.f32.mrf.mxu1  ;;  %v5708_v47 = vpop.f32.mrf.mxu0 }
 0x2ee   :  { %v5706_v32 = vpop.f32.mrf.mxu1  ;;  %v5710_v0 = vpop.f32.mrf.mxu0 }
 0x321   :  { %v2767_v44 = vpop.f32.mrf.mxu1  ;;  %v5712_v36 = vpop.f32.mrf.mxu0 }
 0x323   :  { %v2769_v2 = vpop.f32.mrf.mxu1  ;;  %v2822_v38 = vpop.f32.mrf.mxu0 }
 0x325   :  { %v2771_v56 = vpop.f32.mrf.mxu1  ;;  %v2824_v57 = vpop.f32.mrf.mxu0 }
 0x326   :  { %v2772_v54 = vadd.f32 %v2771_v56, %v5752_v21 }
 0x327   :  { %v2773_v55 = vpop.f32.mrf.mxu1  ;;  %v2826_v10 = vpop.f32.mrf.mxu0 }
 0x329   :  { %v5714_v6 = vpop.f32.mrf.mxu1  ;;  %v5718_v13 = vpop.f32.mrf.mxu0 }
 0x32a   :  { %5853 = vst [vmem:[#allocation5_spill] sm:$0xff] %v5718_v13  ;;  %v2774_v13 = vadd.f32 %v2773_v55, %v5742_v63  ;;  %v2570_v55 = vadd.f32 %v5678_v35, %v5621_v46 }
 0x32b   :  { %v5716_v12 = vpop.f32.mrf.mxu1  ;;  %v5722_v30 = vpop.f32.mrf.mxu0 }
 0x32c   :  { %5854 = vst [vmem:[#allocation6_spill] sm:$0xff] %v5722_v30  ;;  %v2664_v30 = vadd.f32 %v2663_v11, %v1216_v7  ;;  %v2827_v11 = vadd.f32 %v2826_v10, %v2774_v13  ;;  %v2623_v46 = vadd.f32 %v5684_v1, %v2570_v55 }
 0x32d   :  { %v5720_v29 = vpop.f32.mrf.mxu1  ;;  %v5726_v41 = vpop.f32.mrf.mxu0 }
 0x32e   :  { %5855 = vst [vmem:[#allocation7_spill] sm:$0xff] %v5726_v41  ;;  %v2619_v41 = vadd.f32 %v2618_v33, %v2566_v53  ;;  %v2768_v33 = vadd.f32 %v2767_v44, %v5752_v21  ;;  %v2717_v56 = vadd.f32 %v5692_v19, %v2664_v30  ;;  %v2572_v19 = vadd.f32 %v5682_v43, %v5626_v62 }
 0x32f   :  { %v5724_v14 = vpop.f32.mrf.mxu1  ;;  %v5728_v18 = vpop.f32.mrf.mxu0  ;;  %v2969_v1 = vmax.f32 %v2623_v46, 0.0  ;;  %v2672_v43 = vadd.f32 %v5696_v60, %v1212_v3 }
 0x330   :  { %5856 = vst [vmem:[#allocation8_spill] sm:$0xff] %v5728_v18  ;;  %v2625_v62 = vadd.f32 %v5688_v8, %v2572_v19 }
 0x331   :  { %v2725_v60 = vadd.f32 %v5700_v40, %v2672_v43 }
 0x332   :  { %v2970_v8 = vmax.f32 %v2625_v62, 0.0 }
 0x362   :  { %v2873_v48 = vpop.f32.mrf.mxu1  ;;  %v2926_v20 = vpop.f32.mrf.mxu0 }
 0x363   :  { %v2874_v9 = vadd.f32 %v2873_v48, %v5745_v17  ;;  %v2719_v48 = vadd.f32 %v5694_v34, %v2666_v28  ;;  %v2948_v34 = vmax.f32 %v2717_v56, 0.0 }
 0x364   :  { %v2875_v61 = vpop.f32.mrf.mxu1  ;;  %v2928_v24 = vpop.f32.mrf.mxu0 }
 0x365   :  { %v2876_v50 = vadd.f32 %v2875_v61, %v5735_v5  ;;  %v2662_v61 = vadd.f32 %v5686_v4, %v1212_v3  ;;  %v2927_v53 = vadd.f32 %v2926_v20, %v2874_v9  ;;  %v2821_v4 = vadd.f32 %v5712_v36, %v2768_v33 }
 0x366   :  { %v2877_v22 = vpop.f32.mrf.mxu1  ;;  %v2930_v42 = vpop.f32.mrf.mxu0  ;;  %v2674_v20 = vadd.f32 %v5698_v37, %v1216_v7  ;;  %v2676_v36 = vadd.f32 %v5702_v16, %v1212_v3  ;;  %v2784_v37 = vadd.f32 %v5724_v14, %v5742_v63 }
 0x367   :  { %v2878_v27 = vadd.f32 %v2877_v22, %v5745_v17  ;;  %v2721_v22 = vadd.f32 %v2720_v49, %v2668_v15  ;;  %v2929_v59 = vadd.f32 %v2928_v24, %v2876_v50  ;;  %v2715_v15 = vadd.f32 %v5690_v25, %v2662_v61 }
 0x368   :  { %v2879_v58 = vpop.f32.mrf.mxu1  ;;  %v2932_v18 = vpop.f32.mrf.mxu0  ;;  %v2958_v49 = vmax.f32 %v2827_v11, 0.0  ;;  %v2949_v24 = vmax.f32 %v2821_v4, 0.0 }
 0x369   :  { %v2880_v51 = vadd.f32 %v2879_v58, %v5735_v5  ;;  %v2770_v58 = vadd.f32 %v2769_v2, %v5742_v63  ;;  %v2931_v39 = vadd.f32 %v2930_v42, %v2878_v27  ;;  %v2961_v2 = vmax.f32 %v2619_v41, 0.0 }
 0x36a   :  { %v2621_v5 = vadd.f32 %v5680_v45, %v2568_v52  ;;  %v2956_v35 = vmax.f32 %v2721_v22, 0.0  ;;  %v2952_v44 = vmax.f32 %v2929_v59, 0.0  ;;  %v2951_v45 = vmax.f32 %v2927_v53, 0.0  ;;  %v2883_v11 = vpop.f32.mrf.mxu1  ;;  %v5861_v53 = vld [vmem:[#allocation7_spill] sm:$0xff] }
 0x36b   :  { %v2933_v31 = vadd.f32 %v2932_v18, %v2880_v51  ;;  %v2823_v51 = vadd.f32 %v2822_v38, %v2770_v58  ;;  %v2825_v18 = vadd.f32 %v2824_v57, %v2772_v54  ;;  %v2959_v10 = vmax.f32 %v2931_v39, 0.0  ;;  %v5859_v39 = vld [vmem:[#allocation8_spill] sm:$0xff] }
 0x36c   :  { %v2955_v38 = vmax.f32 %v2719_v48, 0.0  ;;  %v2678_v54 = vadd.f32 %v5706_v32, %v1216_v7  ;;  %v2947_v41 = vmax.f32 %v2715_v15, 0.0  ;;  %v2998_v25 = vmax.f32 %v2948_v34, %v2956_v35 }
 0x36d   :  { %v2960_v23 = vmax.f32 %v2933_v31, 0.0  ;;  %v2950_v57 = vmax.f32 %v2823_v51, 0.0  ;;  %v2957_v13 = vmax.f32 %v2825_v18, 0.0  ;;  %v3019_v50 = vmax.f32 %v2951_v45, %v2959_v10  ;;  %v5860_v18 = vld [vmem:[#allocation6_spill] sm:$0xff] }
 0x36e   :  { %v2991_v27 = vmax.f32 %v2947_v41, %v2955_v38  ;;  %v2731_v32 = vadd.f32 %v5710_v0, %v2678_v54  ;;  %v2962_v9 = vmax.f32 %v2621_v5, 0.0  ;;  %v3033_v31 = vmax.f32 %v2961_v2, %v2969_v1 }
 0x36f   :  { %v3026_v30 = vmax.f32 %v2952_v44, %v2960_v23  ;;  %v3012_v42 = vmax.f32 %v2950_v57, %v2958_v49  ;;  %v3005_v28 = vmax.f32 %v2949_v24, %v2957_v13  ;;  %v2727_v52 = vadd.f32 %v5704_v26, %v2674_v20  ;;  %v2885_v49 = vpop.f32.mrf.mxu1 }
 0x370   :  { %v2999_v16 = vrot.slane %v2998_v25, 4  ;;  %v2729_v7 = vadd.f32 %v5708_v47, %v2676_v36  ;;  %v3020_v61 = vrot.slane %v3019_v50, 4  ;;  %v2780_v0 = vadd.f32 %v5716_v12, %v5742_v63 }
 0x371   :  { %v3027_v58 = vrot.slane %v3026_v30, 4  ;;  %v3013_v55 = vrot.slane %v3012_v42, 4  ;;  %v2782_v5 = vadd.f32 %v5720_v29, %v5752_v21  ;;  %v2992_v3 = vrot.slane %v2991_v27, 4  ;;  %v2887_v24 = vpop.f32.mrf.mxu1 }
 0x372   :  { %v2972_v22 = vmax.f32 %v2731_v32, 0.0  ;;  %v3006_v26 = vrot.slane %v3005_v28, 4  ;;  %v3034_v14 = vrot.slane %v3033_v31, 4  ;;  %v2964_v59 = vmax.f32 %v2727_v52, 0.0 }
 0x373   :  { %v3028_v33 = vmax.f32 %v3026_v30, %v3027_v58  ;;  %v2778_v47 = vadd.f32 %v5714_v6, %v5752_v21  ;;  %v2837_v2 = vadd.f32 %v5859_v39, %v2784_v37  ;;  %v3000_v56 = vmax.f32 %v2998_v25, %v2999_v16  ;;  %v5862_v6 = vld [vmem:[#allocation5_spill] sm:$0xff] }
 0x374   :  { %v2971_v40 = vmax.f32 %v2729_v7, 0.0  ;;  %v3014_v48 = vmax.f32 %v3012_v42, %v3013_v55  ;;  %v3021_v51 = vmax.f32 %v3019_v50, %v3020_v61  ;;  %v3040_v12 = vmax.f32 %v2962_v9, %v2970_v8  ;;  %v2889_v55 = vpop.f32.mrf.mxu1  ;;  %v5863_v61 = vld [vmem:[#allocation2_spill] sm:$0xff] }
 0x375   :  { %v2963_v63 = vmax.f32 %v2725_v60, 0.0  ;;  %v2833_v29 = vadd.f32 %v5860_v18, %v2780_v0  ;;  %v2835_v23 = vadd.f32 %v5861_v53, %v2782_v5  ;;  %v2993_v46 = vmax.f32 %v2991_v27, %v2992_v3 }
 0x376   :  { %v3054_v15 = vmax.f32 %v2964_v59, %v2972_v22  ;;  %v3007_v35 = vmax.f32 %v3005_v28, %v3006_v26  ;;  %v3029_v4 = vrot.slane %v3028_v33, 2  ;;  %v4268_v44 = vmov 1966171168  }
 0x377   :  { %v3130_v10 = vunpack.c.l.s4 %v4268_v44  ;;  %v2831_v21 = vadd.f32 %v5862_v6, %v2778_v47  ;;  %v2974_v19 = vmax.f32 %v2837_v2, 0.0  ;;  %v3001_v34 = vrot.slane %v3000_v56, 2 }
 0x378   :  { %v3047_v38 = vmax.f32 %v2963_v63, %v2971_v40  ;;  %v3015_v54 = vrot.slane %v3014_v48, 2  ;;  %v3022_v57 = vrot.slane %v3021_v51, 2  ;;  %v3035_v13 = vmax.f32 %v3033_v31, %v3034_v14 }
 0x379   :  { %v3041_v45 = vrot.slane %v3040_v12, 4  ;;  %v2966_v30 = vmax.f32 %v2833_v29, 0.0  ;;  %v2973_v1 = vmax.f32 %v2835_v23, 0.0  ;;  %v2994_v41 = vrot.slane %v2993_v46, 2 }
 0x37a   :  { %v3055_v25 = vrot.slane %v3054_v15, 4  ;;  %v3008_v20 = vrot.slane %v3007_v35, 2  ;;  %v3030_v36 = vmax.f32 %v3028_v33, %v3029_v4  ;;  %v3131_v42 = vunpack.c.0.s8 %v3130_v10 }
 0x37b   :  { %v2965_v50 = vmax.f32 %v2831_v21, 0.0  ;;  %v3068_v62 = vmax.f32 %v2966_v30, %v2974_v19  ;;  %v3002_v43 = vmax.f32 %v3000_v56, %v3001_v34  ;;  %v3048_v27 = vrot.slane %v3047_v38, 4 }
 0x37c   :  { %v3016_v32 = vmax.f32 %v3014_v48, %v3015_v54  ;;  %v3023_v28 = vmax.f32 %v3021_v51, %v3022_v57  ;;  %v3036_v58 = vrot.slane %v3035_v13, 2  ;;  %v3042_v9 = vmax.f32 %v3040_v12, %v3041_v45  ;;  %v5864_v12 = vld [vmem:[#allocation9_spill] sm:$0xff] }
 0x37d   :  { %v3061_v52 = vmax.f32 %v2965_v50, %v2973_v1  ;;  %v2995_v37 = vmax.f32 %v2993_v46, %v2994_v41  ;;  %v3056_v31 = vmax.f32 %v3054_v15, %v3055_v25  ;;  %v3009_v16 = vmax.f32 %v3007_v35, %v3008_v20 }
 0x37e   :  { %v3031_v7 = vrot.slane %v3030_v36, 1  ;;  %v5796_v8 = vsub.s32 %v3131_v42, %v5863_v61  ;;  %v3069_v60 = vrot.slane %v3068_v62, 4  ;;  %v3003_v0 = vrot.slane %v3002_v43, 1 }
 0x37f   :  { %v3049_v5 = vmax.f32 %v3047_v38, %v3048_v27  ;;  %v3017_v3 = vrot.slane %v3016_v32, 1  ;;  %v3024_v22 = vrot.slane %v3023_v28, 1  ;;  %v3037_v33 = vmax.f32 %v3035_v13, %v3036_v58 }
 0x380   :  { %v3043_v14 = vrot.slane %v3042_v9, 2  ;;  %v3062_v59 = vrot.slane %v3061_v52, 4  ;;  %v2884_v47 = vadd.f32 %v2883_v11, %v5745_v17  ;;  %v2996_v39 = vrot.slane %v2995_v37, 1 }
 0x381   :  { %v3057_v2 = vrot.slane %v3056_v31, 2  ;;  %v3010_v56 = vrot.slane %v3009_v16, 1  ;;  %v3032_v40 = vmax.f32 %v3030_v36, %v3031_v7  ;;  %v3070_v51 = vmax.f32 %v3068_v62, %v3069_v60  ;;  %v5866_v7 = vld [vmem:[#allocation3_spill] sm:$0xff] }
 0x382   :  { %v2886_v63 = vadd.f32 %v2885_v49, %v5864_v12  ;;  %v2888_v18 = vadd.f32 %v2887_v24, %v5745_v17  ;;  %v3004_v53 = vmax.f32 %v3002_v43, %v3003_v0  ;;  %v3050_v23 = vrot.slane %v3049_v5, 2 }
 0x383   :  { %v3018_v46 = vmax.f32 %v3016_v32, %v3017_v3  ;;  %v3025_v15 = vmax.f32 %v3023_v28, %v3024_v22  ;;  %v3063_v4 = vmax.f32 %v3061_v52, %v3062_v59  ;;  %v2890_v44 = vadd.f32 %v2889_v55, %v5864_v12 }
 0x384   :  { %v2997_v6 = vmax.f32 %v2995_v37, %v2996_v39  ;;  %v3058_v21 = vmax.f32 %v3056_v31, %v3057_v2  ;;  %v3011_v19 = vmax.f32 %v3009_v16, %v3010_v56  ;;  %v3071_v54 = vrot.slane %v3070_v51, 2  ;;  %v5865_v16 = vld [vmem:[#allocation4_spill] sm:$0xff] }
 0x385   :  { %v4061_v34 = vpack.c.bf16 %v3032_v40, %v3025_v15  ;;  %v3044_v13 = vmax.f32 %v3042_v9, %v3043_v14  ;;  %v3051_v30 = vmax.f32 %v3049_v5, %v3050_v23  ;;  %v3064_v41 = vrot.slane %v3063_v4, 2 }
 0x386   :  { %v4059_v45 = vpack.c.bf16 %v3004_v53, %v2997_v6  ;;  %v4060_v1 = vpack.c.bf16 %v3018_v46, %v3011_v19  ;;  %v3059_v24 = vrot.slane %v3058_v21, 1  ;;  %v3072_v50 = vmax.f32 %v3070_v51, %v3071_v54 }
 0x387   :  { %v3156_v42 = vrot.slane %v4061_v34, %v5796_v8  ;;  %v3038_v27 = vrot.slane %v3037_v33, 1  ;;  %v3045_v32 = vrot.slane %v3044_v13, 1  ;;  %v3052_v9 = vrot.slane %v3051_v30, 1 }
 0x388   :  { %v3142_v28 = vrot.slane %v4059_v45, %v5796_v8  ;;  %v3149_v58 = vrot.slane %v4060_v1, %v5796_v8  ;;  %v3065_v52 = vmax.f32 %v3063_v4, %v3064_v41  ;;  %v5867_v55 = vpack.c.bf16 %v5865_v16, %v5866_v7 }
 0x389   :  { %v4269_v5 = vmov 1935823168   ;;  %v3060_v22 = vmax.f32 %v3058_v21, %v3059_v24  ;;  %v3046_v39 = vmax.f32 %v3044_v13, %v3045_v32  ;;  %v3053_v56 = vmax.f32 %v3051_v30, %v3052_v9 }
 0x38a   :  { %v3135_v60 = vrot.slane %v5867_v55, %v5796_v8  ;;  %v3158_v0 = vcombine.low %v3149_v58, %v3156_v42  ;;  %v3225_v3 = vunpack.c.l.s4 %v4269_v5  ;;  %v3066_v40 = vrot.slane %v3065_v52, 1 }
 0x38c   :  { %v3157_v2 = vcombine.low %v3135_v60, %v3142_v28  ;;  %v3172_v12 = vrot.slane %v3158_v0, %v5796_v8 }
 0x38e   :  { %v3165_v46 = vrot.slane %v3157_v2, %v5796_v8  ;;  %v4066_v19 = vcombine.low %v3172_v12, %v3172_v12 }
 0x3a2   :  { %v2936_v26 = vpop.f32.mrf.mxu1 }
 0x3a3   :  { %v2937_v29 = vadd.f32 %v2936_v26, %v2884_v47  ;;  %v3073_v26 = vrot.slane %v3072_v50, 1  ;;  %v3039_v47 = vmax.f32 %v3037_v33, %v3038_v27 }
 0x3a4   :  { %v2938_v48 = vpop.f32.mrf.mxu1 }
 0x3a5   :  { %v2939_v11 = vadd.f32 %v2938_v48, %v2886_v63  ;;  %v2967_v49 = vmax.f32 %v2937_v29, 0.0  ;;  %v3226_v63 = vunpack.c.0.s8 %v3225_v3  ;;  %v3074_v29 = vmax.f32 %v3072_v50, %v3073_v26 }
 0x3a6   :  { %v2940_v35 = vpop.f32.mrf.mxu1  ;;  %v4062_v15 = vpack.c.bf16 %v3046_v39, %v3039_v47 }
 0x3a7   :  { %v2941_v10 = vadd.f32 %v2940_v35, %v2888_v18  ;;  %v2968_v25 = vmax.f32 %v2939_v11, 0.0  ;;  %v4063_v18 = vpack.c.bf16 %v3060_v22, %v3053_v56  ;;  %v3067_v35 = vmax.f32 %v3065_v52, %v3066_v40 }
 0x3a8   :  { %v2942_v38 = vpop.f32.mrf.mxu1  ;;  %v3229_v33 = vsub.s32 %v3226_v63, %v5863_v61  ;;  %v3184_v34 = vrot.slane %v4062_v15, %v5796_v8 }
 0x3a9   :  { %v2975_v57 = vmax.f32 %v2941_v10, 0.0  ;;  %v2943_v17 = vadd.f32 %v2942_v38, %v2890_v44  ;;  %v3173_v44 = vcombine.low %v3165_v46, %v3172_v12  ;;  %v3191_v11 = vrot.slane %v4063_v18, %v5796_v8 }
 0x3aa   :  { %v4064_v10 = vpack.c.bf16 %v3074_v29, %v3067_v35  ;;  %v3237_v13 = vrot.slane %v4066_v19, %v3229_v33 }
 0x3ab   :  { %v3075_v20 = vmax.f32 %v2967_v49, %v2975_v57  ;;  %v2976_v36 = vmax.f32 %v2943_v17, 0.0  ;;  %v3230_v54 = vrot.slane %v3173_v44, %v3229_v33  ;;  %v3206_v49 = vcombine.low %v3184_v34, %v3191_v11 }
 0x3ac   :  { %v3198_v57 = vrot.slane %v4064_v10, %v5796_v8  ;;  %v3239_v41 = vcombine.high %v3237_v13, %v3237_v13  ;;  %v3260_v42 = vrot.slane %v3237_v13, %v3229_v33 }
 0x3ad   :  { %v3076_v62 = vrot.slane %v3075_v20, 4  ;;  %v3082_v43 = vmax.f32 %v2968_v25, %v2976_v36  ;;  %v3238_v30 = vcombine.high %v3230_v54, %v3230_v54  ;;  %v3214_v61 = vrot.slane %v3206_v49, %v5796_v8 }
 0x3ae   :  { %v3246_v25 = vrot.slane %v3230_v54, %v3229_v33  ;;  %v3317_v16 = vunpack.c.l.b16 %v3260_v42  ;;  %v3318_v7 = vunpack.c.h.b16 %v3260_v42 }
 0x3af   :  { %v3077_v37 = vmax.f32 %v3075_v20, %v3076_v62  ;;  %v3083_v31 = vrot.slane %v3082_v43, 4  ;;  %v3253_v24 = vrot.slane %v3238_v30, %v3229_v33 }
 0x3b0   :  { %v3313_v27 = vunpack.c.l.b16 %v3246_v25  ;;  %v3314_v32 = vunpack.c.h.b16 %v3246_v25 }
 0x3b1   :  { %v3078_v14 = vrot.slane %v3077_v37, 2  ;;  %v3084_v59 = vmax.f32 %v3082_v43, %v3083_v31  ;;  %v3267_v43 = vrot.slane %v3239_v41, %v3229_v33  ;;  %v3316_v31 = vunpack.c.h.b16 %v3253_v24 }
 0x3b3   :  { %v3079_v48 = vmax.f32 %v3077_v37, %v3078_v14  ;;  %v3085_v51 = vrot.slane %v3084_v59, 2  ;;  %v3315_v37 = vunpack.c.l.b16 %v3253_v24  ;;  %v3319_v3 = vunpack.c.l.b16 %v3267_v43 }
 0x3b4   :  { %v3320_v22 = vunpack.c.h.b16 %v3267_v43 }
 0x3b5   :  { %v3080_v53 = vrot.slane %v3079_v48, 1  ;;  %v3086_v23 = vmax.f32 %v3084_v59, %v3085_v51 }
 0x3b7   :  { %v3087_v4 = vrot.slane %v3086_v23, 1  ;;  %v3081_v6 = vmax.f32 %v3079_v48, %v3080_v53 }
 0x3b9   :  { %v3088_v21 = vmax.f32 %v3086_v23, %v3087_v4 }
 0x3bb   :  { %v4065_v38 = vpack.c.bf16 %v3088_v21, %v3081_v6 }
 0x3bd   :  { %v3205_v17 = vrot.slane %v4065_v38, %v5796_v8 }
 0x3bf   :  { %v3207_v45 = vcombine.low %v3198_v57, %v3205_v17 }
 0x3c1   :  { %v3221_v1 = vrot.slane %v3207_v45, %v5796_v8 }
 0x3c3   :  { %v3222_v20 = vcombine.low %v3214_v61, %v3221_v1  ;;  %v4067_v36 = vcombine.low %v3221_v1, %v3221_v1 }
 0x3c5   :  { %v3275_v50 = vrot.slane %v3222_v20, %v3229_v33  ;;  %v3282_v62 = vrot.slane %v4067_v36, %v3229_v33 }
 0x3c7   :  { %v3283_v28 = vcombine.high %v3275_v50, %v3275_v50  ;;  %v3284_v58 = vcombine.high %v3282_v62, %v3282_v62  ;;  %v3291_v9 = vrot.slane %v3275_v50, %v3229_v33  ;;  %v3305_v52 = vrot.slane %v3282_v62, %v3229_v33 }
 0x3c9   :  { %v3298_v55 = vrot.slane %v3283_v28, %v3229_v33  ;;  %v3312_v60 = vrot.slane %v3284_v58, %v3229_v33  ;;  %v3321_v0 = vunpack.c.l.b16 %v3291_v9  ;;  %v3322_v5 = vunpack.c.h.b16 %v3291_v9 }
 0x3ca   :  { %v3325_v26 = vunpack.c.l.b16 %v3305_v52  ;;  %v3326_v14 = vunpack.c.h.b16 %v3305_v52 }
 0x3cb   :  { %v3323_v59 = vunpack.c.l.b16 %v3298_v55  ;;  %v3324_v47 = vunpack.c.h.b16 %v3298_v55  ;;  %v3327_v39 = vunpack.c.l.b16 %v3312_v60  ;;  %v3328_v2 = vunpack.c.h.b16 %v3312_v60 }
 0x3cc   :  { %v3329_v56 = vrot.slane %v3321_v0, 7  ;;  %v3332_v40 = vrot.slane %v3322_v5, 7  ;;  %v3338_v48 = vrot.slane %v3325_v26, 7  ;;  %v3340_v51 = vrot.slane %v3326_v14, 7 }
 0x3cd   :  { %v3334_v12 = vrot.slane %v3323_v59, 7  ;;  %v3336_v63 = vrot.slane %v3324_v47, 7  ;;  %v3342_v18 = vrot.slane %v3327_v39, 7  ;;  %v3344_v29 = vrot.slane %v3328_v2, 7 }
 0x3ce   :  { %v3331_v53 = vsel %vm3330_vm2, %v3329_v56, %v3313_v27  ;;  %v3333_v23 = vsel %vm3330_vm2, %v3332_v40, %v3314_v32  ;;  %v3339_v46 = vsel %vm3330_vm2, %v3338_v48, %v3317_v16  ;;  %v3341_v15 = vsel %vm3330_vm2, %v3340_v51, %v3318_v7 }
 0x3cf   :  { %v3335_v35 = vsel %vm3330_vm2, %v3334_v12, %v3315_v37  ;;  %v3337_v4 = vsel %vm3330_vm2, %v3336_v63, %v3316_v31  ;;  %v3343_v44 = vsel %vm3330_vm2, %v3342_v18, %v3319_v3  ;;  %v3345_v33 = vsel %vm3330_vm2, %v3344_v29, %v3320_v22 }
 0x3d0   :  { %v3346_v11 = vpack.c.b16 %v3333_v23, %v3331_v53  ;;  %v3347_v10 = vpack.c.b16 %v3337_v4, %v3335_v35  ;;  %v3348_v6 = vpack.c.b16 %v3341_v15, %v3339_v46  ;;  %v3349_v21 = vpack.c.b16 %v3345_v33, %v3343_v44 }
 0x3d2   :  { %v3356_v19 = vrot.slane %v3346_v11, %v5796_v8  ;;  %v3363_v34 = vrot.slane %v3347_v10, %v5796_v8  ;;  %v3370_v38 = vrot.slane %v3348_v6, %v5796_v8  ;;  %v3377_v54 = vrot.slane %v3349_v21, %v5796_v8 }
 0x3d4   :  { %v3378_v49 = vcombine.low %v3356_v19, %v3363_v34  ;;  %v3379_v57 = vcombine.low %v3370_v38, %v3377_v54 }
 0x3d6   :  { %v3386_v17 = vrot.slane %v3378_v49, %v5796_v8  ;;  %v3393_v13 = vrot.slane %v3379_v57, %v5796_v8 }
 0x3d8   :  { %v3394_v45 = vcombine.low %v3386_v17, %v3393_v13 }
 0x3da   :  { %3396 = vst [vmem:[%s5842_s7] sm:$0xff] %v3394_v45 }

// kernel: _lambda_.14
= control target key start
LH: loop header
LB: loop body
LE: loop exit
PB: predicated region body
PF: predicated region fallthrough
CT: control target
= control target key end

     0   :  { %s1228_s18 = smov 0   ;;  %s1459_s0 = inlined_call_operand.vmem [shape: bf16[64,384], index: 0, kind: input, shape index: {}]   ;;  %s1460_s1 = inlined_call_operand.vmem [shape: bf16[384,256], index: 1, kind: input, shape index: {}]   ;;  %s1461_s2 = inlined_call_operand.vmem [shape: f32[1,256], index: 2, kind: input, shape index: {}]   ;;  %s1462_s3 = inlined_call_operand.vmem [shape: bf16[256,128], index: 3, kind: input, shape index: {}]   ;;  %s1463_s4 = inlined_call_operand.vmem [shape: f32[1,128], index: 4, kind: input, shape index: {}]   ;;  %s1464_s5 = inlined_call_operand.vmem [shape: bf16[64,128], index: 5, kind: output, shape index: {}]  }
   0x1 LB: > { %s954_s19 = sadd.s32 4294967295, %s1195_s18   ;;  %p958_p0 = scmp.ge.s32.totalorder %s1195_s18, 1  ;;  %s1195_s18 = sphi %s1228_s18, %s15_s18  }
   0x2   : > { %p189_p1 = scmp.lt.s32.totalorder %s1195_s18, 3 }
   0x4   : > { %p190_p2 = pnand %p958_p0, %p189_p1 }
   0x5   : > { %s959_s25 = sshll.u32 (!%p190_p2), %s954_s19, 2 }
   0x6   : > { %193 = sbr.rel (%p190_p2) target bundleno = 500 (0x1f4), region = 40  ;;  %p219_p3 = scmp.lt.s32.totalorder (!%p190_p2), %s959_s25, 7 }
   0xb   : > { %v1093_v0 = vld [vmem:[%s1460_s1 + $0x74] ss:$8 sps:$4 sm:$0xff]   ;;  %v1095_v1 = vld [vmem:[%s1460_s1 + $0x70] ss:$8 sps:$4 sm:$0xff]   ;;  %v1197_v2 = vmov 0   ;;  %s1466_s25 = smov (!%p219_p3, %s959_s25), 7 }
   0xc   : > { %657 = vmatprep.mubr.bf16.mxu1 %v1197_v2  ;;  %572 = vmatprep.subr.bf16.mxu0 %v1093_v0  ;;  %v1096_v3 = vld [vmem:[%s1460_s1 + $0x64] ss:$8 sps:$4 sm:$0xff]   ;;  %v1098_v4 = vld [vmem:[%s1460_s1 + $0x60] ss:$8 sps:$4 sm:$0xff]   ;;  %v1099_v5 = vld [vmem:[%s1460_s1 + $0x54] ss:$8 sps:$4 sm:$0xff]  }
   0xd   : > { %573 = vmatpush1.bf16.msra.mxu0 %v1095_v1  ;;  %v1101_v6 = vld [vmem:[%s1460_s1 + $0x50] ss:$8 sps:$4 sm:$0xff]   ;;  %v1102_v7 = vld [vmem:[%s1460_s1 + $0x44] ss:$8 sps:$4 sm:$0xff]   ;;  %v1104_v8 = vld [vmem:[%s1460_s1 + $0x40] ss:$8 sps:$4 sm:$0xff]  }
   0xe   : > { %574 = vmatprep.subr.bf16.mxu0 %v1096_v3  ;;  %v1116_v9 = vld [vmem:[%s1460_s1 + $0x174] ss:$8 sps:$4 sm:$0xff]   ;;  %v1119_v10 = vld [vmem:[%s1460_s1 + $0x170] ss:$8 sps:$4 sm:$0xff]   ;;  %v1122_v12 = vld [vmem:[%s1460_s1 + $0x164] ss:$8 sps:$4 sm:$0xff]  }
   0xf   : > { %v1105_v11 = vld [vmem:[%s1460_s1 + $0x34] ss:$8 sps:$4 sm:$0xff]   ;;  %625 = vmatprep.subr.bf16.mxu1 %v1116_v9  ;;  %v1125_v13 = vld [vmem:[%s1460_s1 + $0x160] ss:$8 sps:$4 sm:$0xff]   ;;  %v1107_v14 = vld [vmem:[%s1460_s1 + $0x30] ss:$8 sps:$4 sm:$0xff]  }
  0x10   : > { %626 = vmatpush1.bf16.msra.mxu1 %v1119_v10  ;;  %v1108_v15 = vld [vmem:[%s1460_s1 + $0x24] ss:$8 sps:$4 sm:$0xff]   ;;  %v1128_v16 = vld [vmem:[%s1460_s1 + $0x154] ss:$8 sps:$4 sm:$0xff]   ;;  %v1131_v17 = vld [vmem:[%s1460_s1 + $0x150] ss:$8 sps:$4 sm:$0xff]  }
  0x11   : > { %575 = vmatpush1.bf16.msra.mxu0 %v1098_v4  ;;  %627 = vmatprep.subr.bf16.mxu1 %v1122_v12  ;;  %v1110_v18 = vld [vmem:[%s1460_s1 + $0x20] ss:$8 sps:$4 sm:$0xff]   ;;  %v1134_v19 = vld [vmem:[%s1460_s1 + $0x144] ss:$8 sps:$4 sm:$0xff]   ;;  %v1111_v20 = vld [vmem:[%s1460_s1 + $0x14] ss:$8 sps:$4 sm:$0xff]  }
  0x12   : > { %576 = vmatprep.subr.bf16.mxu0 %v1099_v5  ;;  %v1113_v21 = vld [vmem:[%s1460_s1 + $0x10] ss:$8 sps:$4 sm:$0xff]   ;;  %v1137_v22 = vld [vmem:[%s1460_s1 + $0x140] ss:$8 sps:$4 sm:$0xff]   ;;  %v1140_v23 = vld [vmem:[%s1460_s1 + $0x134] ss:$8 sps:$4 sm:$0xff]  }
  0x13   : > { %v1114_v24 = vld [vmem:[%s1460_s1 + $0x4] ss:$8 sps:$4 sm:$0xff]   ;;  %v1143_v25 = vld [vmem:[%s1460_s1 + $0x130] ss:$8 sps:$4 sm:$0xff]   ;;  %s1083_s24 = smul.u32 12, %s1466_s25  ;;  %s962_s20 = sshll.u32 %s1466_s25, 2 }
  0x14   : > { %628 = vmatpush1.bf16.msra.mxu1 %v1125_v13  ;;  %v1118_v26 = vld [vmem:[%s1460_s1] ss:$8 sps:$4 sm:$0xff]   ;;  %v1146_v27 = vld [vmem:[%s1460_s1 + $0x124] ss:$8 sps:$4 sm:$0xff]   ;;  %v1120_v28 = vld [vmem:[%s1460_s1 + $0xf4] ss:$8 sps:$4 sm:$0xff]   ;;  %s229_s23 = scalar_lea.vmem %s1464_s5, %s962_s20 }
  0x15   : > { %577 = vmatpush1.bf16.msra.mxu0 %v1101_v6  ;;  %629 = vmatprep.subr.bf16.mxu1 %v1128_v16  ;;  %v1124_v29 = vld [vmem:[%s1460_s1 + $0xf0] ss:$8 sps:$4 sm:$0xff]   ;;  %v1149_v30 = vld [vmem:[%s1460_s1 + $0x120] ss:$8 sps:$4 sm:$0xff]   ;;  %s1335_s12 = scalar_lea.vmem %s1459_s0, %s1083_s24  ;;  %v1152_v31 = vld [vmem:[%s1460_s1 + $0x114] ss:$8 sps:$4 sm:$0xff]  }
  0x16   : > { %578 = vmatprep.subr.bf16.mxu0 %v1102_v7  ;;  %v1126_v32 = vld [vmem:[%s1460_s1 + $0xe4] ss:$8 sps:$4 sm:$0xff]   ;;  %v1130_v33 = vld [vmem:[%s1460_s1 + $0xe0] ss:$8 sps:$4 sm:$0xff]   ;;  %v1155_v34 = vld [vmem:[%s1460_s1 + $0x110] ss:$8 sps:$4 sm:$0xff]  }
  0x17   : > { %v1168_v35 = vld [vmem:[%s1335_s12 + $0x4] ss:$12 sps:$4 sm:$0xff]   ;;  %v1132_v37 = vld [vmem:[%s1460_s1 + $0xd4] ss:$8 sps:$4 sm:$0xff]   ;;  %v1161_v40 = vld [vmem:[%s1460_s1 + $0x100] ss:$8 sps:$4 sm:$0xff]  }
  0x18   : > { %630 = vmatpush1.bf16.msra.mxu1 %v1131_v17  ;;  %v1158_v36 = vld [vmem:[%s1460_s1 + $0x104] ss:$8 sps:$4 sm:$0xff]   ;;  %604 = vmatprep.mubr.bf16.mxu0 %v1168_v35  ;;  %v1136_v38 = vld [vmem:[%s1460_s1 + $0xd0] ss:$8 sps:$4 sm:$0xff]   ;;  %v1164_v42 = vld [vmem:[%s1335_s12 + $0x8] ss:$12 sps:$4 sm:$0xff]  }
  0x19   : > { %579 = vmatpush1.bf16.msra.mxu0 %v1104_v8  ;;  %631 = vmatprep.subr.bf16.mxu1 %v1134_v19  ;;  %v1138_v39 = vld [vmem:[%s1460_s1 + $0xc4] ss:$8 sps:$4 sm:$0xff]   ;;  %v1173_v41 = vld [vmem:[%s1462_s3 + $0x78] sm:$0xff]   ;;  %v1142_v43 = vld [vmem:[%s1460_s1 + $0xc0] ss:$8 sps:$4 sm:$0xff]   ;;  %v290_v8 = vlaneseq }
  0x1a   : > { %580 = vmatprep.subr.bf16.mxu0 %v1105_v11  ;;  %v1174_v44 = vld [vmem:[%s1462_s3 + $0x38] sm:$0xff]   ;;  %v1175_v46 = vld [vmem:[%s1462_s3 + $0x70] sm:$0xff]   ;;  %v1177_v49 = vld [vmem:[%s1462_s3 + $0x68] sm:$0xff]  }
  0x1b   : > { %v1144_v45 = vld [vmem:[%s1460_s1 + $0xb4] ss:$8 sps:$4 sm:$0xff]   ;;  %v1148_v48 = vld [vmem:[%s1460_s1 + $0xb0] ss:$8 sps:$4 sm:$0xff]   ;;  %v1150_v50 = vld [vmem:[%s1460_s1 + $0xa4] ss:$8 sps:$4 sm:$0xff]  }
  0x1c   : > { %632 = vmatpush1.bf16.msra.mxu1 %v1137_v22  ;;  %v1176_v47 = vld [vmem:[%s1462_s3 + $0x30] sm:$0xff]   ;;  %v1169_v51 = vld [vmem:[%s1335_s12 + $0x20] ss:$12 sps:$4 sm:$0xff]   ;;  %v1170_v59 = vld [vmem:[%s1335_s12 + $0x1c] ss:$12 sps:$4 sm:$0xff]   ;;  %v291_v10 = vshrl.u32 %v290_v8, 7 }
  0x1d   : > { %581 = vmatpush1.bf16.msra.mxu0 %v1107_v14  ;;  %633 = vmatprep.subr.bf16.mxu1 %v1140_v23  ;;  %v1178_v52 = vld [vmem:[%s1462_s3 + $0x28] sm:$0xff]   ;;  %v1156_v54 = vld [vmem:[%s1460_s1 + $0x94] ss:$8 sps:$4 sm:$0xff]   ;;  %v1160_v55 = vld [vmem:[%s1460_s1 + $0x90] ss:$8 sps:$4 sm:$0xff]  }
  0x1e   : > { %582 = vmatprep.subr.bf16.mxu0 %v1108_v15  ;;  %v1154_v53 = vld [vmem:[%s1460_s1 + $0xa0] ss:$8 sps:$4 sm:$0xff]   ;;  %v1162_v56 = vld [vmem:[%s1460_s1 + $0x84] ss:$8 sps:$4 sm:$0xff]   ;;  %v1181_v63 = vld [vmem:[%s1462_s3 + $0x58] sm:$0xff]   ;;  %v296_v11 = vsub.s32 1, %v291_v10 }
  0x1f   : > { %v1165_v57 = vld [vmem:[%s1460_s1 + $0x80] ss:$8 sps:$4 sm:$0xff]   ;;  %v1172_v60 = vld [vmem:[%s1335_s12 + $0x18] ss:$12 sps:$4 sm:$0xff]   ;;  %v1183_v1 = vld [vmem:[%s1462_s3 + $0x50] sm:$0xff]   ;;  %v292_v12 = vsub.s32 0, %v291_v10 }
  0x20   : > { %634 = vmatpush1.bf16.msra.mxu1 %v1143_v25  ;;  %v1166_v58 = vld [vmem:[%s1335_s12] ss:$12 sps:$4 sm:$0xff]   ;;  %v1182_v0 = vld [vmem:[%s1462_s3 + $0x18] sm:$0xff]  }
  0x21   : > { %583 = vmatpush1.bf16.msra.mxu0 %v1110_v18  ;;  %635 = vmatprep.subr.bf16.mxu1 %v1146_v27  ;;  %v1179_v61 = vld [vmem:[%s1462_s3 + $0x60] sm:$0xff]   ;;  %v1185_v3 = vld [vmem:[%s1462_s3 + $0x48] sm:$0xff]  }
  0x22   : > { %584 = vmatprep.subr.bf16.mxu0 %v1111_v20  ;;  %v1180_v62 = vld [vmem:[%s1462_s3 + $0x20] sm:$0xff]   ;;  %v1186_v4 = vld [vmem:[%s1462_s3 + $0x8] sm:$0xff]  }
  0x23   : > { %v1187_v5 = vld [vmem:[%s1462_s3 + $0x40] sm:$0xff]  }
  0x24   : > { %636 = vmatpush1.bf16.msra.mxu1 %v1149_v30  ;;  %v1188_v6 = vld [vmem:[%s1462_s3] sm:$0xff]  }
  0x25   : > { %585 = vmatpush1.bf16.msra.mxu0 %v1113_v21  ;;  %637 = vmatprep.subr.bf16.mxu1 %v1152_v31  ;;  %v288_v14 = vld [vmem:[%s1461_s2] sm:$0x3] }
  0x26   : > { %586 = vmatprep.subr.bf16.mxu0 %v1114_v24  ;;  %v297_v15 = vrot.slane %v288_v14, %v296_v11  ;;  %v293_v16 = vrot.slane %v288_v14, %v292_v12 }
  0x28   : > { %638 = vmatpush1.bf16.msra.mxu1 %v1155_v34 }
  0x29   : > { %587 = vmatpush1.bf16.msra.mxu0 %v1118_v26  ;;  %639 = vmatprep.subr.bf16.mxu1 %v1158_v36 }
  0x2a   : > { %588 = vmatprep.subr.bf16.mxu0 %v1120_v28 }
  0x2c   : > { %640 = vmatpush1.bf16.msra.mxu1 %v1161_v40 }
  0x2d   : > { %589 = vmatpush2.bf16.msra.mxu0 %v1124_v29  ;;  %1055 = vmatprep.subr.bf16.mxu1 %v1173_v41 }
  0x2e   : > { %590 = vmatprep.subr.bf16.mxu0 %v1126_v32 }
  0x2f   : > { %658 = vmatmul.mubr.bf16.vlgmr.msra.gmra.mxu1 %v1164_v42 }
  0x30   : > { %667 = vmatprep.mubr.bf16.mxu1 %v1197_v2  ;;  %1056 = vmatpush3.bf16.msra.mxu1 %v1174_v44  ;;  %v1184_v2 = vld [vmem:[%s1462_s3 + $0x10] sm:$0xff]  }
  0x31   : > { %591 = vmatpush2.bf16.msra.mxu0 %v1130_v33  ;;  %1057 = vmatprep.subr.bf16.mxu1 %v1175_v46 }
  0x32   : > { %592 = vmatprep.subr.bf16.mxu0 %v1132_v37 }
  0x34   : > { %1058 = vmatpush3.bf16.msra.mxu1 %v1176_v47 }
  0x35   : > { %593 = vmatpush2.bf16.msra.mxu0 %v1136_v38  ;;  %1059 = vmatprep.subr.bf16.mxu1 %v1177_v49 }
  0x36   : > { %594 = vmatprep.subr.bf16.mxu0 %v1138_v39 }
  0x37   : > { %668 = vmatmul.mubr.bf16.gmra.mxu1 %v1169_v51 }
  0x38   : > { %1060 = vmatpush3.bf16.msra.mxu1 %v1178_v52 }
  0x39   : > { %595 = vmatpush2.bf16.msra.mxu0 %v1142_v43  ;;  %1061 = vmatprep.subr.bf16.mxu1 %v1179_v61  ;;  %v1017_v61 = vld [vmem:[%s1463_s4] ss:$0 sm:$0xff] }
  0x3a   : > { %596 = vmatprep.subr.bf16.mxu0 %v1144_v45 }
  0x3c   : > { %1062 = vmatpush3.bf16.msra.mxu1 %v1180_v62 }
  0x3d   : > { %597 = vmatpush2.bf16.msra.mxu0 %v1148_v48  ;;  %1063 = vmatprep.subr.bf16.mxu1 %v1181_v63 }
  0x3e   : > { %598 = vmatprep.subr.bf16.mxu0 %v1150_v50 }
  0x40   : > { %1064 = vmatpush3.bf16.msra.mxu1 %v1182_v0 }
  0x41   : > { %599 = vmatpush2.bf16.msra.mxu0 %v1154_v53  ;;  %1065 = vmatprep.subr.bf16.mxu1 %v1183_v1 }
  0x42   : > { %600 = vmatprep.subr.bf16.mxu0 %v1156_v54 }
  0x44   : > { %1066 = vmatpush3.bf16.msra.mxu1 %v1184_v2 }
  0x45   : > { %601 = vmatpush2.bf16.msra.mxu0 %v1160_v55  ;;  %1067 = vmatprep.subr.bf16.mxu1 %v1185_v3 }
  0x46   : > { %602 = vmatprep.subr.bf16.mxu0 %v1162_v56 }
  0x48   : > { %1068 = vmatpush3.bf16.msra.mxu1 %v1186_v4 }
  0x49   : > { %603 = vmatpush2.bf16.msra.mxu0 %v1165_v57  ;;  %1069 = vmatprep.subr.bf16.mxu1 %v1187_v5 }
  0x4c   : > { %605 = vmatmul.mubr.bf16.vlgmr.msra.gmra.mxu0 %v1166_v58  ;;  %1070 = vmatpush3.bf16.msra.mxu1 %v1188_v6 }
  0x4d   : > { %614 = vmatprep.mubr.bf16.mxu0 %v1170_v59 }
  0x54   : > { %615 = vmatmul.mubr.bf16.gmra.mxu0 %v1172_v60 }
  0xef   : > { %v659_v7 = vpop.f32.mrf.mxu1 }
  0xf1   : > { %v661_v9 = vpop.f32.mrf.mxu1 }
  0xf3   : > { %v663_v13 = vpop.f32.mrf.mxu1 }
  0xf5   : > { %v665_v18 = vpop.f32.mrf.mxu1 }
  0xf7   : > { %v669_v23 = vpop.f32.mrf.mxu1 }
  0xf9   : > { %v671_v30 = vpop.f32.mrf.mxu1 }
  0xfb   : > { %v673_v40 = vpop.f32.mrf.mxu1 }
  0xfd   : > { %v675_v50 = vpop.f32.mrf.mxu1 }
 0x10c   : > { %v606_v17 = vpop.f32.mrf.mxu0 }
 0x10d   : > { %v607_v21 = vadd.f32 %v606_v17, %v293_v16 }
 0x10e   : > { %v608_v19 = vpop.f32.mrf.mxu0 }
 0x10f   : > { %v609_v20 = vadd.f32 %v608_v19, %v297_v15  ;;  %v660_v29 = vadd.f32 %v659_v7, %v607_v21 }
 0x110   : > { %v610_v22 = vpop.f32.mrf.mxu0 }
 0x111   : > { %v611_v24 = vadd.f32 %v610_v22, %v293_v16  ;;  %v662_v26 = vadd.f32 %v661_v9, %v609_v20  ;;  %v678_v38 = vmax.f32 %v660_v29, 0.0 }
 0x112   : > { %v612_v25 = vpop.f32.mrf.mxu0 }
 0x113   : > { %v664_v27 = vadd.f32 %v663_v13, %v611_v24  ;;  %v613_v28 = vadd.f32 %v612_v25, %v297_v15  ;;  %v679_v35 = vmax.f32 %v662_v26, 0.0 }
 0x114   : > { %v616_v31 = vpop.f32.mrf.mxu0 }
 0x115   : > { %v666_v32 = vadd.f32 %v665_v18, %v613_v28  ;;  %v680_v33 = vmax.f32 %v664_v27, 0.0  ;;  %v617_v39 = vadd.f32 %v616_v31, %v293_v16 }
 0x116   : > { %v618_v34 = vpop.f32.mrf.mxu0 }
 0x117   : > { %v681_v36 = vmax.f32 %v666_v32, 0.0  ;;  %v619_v37 = vadd.f32 %v618_v34, %v297_v15  ;;  %v686_v44 = vpack.c.bf16 %v680_v33, %v678_v38  ;;  %v670_v49 = vadd.f32 %v669_v23, %v617_v39 }
 0x118   : > { %v620_v41 = vpop.f32.mrf.mxu0 }
 0x119   : > { %v621_v42 = vadd.f32 %v620_v41, %v293_v16  ;;  %v687_v43 = vpack.c.bf16 %v681_v36, %v679_v35  ;;  %v672_v46 = vadd.f32 %v671_v30, %v619_v37  ;;  %v682_v55 = vmax.f32 %v670_v49, 0.0 }
 0x11a   : > { %v622_v45 = vpop.f32.mrf.mxu0 }
 0x11b   : > { %v674_v47 = vadd.f32 %v673_v40, %v621_v42  ;;  %v623_v48 = vadd.f32 %v622_v45, %v297_v15  ;;  %857 = vmatprep.mubr.bf16.mxu1 %v687_v43  ;;  %v683_v53 = vmax.f32 %v672_v46, 0.0 }
 0x11c   : > { %858 = vmatmul.mubr.bf16.vlgmr.msra.gmra.mxu1 %v686_v44 }
 0x11d   : > { %v676_v51 = vadd.f32 %v675_v50, %v623_v48  ;;  %v684_v52 = vmax.f32 %v674_v47, 0.0 }
 0x11f   : > { %v685_v54 = vmax.f32 %v676_v51, 0.0  ;;  %v688_v57 = vpack.c.bf16 %v684_v52, %v682_v55 }
 0x121   : > { %v689_v56 = vpack.c.bf16 %v685_v54, %v683_v53 }
 0x123   : > { %865 = vmatprep.mubr.bf16.mxu1 %v689_v56 }
 0x124   : > { %866 = vmatmul.mubr.bf16.gmra.mxu1 %v688_v57 }
 0x1dc   : > { %v1071_v58 = vpop.f32.mrf.mxu1 }
 0x1de   : > { %v1072_v59 = vpop.f32.mrf.mxu1 }
 0x1df   : > { %v1073_v60 = vadd.f32 %v1072_v59, %v1071_v58 }
 0x1e0   : > { %v1074_v62 = vpop.f32.mrf.mxu1 }
 0x1e1   : > { %v860_v0 = vadd.f32 %v1073_v60, %v1017_v61 }
 0x1e2   : > { %v1075_v63 = vpop.f32.mrf.mxu1 }
 0x1e3   : > { %v1076_v1 = vadd.f32 %v1075_v63, %v1074_v62  ;;  %v874_v5 = vmax.f32 %v860_v0, 0.0 }
 0x1e4   : > { %v1077_v2 = vpop.f32.mrf.mxu1 }
 0x1e5   : > { %v863_v3 = vadd.f32 %v1076_v1, %v1017_v61 }
 0x1e6   : > { %v1078_v4 = vpop.f32.mrf.mxu1 }
 0x1e7   : > { %v875_v6 = vmax.f32 %v863_v3, 0.0  ;;  %v1079_v7 = vadd.f32 %v1078_v4, %v1077_v2 }
 0x1e8   : > { %v1080_v8 = vpop.f32.mrf.mxu1 }
 0x1e9   : > { %v1047_v9 = vpack.c.bf16 %v875_v6, %v874_v5  ;;  %v868_v11 = vadd.f32 %v1079_v7, %v1017_v61 }
 0x1ea   : > { %v1081_v10 = vpop.f32.mrf.mxu1 }
 0x1eb   : > { %1048 = vst [vmem:[%s229_s23] sm:$0xff] %v1047_v9   ;;  %v1082_v12 = vadd.f32 %v1081_v10, %v1080_v8  ;;  %v876_v14 = vmax.f32 %v868_v11, 0.0 }
 0x1ed   : > { %v871_v13 = vadd.f32 %v1082_v12, %v1017_v61 }
 0x1ef   : > { %v877_v15 = vmax.f32 %v871_v13, 0.0 }
 0x1f1   : > { %v1052_v16 = vpack.c.bf16 %v877_v15, %v876_v14 }
 0x1f3   : > { %1054 = vst [vmem:[%s229_s23 + $0x8] sm:$0xff] %v1052_v16  }
 0x1f4 PF: > { %s15_s18 = sadd.s32 1, %s1195_s18  }
 0x1f5   : > { %p12_p4 = scmp.ge.s32.totalorder %s15_s18, 4  }
 0x1f7   :  { %14 = sbr.rel (!%p12_p4) target bundleno = 1 (0x1), region = 70 }

// kernel: neg.20
= control target key start
LH: loop header
LB: loop body
LE: loop exit
PB: predicated region body
PF: predicated region fallthrough
CT: control target
= control target key end

     0   :  { %s136_s0 = inlined_call_operand.vmem [shape: f32[2,64,32], index: 0, kind: input, shape index: {}]   ;;  %s137_s1 = inlined_call_operand.vmem [shape: f32[2,64,32], index: 1, kind: output, shape index: {}]  }
   0x1   :  { %v2_v0 = vld [vmem:[%s136_s0] sm:$0xff]  ;;  %v66_v2 = vld [vmem:[%s136_s0 + $0x8] sm:$0xff]  ;;  %v70_v7 = vld [vmem:[%s136_s0 + $0x10] sm:$0xff] }
   0x2   :  { %v64_v1 = vld [vmem:[%s136_s0 + $0x20] sm:$0xff]  ;;  %v5_v3 = vxor.u32 2147483648, %v2_v0  ;;  %v20_v5 = vxor.u32 2147483648, %v66_v2  ;;  %v68_v6 = vld [vmem:[%s136_s0 + $0x28] sm:$0xff]  ;;  %v72_v8 = vld [vmem:[%s136_s0 + $0x30] sm:$0xff]  ;;  %v36_v10 = vxor.u32 2147483648, %v70_v7 }
   0x3   :  { %v12_v4 = vxor.u32 2147483648, %v64_v1  ;;  %v28_v9 = vxor.u32 2147483648, %v68_v6  ;;  %v44_v11 = vxor.u32 2147483648, %v72_v8  ;;  %v74_v12 = vld [vmem:[%s136_s0 + $0x18] sm:$0xff] }
   0x4   :  { %v76_v13 = vld [vmem:[%s136_s0 + $0x38] sm:$0xff]  ;;  %7 = vst [vmem:[%s137_s1] sm:$0xff] %v5_v3  ;;  %67 = vst [vmem:[%s137_s1 + $0x8] sm:$0xff] %v20_v5  ;;  %v52_v14 = vxor.u32 2147483648, %v74_v12 }
   0x5   :  { %65 = vst [vmem:[%s137_s1 + $0x20] sm:$0xff] %v12_v4  ;;  %v60_v15 = vxor.u32 2147483648, %v76_v13  ;;  %69 = vst [vmem:[%s137_s1 + $0x28] sm:$0xff] %v28_v9 }
   0x6   :  { %71 = vst [vmem:[%s137_s1 + $0x10] sm:$0xff] %v36_v10  ;;  %73 = vst [vmem:[%s137_s1 + $0x30] sm:$0xff] %v44_v11 }
   0x7   :  { %75 = vst [vmem:[%s137_s1 + $0x18] sm:$0xff] %v52_v14  ;;  %77 = vst [vmem:[%s137_s1 + $0x38] sm:$0xff] %v60_v15 }

// kernel: _lambda_.15
= control target key start
LH: loop header
LB: loop body
LE: loop exit
PB: predicated region body
PF: predicated region fallthrough
CT: control target
= control target key end

     0   :  { %s911_s18 = smov 0   ;;  %s1012_s0 = inlined_call_operand.vmem [shape: bf16[128,192], index: 0, kind: input, shape index: {}]   ;;  %s1013_s1 = inlined_call_operand.vmem [shape: bf16[192,128], index: 1, kind: input, shape index: {}]   ;;  %s1014_s2 = inlined_call_operand.vmem [shape: f32[1,128], index: 2, kind: input, shape index: {}]   ;;  %s1015_s3 = inlined_call_operand.vmem [shape: bf16[128,128], index: 3, kind: input, shape index: {}]   ;;  %s1016_s4 = inlined_call_operand.vmem [shape: f32[1,128], index: 4, kind: input, shape index: {}]   ;;  %s1017_s5 = inlined_call_operand.vmem [shape: bf16[128,128], index: 5, kind: output, shape index: {}]  }
   0x1 LB: > { %s709_s19 = sadd.s32 4294967295, %s878_s18   ;;  %p713_p0 = scmp.ge.s32.totalorder %s878_s18, 1  ;;  %s878_s18 = sphi %s911_s18, %s15_s18  }
   0x2   : > { %p189_p1 = scmp.lt.s32.totalorder %s878_s18, 3 }
   0x4   : > { %p190_p2 = pnand %p713_p0, %p189_p1 }
   0x5   : > { %s714_s22 = sshll.u32 (!%p190_p2), %s709_s19, 3 }
   0x6   : > { %193 = sbr.rel (%p190_p2) target bundleno = 493 (0x1ed), region = 40  ;;  %p219_p3 = scmp.lt.s32.totalorder (!%p190_p2), %s714_s22, 15 }
   0xb   : > { %v840_v0 = vld [vmem:[%s1013_s1 + $0x38] sm:$0xff]   ;;  %v880_v1 = vmov 0   ;;  %v841_v2 = vld [vmem:[%s1013_s1 + $0x30] sm:$0xff]   ;;  %s1019_s22 = smov (!%p219_p3, %s714_s22), 15  ;;  %v842_v3 = vld [vmem:[%s1013_s1 + $0x28] sm:$0xff]   ;;  %vm379_vm0 = vcmask 523264  }
   0xc   : > { %392 = vmatprep.subr.bf16.mxu0 %v880_v1  ;;  %s763_s27 = sshll.u32 %s1019_s22, 3  ;;  %v843_v4 = vld [vmem:[%s1013_s1 + $0x20] sm:$0xff]   ;;  %v844_v6 = vld [vmem:[%s1013_s1 + $0x18] sm:$0xff]   ;;  %v845_v7 = vld [vmem:[%s1013_s1 + $0x10] sm:$0xff]   ;;  %s718_s23 = sshll.u32 %s1019_s22, 2 }
   0xd   : > { %393 = vmatpush1.bf16.msra.mxu0 %v840_v0  ;;  %s937_s7 = scalar_lea.vmem %s1012_s0, %s763_s27  ;;  %v864_v8 = vld [vmem:[%s1015_s3 + $0x38] sm:$0xff]   ;;  %v865_v9 = vld [vmem:[%s1015_s3 + $0x30] sm:$0xff]   ;;  %v846_v10 = vld [vmem:[%s1013_s1 + $0x8] sm:$0xff]   ;;  %s229_s26 = scalar_lea.vmem %s1017_s5, %s718_s23 }
   0xe   : > { %394 = vmatprep.subr.bf16.mxu0 %v880_v1  ;;  %v854_v5 = vld [vmem:[%s937_s7 + $0x4] ss:$8 sps:$4 sm:$0xff]   ;;  %807 = vmatprep.subr.bf16.mxu1 %v864_v8  ;;  %v848_v14 = vld [vmem:[%s1013_s1 + $0x58] sm:$0xff]   ;;  %v849_v15 = vld [vmem:[%s1013_s1 + $0x50] sm:$0xff]  }
   0xf   : > { %740 = vmatprep.mubr.msk.bf16.mxu0 %vm379_vm0, %v854_v5  ;;  %808 = vmatpush3.bf16.msra.mxu1 %v864_v8  ;;  %v866_v11 = vld [vmem:[%s1015_s3 + $0x28] sm:$0xff]   ;;  %v847_v12 = vld [vmem:[%s1013_s1] sm:$0xff]   ;;  %v855_v19 = vld [vmem:[%s937_s7 + $0x14] ss:$8 sps:$4 sm:$0xff]  }
  0x10   : > { %809 = vmatprep.subr.bf16.mxu1 %v865_v9  ;;  %v867_v13 = vld [vmem:[%s1015_s3 + $0x20] sm:$0xff]   ;;  %v850_v16 = vld [vmem:[%s1013_s1 + $0x48] sm:$0xff]   ;;  %v857_v20 = vld [vmem:[%s937_s7 + $0x10] ss:$8 sps:$4 sm:$0xff]  }
  0x11   : > { %395 = vmatpush1.bf16.msra.mxu0 %v841_v2  ;;  %v851_v17 = vld [vmem:[%s1013_s1 + $0x40] sm:$0xff]   ;;  %v861_v23 = vld [vmem:[%s937_s7 + $0x34] ss:$8 sps:$4 sm:$0xff]   ;;  %v863_v24 = vld [vmem:[%s937_s7 + $0x30] ss:$8 sps:$4 sm:$0xff]  }
  0x12   : > { %396 = vmatprep.subr.bf16.mxu0 %v880_v1  ;;  %v852_v18 = vld [vmem:[%s937_s7] ss:$8 sps:$4 sm:$0xff]   ;;  %v858_v21 = vld [vmem:[%s937_s7 + $0x24] ss:$8 sps:$4 sm:$0xff]   ;;  %v868_v25 = vld [vmem:[%s1015_s3 + $0x18] sm:$0xff]  }
  0x13   : > { %810 = vmatpush3.bf16.msra.mxu1 %v865_v9  ;;  %v860_v22 = vld [vmem:[%s937_s7 + $0x20] ss:$8 sps:$4 sm:$0xff]   ;;  %v869_v26 = vld [vmem:[%s1015_s3 + $0x10] sm:$0xff]  }
  0x14   : > { %811 = vmatprep.subr.bf16.mxu1 %v866_v11  ;;  %v870_v27 = vld [vmem:[%s1015_s3 + $0x8] sm:$0xff]   ;;  %v871_v28 = vld [vmem:[%s1015_s3] sm:$0xff]  }
  0x15   : > { %397 = vmatpush1.bf16.msra.mxu0 %v842_v3  ;;  %v719_v29 = vld [vmem:[%s1014_s2] ss:$0 sm:$0xff] }
  0x16   : > { %398 = vmatprep.subr.bf16.mxu0 %v880_v1  ;;  %v744_v3 = vld [vmem:[%s1016_s4] ss:$0 sm:$0xff] }
  0x17   : > { %812 = vmatpush3.bf16.msra.mxu1 %v866_v11 }
  0x18   : > { %813 = vmatprep.subr.bf16.mxu1 %v867_v13 }
  0x19   : > { %399 = vmatpush1.bf16.msra.mxu0 %v843_v4 }
  0x1a   : > { %400 = vmatprep.subr.bf16.mxu0 %v880_v1 }
  0x1b   : > { %814 = vmatpush3.bf16.msra.mxu1 %v867_v13 }
  0x1c   : > { %815 = vmatprep.subr.bf16.mxu1 %v868_v25 }
  0x1d   : > { %401 = vmatpush1.bf16.msra.mxu0 %v844_v6 }
  0x1e   : > { %402 = vmatprep.subr.bf16.mxu0 %v880_v1 }
  0x1f   : > { %816 = vmatpush3.bf16.msra.mxu1 %v868_v25 }
  0x20   : > { %817 = vmatprep.subr.bf16.mxu1 %v869_v26 }
  0x21   : > { %403 = vmatpush1.bf16.msra.mxu0 %v845_v7 }
  0x22   : > { %404 = vmatprep.subr.bf16.mxu0 %v880_v1 }
  0x23   : > { %818 = vmatpush3.bf16.msra.mxu1 %v869_v26 }
  0x24   : > { %819 = vmatprep.subr.bf16.mxu1 %v870_v27 }
  0x25   : > { %405 = vmatpush1.bf16.msra.mxu0 %v846_v10 }
  0x26   : > { %406 = vmatprep.subr.bf16.mxu0 %v880_v1 }
  0x27   : > { %820 = vmatpush3.bf16.msra.mxu1 %v870_v27 }
  0x28   : > { %821 = vmatprep.subr.bf16.mxu1 %v871_v28 }
  0x29   : > { %407 = vmatpush1.bf16.msra.mxu0 %v847_v12 }
  0x2a   : > { %416 = vmatprep.subr.bf16.mxu0 %v880_v1 }
  0x2b   : > { %822 = vmatpush3.bf16.msra.mxu1 %v871_v28 }
  0x2d   : > { %417 = vmatpush2.bf16.msra.mxu0 %v848_v14 }
  0x2e   : > { %418 = vmatprep.subr.bf16.mxu0 %v880_v1 }
  0x31   : > { %419 = vmatpush2.bf16.msra.mxu0 %v849_v15 }
  0x32   : > { %420 = vmatprep.subr.bf16.mxu0 %v880_v1 }
  0x35   : > { %421 = vmatpush2.bf16.msra.mxu0 %v850_v16 }
  0x36   : > { %422 = vmatprep.subr.bf16.mxu0 %v880_v1 }
  0x39   : > { %423 = vmatpush2.bf16.msra.mxu0 %v851_v17 }
  0x3c   : > { %425 = vmatmul.mubr.bf16.vlgmr.msra.gmra.mxu0 %v852_v18 }
  0x3d   : > { %741 = vmatprep.mubr.msk.bf16.mxu0 %vm379_vm0, %v855_v19 }
  0x44   : > { %433 = vmatmul.mubr.bf16.gmra.mxu0 %v857_v20 }
  0x45   : > { %742 = vmatprep.mubr.msk.bf16.mxu0 %vm379_vm0, %v858_v21 }
  0x4c   : > { %441 = vmatmul.mubr.bf16.gmra.mxu0 %v860_v22 }
  0x4d   : > { %743 = vmatprep.mubr.msk.bf16.mxu0 %vm379_vm0, %v861_v23 }
  0x54   : > { %449 = vmatmul.mubr.bf16.gmra.mxu0 %v863_v24 }
  0xfc   : > { %v426_v30 = vpop.f32.mrf.mxu0 }
  0xfd   : > { %v427_v32 = vadd.f32 %v719_v29, %v426_v30 }
  0xfe   : > { %v428_v31 = vpop.f32.mrf.mxu0 }
  0xff   : > { %v457_v36 = vmax.f32 %v427_v32, 0.0 }
 0x100   : > { %v429_v33 = vpop.f32.mrf.mxu0 }
 0x101   : > { %v430_v34 = vadd.f32 %v719_v29, %v429_v33 }
 0x102   : > { %v431_v35 = vpop.f32.mrf.mxu0 }
 0x103   : > { %v458_v37 = vmax.f32 %v430_v34, 0.0 }
 0x104   : > { %v434_v38 = vpop.f32.mrf.mxu0 }
 0x105   : > { %v465_v39 = vpack.c.bf16 %v458_v37, %v457_v36  ;;  %v435_v41 = vadd.f32 %v719_v29, %v434_v38 }
 0x106   : > { %v436_v40 = vpop.f32.mrf.mxu0 }
 0x107   : > { %823 = vmatprep.mubr.bf16.mxu1 %v465_v39  ;;  %v459_v45 = vmax.f32 %v435_v41, 0.0 }
 0x108   : > { %v437_v42 = vpop.f32.mrf.mxu0 }
 0x109   : > { %v438_v43 = vadd.f32 %v719_v29, %v437_v42 }
 0x10a   : > { %v439_v44 = vpop.f32.mrf.mxu0 }
 0x10b   : > { %v460_v46 = vmax.f32 %v438_v43, 0.0 }
 0x10c   : > { %v442_v47 = vpop.f32.mrf.mxu0 }
 0x10d   : > { %v466_v48 = vpack.c.bf16 %v460_v46, %v459_v45  ;;  %v443_v50 = vadd.f32 %v719_v29, %v442_v47 }
 0x10e   : > { %v444_v49 = vpop.f32.mrf.mxu0 }
 0x10f   : > { %824 = vmatmul.mubr.bf16.vlgmr.msra.gmra.mxu1 %v466_v48  ;;  %v461_v54 = vmax.f32 %v443_v50, 0.0 }
 0x110   : > { %v445_v51 = vpop.f32.mrf.mxu0 }
 0x111   : > { %v446_v52 = vadd.f32 %v719_v29, %v445_v51 }
 0x112   : > { %v447_v53 = vpop.f32.mrf.mxu0 }
 0x113   : > { %v462_v55 = vmax.f32 %v446_v52, 0.0 }
 0x114   : > { %v450_v56 = vpop.f32.mrf.mxu0 }
 0x115   : > { %v467_v57 = vpack.c.bf16 %v462_v55, %v461_v54  ;;  %v451_v59 = vadd.f32 %v719_v29, %v450_v56 }
 0x116   : > { %v452_v58 = vpop.f32.mrf.mxu0 }
 0x117   : > { %827 = vmatprep.mubr.bf16.mxu1 %v467_v57  ;;  %v463_v63 = vmax.f32 %v451_v59, 0.0 }
 0x118   : > { %v453_v60 = vpop.f32.mrf.mxu0 }
 0x119   : > { %v454_v61 = vadd.f32 %v719_v29, %v453_v60 }
 0x11a   : > { %v455_v62 = vpop.f32.mrf.mxu0 }
 0x11b   : > { %v464_v0 = vmax.f32 %v454_v61, 0.0 }
 0x11d   : > { %v468_v1 = vpack.c.bf16 %v464_v0, %v463_v63 }
 0x11f   : > { %828 = vmatmul.mubr.bf16.gmra.mxu1 %v468_v1 }
 0x1cf   : > { %v825_v2 = vpop.f32.mrf.mxu1 }
 0x1d0   : > { %v583_v5 = vadd.f32 %v825_v2, %v744_v3 }
 0x1d1   : > { %v574_v4 = vpop.f32.mrf.mxu1 }
 0x1d2   : > { %v575_v7 = vadd.f32 %v744_v3, %v574_v4  ;;  %v607_v10 = vmax.f32 %v583_v5, 0.0 }
 0x1d3   : > { %v826_v6 = vpop.f32.mrf.mxu1 }
 0x1d4   : > { %v586_v8 = vadd.f32 %v826_v6, %v744_v3  ;;  %v605_v13 = vmax.f32 %v575_v7, 0.0 }
 0x1d5   : > { %v577_v9 = vpop.f32.mrf.mxu1 }
 0x1d6   : > { %v608_v11 = vmax.f32 %v586_v8, 0.0  ;;  %v578_v12 = vadd.f32 %v744_v3, %v577_v9 }
 0x1d8   : > { %v780_v14 = vpack.c.bf16 %v608_v11, %v607_v10  ;;  %v606_v15 = vmax.f32 %v578_v12, 0.0 }
 0x1da   : > { %792 = vst [vmem:[%s229_s26 + $0x8] sm:$0xff] %v780_v14   ;;  %v775_v16 = vpack.c.bf16 %v606_v15, %v605_v13 }
 0x1dc   : > { %776 = vst [vmem:[%s229_s26] sm:$0xff] %v775_v16  }
 0x1df   : > { %v829_v17 = vpop.f32.mrf.mxu1 }
 0x1e0   : > { %v599_v19 = vadd.f32 %v829_v17, %v744_v3 }
 0x1e1   : > { %v590_v18 = vpop.f32.mrf.mxu1 }
 0x1e2   : > { %v591_v21 = vadd.f32 %v744_v3, %v590_v18  ;;  %v611_v24 = vmax.f32 %v599_v19, 0.0 }
 0x1e3   : > { %v830_v20 = vpop.f32.mrf.mxu1 }
 0x1e4   : > { %v602_v22 = vadd.f32 %v830_v20, %v744_v3  ;;  %v609_v27 = vmax.f32 %v591_v21, 0.0 }
 0x1e5   : > { %v593_v23 = vpop.f32.mrf.mxu1 }
 0x1e6   : > { %v612_v25 = vmax.f32 %v602_v22, 0.0  ;;  %v594_v26 = vadd.f32 %v744_v3, %v593_v23 }
 0x1e8   : > { %v790_v28 = vpack.c.bf16 %v612_v25, %v611_v24  ;;  %v610_v29 = vmax.f32 %v594_v26, 0.0 }
 0x1ea   : > { %794 = vst [vmem:[%s229_s26 + $0x18] sm:$0xff] %v790_v28   ;;  %v785_v30 = vpack.c.bf16 %v610_v29, %v609_v27 }
 0x1ec   : > { %793 = vst [vmem:[%s229_s26 + $0x10] sm:$0xff] %v785_v30  }
 0x1ed PF: > { %s15_s18 = sadd.s32 1, %s878_s18  }
 0x1ee   : > { %p12_p4 = scmp.ge.s32.totalorder %s15_s18, 4  }
 0x1f0   :  { %14 = sbr.rel (!%p12_p4) target bundleno = 1 (0x1), region = 70 }

// kernel: neg.22
= control target key start
LH: loop header
LB: loop body
LE: loop exit
PB: predicated region body
PF: predicated region fallthrough
CT: control target
= control target key end

     0   :  { %s264_s0 = inlined_call_operand.vmem [shape: f32[2,128,64], index: 0, kind: input, shape index: {}]   ;;  %s265_s1 = inlined_call_operand.vmem [shape: f32[2,128,64], index: 1, kind: output, shape index: {}]  }
   0x1   :  { %v2_v0 = vld [vmem:[%s264_s0] sm:$0xff]  ;;  %v130_v2 = vld [vmem:[%s264_s0 + $0x8] sm:$0xff]  ;;  %v134_v7 = vld [vmem:[%s264_s0 + $0x10] sm:$0xff] }
   0x2   :  { %v128_v1 = vld [vmem:[%s264_s0 + $0x40] sm:$0xff]  ;;  %v5_v3 = vxor.u32 2147483648, %v2_v0  ;;  %v20_v5 = vxor.u32 2147483648, %v130_v2  ;;  %v132_v6 = vld [vmem:[%s264_s0 + $0x48] sm:$0xff]  ;;  %v136_v8 = vld [vmem:[%s264_s0 + $0x50] sm:$0xff]  ;;  %v36_v10 = vxor.u32 2147483648, %v134_v7 }
   0x3   :  { %v12_v4 = vxor.u32 2147483648, %v128_v1  ;;  %v28_v9 = vxor.u32 2147483648, %v132_v6  ;;  %v44_v11 = vxor.u32 2147483648, %v136_v8  ;;  %v138_v12 = vld [vmem:[%s264_s0 + $0x18] sm:$0xff]  ;;  %v142_v14 = vld [vmem:[%s264_s0 + $0x20] sm:$0xff]  ;;  %v146_v19 = vld [vmem:[%s264_s0 + $0x28] sm:$0xff] }
   0x4   :  { %v140_v13 = vld [vmem:[%s264_s0 + $0x58] sm:$0xff]  ;;  %7 = vst [vmem:[%s265_s1] sm:$0xff] %v5_v3  ;;  %131 = vst [vmem:[%s265_s1 + $0x8] sm:$0xff] %v20_v5  ;;  %v52_v15 = vxor.u32 2147483648, %v138_v12  ;;  %v68_v17 = vxor.u32 2147483648, %v142_v14  ;;  %v144_v18 = vld [vmem:[%s264_s0 + $0x60] sm:$0xff]  ;;  %v84_v22 = vxor.u32 2147483648, %v146_v19 }
   0x5   :  { %129 = vst [vmem:[%s265_s1 + $0x40] sm:$0xff] %v12_v4  ;;  %v60_v16 = vxor.u32 2147483648, %v140_v13  ;;  %v148_v20 = vld [vmem:[%s264_s0 + $0x68] sm:$0xff]  ;;  %133 = vst [vmem:[%s265_s1 + $0x48] sm:$0xff] %v28_v9  ;;  %v76_v21 = vxor.u32 2147483648, %v144_v18  ;;  %v150_v24 = vld [vmem:[%s264_s0 + $0x30] sm:$0xff] }
   0x6   :  { %135 = vst [vmem:[%s265_s1 + $0x10] sm:$0xff] %v36_v10  ;;  %137 = vst [vmem:[%s265_s1 + $0x50] sm:$0xff] %v44_v11  ;;  %v92_v23 = vxor.u32 2147483648, %v148_v20  ;;  %v152_v25 = vld [vmem:[%s264_s0 + $0x70] sm:$0xff]  ;;  %v154_v26 = vld [vmem:[%s264_s0 + $0x38] sm:$0xff]  ;;  %v100_v27 = vxor.u32 2147483648, %v150_v24 }
   0x7   :  { %139 = vst [vmem:[%s265_s1 + $0x18] sm:$0xff] %v52_v15  ;;  %141 = vst [vmem:[%s265_s1 + $0x58] sm:$0xff] %v60_v16  ;;  %v108_v28 = vxor.u32 2147483648, %v152_v25  ;;  %v116_v29 = vxor.u32 2147483648, %v154_v26  ;;  %v156_v30 = vld [vmem:[%s264_s0 + $0x78] sm:$0xff] }
   0x8   :  { %143 = vst [vmem:[%s265_s1 + $0x20] sm:$0xff] %v68_v17  ;;  %145 = vst [vmem:[%s265_s1 + $0x60] sm:$0xff] %v76_v21  ;;  %v124_v31 = vxor.u32 2147483648, %v156_v30 }
   0x9   :  { %147 = vst [vmem:[%s265_s1 + $0x28] sm:$0xff] %v84_v22  ;;  %149 = vst [vmem:[%s265_s1 + $0x68] sm:$0xff] %v92_v23 }
   0xa   :  { %151 = vst [vmem:[%s265_s1 + $0x30] sm:$0xff] %v100_v27  ;;  %153 = vst [vmem:[%s265_s1 + $0x70] sm:$0xff] %v108_v28 }
   0xb   :  { %155 = vst [vmem:[%s265_s1 + $0x38] sm:$0xff] %v116_v29  ;;  %157 = vst [vmem:[%s265_s1 + $0x78] sm:$0xff] %v124_v31 }

// kernel: _lambda_.16
= control target key start
LH: loop header
LB: loop body
LE: loop exit
PB: predicated region body
PF: predicated region fallthrough
CT: control target
= control target key end

     0   :  { %s1377_s24 = smov 0   ;;  %s1494_s0 = inlined_call_operand.vmem [shape: bf16[256,128], index: 0, kind: input, shape index: {}]   ;;  %s1495_s1 = inlined_call_operand.vmem [shape: bf16[128,64], index: 1, kind: input, shape index: {}]   ;;  %s1496_s2 = inlined_call_operand.vmem [shape: f32[1,64], index: 2, kind: input, shape index: {}]   ;;  %s1497_s3 = inlined_call_operand.vmem [shape: bf16[64,64], index: 3, kind: input, shape index: {}]   ;;  %s1498_s4 = inlined_call_operand.vmem [shape: f32[1,64], index: 4, kind: input, shape index: {}]   ;;  %s1499_s5 = inlined_call_operand.vmem [shape: bf16[64,128], index: 5, kind: input, shape index: {}]   ;;  %s1500_s6 = inlined_call_operand.vmem [shape: f32[1,128], index: 6, kind: input, shape index: {}]   ;;  %s1501_s7 = inlined_call_operand.vmem [shape: bf16[256,128], index: 7, kind: output, shape index: {}]  }
   0x1 LB: > { %s1036_s25 = sadd.s32 4294967295, %s1335_s24   ;;  %p1040_p0 = scmp.ge.s32.totalorder %s1335_s24, 1  ;;  %s1335_s24 = sphi %s1377_s24, %s17_s24  }
   0x2   : > { %p238_p1 = scmp.lt.s32.totalorder %s1335_s24, 3 }
   0x4   : > { %p239_p2 = pnand %p1040_p0, %p238_p1 }
   0x5   : > { %s1041_s28 = sshll.u32 (!%p239_p2), %s1036_s25, 4 }
   0x6   : > { %242 = sbr.rel (%p239_p2) target bundleno = 686 (0x2ae), region = 48  ;;  %p271_p3 = scmp.lt.s32.totalorder (!%p239_p2), %s1041_s28, 31 }
   0xb   : > { %v1305_v0 = vld [vmem:[%s1495_s1 + $0x38] sm:$0xff]   ;;  %v1306_v1 = vld [vmem:[%s1495_s1 + $0x30] sm:$0xff]   ;;  %s1503_s28 = smov (!%p271_p3, %s1041_s28), 31  ;;  %v1307_v2 = vld [vmem:[%s1495_s1 + $0x28] sm:$0xff]   ;;  %vm578_vm0 = vcmask 523264  }
   0xc   : > { %1209 = vmatprep.subr.bf16.mxu0 %v1305_v0  ;;  %s1042_s10 = sshll.u32 %s1503_s28, 2  ;;  %v1308_v3 = vld [vmem:[%s1495_s1 + $0x20] sm:$0xff]   ;;  %v1309_v5 = vld [vmem:[%s1495_s1 + $0x18] sm:$0xff]   ;;  %v1310_v6 = vld [vmem:[%s1495_s1 + $0x10] sm:$0xff]  }
   0xd   : > { %1210 = vmatpush3.bf16.msra.mxu0 %v1305_v0  ;;  %s1402_s13 = scalar_lea.vmem %s1494_s0, %s1042_s10  ;;  %v1321_v7 = vld [vmem:[%s1497_s3 + $0x18] sm:$0xff]   ;;  %v1311_v8 = vld [vmem:[%s1495_s1 + $0x8] sm:$0xff]   ;;  %v1322_v9 = vld [vmem:[%s1497_s3 + $0x10] sm:$0xff]   ;;  %s1481_s30 = scalar_lea.vmem %s1501_s7, %s1042_s10 }
   0xe   : > { %1211 = vmatprep.subr.bf16.mxu0 %v1306_v1  ;;  %v1313_v4 = vld [vmem:[%s1402_s13] sm:$0xff]   ;;  %1289 = vmatprep.subr.bf16.mxu1 %v1321_v7  ;;  %v1323_v10 = vld [vmem:[%s1497_s3 + $0x8] sm:$0xff]   ;;  %v1315_v13 = vld [vmem:[%s1402_s13 + $0x10] sm:$0xff]  }
   0xf   : > { %1225 = vmatprep.mubr.bf16.mxu0 %v1313_v4  ;;  %1293 = vmatpush3.bf16.msra.mxu1 %v1321_v7  ;;  %v1312_v11 = vld [vmem:[%s1495_s1] sm:$0xff]   ;;  %v1314_v12 = vld [vmem:[%s1402_s13 + $0x8] sm:$0xff]   ;;  %v1316_v14 = vld [vmem:[%s1402_s13 + $0x18] sm:$0xff]  }
  0x10   : > { %1290 = vmatprep.subr.bf16.mxu1 %v1322_v9  ;;  %v1317_v15 = vld [vmem:[%s1402_s13 + $0x20] sm:$0xff]   ;;  %v1318_v16 = vld [vmem:[%s1402_s13 + $0x28] sm:$0xff]   ;;  %v1319_v17 = vld [vmem:[%s1402_s13 + $0x30] sm:$0xff]  }
  0x11   : > { %1212 = vmatpush3.bf16.msra.mxu0 %v1306_v1  ;;  %v1320_v18 = vld [vmem:[%s1402_s13 + $0x38] sm:$0xff]   ;;  %v1324_v19 = vld [vmem:[%s1497_s3] sm:$0xff]   ;;  %v1326_v53 = vld [vmem:[%s1499_s5 + $0x10] sm:$0xff]  }
  0x12   : > { %1213 = vmatprep.subr.bf16.mxu0 %v1307_v2  ;;  %v1325_v20 = vld [vmem:[%s1499_s5 + $0x18] sm:$0xff]   ;;  %v1045_v23 = vld [vmem:[%s1496_s2] ss:$0 sm:$0xff] }
  0x13   : > { %1294 = vmatpush3.bf16.msra.mxu1 %v1322_v9 }
  0x14   : > { %1291 = vmatprep.subr.bf16.mxu1 %v1323_v10 }
  0x15   : > { %1214 = vmatpush3.bf16.msra.mxu0 %v1307_v2 }
  0x16   : > { %1215 = vmatprep.subr.bf16.mxu0 %v1308_v3 }
  0x17   : > { %1295 = vmatpush3.bf16.msra.mxu1 %v1323_v10 }
  0x18   : > { %1292 = vmatprep.subr.bf16.mxu1 %v1324_v19 }
  0x19   : > { %1216 = vmatpush3.bf16.msra.mxu0 %v1308_v3 }
  0x1a   : > { %1217 = vmatprep.subr.bf16.mxu0 %v1309_v5 }
  0x1b   : > { %1296 = vmatpush3.bf16.msra.mxu1 %v1324_v19 }
  0x1c   : > { %1265 = vmatprep.subr.bf16.mxu1 %v1325_v20 }
  0x1d   : > { %1218 = vmatpush3.bf16.msra.mxu0 %v1309_v5 }
  0x1e   : > { %1219 = vmatprep.subr.bf16.mxu0 %v1310_v6 }
  0x21   : > { %1220 = vmatpush3.bf16.msra.mxu0 %v1310_v6 }
  0x22   : > { %1221 = vmatprep.subr.bf16.mxu0 %v1311_v8 }
  0x25   : > { %1222 = vmatpush3.bf16.msra.mxu0 %v1311_v8 }
  0x26   : > { %1223 = vmatprep.subr.bf16.mxu0 %v1312_v11 }
  0x29   : > { %1224 = vmatpush3.bf16.msra.mxu0 %v1312_v11 }
  0x2a   : > { %1241 = vmatprep.subr.bf16.mxu0 %v1321_v7 }
  0x2c   : > { %1226 = vmatmul.mubr.bf16.vlgmr.msra.gmra.mxu0 %v1314_v12 }
  0x2d   : > { %1229 = vmatprep.mubr.bf16.mxu0 %v1315_v13  ;;  %1242 = vmatpush3.bf16.msra.mxu0 %v1321_v7 }
  0x2e   : > { %1243 = vmatprep.subr.bf16.mxu0 %v1322_v9 }
  0x31   : > { %1244 = vmatpush3.bf16.msra.mxu0 %v1322_v9 }
  0x32   : > { %1245 = vmatprep.subr.bf16.mxu0 %v1323_v10 }
  0x34   : > { %1230 = vmatmul.mubr.bf16.gmra.mxu0 %v1316_v14 }
  0x35   : > { %1233 = vmatprep.mubr.bf16.mxu0 %v1317_v15  ;;  %1246 = vmatpush3.bf16.msra.mxu0 %v1323_v10  ;;  %v1327_v15 = vld [vmem:[%s1499_s5 + $0x8] sm:$0xff]  }
  0x36   : > { %1247 = vmatprep.subr.bf16.mxu0 %v1324_v19 }
  0x39   : > { %1248 = vmatpush3.bf16.msra.mxu0 %v1324_v19  ;;  %v1062_v19 = vld [vmem:[%s1498_s4] ss:$0 sm:$0xff] }
  0x3c   : > { %1234 = vmatmul.mubr.bf16.gmra.mxu0 %v1318_v16  ;;  %v1328_v16 = vld [vmem:[%s1499_s5] sm:$0xff]  }
  0x3d   : > { %1237 = vmatprep.mubr.bf16.mxu0 %v1319_v17 }
  0x44   : > { %1238 = vmatmul.mubr.bf16.gmra.mxu0 %v1320_v18 }
  0xec   : > { %v1227_v21 = vpop.f32.mrf.mxu0 }
  0xed   : > { %v461_v27 = vadd.f32 %v1227_v21, %v1045_v23 }
  0xee   : > { %v452_v22 = vpop.f32.mrf.mxu0 }
  0xef   : > { %v453_v25 = vadd.f32 %v1045_v23, %v452_v22  ;;  %v517_v34 = vmax.f32 %v461_v27, 0.0 }
  0xf0   : > { %v1228_v24 = vpop.f32.mrf.mxu0 }
  0xf1   : > { %v464_v26 = vadd.f32 %v1228_v24, %v1045_v23  ;;  %v515_v32 = vmax.f32 %v453_v25, 0.0 }
  0xf2   : > { %v455_v28 = vpop.f32.mrf.mxu0 }
  0xf3   : > { %v456_v29 = vadd.f32 %v1045_v23, %v455_v28  ;;  %v518_v30 = vmax.f32 %v464_v26, 0.0 }
  0xf4   : > { %v1231_v31 = vpop.f32.mrf.mxu0 }
  0xf5   : > { %v516_v33 = vmax.f32 %v456_v29, 0.0  ;;  %v532_v37 = vpack.c.bf16 %v518_v30, %v517_v34  ;;  %v477_v41 = vadd.f32 %v1231_v31, %v1045_v23 }
  0xf6   : > { %v468_v35 = vpop.f32.mrf.mxu0 }
  0xf7   : > { %v531_v36 = vpack.c.bf16 %v516_v33, %v515_v32  ;;  %v469_v39 = vadd.f32 %v1045_v23, %v468_v35  ;;  %v521_v48 = vmax.f32 %v477_v41, 0.0 }
  0xf8   : > { %v1232_v38 = vpop.f32.mrf.mxu0 }
  0xf9   : > { %v480_v40 = vadd.f32 %v1232_v38, %v1045_v23  ;;  %1249 = vmatprep.mubr.msk.bf16.mxu0 %vm578_vm0, %v531_v36  ;;  %v519_v46 = vmax.f32 %v469_v39, 0.0 }
  0xfa   : > { %v471_v42 = vpop.f32.mrf.mxu0  ;;  %1250 = vmatmul.mubr.msk.bf16.vlgmr.msra.gmra.mxu0 %vm578_vm0, %v532_v37 }
  0xfb   : > { %v472_v43 = vadd.f32 %v1045_v23, %v471_v42  ;;  %v522_v44 = vmax.f32 %v480_v40, 0.0 }
  0xfc   : > { %v1235_v45 = vpop.f32.mrf.mxu0 }
  0xfd   : > { %v520_v47 = vmax.f32 %v472_v43, 0.0  ;;  %v534_v51 = vpack.c.bf16 %v522_v44, %v521_v48  ;;  %v493_v56 = vadd.f32 %v1235_v45, %v1045_v23 }
  0xfe   : > { %v484_v49 = vpop.f32.mrf.mxu0 }
  0xff   : > { %v533_v50 = vpack.c.bf16 %v520_v47, %v519_v46  ;;  %v485_v54 = vadd.f32 %v1045_v23, %v484_v49  ;;  %v525_v63 = vmax.f32 %v493_v56, 0.0 }
 0x100   : > { %v1236_v52 = vpop.f32.mrf.mxu0 }
 0x101   : > { %v496_v55 = vadd.f32 %v1236_v52, %v1045_v23  ;;  %1253 = vmatprep.mubr.msk.bf16.mxu1 %vm578_vm0, %v533_v50  ;;  %v523_v61 = vmax.f32 %v485_v54, 0.0 }
 0x102   : > { %v487_v57 = vpop.f32.mrf.mxu0  ;;  %1254 = vmatmul.mubr.msk.bf16.vlgmr.msra.gmra.mxu1 %vm578_vm0, %v534_v51 }
 0x103   : > { %v488_v58 = vadd.f32 %v1045_v23, %v487_v57  ;;  %1266 = vmatpush3.bf16.msra.mxu1 %v1325_v20  ;;  %v526_v59 = vmax.f32 %v496_v55, 0.0 }
 0x104   : > { %v1239_v60 = vpop.f32.mrf.mxu0  ;;  %1267 = vmatprep.subr.bf16.mxu1 %v1326_v53 }
 0x105   : > { %v524_v62 = vmax.f32 %v488_v58, 0.0  ;;  %v536_v2 = vpack.c.bf16 %v526_v59, %v525_v63  ;;  %v509_v6 = vadd.f32 %v1239_v60, %v1045_v23 }
 0x106   : > { %v500_v0 = vpop.f32.mrf.mxu0 }
 0x107   : > { %v535_v1 = vpack.c.bf16 %v524_v62, %v523_v61  ;;  %1268 = vmatpush3.bf16.msra.mxu1 %v1326_v53  ;;  %v501_v4 = vadd.f32 %v1045_v23, %v500_v0  ;;  %v529_v12 = vmax.f32 %v509_v6, 0.0 }
 0x108   : > { %v1240_v3 = vpop.f32.mrf.mxu0  ;;  %1269 = vmatprep.subr.bf16.mxu1 %v1327_v15 }
 0x109   : > { %v512_v5 = vadd.f32 %v1240_v3, %v1045_v23  ;;  %1257 = vmatprep.mubr.msk.bf16.mxu1 %vm578_vm0, %v535_v1  ;;  %v527_v10 = vmax.f32 %v501_v4, 0.0 }
 0x10a   : > { %v503_v7 = vpop.f32.mrf.mxu0  ;;  %1258 = vmatmul.mubr.msk.bf16.gmra.mxu1 %vm578_vm0, %v536_v2 }
 0x10b   : > { %v504_v8 = vadd.f32 %v1045_v23, %v503_v7  ;;  %v530_v9 = vmax.f32 %v512_v5, 0.0  ;;  %1270 = vmatpush3.bf16.msra.mxu1 %v1327_v15 }
 0x10c   : > { %1271 = vmatprep.subr.bf16.mxu1 %v1328_v16 }
 0x10d   : > { %v528_v11 = vmax.f32 %v504_v8, 0.0  ;;  %v538_v14 = vpack.c.bf16 %v530_v9, %v529_v12 }
 0x10f   : > { %v537_v13 = vpack.c.bf16 %v528_v11, %v527_v10  ;;  %1272 = vmatpush3.bf16.msra.mxu1 %v1328_v16  ;;  %v1075_v11 = vld [vmem:[%s1500_s6] ss:$0 sm:$0xff] }
 0x111   : > { %1261 = vmatprep.mubr.msk.bf16.mxu1 %vm578_vm0, %v537_v13 }
 0x112   : > { %1262 = vmatmul.mubr.msk.bf16.gmra.mxu1 %vm578_vm0, %v538_v14 }
 0x1ba   : > { %v1251_v17 = vpop.f32.mrf.mxu0 }
 0x1bb   : > { %v646_v23 = vadd.f32 %v1251_v17, %v1062_v19 }
 0x1bc   : > { %v637_v18 = vpop.f32.mrf.mxu0 }
 0x1bd   : > { %v638_v21 = vadd.f32 %v1062_v19, %v637_v18  ;;  %v702_v30 = vmax.f32 %v646_v23, 0.0 }
 0x1be   : > { %v1252_v20 = vpop.f32.mrf.mxu0 }
 0x1bf   : > { %v649_v22 = vadd.f32 %v1252_v20, %v1062_v19  ;;  %v700_v28 = vmax.f32 %v638_v21, 0.0 }
 0x1c0   : > { %v640_v24 = vpop.f32.mrf.mxu0 }
 0x1c1   : > { %v641_v25 = vadd.f32 %v1062_v19, %v640_v24  ;;  %v703_v26 = vmax.f32 %v649_v22, 0.0 }
 0x1c2   : > { %v1255_v27 = vpop.f32.mrf.mxu1 }
 0x1c3   : > { %v701_v29 = vmax.f32 %v641_v25, 0.0  ;;  %v717_v33 = vpack.c.bf16 %v703_v26, %v702_v30  ;;  %v662_v37 = vadd.f32 %v1255_v27, %v1062_v19 }
 0x1c4   : > { %v653_v31 = vpop.f32.mrf.mxu1 }
 0x1c5   : > { %v716_v32 = vpack.c.bf16 %v701_v29, %v700_v28  ;;  %v654_v35 = vadd.f32 %v1062_v19, %v653_v31  ;;  %v706_v44 = vmax.f32 %v662_v37, 0.0 }
 0x1c6   : > { %v1256_v34 = vpop.f32.mrf.mxu1 }
 0x1c7   : > { %v665_v36 = vadd.f32 %v1256_v34, %v1062_v19  ;;  %1273 = vmatprep.mubr.msk.bf16.mxu1 %vm578_vm0, %v716_v32  ;;  %v704_v42 = vmax.f32 %v654_v35, 0.0 }
 0x1c8   : > { %v656_v38 = vpop.f32.mrf.mxu1  ;;  %1274 = vmatmul.mubr.msk.bf16.vlgmr.msra.gmra.mxu1 %vm578_vm0, %v717_v33 }
 0x1c9   : > { %v657_v39 = vadd.f32 %v1062_v19, %v656_v38  ;;  %v707_v40 = vmax.f32 %v665_v36, 0.0 }
 0x1ca   : > { %v1259_v41 = vpop.f32.mrf.mxu1 }
 0x1cb   : > { %v705_v43 = vmax.f32 %v657_v39, 0.0  ;;  %v719_v47 = vpack.c.bf16 %v707_v40, %v706_v44  ;;  %v678_v51 = vadd.f32 %v1259_v41, %v1062_v19 }
 0x1cc   : > { %v669_v45 = vpop.f32.mrf.mxu1 }
 0x1cd   : > { %v718_v46 = vpack.c.bf16 %v705_v43, %v704_v42  ;;  %v670_v49 = vadd.f32 %v1062_v19, %v669_v45  ;;  %v710_v58 = vmax.f32 %v678_v51, 0.0 }
 0x1ce   : > { %v1260_v48 = vpop.f32.mrf.mxu1 }
 0x1cf   : > { %v681_v50 = vadd.f32 %v1260_v48, %v1062_v19  ;;  %1277 = vmatprep.mubr.msk.bf16.mxu1 %vm578_vm0, %v718_v46  ;;  %v708_v56 = vmax.f32 %v670_v49, 0.0 }
 0x1d0   : > { %v672_v52 = vpop.f32.mrf.mxu1  ;;  %1278 = vmatmul.mubr.msk.bf16.gmra.mxu1 %vm578_vm0, %v719_v47 }
 0x1d1   : > { %v673_v53 = vadd.f32 %v1062_v19, %v672_v52  ;;  %v711_v54 = vmax.f32 %v681_v50, 0.0 }
 0x1d2   : > { %v1263_v55 = vpop.f32.mrf.mxu1 }
 0x1d3   : > { %v709_v57 = vmax.f32 %v673_v53, 0.0  ;;  %v721_v61 = vpack.c.bf16 %v711_v54, %v710_v58  ;;  %v694_v1 = vadd.f32 %v1263_v55, %v1062_v19 }
 0x1d4   : > { %v685_v59 = vpop.f32.mrf.mxu1 }
 0x1d5   : > { %v720_v60 = vpack.c.bf16 %v709_v57, %v708_v56  ;;  %v686_v63 = vadd.f32 %v1062_v19, %v685_v59  ;;  %v714_v7 = vmax.f32 %v694_v1, 0.0 }
 0x1d6   : > { %v1264_v62 = vpop.f32.mrf.mxu1 }
 0x1d7   : > { %v697_v0 = vadd.f32 %v1264_v62, %v1062_v19  ;;  %1281 = vmatprep.mubr.msk.bf16.mxu1 %vm578_vm0, %v720_v60  ;;  %v712_v5 = vmax.f32 %v686_v63, 0.0 }
 0x1d8   : > { %v688_v2 = vpop.f32.mrf.mxu1  ;;  %1282 = vmatmul.mubr.msk.bf16.gmra.mxu1 %vm578_vm0, %v721_v61 }
 0x1d9   : > { %v689_v3 = vadd.f32 %v1062_v19, %v688_v2  ;;  %v715_v4 = vmax.f32 %v697_v0, 0.0 }
 0x1db   : > { %v713_v6 = vmax.f32 %v689_v3, 0.0  ;;  %v723_v9 = vpack.c.bf16 %v715_v4, %v714_v7 }
 0x1dd   : > { %v722_v8 = vpack.c.bf16 %v713_v6, %v712_v5 }
 0x1df   : > { %1285 = vmatprep.mubr.msk.bf16.mxu1 %vm578_vm0, %v722_v8 }
 0x1e0   : > { %1286 = vmatmul.mubr.msk.bf16.gmra.mxu1 %vm578_vm0, %v723_v9 }
 0x288   : > { %v1275_v10 = vpop.f32.mrf.mxu1 }
 0x289   : > { %v830_v13 = vadd.f32 %v1275_v10, %v1075_v11 }
 0x28a   : > { %v821_v12 = vpop.f32.mrf.mxu1 }
 0x28b   : > { %v822_v15 = vadd.f32 %v1075_v11, %v821_v12  ;;  %v886_v18 = vmax.f32 %v830_v13, 0.0 }
 0x28c   : > { %v1276_v14 = vpop.f32.mrf.mxu1 }
 0x28d   : > { %v833_v16 = vadd.f32 %v1276_v14, %v1075_v11  ;;  %v884_v22 = vmax.f32 %v822_v15, 0.0 }
 0x28e   : > { %v824_v17 = vpop.f32.mrf.mxu1 }
 0x28f   : > { %v887_v19 = vmax.f32 %v833_v16, 0.0  ;;  %v825_v20 = vadd.f32 %v1075_v11, %v824_v17 }
 0x290   : > { %v1279_v21 = vpop.f32.mrf.mxu1 }
 0x291   : > { %v1130_v23 = vpack.c.bf16 %v887_v19, %v886_v18  ;;  %v885_v24 = vmax.f32 %v825_v20, 0.0  ;;  %v846_v27 = vadd.f32 %v1279_v21, %v1075_v11 }
 0x292   : > { %v837_v25 = vpop.f32.mrf.mxu1 }
 0x293   : > { %1162 = vst [vmem:[%s1481_s30 + $0x8] sm:$0xff] %v1130_v23   ;;  %v1125_v26 = vpack.c.bf16 %v885_v24, %v884_v22  ;;  %v838_v29 = vadd.f32 %v1075_v11, %v837_v25  ;;  %v890_v32 = vmax.f32 %v846_v27, 0.0 }
 0x294   : > { %v1280_v28 = vpop.f32.mrf.mxu1 }
 0x295   : > { %1126 = vst [vmem:[%s1481_s30] sm:$0xff] %v1125_v26   ;;  %v849_v30 = vadd.f32 %v1280_v28, %v1075_v11  ;;  %v888_v36 = vmax.f32 %v838_v29, 0.0 }
 0x296   : > { %v840_v31 = vpop.f32.mrf.mxu1 }
 0x297   : > { %v891_v33 = vmax.f32 %v849_v30, 0.0  ;;  %v841_v34 = vadd.f32 %v1075_v11, %v840_v31 }
 0x298   : > { %v1283_v35 = vpop.f32.mrf.mxu1 }
 0x299   : > { %v1140_v37 = vpack.c.bf16 %v891_v33, %v890_v32  ;;  %v889_v38 = vmax.f32 %v841_v34, 0.0  ;;  %v862_v41 = vadd.f32 %v1283_v35, %v1075_v11 }
 0x29a   : > { %v853_v39 = vpop.f32.mrf.mxu1 }
 0x29b   : > { %1164 = vst [vmem:[%s1481_s30 + $0x18] sm:$0xff] %v1140_v37   ;;  %v1135_v40 = vpack.c.bf16 %v889_v38, %v888_v36  ;;  %v854_v43 = vadd.f32 %v1075_v11, %v853_v39  ;;  %v894_v46 = vmax.f32 %v862_v41, 0.0 }
 0x29c   : > { %v1284_v42 = vpop.f32.mrf.mxu1 }
 0x29d   : > { %1163 = vst [vmem:[%s1481_s30 + $0x10] sm:$0xff] %v1135_v40   ;;  %v865_v44 = vadd.f32 %v1284_v42, %v1075_v11  ;;  %v892_v50 = vmax.f32 %v854_v43, 0.0 }
 0x29e   : > { %v856_v45 = vpop.f32.mrf.mxu1 }
 0x29f   : > { %v895_v47 = vmax.f32 %v865_v44, 0.0  ;;  %v857_v48 = vadd.f32 %v1075_v11, %v856_v45 }
 0x2a0   : > { %v1287_v49 = vpop.f32.mrf.mxu1 }
 0x2a1   : > { %v1150_v51 = vpack.c.bf16 %v895_v47, %v894_v46  ;;  %v893_v52 = vmax.f32 %v857_v48, 0.0  ;;  %v878_v55 = vadd.f32 %v1287_v49, %v1075_v11 }
 0x2a2   : > { %v869_v53 = vpop.f32.mrf.mxu1 }
 0x2a3   : > { %1166 = vst [vmem:[%s1481_s30 + $0x28] sm:$0xff] %v1150_v51   ;;  %v1145_v54 = vpack.c.bf16 %v893_v52, %v892_v50  ;;  %v870_v57 = vadd.f32 %v1075_v11, %v869_v53  ;;  %v898_v60 = vmax.f32 %v878_v55, 0.0 }
 0x2a4   : > { %v1288_v56 = vpop.f32.mrf.mxu1 }
 0x2a5   : > { %1165 = vst [vmem:[%s1481_s30 + $0x20] sm:$0xff] %v1145_v54   ;;  %v881_v58 = vadd.f32 %v1288_v56, %v1075_v11  ;;  %v896_v63 = vmax.f32 %v870_v57, 0.0 }
 0x2a6   : > { %v872_v59 = vpop.f32.mrf.mxu1 }
 0x2a7   : > { %v899_v61 = vmax.f32 %v881_v58, 0.0  ;;  %v873_v62 = vadd.f32 %v1075_v11, %v872_v59 }
 0x2a9   : > { %v1160_v0 = vpack.c.bf16 %v899_v61, %v898_v60  ;;  %v897_v1 = vmax.f32 %v873_v62, 0.0 }
 0x2ab   : > { %1168 = vst [vmem:[%s1481_s30 + $0x38] sm:$0xff] %v1160_v0   ;;  %v1155_v2 = vpack.c.bf16 %v897_v1, %v896_v63 }
 0x2ad   : > { %1167 = vst [vmem:[%s1481_s30 + $0x30] sm:$0xff] %v1155_v2  }
 0x2ae PF: > { %s17_s24 = sadd.s32 1, %s1335_s24  }
 0x2af   : > { %p14_p4 = scmp.ge.s32.totalorder %s17_s24, 4  }
 0x2b1   :  { %16 = sbr.rel (!%p14_p4) target bundleno = 1 (0x1), region = 78 }

// kernel: _lambda_.17
= control target key start
LH: loop header
LB: loop body
LE: loop exit
PB: predicated region body
PF: predicated region fallthrough
CT: control target
= control target key end

     0   :  { %s1557_s18 = smov 0   ;;  %s1836_s0 = inlined_call_operand.vmem [shape: bf16[256,128], index: 0, kind: input, shape index: {}]   ;;  %s1837_s1 = inlined_call_operand.vmem [shape: bf16[128,384], index: 1, kind: input, shape index: {}]   ;;  %s1838_s2 = inlined_call_operand.vmem [shape: f32[1,384], index: 2, kind: input, shape index: {}]   ;;  %s1839_s3 = inlined_call_operand.vmem [shape: bf16[384,128], index: 3, kind: input, shape index: {}]   ;;  %s1840_s4 = inlined_call_operand.vmem [shape: f32[1,128], index: 4, kind: input, shape index: {}]   ;;  %s1841_s5 = inlined_call_operand.vmem [shape: f32[256,128], index: 5, kind: output, shape index: {}]  }
   0x1 LB: > { %s1217_s19 = sadd.s32 4294967295, %s1524_s18   ;;  %p1221_p0 = scmp.ge.s32.totalorder %s1524_s18, 1  ;;  %s1524_s18 = sphi %s1557_s18, %s15_s18  }
   0x2   : > { %p188_p1 = scmp.lt.s32.totalorder %s1524_s18, 3 }
   0x4   : > { %p189_p2 = pnand %p1221_p0, %p188_p1 }
   0x5   : > { %s1222_s24 = sshll.u32 (!%p189_p2), %s1217_s19, 4 }
   0x6   : > { %192 = sbr.rel (%p189_p2) target bundleno = 512 (0x200), region = 40  ;;  %p217_p3 = scmp.lt.s32.totalorder (!%p189_p2), %s1222_s24, 31 }
   0xb   : > { %v1454_v0 = vld [vmem:[%s1837_s1 + $0xac] ss:$12 sps:$4 sm:$0xff]   ;;  %v1456_v1 = vld [vmem:[%s1837_s1 + $0xa8] ss:$12 sps:$4 sm:$0xff]   ;;  %v1526_v2 = vmov 0   ;;  %s1843_s24 = smov (!%p217_p3, %s1222_s24), 31  ;;  %v279_v57 = vlaneseq }
   0xc   : > { %502 = vmatprep.mubr.bf16.mxu0 %v1526_v2  ;;  %470 = vmatprep.subr.bf16.mxu0 %v1454_v0  ;;  %v1457_v3 = vld [vmem:[%s1837_s1 + $0x94] ss:$12 sps:$4 sm:$0xff]   ;;  %v1459_v4 = vld [vmem:[%s1837_s1 + $0xb0] ss:$12 sps:$4 sm:$0xff]   ;;  %v1463_v7 = vld [vmem:[%s1837_s1 + $0x98] ss:$12 sps:$4 sm:$0xff]  }
   0xd   : > { %471 = vmatpush1.bf16.msra.mxu0 %v1456_v1  ;;  %v1460_v5 = vld [vmem:[%s1837_s1 + $0x90] ss:$12 sps:$4 sm:$0xff]   ;;  %1381 = vmatprep.subr.bf16.mxu1 %v1459_v4  ;;  %v1464_v8 = vld [vmem:[%s1837_s1 + $0x78] ss:$12 sps:$4 sm:$0xff]   ;;  %v1467_v9 = vld [vmem:[%s1837_s1 + $0x80] ss:$12 sps:$4 sm:$0xff]  }
   0xe   : > { %472 = vmatprep.subr.bf16.mxu0 %v1457_v3  ;;  %v1461_v6 = vld [vmem:[%s1837_s1 + $0x7c] ss:$12 sps:$4 sm:$0xff]   ;;  %1382 = vmatpush3.bf16.msra.mxu1 %v1459_v4  ;;  %v1465_v10 = vld [vmem:[%s1837_s1 + $0x64] ss:$12 sps:$4 sm:$0xff]   ;;  %v1468_v11 = vld [vmem:[%s1837_s1 + $0x60] ss:$12 sps:$4 sm:$0xff]  }
   0xf   : > { %1383 = vmatprep.subr.bf16.mxu1 %v1463_v7  ;;  %v1471_v12 = vld [vmem:[%s1837_s1 + $0x68] ss:$12 sps:$4 sm:$0xff]   ;;  %v1469_v13 = vld [vmem:[%s1837_s1 + $0x4c] ss:$12 sps:$4 sm:$0xff]   ;;  %s1223_s23 = sshll.u32 %s1843_s24, 2  ;;  %v1507_v38 = vld [vmem:[%s1839_s3 + $0xa0] sm:$0xff]  }
  0x10   : > { %v1472_v14 = vld [vmem:[%s1837_s1 + $0x48] ss:$12 sps:$4 sm:$0xff]   ;;  %v1475_v15 = vld [vmem:[%s1837_s1 + $0x50] ss:$12 sps:$4 sm:$0xff]   ;;  %s1617_s6 = scalar_lea.vmem %s1836_s0, %s1223_s23  ;;  %v1479_v19 = vld [vmem:[%s1837_s1 + $0x38] ss:$12 sps:$4 sm:$0xff]  }
  0x11   : > { %473 = vmatpush1.bf16.msra.mxu0 %v1460_v5  ;;  %v1473_v16 = vld [vmem:[%s1837_s1 + $0x34] ss:$12 sps:$4 sm:$0xff]   ;;  %v1476_v17 = vld [vmem:[%s1837_s1 + $0x30] ss:$12 sps:$4 sm:$0xff]   ;;  %v1480_v21 = vld [vmem:[%s1837_s1 + $0x18] ss:$12 sps:$4 sm:$0xff]  }
  0x12   : > { %474 = vmatprep.subr.bf16.mxu0 %v1461_v6  ;;  %1384 = vmatpush3.bf16.msra.mxu1 %v1463_v7  ;;  %v1485_v18 = vld [vmem:[%s1617_s6] sm:$0xff]   ;;  %v1477_v20 = vld [vmem:[%s1837_s1 + $0x1c] ss:$12 sps:$4 sm:$0xff]   ;;  %v1501_v30 = vld [vmem:[%s1839_s3 + $0xb0] sm:$0xff]   ;;  %v280_v58 = vshrl.u32 %v279_v57, 7  ;;  %s1225_s10 = sshll.u32 %s1843_s24, 3 }
  0x13   : > { %1385 = vmatprep.subr.bf16.mxu1 %v1467_v9  ;;  %1397 = vmatprep.mubr.bf16.mxu1 %v1485_v18  ;;  %v1483_v22 = vld [vmem:[%s1837_s1 + $0x20] ss:$12 sps:$4 sm:$0xff]   ;;  %v1481_v23 = vld [vmem:[%s1837_s1 + $0x4] ss:$12 sps:$4 sm:$0xff]   ;;  %v1486_v25 = vld [vmem:[%s1837_s1 + $0x8] ss:$12 sps:$4 sm:$0xff]   ;;  %s1800_s12 = scalar_lea.vmem %s1841_s5, %s1225_s10 }
  0x14   : > { %v1484_v24 = vld [vmem:[%s1837_s1] ss:$12 sps:$4 sm:$0xff]   ;;  %v1497_v26 = vld [vmem:[%s1839_s3 + $0xb8] sm:$0xff]   ;;  %v1496_v31 = vld [vmem:[%s1839_s3 + $0x70] sm:$0xff]   ;;  %v285_v59 = vsub.s32 1, %v280_v58  ;;  %v289_v60 = vsub.s32 2, %v280_v58 }
  0x15   : > { %475 = vmatpush1.bf16.msra.mxu0 %v1464_v8  ;;  %v1494_v27 = vld [vmem:[%s1839_s3 + $0x78] sm:$0xff]   ;;  %v1487_v28 = vld [vmem:[%s1617_s6 + $0x8] sm:$0xff]   ;;  %v1488_v32 = vld [vmem:[%s1617_s6 + $0x10] sm:$0xff]   ;;  %v281_v61 = vsub.s32 0, %v280_v58 }
  0x16   : > { %476 = vmatprep.subr.bf16.mxu0 %v1465_v10  ;;  %1386 = vmatpush3.bf16.msra.mxu1 %v1467_v9  ;;  %v1495_v29 = vld [vmem:[%s1839_s3 + $0x38] sm:$0xff]   ;;  %v1504_v33 = vld [vmem:[%s1839_s3 + $0xa8] sm:$0xff]   ;;  %v1498_v34 = vld [vmem:[%s1839_s3 + $0x30] sm:$0xff]  }
  0x17   : > { %1387 = vmatprep.subr.bf16.mxu1 %v1471_v12  ;;  %v1489_v35 = vld [vmem:[%s1617_s6 + $0x18] sm:$0xff]   ;;  %v1499_v36 = vld [vmem:[%s1839_s3 + $0x68] sm:$0xff]   ;;  %v1502_v39 = vld [vmem:[%s1839_s3 + $0x60] sm:$0xff]  }
  0x18   : > { %v1500_v37 = vld [vmem:[%s1839_s3 + $0x28] sm:$0xff]   ;;  %v1490_v40 = vld [vmem:[%s1617_s6 + $0x20] sm:$0xff]   ;;  %v1505_v42 = vld [vmem:[%s1839_s3 + $0x58] sm:$0xff]  }
  0x19   : > { %477 = vmatpush1.bf16.msra.mxu0 %v1468_v11  ;;  %v1503_v41 = vld [vmem:[%s1839_s3 + $0x20] sm:$0xff]   ;;  %v1491_v43 = vld [vmem:[%s1617_s6 + $0x28] sm:$0xff]   ;;  %v1492_v44 = vld [vmem:[%s1617_s6 + $0x30] sm:$0xff]  }
  0x1a   : > { %478 = vmatprep.subr.bf16.mxu0 %v1469_v13  ;;  %1388 = vmatpush3.bf16.msra.mxu1 %v1471_v12  ;;  %v1506_v45 = vld [vmem:[%s1839_s3 + $0x18] sm:$0xff]   ;;  %v1508_v47 = vld [vmem:[%s1839_s3 + $0x50] sm:$0xff]   ;;  %v1511_v50 = vld [vmem:[%s1839_s3 + $0x48] sm:$0xff]  }
  0x1b   : > { %1389 = vmatprep.subr.bf16.mxu1 %v1475_v15  ;;  %v1493_v46 = vld [vmem:[%s1617_s6 + $0x38] sm:$0xff]   ;;  %v1509_v49 = vld [vmem:[%s1839_s3 + $0x10] sm:$0xff]   ;;  %v1512_v52 = vld [vmem:[%s1839_s3 + $0x8] sm:$0xff]  }
  0x1c   : > { %v1510_v48 = vld [vmem:[%s1839_s3 + $0x98] sm:$0xff]   ;;  %v1513_v51 = vld [vmem:[%s1839_s3 + $0x90] sm:$0xff]   ;;  %v1514_v53 = vld [vmem:[%s1839_s3 + $0x40] sm:$0xff]  }
  0x1d   : > { %479 = vmatpush1.bf16.msra.mxu0 %v1472_v14  ;;  %v1516_v54 = vld [vmem:[%s1839_s3 + $0x88] sm:$0xff]   ;;  %v1515_v55 = vld [vmem:[%s1839_s3] sm:$0xff]  }
  0x1e   : > { %480 = vmatprep.subr.bf16.mxu0 %v1473_v16  ;;  %1390 = vmatpush3.bf16.msra.mxu1 %v1475_v15  ;;  %v1517_v56 = vld [vmem:[%s1839_s3 + $0x80] sm:$0xff]  }
  0x1f   : > { %1391 = vmatprep.subr.bf16.mxu1 %v1479_v19  ;;  %v277_v62 = vld [vmem:[%s1838_s2] sm:$0x7] }
  0x20   : > { %v1736_v0 = vrot.slane %v277_v62, %v285_v59  ;;  %v1738_v1 = vrot.slane %v277_v62, %v289_v60 }
  0x21   : > { %481 = vmatpush1.bf16.msra.mxu0 %v1476_v17 }
  0x22   : > { %482 = vmatprep.subr.bf16.mxu0 %v1477_v20  ;;  %1392 = vmatpush3.bf16.msra.mxu1 %v1479_v19 }
  0x23   : > { %1393 = vmatprep.subr.bf16.mxu1 %v1483_v22 }
  0x25   : > { %483 = vmatpush1.bf16.msra.mxu0 %v1480_v21 }
  0x26   : > { %484 = vmatprep.subr.bf16.mxu0 %v1481_v23  ;;  %1394 = vmatpush3.bf16.msra.mxu1 %v1483_v22 }
  0x27   : > { %1395 = vmatprep.subr.bf16.mxu1 %v1486_v25 }
  0x29   : > { %485 = vmatpush1.bf16.msra.mxu0 %v1484_v24 }
  0x2a   : > { %1413 = vmatprep.subr.bf16.mxu0 %v1497_v26  ;;  %1396 = vmatpush3.bf16.msra.mxu1 %v1486_v25 }
  0x2b   : > { %1301 = vmatprep.subr.bf16.mxu1 %v1494_v27 }
  0x2c   : > { %503 = vmatmul.mubr.bf16.vlgmr.msra.gmra.mxu0 %v1485_v18 }
  0x2d   : > { %512 = vmatprep.mubr.bf16.mxu0 %v1526_v2  ;;  %1414 = vmatpush3.bf16.msra.mxu0 %v1497_v26 }
  0x2e   : > { %1398 = vmatmul.mubr.bf16.vlgmr.msra.gmra.mxu1 %v1487_v28  ;;  %1415 = vmatprep.subr.bf16.mxu0 %v1501_v30 }
  0x2f   : > { %1401 = vmatprep.mubr.bf16.mxu1 %v1488_v32  ;;  %1302 = vmatpush3.bf16.msra.mxu1 %v1495_v29 }
  0x30   : > { %1303 = vmatprep.subr.bf16.mxu1 %v1496_v31 }
  0x31   : > { %1416 = vmatpush3.bf16.msra.mxu0 %v1501_v30 }
  0x32   : > { %1417 = vmatprep.subr.bf16.mxu0 %v1504_v33 }
  0x33   : > { %1304 = vmatpush3.bf16.msra.mxu1 %v1498_v34 }
  0x34   : > { %513 = vmatmul.mubr.bf16.gmra.mxu0 %v1487_v28  ;;  %1305 = vmatprep.subr.bf16.mxu1 %v1499_v36 }
  0x35   : > { %522 = vmatprep.mubr.bf16.mxu0 %v1526_v2  ;;  %1418 = vmatpush3.bf16.msra.mxu0 %v1504_v33 }
  0x36   : > { %1402 = vmatmul.mubr.bf16.gmra.mxu1 %v1489_v35  ;;  %1419 = vmatprep.subr.bf16.mxu0 %v1507_v38 }
  0x37   : > { %1405 = vmatprep.mubr.bf16.mxu1 %v1490_v40  ;;  %1306 = vmatpush3.bf16.msra.mxu1 %v1500_v37 }
  0x38   : > { %1307 = vmatprep.subr.bf16.mxu1 %v1502_v39 }
  0x39   : > { %1420 = vmatpush3.bf16.msra.mxu0 %v1507_v38 }
  0x3a   : > { %1421 = vmatprep.subr.bf16.mxu0 %v1510_v48 }
  0x3b   : > { %1308 = vmatpush3.bf16.msra.mxu1 %v1503_v41 }
  0x3c   : > { %523 = vmatmul.mubr.bf16.gmra.mxu0 %v1488_v32  ;;  %1309 = vmatprep.subr.bf16.mxu1 %v1505_v42 }
  0x3d   : > { %532 = vmatprep.mubr.bf16.mxu0 %v1526_v2  ;;  %1422 = vmatpush3.bf16.msra.mxu0 %v1510_v48 }
  0x3e   : > { %1406 = vmatmul.mubr.bf16.gmra.mxu1 %v1491_v43  ;;  %1423 = vmatprep.subr.bf16.mxu0 %v1513_v51 }
  0x3f   : > { %1409 = vmatprep.mubr.bf16.mxu1 %v1492_v44  ;;  %1310 = vmatpush3.bf16.msra.mxu1 %v1506_v45 }
  0x40   : > { %1311 = vmatprep.subr.bf16.mxu1 %v1508_v47 }
  0x41   : > { %1424 = vmatpush3.bf16.msra.mxu0 %v1513_v51 }
  0x42   : > { %1425 = vmatprep.subr.bf16.mxu0 %v1516_v54 }
  0x43   : > { %1312 = vmatpush3.bf16.msra.mxu1 %v1509_v49 }
  0x44   : > { %533 = vmatmul.mubr.bf16.gmra.mxu0 %v1489_v35  ;;  %1313 = vmatprep.subr.bf16.mxu1 %v1511_v50 }
  0x45   : > { %542 = vmatprep.mubr.bf16.mxu0 %v1526_v2  ;;  %1426 = vmatpush3.bf16.msra.mxu0 %v1516_v54 }
  0x46   : > { %1410 = vmatmul.mubr.bf16.gmra.mxu1 %v1493_v46  ;;  %1427 = vmatprep.subr.bf16.mxu0 %v1517_v56 }
  0x47   : > { %1314 = vmatpush3.bf16.msra.mxu1 %v1512_v52 }
  0x48   : > { %1315 = vmatprep.subr.bf16.mxu1 %v1514_v53 }
  0x49   : > { %1428 = vmatpush3.bf16.msra.mxu0 %v1517_v56 }
  0x4b   : > { %1316 = vmatpush3.bf16.msra.mxu1 %v1515_v55 }
  0x4c   : > { %543 = vmatmul.mubr.bf16.gmra.mxu0 %v1490_v40 }
  0x4d   : > { %552 = vmatprep.mubr.bf16.mxu0 %v1526_v2 }
  0x54   : > { %553 = vmatmul.mubr.bf16.gmra.mxu0 %v1491_v43 }
  0x55   : > { %562 = vmatprep.mubr.bf16.mxu0 %v1526_v2 }
  0x5c   : > { %563 = vmatmul.mubr.bf16.gmra.mxu0 %v1492_v44 }
  0x5d   : > { %572 = vmatprep.mubr.bf16.mxu0 %v1526_v2  ;;  %v1740_v2 = vrot.slane %v277_v62, %v281_v61 }
  0x64   : > { %573 = vmatmul.mubr.bf16.gmra.mxu0 %v1493_v46 }
  0xec   : > { %v504_v63 = vpop.f32.mrf.mxu0 }
  0xed   : > { %v505_v10 = vadd.f32 %v504_v63, %v1740_v2 }
  0xee   : > { %v506_v3 = vpop.f32.mrf.mxu0  ;;  %v1399_v4 = vpop.f32.mrf.mxu1 }
  0xef   : > { %v507_v6 = vadd.f32 %v506_v3, %v1736_v0  ;;  %v626_v8 = vadd.f32 %v1399_v4, %v1738_v1  ;;  %v680_v22 = vmax.f32 %v505_v10, 0.0 }
  0xf0   : > { %v508_v5 = vpop.f32.mrf.mxu0  ;;  %v617_v9 = vpop.f32.mrf.mxu1 }
  0xf1   : > { %v509_v7 = vadd.f32 %v508_v5, %v1740_v2  ;;  %v618_v12 = vadd.f32 %v617_v9, %v1738_v1  ;;  %v681_v18 = vmax.f32 %v507_v6, 0.0  ;;  %v688_v19 = vmax.f32 %v626_v8, 0.0 }
  0xf2   : > { %v510_v11 = vpop.f32.mrf.mxu0  ;;  %v1400_v14 = vpop.f32.mrf.mxu1 }
  0xf3   : > { %v511_v13 = vadd.f32 %v510_v11, %v1736_v0  ;;  %v683_v15 = vmax.f32 %v509_v7, 0.0  ;;  %v629_v17 = vadd.f32 %v1400_v14, %v1738_v1  ;;  %v682_v23 = vmax.f32 %v618_v12, 0.0 }
  0xf4   : > { %v514_v16 = vpop.f32.mrf.mxu0  ;;  %v620_v21 = vpop.f32.mrf.mxu1 }
  0xf5   : > { %v684_v20 = vmax.f32 %v511_v13, 0.0  ;;  %v691_v24 = vmax.f32 %v629_v17, 0.0  ;;  %v621_v26 = vadd.f32 %v620_v21, %v1738_v1  ;;  %v728_v29 = vpack.c.bf16 %v683_v15, %v680_v22 }
  0xf6   : > { %v516_v25 = vpop.f32.mrf.mxu0  ;;  %v1403_v28 = vpop.f32.mrf.mxu1  ;;  %v515_v37 = vadd.f32 %v514_v16, %v1740_v2 }
  0xf7   : > { %v729_v27 = vpack.c.bf16 %v684_v20, %v681_v18  ;;  %v685_v30 = vmax.f32 %v621_v26, 0.0  ;;  %v733_v32 = vpack.c.bf16 %v691_v24, %v688_v19  ;;  %v517_v33 = vadd.f32 %v516_v25, %v1736_v0 }
  0xf8   : > { %v518_v31 = vpop.f32.mrf.mxu0  ;;  %v642_v35 = vadd.f32 %v1403_v28, %v1738_v1  ;;  %v633_v36 = vpop.f32.mrf.mxu1  ;;  %v686_v50 = vmax.f32 %v515_v37, 0.0 }
  0xf9   : > { %v519_v34 = vadd.f32 %v518_v31, %v1740_v2  ;;  %983 = vmatprep.mubr.bf16.mxu1 %v729_v27  ;;  %v730_v38 = vpack.c.bf16 %v685_v30, %v682_v23  ;;  %v634_v40 = vadd.f32 %v633_v36, %v1738_v1  ;;  %v687_v46 = vmax.f32 %v517_v33, 0.0 }
  0xfa   : > { %v520_v39 = vpop.f32.mrf.mxu0  ;;  %984 = vmatmul.mubr.bf16.vlgmr.msra.gmra.mxu1 %v728_v29  ;;  %v1404_v42 = vpop.f32.mrf.mxu1  ;;  %v700_v48 = vmax.f32 %v642_v35, 0.0 }
  0xfb   : > { %v521_v41 = vadd.f32 %v520_v39, %v1736_v0  ;;  %v689_v43 = vmax.f32 %v519_v34, 0.0  ;;  %1429 = vmatprep.mubr.bf16.mxu0 %v730_v38  ;;  %v645_v45 = vadd.f32 %v1404_v42, %v1738_v1  ;;  %v694_v52 = vmax.f32 %v634_v40, 0.0 }
  0xfc   : > { %v524_v44 = vpop.f32.mrf.mxu0  ;;  %1430 = vmatmul.mubr.bf16.vlgmr.msra.gmra.mxu0 %v733_v32  ;;  %v636_v49 = vpop.f32.mrf.mxu1 }
  0xfd   : > { %v690_v47 = vmax.f32 %v521_v41, 0.0  ;;  %v703_v53 = vmax.f32 %v645_v45, 0.0  ;;  %v637_v54 = vadd.f32 %v636_v49, %v1738_v1  ;;  %v731_v57 = vpack.c.bf16 %v689_v43, %v686_v50 }
  0xfe   : > { %v526_v51 = vpop.f32.mrf.mxu0  ;;  %v1407_v56 = vpop.f32.mrf.mxu1  ;;  %v525_v4 = vadd.f32 %v524_v44, %v1740_v2 }
  0xff   : > { %v732_v55 = vpack.c.bf16 %v690_v47, %v687_v46  ;;  %v697_v59 = vmax.f32 %v637_v54, 0.0  ;;  %v527_v60 = vadd.f32 %v526_v51, %v1736_v0  ;;  %v739_v62 = vpack.c.bf16 %v703_v53, %v700_v48 }
 0x100   : > { %v528_v58 = vpop.f32.mrf.mxu0  ;;  %v658_v63 = vadd.f32 %v1407_v56, %v1738_v1  ;;  %v649_v3 = vpop.f32.mrf.mxu1  ;;  %v692_v17 = vmax.f32 %v525_v4, 0.0 }
 0x101   : > { %v529_v61 = vadd.f32 %v528_v58, %v1740_v2  ;;  %991 = vmatprep.mubr.bf16.mxu1 %v732_v55  ;;  %v736_v6 = vpack.c.bf16 %v697_v59, %v694_v52  ;;  %v650_v7 = vadd.f32 %v649_v3, %v1738_v1  ;;  %v693_v13 = vmax.f32 %v527_v60, 0.0 }
 0x102   : > { %v530_v5 = vpop.f32.mrf.mxu0  ;;  %992 = vmatmul.mubr.bf16.gmra.mxu1 %v731_v57  ;;  %v1408_v9 = vpop.f32.mrf.mxu1  ;;  %v712_v15 = vmax.f32 %v658_v63, 0.0 }
 0x103   : > { %v531_v8 = vadd.f32 %v530_v5, %v1736_v0  ;;  %v695_v10 = vmax.f32 %v529_v61, 0.0  ;;  %1433 = vmatprep.mubr.bf16.mxu0 %v736_v6  ;;  %v661_v12 = vadd.f32 %v1408_v9, %v1738_v1  ;;  %v706_v19 = vmax.f32 %v650_v7, 0.0 }
 0x104   : > { %v534_v11 = vpop.f32.mrf.mxu0  ;;  %1434 = vmatmul.mubr.bf16.gmra.mxu0 %v739_v62  ;;  %v652_v16 = vpop.f32.mrf.mxu1 }
 0x105   : > { %v696_v14 = vmax.f32 %v531_v8, 0.0  ;;  %v715_v20 = vmax.f32 %v661_v12, 0.0  ;;  %v653_v21 = vadd.f32 %v652_v16, %v1738_v1  ;;  %v734_v24 = vpack.c.bf16 %v695_v10, %v692_v17 }
 0x106   : > { %v536_v18 = vpop.f32.mrf.mxu0  ;;  %v1411_v23 = vpop.f32.mrf.mxu1  ;;  %v535_v32 = vadd.f32 %v534_v11, %v1740_v2 }
 0x107   : > { %v735_v22 = vpack.c.bf16 %v696_v14, %v693_v13  ;;  %v709_v26 = vmax.f32 %v653_v21, 0.0  ;;  %v537_v27 = vadd.f32 %v536_v18, %v1736_v0  ;;  %v745_v29 = vpack.c.bf16 %v715_v20, %v712_v15 }
 0x108   : > { %v538_v25 = vpop.f32.mrf.mxu0  ;;  %v674_v30 = vadd.f32 %v1411_v23, %v1738_v1  ;;  %v665_v31 = vpop.f32.mrf.mxu1  ;;  %v698_v45 = vmax.f32 %v535_v32, 0.0 }
 0x109   : > { %v539_v28 = vadd.f32 %v538_v25, %v1740_v2  ;;  %999 = vmatprep.mubr.bf16.mxu1 %v735_v22  ;;  %v742_v34 = vpack.c.bf16 %v709_v26, %v706_v19  ;;  %v666_v35 = vadd.f32 %v665_v31, %v1738_v1  ;;  %v699_v41 = vmax.f32 %v537_v27, 0.0 }
 0x10a   : > { %v540_v33 = vpop.f32.mrf.mxu0  ;;  %1000 = vmatmul.mubr.bf16.gmra.mxu1 %v734_v24  ;;  %v1412_v37 = vpop.f32.mrf.mxu1  ;;  %v724_v43 = vmax.f32 %v674_v30, 0.0 }
 0x10b   : > { %v541_v36 = vadd.f32 %v540_v33, %v1736_v0  ;;  %v701_v38 = vmax.f32 %v539_v28, 0.0  ;;  %1437 = vmatprep.mubr.bf16.mxu0 %v742_v34  ;;  %v677_v40 = vadd.f32 %v1412_v37, %v1738_v1  ;;  %v718_v47 = vmax.f32 %v666_v35, 0.0 }
 0x10c   : > { %v544_v39 = vpop.f32.mrf.mxu0  ;;  %1438 = vmatmul.mubr.bf16.gmra.mxu0 %v745_v29  ;;  %v668_v44 = vpop.f32.mrf.mxu1 }
 0x10d   : > { %v702_v42 = vmax.f32 %v541_v36, 0.0  ;;  %v727_v48 = vmax.f32 %v677_v40, 0.0  ;;  %v669_v49 = vadd.f32 %v668_v44, %v1738_v1  ;;  %v737_v51 = vpack.c.bf16 %v701_v38, %v698_v45 }
 0x10e   : > { %v546_v46 = vpop.f32.mrf.mxu0  ;;  %v545_v57 = vadd.f32 %v544_v39, %v1740_v2 }
 0x10f   : > { %v738_v50 = vpack.c.bf16 %v702_v42, %v699_v41  ;;  %v721_v53 = vmax.f32 %v669_v49, 0.0  ;;  %v547_v54 = vadd.f32 %v546_v46, %v1736_v0  ;;  %v751_v56 = vpack.c.bf16 %v727_v48, %v724_v43  ;;  %v1793_v49 = vld [vmem:[%s1840_s4] ss:$0 sm:$0xff] }
 0x110   : > { %v548_v52 = vpop.f32.mrf.mxu0  ;;  %v704_v3 = vmax.f32 %v545_v57, 0.0 }
 0x111   : > { %v549_v55 = vadd.f32 %v548_v52, %v1740_v2  ;;  %1007 = vmatprep.mubr.bf16.mxu1 %v738_v50  ;;  %v748_v59 = vpack.c.bf16 %v721_v53, %v718_v47  ;;  %v705_v1 = vmax.f32 %v547_v54, 0.0 }
 0x112   : > { %v550_v58 = vpop.f32.mrf.mxu0  ;;  %1008 = vmatmul.mubr.bf16.gmra.mxu1 %v737_v51 }
 0x113   : > { %v551_v60 = vadd.f32 %v550_v58, %v1736_v0  ;;  %v707_v61 = vmax.f32 %v549_v55, 0.0  ;;  %1441 = vmatprep.mubr.bf16.mxu0 %v748_v59 }
 0x114   : > { %v554_v62 = vpop.f32.mrf.mxu0  ;;  %1442 = vmatmul.mubr.bf16.gmra.mxu0 %v751_v56 }
 0x115   : > { %v708_v63 = vmax.f32 %v551_v60, 0.0  ;;  %v740_v6 = vpack.c.bf16 %v707_v61, %v704_v3  ;;  %v555_v10 = vadd.f32 %v554_v62, %v1740_v2 }
 0x116   : > { %v556_v4 = vpop.f32.mrf.mxu0 }
 0x117   : > { %v741_v5 = vpack.c.bf16 %v708_v63, %v705_v1  ;;  %v557_v8 = vadd.f32 %v556_v4, %v1736_v0  ;;  %v710_v17 = vmax.f32 %v555_v10, 0.0 }
 0x118   : > { %v558_v7 = vpop.f32.mrf.mxu0 }
 0x119   : > { %v559_v9 = vadd.f32 %v558_v7, %v1740_v2  ;;  %1015 = vmatprep.mubr.bf16.mxu1 %v741_v5  ;;  %v711_v15 = vmax.f32 %v557_v8, 0.0 }
 0x11a   : > { %v560_v11 = vpop.f32.mrf.mxu0  ;;  %1016 = vmatmul.mubr.bf16.gmra.mxu1 %v740_v6 }
 0x11b   : > { %v561_v12 = vadd.f32 %v560_v11, %v1736_v0  ;;  %v713_v13 = vmax.f32 %v559_v9, 0.0 }
 0x11c   : > { %v564_v14 = vpop.f32.mrf.mxu0 }
 0x11d   : > { %v714_v16 = vmax.f32 %v561_v12, 0.0  ;;  %v743_v20 = vpack.c.bf16 %v713_v13, %v710_v17  ;;  %v565_v24 = vadd.f32 %v564_v14, %v1740_v2 }
 0x11e   : > { %v566_v18 = vpop.f32.mrf.mxu0 }
 0x11f   : > { %v744_v19 = vpack.c.bf16 %v714_v16, %v711_v15  ;;  %v567_v22 = vadd.f32 %v566_v18, %v1736_v0  ;;  %v716_v31 = vmax.f32 %v565_v24, 0.0 }
 0x120   : > { %v568_v21 = vpop.f32.mrf.mxu0 }
 0x121   : > { %v569_v23 = vadd.f32 %v568_v21, %v1740_v2  ;;  %1023 = vmatprep.mubr.bf16.mxu1 %v744_v19  ;;  %v717_v29 = vmax.f32 %v567_v22, 0.0 }
 0x122   : > { %v570_v25 = vpop.f32.mrf.mxu0  ;;  %1024 = vmatmul.mubr.bf16.gmra.mxu1 %v743_v20 }
 0x123   : > { %v571_v26 = vadd.f32 %v570_v25, %v1736_v0  ;;  %v719_v27 = vmax.f32 %v569_v23, 0.0 }
 0x124   : > { %v574_v28 = vpop.f32.mrf.mxu0 }
 0x125   : > { %v720_v30 = vmax.f32 %v571_v26, 0.0  ;;  %v746_v34 = vpack.c.bf16 %v719_v27, %v716_v31  ;;  %v575_v38 = vadd.f32 %v574_v28, %v1740_v2 }
 0x126   : > { %v576_v32 = vpop.f32.mrf.mxu0 }
 0x127   : > { %v747_v33 = vpack.c.bf16 %v720_v30, %v717_v29  ;;  %v577_v36 = vadd.f32 %v576_v32, %v1736_v0  ;;  %v722_v44 = vmax.f32 %v575_v38, 0.0 }
 0x128   : > { %v578_v35 = vpop.f32.mrf.mxu0 }
 0x129   : > { %v579_v37 = vadd.f32 %v578_v35, %v1740_v2  ;;  %1031 = vmatprep.mubr.bf16.mxu1 %v747_v33  ;;  %v723_v42 = vmax.f32 %v577_v36, 0.0 }
 0x12a   : > { %v580_v39 = vpop.f32.mrf.mxu0  ;;  %1032 = vmatmul.mubr.bf16.gmra.mxu1 %v746_v34 }
 0x12b   : > { %v581_v40 = vadd.f32 %v580_v39, %v1736_v0  ;;  %v725_v41 = vmax.f32 %v579_v37, 0.0 }
 0x12d   : > { %v726_v43 = vmax.f32 %v581_v40, 0.0  ;;  %v749_v46 = vpack.c.bf16 %v725_v41, %v722_v44 }
 0x12f   : > { %v750_v45 = vpack.c.bf16 %v726_v43, %v723_v42 }
 0x131   : > { %1039 = vmatprep.mubr.bf16.mxu1 %v750_v45 }
 0x132   : > { %1040 = vmatmul.mubr.bf16.gmra.mxu1 %v749_v46 }
 0x1ba   : > { %v1317_v47 = vpop.f32.mrf.mxu1 }
 0x1bc   : > { %v1318_v48 = vpop.f32.mrf.mxu1  ;;  %v1431_v50 = vpop.f32.mrf.mxu0 }
 0x1bd   : > { %v1319_v2 = vadd.f32 %v1318_v48, %v1317_v47 }
 0x1be   : > { %v1320_v51 = vpop.f32.mrf.mxu1  ;;  %v1082_v52 = vpop.f32.mrf.mxu0 }
 0x1bf   : > { %v986_v0 = vadd.f32 %v1319_v2, %v1793_v49 }
 0x1c0   : > { %v1321_v53 = vpop.f32.mrf.mxu1  ;;  %v1432_v56 = vpop.f32.mrf.mxu0 }
 0x1c1   : > { %v1322_v54 = vadd.f32 %v1321_v53, %v1320_v51  ;;  %v1083_v55 = vadd.f32 %v1082_v52, %v986_v0 }
 0x1c2   : > { %v1323_v57 = vpop.f32.mrf.mxu1  ;;  %v1085_v59 = vpop.f32.mrf.mxu0 }
 0x1c3   : > { %1145 = vst [vmem:[%s1800_s12] sm:$0xff] %v1083_v55  ;;  %v989_v58 = vadd.f32 %v1322_v54, %v1793_v49 }
 0x1c4   : > { %v1324_v60 = vpop.f32.mrf.mxu1  ;;  %v1435_v63 = vpop.f32.mrf.mxu0 }
 0x1c5   : > { %v1325_v61 = vadd.f32 %v1324_v60, %v1323_v57  ;;  %v1086_v62 = vadd.f32 %v1085_v59, %v989_v58 }
 0x1c6   : > { %v1326_v1 = vpop.f32.mrf.mxu1  ;;  %v1098_v8 = vpop.f32.mrf.mxu0 }
 0x1c7   : > { %v994_v3 = vadd.f32 %v1325_v61, %v1793_v49  ;;  %1146 = vst [vmem:[%s1800_s12 + $0x8] sm:$0xff] %v1086_v62 }
 0x1c8   : > { %v1327_v4 = vpop.f32.mrf.mxu1  ;;  %v1436_v14 = vpop.f32.mrf.mxu0 }
 0x1c9   : > { %v1091_v5 = vadd.f32 %v1431_v50, %v994_v3  ;;  %v1328_v6 = vadd.f32 %v1327_v4, %v1326_v1 }
 0x1ca   : > { %v1329_v7 = vpop.f32.mrf.mxu1  ;;  %v1101_v20 = vpop.f32.mrf.mxu0 }
 0x1cb   : > { %1147 = vst [vmem:[%s1800_s12 + $0x10] sm:$0xff] %v1091_v5  ;;  %v997_v9 = vadd.f32 %v1328_v6, %v1793_v49 }
 0x1cc   : > { %v1330_v10 = vpop.f32.mrf.mxu1  ;;  %v1439_v26 = vpop.f32.mrf.mxu0 }
 0x1cd   : > { %v1094_v11 = vadd.f32 %v1432_v56, %v997_v9  ;;  %v1331_v12 = vadd.f32 %v1330_v10, %v1329_v7 }
 0x1ce   : > { %v1332_v13 = vpop.f32.mrf.mxu1  ;;  %v1114_v32 = vpop.f32.mrf.mxu0 }
 0x1cf   : > { %1148 = vst [vmem:[%s1800_s12 + $0x18] sm:$0xff] %v1094_v11  ;;  %v1002_v15 = vadd.f32 %v1331_v12, %v1793_v49 }
 0x1d0   : > { %v1333_v16 = vpop.f32.mrf.mxu1  ;;  %v1440_v38 = vpop.f32.mrf.mxu0 }
 0x1d1   : > { %v1334_v17 = vadd.f32 %v1333_v16, %v1332_v13  ;;  %v1099_v18 = vadd.f32 %v1098_v8, %v1002_v15 }
 0x1d2   : > { %v1335_v19 = vpop.f32.mrf.mxu1  ;;  %v1117_v44 = vpop.f32.mrf.mxu0 }
 0x1d3   : > { %1149 = vst [vmem:[%s1800_s12 + $0x20] sm:$0xff] %v1099_v18  ;;  %v1005_v21 = vadd.f32 %v1334_v17, %v1793_v49 }
 0x1d4   : > { %v1336_v22 = vpop.f32.mrf.mxu1  ;;  %v1443_v0 = vpop.f32.mrf.mxu0 }
 0x1d5   : > { %v1337_v23 = vadd.f32 %v1336_v22, %v1335_v19  ;;  %v1102_v24 = vadd.f32 %v1101_v20, %v1005_v21 }
 0x1d6   : > { %v1338_v25 = vpop.f32.mrf.mxu1  ;;  %v1130_v56 = vpop.f32.mrf.mxu0 }
 0x1d7   : > { %v1010_v27 = vadd.f32 %v1337_v23, %v1793_v49  ;;  %1150 = vst [vmem:[%s1800_s12 + $0x28] sm:$0xff] %v1102_v24 }
 0x1d8   : > { %v1339_v28 = vpop.f32.mrf.mxu1  ;;  %v1444_v62 = vpop.f32.mrf.mxu0 }
 0x1d9   : > { %v1107_v29 = vadd.f32 %v1435_v63, %v1010_v27  ;;  %v1340_v30 = vadd.f32 %v1339_v28, %v1338_v25 }
 0x1da   : > { %v1341_v31 = vpop.f32.mrf.mxu1  ;;  %v1133_v6 = vpop.f32.mrf.mxu0 }
 0x1db   : > { %1151 = vst [vmem:[%s1800_s12 + $0x30] sm:$0xff] %v1107_v29  ;;  %v1013_v33 = vadd.f32 %v1340_v30, %v1793_v49 }
 0x1dc   : > { %v1342_v34 = vpop.f32.mrf.mxu1 }
 0x1dd   : > { %v1110_v35 = vadd.f32 %v1436_v14, %v1013_v33  ;;  %v1343_v36 = vadd.f32 %v1342_v34, %v1341_v31 }
 0x1de   : > { %v1344_v37 = vpop.f32.mrf.mxu1 }
 0x1df   : > { %1152 = vst [vmem:[%s1800_s12 + $0x38] sm:$0xff] %v1110_v35  ;;  %v1018_v39 = vadd.f32 %v1343_v36, %v1793_v49 }
 0x1e0   : > { %v1345_v40 = vpop.f32.mrf.mxu1 }
 0x1e1   : > { %v1346_v41 = vadd.f32 %v1345_v40, %v1344_v37  ;;  %v1115_v42 = vadd.f32 %v1114_v32, %v1018_v39 }
 0x1e2   : > { %v1347_v43 = vpop.f32.mrf.mxu1 }
 0x1e3   : > { %1153 = vst [vmem:[%s1800_s12 + $0x40] sm:$0xff] %v1115_v42  ;;  %v1021_v45 = vadd.f32 %v1346_v41, %v1793_v49 }
 0x1e4   : > { %v1348_v46 = vpop.f32.mrf.mxu1 }
 0x1e5   : > { %v1349_v47 = vadd.f32 %v1348_v46, %v1347_v43  ;;  %v1118_v48 = vadd.f32 %v1117_v44, %v1021_v45 }
 0x1e6   : > { %v1350_v2 = vpop.f32.mrf.mxu1 }
 0x1e7   : > { %v1026_v50 = vadd.f32 %v1349_v47, %v1793_v49  ;;  %1154 = vst [vmem:[%s1800_s12 + $0x48] sm:$0xff] %v1118_v48 }
 0x1e8   : > { %v1351_v51 = vpop.f32.mrf.mxu1 }
 0x1e9   : > { %v1123_v52 = vadd.f32 %v1439_v26, %v1026_v50  ;;  %v1352_v53 = vadd.f32 %v1351_v51, %v1350_v2 }
 0x1ea   : > { %v1353_v54 = vpop.f32.mrf.mxu1 }
 0x1eb   : > { %1155 = vst [vmem:[%s1800_s12 + $0x50] sm:$0xff] %v1123_v52  ;;  %v1029_v55 = vadd.f32 %v1352_v53, %v1793_v49 }
 0x1ec   : > { %v1354_v57 = vpop.f32.mrf.mxu1 }
 0x1ed   : > { %v1126_v58 = vadd.f32 %v1440_v38, %v1029_v55  ;;  %v1355_v59 = vadd.f32 %v1354_v57, %v1353_v54 }
 0x1ee   : > { %v1356_v60 = vpop.f32.mrf.mxu1 }
 0x1ef   : > { %1156 = vst [vmem:[%s1800_s12 + $0x58] sm:$0xff] %v1126_v58  ;;  %v1034_v61 = vadd.f32 %v1355_v59, %v1793_v49 }
 0x1f0   : > { %v1357_v1 = vpop.f32.mrf.mxu1 }
 0x1f1   : > { %v1131_v63 = vadd.f32 %v1130_v56, %v1034_v61  ;;  %v1358_v3 = vadd.f32 %v1357_v1, %v1356_v60 }
 0x1f2   : > { %v1359_v4 = vpop.f32.mrf.mxu1 }
 0x1f3   : > { %1157 = vst [vmem:[%s1800_s12 + $0x60] sm:$0xff] %v1131_v63  ;;  %v1037_v5 = vadd.f32 %v1358_v3, %v1793_v49 }
 0x1f4   : > { %v1360_v7 = vpop.f32.mrf.mxu1 }
 0x1f5   : > { %v1134_v8 = vadd.f32 %v1133_v6, %v1037_v5  ;;  %v1361_v9 = vadd.f32 %v1360_v7, %v1359_v4 }
 0x1f6   : > { %v1362_v10 = vpop.f32.mrf.mxu1 }
 0x1f7   : > { %1158 = vst [vmem:[%s1800_s12 + $0x68] sm:$0xff] %v1134_v8  ;;  %v1042_v11 = vadd.f32 %v1361_v9, %v1793_v49 }
 0x1f8   : > { %v1363_v12 = vpop.f32.mrf.mxu1 }
 0x1f9   : > { %v1139_v13 = vadd.f32 %v1443_v0, %v1042_v11  ;;  %v1364_v14 = vadd.f32 %v1363_v12, %v1362_v10 }
 0x1fb   : > { %1159 = vst [vmem:[%s1800_s12 + $0x70] sm:$0xff] %v1139_v13  ;;  %v1045_v15 = vadd.f32 %v1364_v14, %v1793_v49 }
 0x1fd   : > { %v1142_v16 = vadd.f32 %v1444_v62, %v1045_v15 }
 0x1ff   : > { %1160 = vst [vmem:[%s1800_s12 + $0x78] sm:$0xff] %v1142_v16 }
 0x200 PF: > { %s15_s18 = sadd.s32 1, %s1524_s18  }
 0x201   : > { %p12_p4 = scmp.ge.s32.totalorder %s15_s18, 4  }
 0x203   :  { %14 = sbr.rel (!%p12_p4) target bundleno = 1 (0x1), region = 70 }

</bundles_post_ra>
